<compile_context>
chip_gen: v7x
topology: tpu7x:2x2x1
jax: 0.10.0
libtpu: 0.0.40
codegen_flags: <defaults>
</compile_context>

<pallas_src>
import functools

import jax
import jax.numpy as jnp
import numpy as np
from jax.experimental import pallas as pl
from jax.experimental.pallas import tpu as pltpu

FINGERPRINT_DIM = 2048
READOUT_DIM = 512          # readout_config.output_dim
FC_HIDDEN = 1024
LABEL_EMB_DIM = 64

_VMEM_LIMIT = 32 * 1024 * 1024


def _softplus(x):
    # numerically stable softplus (matches torch.nn.functional.softplus)
    return jnp.maximum(x, 0.0) + jnp.log(1.0 + jnp.exp(-jnp.abs(x)))


# --------------------- packed bias layout (one f32 row) -----------------------
# All biases plus the (1,64) first label-embedding weight live in one lane-aligned
# f32 row; each slot starts at a multiple of 128 lanes so in-kernel static slices
# are aligned sub-views.
def _make_bias_layout():
    entries = [
        ("fc_b1", FC_HIDDEN), ("fc_b2", READOUT_DIM),
        ("wl1", LABEL_EMB_DIM), ("bl1", LABEL_EMB_DIM), ("bl2", LABEL_EMB_DIM),
        ("be1", 512), ("be2", 512), ("be3", 512),
        ("bd1", 512), ("bd2", 512), ("bd3", 256), ("bd4", 256), ("bd5", 2),
    ]
    slots, off = {}, 0
    for name, width in entries:
        slots[name] = (off, width)
        off += ((width + 127) // 128) * 128
    return slots, off


_BIAS_SLOT, _BIAS_TOTAL = _make_bias_layout()


def _bias_slice(packed, name):
    # Works both on the in-kernel VMEM ref and on a host-side jnp array.
    off, width = _BIAS_SLOT[name]
    return packed[:, off:off + width]


# --------------------------- the fused forward kernel -------------------------
# fc:       Linear(2048,1024) -> ReLU -> Linear(1024,512)     (support & query, one pass)
# enc_lab:  Linear(1,64) -> ReLU -> Linear(64,64)
# enc_fin:  Linear(576,512) -> ReLU -> Linear(512,512) -> ReLU -> Linear(512,512)
#           then mean over the support set.
# decoder:  Linear(1024,512) -> ReLU -> Linear(512,512) -> ReLU -> Linear(512,256)
#           -> ReLU -> Linear(256,256) -> ReLU -> Linear(256,2)
# head:     mu, log_sigma = split; sigma = 0.01 + 0.09*softplus(log_sigma)
#           log_prob = Bernoulli(logits=mu).log_prob(query_labels)
def _cnp_fused_kernel(ns,
                      fp_ref, sup_y_ref, qry_y_ref, biases_ref,
                      fc_w1_ref, fc_w2_ref, wl2_ref,
                      we1f_ref, we1l_ref, we2_ref, we3_ref,
                      wd1r_ref, wd1q_ref, wd2_ref, wd3_ref, wd4_ref, wd5_ref,
                      out_ref):
    b = lambda name: _bias_slice(biases_ref, name)          # (1, width) f32

    def mm(x, w_ref):                                        # bf16 x bf16 -> f32 acc
        return jnp.dot(x, w_ref[...], preferred_element_type=jnp.float32)

    def relu_bf16(x):
        return jnp.maximum(x, 0.0).astype(jnp.bfloat16)

    # ---- shared fc MLP, single pass over [support ; query] fingerprints ----
    h = relu_bf16(mm(fp_ref[...], fc_w1_ref) + b("fc_b1"))               # (Ns+Nq, 1024)
    feat = (mm(h, fc_w2_ref) + b("fc_b2")).astype(jnp.bfloat16)          # (Ns+Nq, 512)
    sup_feat = feat[:ns, :]                                              # (Ns, 512)
    qry_feat = feat[ns:, :]                                              # (Nq, 512)

    # ---- encoder: label embedding + pair encoder + mean over support ----
    lab = sup_y_ref[...]                                                 # (Ns, 1) f32
    # Linear(1,64) == broadcasted multiply with the packed (1,64) weight row.
    hl = relu_bf16(lab * b("wl1") + b("bl1"))                            # (Ns, 64)
    lab_emb = (mm(hl, wl2_ref) + b("bl2")).astype(jnp.bfloat16)          # (Ns, 64)
    # cat([feat, lab_emb]) @ We1 == feat @ We1[:512] + lab_emb @ We1[512:]
    e1 = relu_bf16(mm(sup_feat, we1f_ref) + mm(lab_emb, we1l_ref) + b("be1"))
    e2 = relu_bf16(mm(e1, we2_ref) + b("be2"))
    e3 = mm(e2, we3_ref) + b("be3")                                      # (Ns, 512) f32
    rep = jnp.mean(e3, axis=0, keepdims=True).astype(jnp.bfloat16)       # (1, 512)

    # ---- decoder + Bernoulli(logits) head ----
    # cat([rep, qfeat]) @ Wd1 == rep @ Wd1[:512] + qfeat @ Wd1[512:]
    rep_term = mm(rep, wd1r_ref)                                         # (1, 512) f32
    d1 = relu_bf16(mm(qry_feat, wd1q_ref) + rep_term + b("bd1"))
    d2 = relu_bf16(mm(d1, wd2_ref) + b("bd2"))
    d3 = relu_bf16(mm(d2, wd3_ref) + b("bd3"))
    d4 = relu_bf16(mm(d3, wd4_ref) + b("bd4"))
    out = mm(d4, wd5_ref) + b("bd5")                                     # (Nq, 2) f32

    mu = out[:, 0:1]
    log_sigma = out[:, 1:2]
    sigma = 0.01 + 0.09 * _softplus(log_sigma)
    # Bernoulli(logits=mu).log_prob(y) = y*mu - softplus(mu)
    log_prob = qry_y_ref[...] * mu - _softplus(mu)

    # Single store of the (Nq, 3) result: [log_prob | mu | sigma]
    out_ref[...] = jnp.concatenate([log_prob, mu, sigma], axis=1)


# ----------------------------- full forward ----------------------------------
_WEIGHT_KEYS = ("fc_w1", "fc_w2", "wl2", "we1_feat", "we1_lab", "we2", "we3",
                "wd1_rep", "wd1_q", "wd2", "wd3", "wd4", "wd5")


@jax.jit
def cnp_forward(params, support_fp, support_labels, query_fp, query_labels):
    """Task-batched CNP forward.

    support_fp: (T, Ns, 2048), support_labels: (T, Ns)
    query_fp:   (T, Nq, 2048), query_labels:   (T, Nq)
    Returns (log_prob, mu, sigma), each (T, Nq, 1).
    Ns should be a multiple of 16 (bf16 sublane tile) for a free support/query split.
    """
    n_tasks, ns, _ = support_fp.shape
    nq = query_fp.shape[1]

    sup_y = support_labels.astype(jnp.float32)[..., None]        # (T, Ns, 1)
    qry_y = query_labels.astype(jnp.float32)[..., None]          # (T, Nq, 1)
    # Binary fingerprints are exactly representable in bf16 -> halves input DMA
    # and feeds the MXU's native bf16 path.
    all_fp = jnp.concatenate([support_fp, query_fp], axis=1).astype(jnp.bfloat16)

    row = lambda t: (t, 0, 0)     # per-task activation / output blocks
    const = lambda t: (0, 0)      # weights: same block every step -> DMA'd once

    in_specs = [
        pl.BlockSpec((None, ns + nq, FINGERPRINT_DIM), row),
        pl.BlockSpec((None, ns, 1), row),
        pl.BlockSpec((None, nq, 1), row),
        pl.BlockSpec(params["biases"].shape, const),
    ] + [pl.BlockSpec(params[k].shape, const) for k in _WEIGHT_KEYS]

    out = pl.pallas_call(
        functools.partial(_cnp_fused_kernel, ns),
        grid=(n_tasks,),
        in_specs=in_specs,
        out_specs=pl.BlockSpec((None, nq, 3), row),
        out_shape=jax.ShapeDtypeStruct((n_tasks, nq, 3), jnp.float32),
        compiler_params=pltpu.CompilerParams(
            # Independent task axis -> shard across v7x's two TensorCores.
            dimension_semantics=("parallel",),
            vmem_limit_bytes=_VMEM_LIMIT,
        ),
    )(all_fp, sup_y, qry_y, params["biases"],
      *[params[k] for k in _WEIGHT_KEYS])

    return out[..., 0:1], out[..., 1:2], out[..., 2:3]


def cnp_forward_single(params, support_fp, support_labels, query_fp, query_labels):
    """Single-episode convenience wrapper (matches the original module's forward)."""
    lp, mu, sg = cnp_forward(params, support_fp[None], support_labels[None],
                             query_fp[None], query_labels[None])
    return lp[0], mu[0], sg[0]


# ----------------------------- parameter setup -------------------------------
def _linear(key, in_dim, out_dim):
    kw, kb = jax.random.split(key)
    bound = 1.0 / np.sqrt(in_dim)
    w = jax.random.uniform(kw, (in_dim, out_dim), jnp.float32, -bound, bound)
    b = jax.random.uniform(kb, (1, out_dim), jnp.float32, -bound, bound)
    return w, b


def init_params(key):
    ks = jax.random.split(key, 12)
    raw_w, raw_b = {}, {}
    # self.fc
    raw_w["fc_w1"], raw_b["fc_b1"] = _linear(ks[0], FINGERPRINT_DIM, FC_HIDDEN)
    raw_w["fc_w2"], raw_b["fc_b2"] = _linear(ks[1], FC_HIDDEN, READOUT_DIM)
    # encoder_label_fc (the (1,64) input weight is packed with the biases, kept f32)
    wl1, raw_b["bl1"] = _linear(ks[2], 1, LABEL_EMB_DIM)
    raw_b["wl1"] = wl1
    raw_w["wl2"], raw_b["bl2"] = _linear(ks[3], LABEL_EMB_DIM, LABEL_EMB_DIM)
    # encoder_final_fc (first Linear's weight rows split into feat/label parts)
    we1, raw_b["be1"] = _linear(ks[4], READOUT_DIM + LABEL_EMB_DIM, 512)
    raw_w["we1_feat"], raw_w["we1_lab"] = we1[:READOUT_DIM], we1[READOUT_DIM:]
    raw_w["we2"], raw_b["be2"] = _linear(ks[5], 512, 512)
    raw_w["we3"], raw_b["be3"] = _linear(ks[6], 512, 512)
    # decoder_fc (first Linear's weight rows split into representation/query parts)
    wd1, raw_b["bd1"] = _linear(ks[7], 512 + READOUT_DIM, 512)
    raw_w["wd1_rep"], raw_w["wd1_q"] = wd1[:512], wd1[512:]
    raw_w["wd2"], raw_b["bd2"] = _linear(ks[8], 512, 512)
    raw_w["wd3"], raw_b["bd3"] = _linear(ks[9], 512, 256)
    raw_w["wd4"], raw_b["bd4"] = _linear(ks[10], 256, 256)
    raw_w["wd5"], raw_b["bd5"] = _linear(ks[11], 256, 2)

    # Matmul weights in bf16 (halves DMA bytes, native MXU path); biases f32.
    params = {k: v.astype(jnp.bfloat16) for k, v in raw_w.items()}
    packed = jnp.zeros((1, _BIAS_TOTAL), jnp.float32)
    for name, (off, width) in _BIAS_SLOT.items():
        packed = packed.at[:, off:off + width].set(raw_b[name])
    params["biases"] = packed
    return params


# --------------------------- pure-JAX reference -------------------------------
# Mirrors the kernel's precision policy (bf16 weights & activations, f32
# accumulation / biases).  Note: bf16 storage is a quantization of the original
# f32 PyTorch weights; validate against a real checkpoint for accuracy claims.
def reference_forward(params, support_fp, support_labels, query_fp, query_labels):
    bias = lambda name: _bias_slice(params["biases"], name)
    bf = jnp.bfloat16

    def mm(x, w):
        return jnp.dot(x.astype(bf), w, preferred_element_type=jnp.float32)

    def relu_bf(x):
        return jnp.maximum(x, 0.0).astype(bf)

    def single(sfp, sy, qfp, qy):
        ns = sfp.shape[0]
        sy = sy.astype(jnp.float32)[:, None]
        qy = qy.astype(jnp.float32)[:, None]
        fp = jnp.concatenate([sfp, qfp], axis=0).astype(bf)
        h = relu_bf(mm(fp, params["fc_w1"]) + bias("fc_b1"))
        feat = (mm(h, params["fc_w2"]) + bias("fc_b2")).astype(bf)
        sup_feat, qry_feat = feat[:ns], feat[ns:]
        hl = relu_bf(sy * bias("wl1") + bias("bl1"))
        lab_emb = (mm(hl, params["wl2"]) + bias("bl2")).astype(bf)
        e1 = relu_bf(mm(sup_feat, params["we1_feat"])
                     + mm(lab_emb, params["we1_lab"]) + bias("be1"))
        e2 = relu_bf(mm(e1, params["we2"]) + bias("be2"))
        e3 = mm(e2, params["we3"]) + bias("be3")
        rep = jnp.mean(e3, axis=0, keepdims=True).astype(bf)
        d1 = relu_bf(mm(qry_feat, params["wd1_q"])
                     + mm(rep, params["wd1_rep"]) + bias("bd1"))
        d2 = relu_bf(mm(d1, params["wd2"]) + bias("bd2"))
        d3 = relu_bf(mm(d2, params["wd3"]) + bias("bd3"))
        d4 = relu_bf(mm(d3, params["wd4"]) + bias("bd4"))
        out = mm(d4, params["wd5"]) + bias("bd5")
        mu, log_sigma = out[:, 0:1], out[:, 1:2]
        sigma = 0.01 + 0.09 * _softplus(log_sigma)
        log_prob = qy * mu - _softplus(mu)
        return log_prob, mu, sigma

    return jax.vmap(single)(support_fp, support_labels, query_fp, query_labels)


if __name__ == "__main__":
    key = jax.random.PRNGKey(0)
    k_params, k_sfp, k_qfp, k_sy, k_qy = jax.random.split(key, 5)

    T, NS, NQ = 2, 16, 16     # 2 few-shot tasks (grid axis), 16 support / 16 query each
    params = init_params(k_params)
    support_fp = jax.random.bernoulli(k_sfp, 0.1, (T, NS, FINGERPRINT_DIM)).astype(jnp.float32)
    query_fp = jax.random.bernoulli(k_qfp, 0.1, (T, NQ, FINGERPRINT_DIM)).astype(jnp.float32)
    support_labels = jax.random.bernoulli(k_sy, 0.5, (T, NS)).astype(jnp.float32)
    query_labels = jax.random.bernoulli(k_qy, 0.5, (T, NQ)).astype(jnp.float32)

    log_prob, mu, sigma = cnp_forward(params, support_fp, support_labels,
                                      query_fp, query_labels)
    jax.block_until_ready((log_prob, mu, sigma))

    ref_lp, ref_mu, ref_sigma = reference_forward(params, support_fp, support_labels,
                                                  query_fp, query_labels)
    np.testing.assert_allclose(np.asarray(log_prob), np.asarray(ref_lp), rtol=1e-2, atol=1e-2)
    np.testing.assert_allclose(np.asarray(mu), np.asarray(ref_mu), rtol=1e-2, atol=1e-2)
    np.testing.assert_allclose(np.asarray(sigma), np.asarray(ref_sigma), rtol=1e-2, atol=1e-2)

    print("KERNEL_OK")
</pallas_src>

<mosaic_0001>
module attributes {stable_mosaic.version = 11 : i64} {
  func.func @_cnp_fused_kernel(%arg0: i32, %arg1: memref<1x32x2048xbf16, #tpu.memory_space<vmem>>, %arg2: memref<1x16x1xf32, #tpu.memory_space<vmem>>, %arg3: memref<1x16x1xf32, #tpu.memory_space<vmem>>, %arg4: memref<1x5120xf32, #tpu.memory_space<vmem>>, %arg5: memref<2048x1024xbf16, #tpu.memory_space<vmem>>, %arg6: memref<1024x512xbf16, #tpu.memory_space<vmem>>, %arg7: memref<64x64xbf16, #tpu.memory_space<vmem>>, %arg8: memref<512x512xbf16, #tpu.memory_space<vmem>>, %arg9: memref<64x512xbf16, #tpu.memory_space<vmem>>, %arg10: memref<512x512xbf16, #tpu.memory_space<vmem>>, %arg11: memref<512x512xbf16, #tpu.memory_space<vmem>>, %arg12: memref<512x512xbf16, #tpu.memory_space<vmem>>, %arg13: memref<512x512xbf16, #tpu.memory_space<vmem>>, %arg14: memref<512x512xbf16, #tpu.memory_space<vmem>>, %arg15: memref<512x256xbf16, #tpu.memory_space<vmem>>, %arg16: memref<256x256xbf16, #tpu.memory_space<vmem>>, %arg17: memref<256x2xbf16, #tpu.memory_space<vmem>>, %arg18: memref<1x16x3xf32, #tpu.memory_space<vmem>>) attributes {dimension_semantics = [#tpu.dimension_semantics<parallel>], iteration_bounds = array<i64: 2>, scalar_prefetch = 0 : i64, scratch_operands = 0 : i64, tpu.core_type = #tpu.core_type<tc>, window_params = [{transform_indices = @transform_0, window_bounds = array<i64: 1, 32, 2048>}, {transform_indices = @transform_1, window_bounds = array<i64: 1, 16, 1>}, {transform_indices = @transform_2, window_bounds = array<i64: 1, 16, 1>}, {pipeline_mode = #tpu.pipeline_mode<synchronous>, transform_indices = @transform_3, window_bounds = array<i64: 1, 5120>}, {pipeline_mode = #tpu.pipeline_mode<synchronous>, transform_indices = @transform_4, window_bounds = array<i64: 2048, 1024>}, {pipeline_mode = #tpu.pipeline_mode<synchronous>, transform_indices = @transform_5, window_bounds = array<i64: 1024, 512>}, {pipeline_mode = #tpu.pipeline_mode<synchronous>, transform_indices = @transform_6, window_bounds = array<i64: 64, 64>}, {pipeline_mode = #tpu.pipeline_mode<synchronous>, transform_indices = @transform_7, window_bounds = array<i64: 512, 512>}, {pipeline_mode = #tpu.pipeline_mode<synchronous>, transform_indices = @transform_8, window_bounds = array<i64: 64, 512>}, {pipeline_mode = #tpu.pipeline_mode<synchronous>, transform_indices = @transform_9, window_bounds = array<i64: 512, 512>}, {pipeline_mode = #tpu.pipeline_mode<synchronous>, transform_indices = @transform_10, window_bounds = array<i64: 512, 512>}, {pipeline_mode = #tpu.pipeline_mode<synchronous>, transform_indices = @transform_11, window_bounds = array<i64: 512, 512>}, {pipeline_mode = #tpu.pipeline_mode<synchronous>, transform_indices = @transform_12, window_bounds = array<i64: 512, 512>}, {pipeline_mode = #tpu.pipeline_mode<synchronous>, transform_indices = @transform_13, window_bounds = array<i64: 512, 512>}, {pipeline_mode = #tpu.pipeline_mode<synchronous>, transform_indices = @transform_14, window_bounds = array<i64: 512, 256>}, {pipeline_mode = #tpu.pipeline_mode<synchronous>, transform_indices = @transform_15, window_bounds = array<i64: 256, 256>}, {pipeline_mode = #tpu.pipeline_mode<synchronous>, transform_indices = @transform_16, window_bounds = array<i64: 256, 2>}, {transform_indices = @transform_17, window_bounds = array<i64: 1, 16, 3>}]} {
    %c0 = arith.constant 0 : index
    %c0_0 = arith.constant 0 : index
    %c0_1 = arith.constant 0 : index
    %0 = vector.load %arg1[%c0, %c0_0, %c0_1] : memref<1x32x2048xbf16, #tpu.memory_space<vmem>>, vector<1x32x2048xbf16>
    %1 = vector.shape_cast %0 : vector<1x32x2048xbf16> to vector<32x2048xbf16>
    %c0_2 = arith.constant 0 : index
    %c0_3 = arith.constant 0 : index
    %2 = vector.load %arg5[%c0_2, %c0_3] : memref<2048x1024xbf16, #tpu.memory_space<vmem>>, vector<2048x1024xbf16>
    %cst = arith.constant dense<0.000000e+00> : vector<32x1024xf32>
    %3 = tpu.matmul %1, %2, %cst {dimension_numbers = #tpu.dot_dimension_numbers<[1], [0], [0], [1], [0, 0, 1, 1], [], []>} : vector<32x2048xbf16>, vector<2048x1024xbf16>, vector<32x1024xf32> -> vector<32x1024xf32>
    %c0_4 = arith.constant 0 : index
    %c0_5 = arith.constant 0 : index
    %4 = vector.load %arg4[%c0_4, %c0_5] : memref<1x5120xf32, #tpu.memory_space<vmem>>, vector<1x1024xf32>
    %5 = vector.broadcast %4 : vector<1x1024xf32> to vector<32x1024xf32>
    %6 = arith.addf %3, %5 : vector<32x1024xf32>
    %cst_6 = arith.constant 0.000000e+00 : f32
    %7 = vector.broadcast %cst_6 : f32 to vector<32x1024xf32>
    %8 = arith.maximumf %6, %7 : vector<32x1024xf32>
    %9 = arith.truncf %8 : vector<32x1024xf32> to vector<32x1024xbf16>
    %c0_7 = arith.constant 0 : index
    %c0_8 = arith.constant 0 : index
    %10 = vector.load %arg6[%c0_7, %c0_8] : memref<1024x512xbf16, #tpu.memory_space<vmem>>, vector<1024x512xbf16>
    %cst_9 = arith.constant dense<0.000000e+00> : vector<32x512xf32>
    %11 = tpu.matmul %9, %10, %cst_9 {dimension_numbers = #tpu.dot_dimension_numbers<[1], [0], [0], [1], [0, 0, 1, 1], [], []>} : vector<32x1024xbf16>, vector<1024x512xbf16>, vector<32x512xf32> -> vector<32x512xf32>
    %c0_10 = arith.constant 0 : index
    %c1024 = arith.constant 1024 : index
    %12 = vector.load %arg4[%c0_10, %c1024] : memref<1x5120xf32, #tpu.memory_space<vmem>>, vector<1x512xf32>
    %13 = vector.broadcast %12 : vector<1x512xf32> to vector<32x512xf32>
    %14 = arith.addf %11, %13 : vector<32x512xf32>
    %15 = arith.truncf %14 : vector<32x512xf32> to vector<32x512xbf16>
    %16 = vector.extract_strided_slice %15 {offsets = [0, 0], sizes = [16, 512], strides = [1, 1]} : vector<32x512xbf16> to vector<16x512xbf16>
    %17 = vector.extract_strided_slice %15 {offsets = [16, 0], sizes = [16, 512], strides = [1, 1]} : vector<32x512xbf16> to vector<16x512xbf16>
    %c0_11 = arith.constant 0 : index
    %c0_12 = arith.constant 0 : index
    %c0_13 = arith.constant 0 : index
    %18 = vector.load %arg2[%c0_11, %c0_12, %c0_13] : memref<1x16x1xf32, #tpu.memory_space<vmem>>, vector<1x16x1xf32>
    %19 = vector.shape_cast %18 : vector<1x16x1xf32> to vector<16x1xf32>
    %c0_14 = arith.constant 0 : index
    %c1536 = arith.constant 1536 : index
    %20 = vector.load %arg4[%c0_14, %c1536] : memref<1x5120xf32, #tpu.memory_space<vmem>>, vector<1x64xf32>
    %21 = vector.broadcast %19 : vector<16x1xf32> to vector<16x64xf32>
    %22 = vector.broadcast %20 : vector<1x64xf32> to vector<16x64xf32>
    %23 = arith.mulf %21, %22 : vector<16x64xf32>
    %c0_15 = arith.constant 0 : index
    %c1664 = arith.constant 1664 : index
    %24 = vector.load %arg4[%c0_15, %c1664] : memref<1x5120xf32, #tpu.memory_space<vmem>>, vector<1x64xf32>
    %25 = vector.broadcast %24 : vector<1x64xf32> to vector<16x64xf32>
    %26 = arith.addf %23, %25 : vector<16x64xf32>
    %cst_16 = arith.constant 0.000000e+00 : f32
    %27 = vector.broadcast %cst_16 : f32 to vector<16x64xf32>
    %28 = arith.maximumf %26, %27 : vector<16x64xf32>
    %29 = arith.truncf %28 : vector<16x64xf32> to vector<16x64xbf16>
    %c0_17 = arith.constant 0 : index
    %c0_18 = arith.constant 0 : index
    %30 = vector.load %arg7[%c0_17, %c0_18] : memref<64x64xbf16, #tpu.memory_space<vmem>>, vector<64x64xbf16>
    %cst_19 = arith.constant dense<0.000000e+00> : vector<16x64xf32>
    %31 = tpu.matmul %29, %30, %cst_19 {dimension_numbers = #tpu.dot_dimension_numbers<[1], [0], [0], [1], [0, 0, 1, 1], [], []>} : vector<16x64xbf16>, vector<64x64xbf16>, vector<16x64xf32> -> vector<16x64xf32>
    %c0_20 = arith.constant 0 : index
    %c1792 = arith.constant 1792 : index
    %32 = vector.load %arg4[%c0_20, %c1792] : memref<1x5120xf32, #tpu.memory_space<vmem>>, vector<1x64xf32>
    %33 = vector.broadcast %32 : vector<1x64xf32> to vector<16x64xf32>
    %34 = arith.addf %31, %33 : vector<16x64xf32>
    %35 = arith.truncf %34 : vector<16x64xf32> to vector<16x64xbf16>
    %c0_21 = arith.constant 0 : index
    %c0_22 = arith.constant 0 : index
    %36 = vector.load %arg8[%c0_21, %c0_22] : memref<512x512xbf16, #tpu.memory_space<vmem>>, vector<512x512xbf16>
    %cst_23 = arith.constant dense<0.000000e+00> : vector<16x512xf32>
    %37 = tpu.matmul %16, %36, %cst_23 {dimension_numbers = #tpu.dot_dimension_numbers<[1], [0], [0], [1], [0, 0, 1, 1], [], []>} : vector<16x512xbf16>, vector<512x512xbf16>, vector<16x512xf32> -> vector<16x512xf32>
    %c0_24 = arith.constant 0 : index
    %c0_25 = arith.constant 0 : index
    %38 = vector.load %arg9[%c0_24, %c0_25] : memref<64x512xbf16, #tpu.memory_space<vmem>>, vector<64x512xbf16>
    %cst_26 = arith.constant dense<0.000000e+00> : vector<16x512xf32>
    %39 = tpu.matmul %35, %38, %cst_26 {dimension_numbers = #tpu.dot_dimension_numbers<[1], [0], [0], [1], [0, 0, 1, 1], [], []>} : vector<16x64xbf16>, vector<64x512xbf16>, vector<16x512xf32> -> vector<16x512xf32>
    %40 = arith.addf %37, %39 : vector<16x512xf32>
    %c0_27 = arith.constant 0 : index
    %c1920 = arith.constant 1920 : index
    %41 = vector.load %arg4[%c0_27, %c1920] : memref<1x5120xf32, #tpu.memory_space<vmem>>, vector<1x512xf32>
    %42 = vector.broadcast %41 : vector<1x512xf32> to vector<16x512xf32>
    %43 = arith.addf %40, %42 : vector<16x512xf32>
    %cst_28 = arith.constant 0.000000e+00 : f32
    %44 = vector.broadcast %cst_28 : f32 to vector<16x512xf32>
    %45 = arith.maximumf %43, %44 : vector<16x512xf32>
    %46 = arith.truncf %45 : vector<16x512xf32> to vector<16x512xbf16>
    %c0_29 = arith.constant 0 : index
    %c0_30 = arith.constant 0 : index
    %47 = vector.load %arg10[%c0_29, %c0_30] : memref<512x512xbf16, #tpu.memory_space<vmem>>, vector<512x512xbf16>
    %cst_31 = arith.constant dense<0.000000e+00> : vector<16x512xf32>
    %48 = tpu.matmul %46, %47, %cst_31 {dimension_numbers = #tpu.dot_dimension_numbers<[1], [0], [0], [1], [0, 0, 1, 1], [], []>} : vector<16x512xbf16>, vector<512x512xbf16>, vector<16x512xf32> -> vector<16x512xf32>
    %c0_32 = arith.constant 0 : index
    %c2432 = arith.constant 2432 : index
    %49 = vector.load %arg4[%c0_32, %c2432] : memref<1x5120xf32, #tpu.memory_space<vmem>>, vector<1x512xf32>
    %50 = vector.broadcast %49 : vector<1x512xf32> to vector<16x512xf32>
    %51 = arith.addf %48, %50 : vector<16x512xf32>
    %cst_33 = arith.constant 0.000000e+00 : f32
    %52 = vector.broadcast %cst_33 : f32 to vector<16x512xf32>
    %53 = arith.maximumf %51, %52 : vector<16x512xf32>
    %54 = arith.truncf %53 : vector<16x512xf32> to vector<16x512xbf16>
    %c0_34 = arith.constant 0 : index
    %c0_35 = arith.constant 0 : index
    %55 = vector.load %arg11[%c0_34, %c0_35] : memref<512x512xbf16, #tpu.memory_space<vmem>>, vector<512x512xbf16>
    %cst_36 = arith.constant dense<0.000000e+00> : vector<16x512xf32>
    %56 = tpu.matmul %54, %55, %cst_36 {dimension_numbers = #tpu.dot_dimension_numbers<[1], [0], [0], [1], [0, 0, 1, 1], [], []>} : vector<16x512xbf16>, vector<512x512xbf16>, vector<16x512xf32> -> vector<16x512xf32>
    %c0_37 = arith.constant 0 : index
    %c2944 = arith.constant 2944 : index
    %57 = vector.load %arg4[%c0_37, %c2944] : memref<1x5120xf32, #tpu.memory_space<vmem>>, vector<1x512xf32>
    %58 = vector.broadcast %57 : vector<1x512xf32> to vector<16x512xf32>
    %59 = arith.addf %56, %58 : vector<16x512xf32>
    %cst_38 = arith.constant dense<0.000000e+00> : vector<512xf32>
    %60 = vector.multi_reduction <add>, %59, %cst_38 [0] : vector<16x512xf32> to vector<512xf32>
    %61 = vector.shape_cast %60 : vector<512xf32> to vector<1x512xf32>
    %cst_39 = arith.constant 1.600000e+01 : f32
    %62 = vector.broadcast %cst_39 : f32 to vector<1x512xf32>
    %63 = arith.divf %61, %62 : vector<1x512xf32>
    %64 = arith.truncf %63 : vector<1x512xf32> to vector<1x512xbf16>
    %c0_40 = arith.constant 0 : index
    %c0_41 = arith.constant 0 : index
    %65 = vector.load %arg12[%c0_40, %c0_41] : memref<512x512xbf16, #tpu.memory_space<vmem>>, vector<512x512xbf16>
    %cst_42 = arith.constant dense<0.000000e+00> : vector<1x512xf32>
    %66 = tpu.matmul %64, %65, %cst_42 {dimension_numbers = #tpu.dot_dimension_numbers<[1], [0], [0], [1], [0, 0, 1, 1], [], []>} : vector<1x512xbf16>, vector<512x512xbf16>, vector<1x512xf32> -> vector<1x512xf32>
    %c0_43 = arith.constant 0 : index
    %c0_44 = arith.constant 0 : index
    %67 = vector.load %arg13[%c0_43, %c0_44] : memref<512x512xbf16, #tpu.memory_space<vmem>>, vector<512x512xbf16>
    %cst_45 = arith.constant dense<0.000000e+00> : vector<16x512xf32>
    %68 = tpu.matmul %17, %67, %cst_45 {dimension_numbers = #tpu.dot_dimension_numbers<[1], [0], [0], [1], [0, 0, 1, 1], [], []>} : vector<16x512xbf16>, vector<512x512xbf16>, vector<16x512xf32> -> vector<16x512xf32>
    %69 = vector.broadcast %66 : vector<1x512xf32> to vector<16x512xf32>
    %70 = arith.addf %68, %69 : vector<16x512xf32>
    %c0_46 = arith.constant 0 : index
    %c3456 = arith.constant 3456 : index
    %71 = vector.load %arg4[%c0_46, %c3456] : memref<1x5120xf32, #tpu.memory_space<vmem>>, vector<1x512xf32>
    %72 = vector.broadcast %71 : vector<1x512xf32> to vector<16x512xf32>
    %73 = arith.addf %70, %72 : vector<16x512xf32>
    %cst_47 = arith.constant 0.000000e+00 : f32
    %74 = vector.broadcast %cst_47 : f32 to vector<16x512xf32>
    %75 = arith.maximumf %73, %74 : vector<16x512xf32>
    %76 = arith.truncf %75 : vector<16x512xf32> to vector<16x512xbf16>
    %c0_48 = arith.constant 0 : index
    %c0_49 = arith.constant 0 : index
    %77 = vector.load %arg14[%c0_48, %c0_49] : memref<512x512xbf16, #tpu.memory_space<vmem>>, vector<512x512xbf16>
    %cst_50 = arith.constant dense<0.000000e+00> : vector<16x512xf32>
    %78 = tpu.matmul %76, %77, %cst_50 {dimension_numbers = #tpu.dot_dimension_numbers<[1], [0], [0], [1], [0, 0, 1, 1], [], []>} : vector<16x512xbf16>, vector<512x512xbf16>, vector<16x512xf32> -> vector<16x512xf32>
    %c0_51 = arith.constant 0 : index
    %c3968 = arith.constant 3968 : index
    %79 = vector.load %arg4[%c0_51, %c3968] : memref<1x5120xf32, #tpu.memory_space<vmem>>, vector<1x512xf32>
    %80 = vector.broadcast %79 : vector<1x512xf32> to vector<16x512xf32>
    %81 = arith.addf %78, %80 : vector<16x512xf32>
    %cst_52 = arith.constant 0.000000e+00 : f32
    %82 = vector.broadcast %cst_52 : f32 to vector<16x512xf32>
    %83 = arith.maximumf %81, %82 : vector<16x512xf32>
    %84 = arith.truncf %83 : vector<16x512xf32> to vector<16x512xbf16>
    %c0_53 = arith.constant 0 : index
    %c0_54 = arith.constant 0 : index
    %85 = vector.load %arg15[%c0_53, %c0_54] : memref<512x256xbf16, #tpu.memory_space<vmem>>, vector<512x256xbf16>
    %cst_55 = arith.constant dense<0.000000e+00> : vector<16x256xf32>
    %86 = tpu.matmul %84, %85, %cst_55 {dimension_numbers = #tpu.dot_dimension_numbers<[1], [0], [0], [1], [0, 0, 1, 1], [], []>} : vector<16x512xbf16>, vector<512x256xbf16>, vector<16x256xf32> -> vector<16x256xf32>
    %c0_56 = arith.constant 0 : index
    %c4480 = arith.constant 4480 : index
    %87 = vector.load %arg4[%c0_56, %c4480] : memref<1x5120xf32, #tpu.memory_space<vmem>>, vector<1x256xf32>
    %88 = vector.broadcast %87 : vector<1x256xf32> to vector<16x256xf32>
    %89 = arith.addf %86, %88 : vector<16x256xf32>
    %cst_57 = arith.constant 0.000000e+00 : f32
    %90 = vector.broadcast %cst_57 : f32 to vector<16x256xf32>
    %91 = arith.maximumf %89, %90 : vector<16x256xf32>
    %92 = arith.truncf %91 : vector<16x256xf32> to vector<16x256xbf16>
    %c0_58 = arith.constant 0 : index
    %c0_59 = arith.constant 0 : index
    %93 = vector.load %arg16[%c0_58, %c0_59] : memref<256x256xbf16, #tpu.memory_space<vmem>>, vector<256x256xbf16>
    %cst_60 = arith.constant dense<0.000000e+00> : vector<16x256xf32>
    %94 = tpu.matmul %92, %93, %cst_60 {dimension_numbers = #tpu.dot_dimension_numbers<[1], [0], [0], [1], [0, 0, 1, 1], [], []>} : vector<16x256xbf16>, vector<256x256xbf16>, vector<16x256xf32> -> vector<16x256xf32>
    %c0_61 = arith.constant 0 : index
    %c4736 = arith.constant 4736 : index
    %95 = vector.load %arg4[%c0_61, %c4736] : memref<1x5120xf32, #tpu.memory_space<vmem>>, vector<1x256xf32>
    %96 = vector.broadcast %95 : vector<1x256xf32> to vector<16x256xf32>
    %97 = arith.addf %94, %96 : vector<16x256xf32>
    %cst_62 = arith.constant 0.000000e+00 : f32
    %98 = vector.broadcast %cst_62 : f32 to vector<16x256xf32>
    %99 = arith.maximumf %97, %98 : vector<16x256xf32>
    %100 = arith.truncf %99 : vector<16x256xf32> to vector<16x256xbf16>
    %c0_63 = arith.constant 0 : index
    %c0_64 = arith.constant 0 : index
    %101 = vector.load %arg17[%c0_63, %c0_64] : memref<256x2xbf16, #tpu.memory_space<vmem>>, vector<256x2xbf16>
    %cst_65 = arith.constant dense<0.000000e+00> : vector<16x2xf32>
    %102 = tpu.matmul %100, %101, %cst_65 {dimension_numbers = #tpu.dot_dimension_numbers<[1], [0], [0], [1], [0, 0, 1, 1], [], []>} : vector<16x256xbf16>, vector<256x2xbf16>, vector<16x2xf32> -> vector<16x2xf32>
    %c0_66 = arith.constant 0 : index
    %c4992 = arith.constant 4992 : index
    %103 = vector.load %arg4[%c0_66, %c4992] : memref<1x5120xf32, #tpu.memory_space<vmem>>, vector<1x2xf32>
    %104 = vector.broadcast %103 : vector<1x2xf32> to vector<16x2xf32>
    %105 = arith.addf %102, %104 : vector<16x2xf32>
    %106 = vector.extract_strided_slice %105 {offsets = [0, 0], sizes = [16, 1], strides = [1, 1]} : vector<16x2xf32> to vector<16x1xf32>
    %107 = vector.extract_strided_slice %105 {offsets = [0, 1], sizes = [16, 1], strides = [1, 1]} : vector<16x2xf32> to vector<16x1xf32>
    %cst_67 = arith.constant 0.000000e+00 : f32
    %108 = vector.broadcast %cst_67 : f32 to vector<16x1xf32>
    %109 = arith.maximumf %107, %108 : vector<16x1xf32>
    %110 = math.absf %107 : vector<16x1xf32>
    %cst_68 = arith.constant 0.000000e+00 : f32
    %111 = vector.broadcast %cst_68 : f32 to vector<16x1xf32>
    %112 = arith.subf %111, %110 : vector<16x1xf32>
    %113 = math.exp %112 : vector<16x1xf32>
    %cst_69 = arith.constant 1.000000e+00 : f32
    %114 = vector.broadcast %cst_69 : f32 to vector<16x1xf32>
    %115 = arith.addf %114, %113 : vector<16x1xf32>
    %116 = math.log %115 : vector<16x1xf32>
    %117 = arith.addf %109, %116 : vector<16x1xf32>
    %cst_70 = arith.constant 9.000000e-02 : f32
    %118 = vector.broadcast %cst_70 : f32 to vector<16x1xf32>
    %119 = arith.mulf %118, %117 : vector<16x1xf32>
    %cst_71 = arith.constant 0.00999999977 : f32
    %120 = vector.broadcast %cst_71 : f32 to vector<16x1xf32>
    %121 = arith.addf %120, %119 : vector<16x1xf32>
    %c0_72 = arith.constant 0 : index
    %c0_73 = arith.constant 0 : index
    %c0_74 = arith.constant 0 : index
    %122 = vector.load %arg3[%c0_72, %c0_73, %c0_74] : memref<1x16x1xf32, #tpu.memory_space<vmem>>, vector<1x16x1xf32>
    %123 = vector.shape_cast %122 : vector<1x16x1xf32> to vector<16x1xf32>
    %124 = arith.mulf %123, %106 : vector<16x1xf32>
    %cst_75 = arith.constant 0.000000e+00 : f32
    %125 = vector.broadcast %cst_75 : f32 to vector<16x1xf32>
    %126 = arith.maximumf %106, %125 : vector<16x1xf32>
    %127 = math.absf %106 : vector<16x1xf32>
    %cst_76 = arith.constant 0.000000e+00 : f32
    %128 = vector.broadcast %cst_76 : f32 to vector<16x1xf32>
    %129 = arith.subf %128, %127 : vector<16x1xf32>
    %130 = math.exp %129 : vector<16x1xf32>
    %cst_77 = arith.constant 1.000000e+00 : f32
    %131 = vector.broadcast %cst_77 : f32 to vector<16x1xf32>
    %132 = arith.addf %131, %130 : vector<16x1xf32>
    %133 = math.log %132 : vector<16x1xf32>
    %134 = arith.addf %126, %133 : vector<16x1xf32>
    %135 = arith.subf %124, %134 : vector<16x1xf32>
    %136 = tpu.concatenate %135, %106, %121 in 1 : vector<16x1xf32>, vector<16x1xf32>, vector<16x1xf32> -> vector<16x3xf32>
    %c0_78 = arith.constant 0 : index
    %c0_79 = arith.constant 0 : index
    %c0_80 = arith.constant 0 : index
    %137 = vector.load %arg18[%c0_78, %c0_79, %c0_80] : memref<1x16x3xf32, #tpu.memory_space<vmem>>, vector<1x16x3xf32>
    %138 = vector.shape_cast %137 : vector<1x16x3xf32> to vector<16x3xf32>
    %139 = vector.shape_cast %136 : vector<16x3xf32> to vector<1x16x3xf32>
    tpu.vector_store %arg18[%c0_78, %c0_79, %c0_80], %139 {strides = array<i32>} : memref<1x16x3xf32, #tpu.memory_space<vmem>>, vector<1x16x3xf32>,
    return
  }
  func.func @transform_0(%arg0: i32) -> (i32, i32, i32) {
    %c0_i32 = arith.constant 0 : i32
    %c0_i32_0 = arith.constant 0 : i32
    %c0_i32_1 = arith.constant 0 : i32
    return %arg0, %c0_i32, %c0_i32_0 : i32, i32, i32
  }
  func.func @transform_1(%arg0: i32) -> (i32, i32, i32) {
    %c0_i32 = arith.constant 0 : i32
    %c0_i32_0 = arith.constant 0 : i32
    %c0_i32_1 = arith.constant 0 : i32
    return %arg0, %c0_i32, %c0_i32_0 : i32, i32, i32
  }
  func.func @transform_2(%arg0: i32) -> (i32, i32, i32) {
    %c0_i32 = arith.constant 0 : i32
    %c0_i32_0 = arith.constant 0 : i32
    %c0_i32_1 = arith.constant 0 : i32
    return %arg0, %c0_i32, %c0_i32_0 : i32, i32, i32
  }
  func.func @transform_3(%arg0: i32) -> (i32, i32) {
    %c0_i32 = arith.constant 0 : i32
    %c0_i32_0 = arith.constant 0 : i32
    %c0_i32_1 = arith.constant 0 : i32
    return %c0_i32, %c0_i32_0 : i32, i32
  }
  func.func @transform_4(%arg0: i32) -> (i32, i32) {
    %c0_i32 = arith.constant 0 : i32
    %c0_i32_0 = arith.constant 0 : i32
    %c0_i32_1 = arith.constant 0 : i32
    return %c0_i32, %c0_i32_0 : i32, i32
  }
  func.func @transform_5(%arg0: i32) -> (i32, i32) {
    %c0_i32 = arith.constant 0 : i32
    %c0_i32_0 = arith.constant 0 : i32
    %c0_i32_1 = arith.constant 0 : i32
    return %c0_i32, %c0_i32_0 : i32, i32
  }
  func.func @transform_6(%arg0: i32) -> (i32, i32) {
    %c0_i32 = arith.constant 0 : i32
    %c0_i32_0 = arith.constant 0 : i32
    %c0_i32_1 = arith.constant 0 : i32
    return %c0_i32, %c0_i32_0 : i32, i32
  }
  func.func @transform_7(%arg0: i32) -> (i32, i32) {
    %c0_i32 = arith.constant 0 : i32
    %c0_i32_0 = arith.constant 0 : i32
    %c0_i32_1 = arith.constant 0 : i32
    return %c0_i32, %c0_i32_0 : i32, i32
  }
  func.func @transform_8(%arg0: i32) -> (i32, i32) {
    %c0_i32 = arith.constant 0 : i32
    %c0_i32_0 = arith.constant 0 : i32
    %c0_i32_1 = arith.constant 0 : i32
    return %c0_i32, %c0_i32_0 : i32, i32
  }
  func.func @transform_9(%arg0: i32) -> (i32, i32) {
    %c0_i32 = arith.constant 0 : i32
    %c0_i32_0 = arith.constant 0 : i32
    %c0_i32_1 = arith.constant 0 : i32
    return %c0_i32, %c0_i32_0 : i32, i32
  }
  func.func @transform_10(%arg0: i32) -> (i32, i32) {
    %c0_i32 = arith.constant 0 : i32
    %c0_i32_0 = arith.constant 0 : i32
    %c0_i32_1 = arith.constant 0 : i32
    return %c0_i32, %c0_i32_0 : i32, i32
  }
  func.func @transform_11(%arg0: i32) -> (i32, i32) {
    %c0_i32 = arith.constant 0 : i32
    %c0_i32_0 = arith.constant 0 : i32
    %c0_i32_1 = arith.constant 0 : i32
    return %c0_i32, %c0_i32_0 : i32, i32
  }
  func.func @transform_12(%arg0: i32) -> (i32, i32) {
    %c0_i32 = arith.constant 0 : i32
    %c0_i32_0 = arith.constant 0 : i32
    %c0_i32_1 = arith.constant 0 : i32
    return %c0_i32, %c0_i32_0 : i32, i32
  }
  func.func @transform_13(%arg0: i32) -> (i32, i32) {
    %c0_i32 = arith.constant 0 : i32
    %c0_i32_0 = arith.constant 0 : i32
    %c0_i32_1 = arith.constant 0 : i32
    return %c0_i32, %c0_i32_0 : i32, i32
  }
  func.func @transform_14(%arg0: i32) -> (i32, i32) {
    %c0_i32 = arith.constant 0 : i32
    %c0_i32_0 = arith.constant 0 : i32
    %c0_i32_1 = arith.constant 0 : i32
    return %c0_i32, %c0_i32_0 : i32, i32
  }
  func.func @transform_15(%arg0: i32) -> (i32, i32) {
    %c0_i32 = arith.constant 0 : i32
    %c0_i32_0 = arith.constant 0 : i32
    %c0_i32_1 = arith.constant 0 : i32
    return %c0_i32, %c0_i32_0 : i32, i32
  }
  func.func @transform_16(%arg0: i32) -> (i32, i32) {
    %c0_i32 = arith.constant 0 : i32
    %c0_i32_0 = arith.constant 0 : i32
    %c0_i32_1 = arith.constant 0 : i32
    return %c0_i32, %c0_i32_0 : i32, i32
  }
  func.func @transform_17(%arg0: i32) -> (i32, i32, i32) {
    %c0_i32 = arith.constant 0 : i32
    %c0_i32_0 = arith.constant 0 : i32
    %c0_i32_1 = arith.constant 0 : i32
    return %arg0, %c0_i32, %c0_i32_0 : i32, i32, i32
  }
}

</mosaic_0001>

<bundles_post_ra>
// kernel: cnp_forward.1
= control target key start
LH: loop header
LB: loop body
LE: loop exit
PB: predicated region body
PF: predicated region fallthrough
CT: control target
= control target key end

     0   :  { %s24245_s0 = inlined_call_operand.vmem [shape: bf16[2,32,2048], index: 0, kind: input, shape index: {}]   ;;  %s24246_s1 = inlined_call_operand.vmem [shape: f32[2,16,1], index: 1, kind: input, shape index: {}]   ;;  %s24247_s2 = inlined_call_operand.vmem [shape: f32[2,16,1], index: 2, kind: input, shape index: {}]   ;;  %s24248_s3 = inlined_call_operand.hbm [shape: f32[1,5120], index: 3, kind: input, shape index: {}]   ;;  %s24249_s4 = inlined_call_operand.hbm [shape: bf16[2048,1024], index: 4, kind: input, shape index: {}]   ;;  %s24250_s5 = inlined_call_operand.hbm [shape: bf16[1024,512], index: 5, kind: input, shape index: {}]   ;;  %s24251_s6 = inlined_call_operand.hbm [shape: bf16[64,64], index: 6, kind: input, shape index: {}]   ;;  %s24252_s7 = inlined_call_operand.hbm [shape: bf16[512,512], index: 7, kind: input, shape index: {}]   ;;  %s24253_s8 = inlined_call_operand.hbm [shape: bf16[64,512], index: 8, kind: input, shape index: {}]   ;;  %s24254_s9 = inlined_call_operand.hbm [shape: bf16[512,512], index: 9, kind: input, shape index: {}]   ;;  %s24255_s10 = inlined_call_operand.hbm [shape: bf16[512,512], index: 10, kind: input, shape index: {}]   ;;  %s24256_s11 = inlined_call_operand.hbm [shape: bf16[512,512], index: 11, kind: input, shape index: {}]   ;;  %s24257_s12 = inlined_call_operand.hbm [shape: bf16[512,512], index: 12, kind: input, shape index: {}]   ;;  %s24258_s13 = inlined_call_operand.hbm [shape: bf16[512,512], index: 13, kind: input, shape index: {}]   ;;  %s24259_s14 = inlined_call_operand.hbm [shape: bf16[512,256], index: 14, kind: input, shape index: {}]   ;;  %s24260_s15 = inlined_call_operand.hbm [shape: bf16[256,256], index: 15, kind: input, shape index: {}]   ;;  %s24261_s16 = inlined_call_operand.vmem [shape: bf16[256,2], index: 16, kind: input, shape index: {}]   ;;  %s24262_s17 = inlined_call_operand.vmem [shape: f32[2,16,3], index: 17, kind: output, shape index: {}]  }
   0x1   :  { %24274 = sst [smem:[#allocation31_spill]] %s24245_s0 }
   0x2   :  { %24275 = sst [smem:[#allocation32_spill]] %s24246_s1 }
   0x3   :  { %24276 = sst [smem:[#allocation33_spill]] %s24247_s2 }
   0x4   :  { %24277 = sst [smem:[#allocation34_spill]] %s24249_s4 }
   0x5   :  { %24278 = sst [smem:[#allocation35_spill]] %s24261_s16 }
   0x6   :  { %24279 = sst [smem:[#allocation36_spill]] %s24262_s17 }
   0x7   :  { %22 = vsyncpa [#allocation3], 0 }
   0x8   :  { %23 = vsyncpa [#allocation5], 0 }
   0x9   :  { %24 = vsyncpa [#allocation8], 0 }
   0xa   :  { %25 = vsyncpa [#allocation11], 0 }
   0xb   :  { %26 = vsyncpa [#allocation14], 0 }
   0xc   :  { %27 = vsyncpa [#allocation17], 0 }
   0xd   :  { %28 = vsyncpa [#allocation20], 0  ;;  %s23345_s24 = smov 0  }
   0xe LB: > { %24280 = sst [smem:[#allocation29_spill]] %s23228_s24  ;;  %s23230_s25 = smov [#allocation4]   ;;  %s23228_s24 = sphi %s23345_s24, %s34_s24  }
   0xf   : > { %s460_s26 = sshll.u32 %s23230_s25, 4  ;;  %s23351_s27 = sadd.s32 4294967295, %s23228_s24   ;;  %s23356_s26 = int_to_ptr.vmem [resolvable:$true] %s460_s26 }
  0x10   : > { %24281 = sst [smem:[#allocation30_spill]] %s23351_s27  ;;  %p18228_p0 = scmp.ge.s32.totalorder %s23228_s24, 1 }
  0x11   : > { %p437_p1 = scmp.lt.s32.totalorder %s23228_s24, 3  ;;  %p24267_p2 = scmp.eq.s32.totalorder %s23351_s27, 0 }
  0x12   : > { %s23231_s29 = smov [#allocation7]   ;;  %s24284_s4 = sld [smem:[#allocation34_spill]] }
  0x13   : > { %p23358_p3 = pnand %p18228_p0, %p437_p1  ;;  %s486_s0 = sshll.u32 %s23231_s29, 4  ;;  %s23364_s0 = int_to_ptr.vmem [resolvable:$true] %s486_s0 }
  0x15   : > { %s24282_s28 = scalar_select %p23358_p3, 1, 0 }
  0x16   : > { %p20997_p4 = pneg %p23358_p3 }
  0x18   : > { %p23368_p5 = pnand %p24267_p2, %p20997_p4  ;;  %s22830_s1 = scalar_lea.hbm %s24284_s4, 131072 }
  0x19   : > { %p22831_p6 = scmp.ne.s32.totalorder %s24284_s4, %s22830_s1  ;;  %p22837_p10 = scmp.lt.u32.totalorder %s22830_s1, %s24284_s4 }
  0x1a   : > { %p23380_p7 = pneg %p23368_p5 }
  0x1c   : > { %p22833_p8 = pnand %p23380_p7, %p22831_p6 }
  0x1e   : > { %p22834_p9 = pneg %p22833_p8 }
  0x20   : > { %p22839_p11 = pnand %p22837_p10, %p22834_p9 }
  0x22   : > { %22842 = shalt.err (!%p22839_p11)
}
  0x23   : > { %s22843_s29 = scalar_lea.vmem %s23356_s26, 131072  ;;  %p22851_p1 = scmp.lt.s32.totalorder %s23356_s26, %s23356_s26 }
  0x24   : > { %p22844_p12 = scmp.ne.s32.totalorder %s23356_s26, %s22843_s29  ;;  %p22852_p4 = scmp.lt.s32.totalorder %s22843_s29, %s22843_s29 }
  0x26   : > { %p22846_p13 = pnand %p22844_p12, %p23380_p7  ;;  %p22853_p6 = por %p22852_p4, %p22851_p1 }
  0x28   : > { %p22847_p0 = pneg %p22846_p13 }
  0x2a   : > { %p22854_p8 = pnand %p22853_p6, %p22847_p0 }
  0x2c   : > { %22857 = shalt.err (!%p22854_p8)
}
  0x2d   : > { %s23232_s18 = smov 512   ;;  %s23233_s19 = smov 32  }
  0x2e   : > { %21003 = dma.hbm_to_vmem [thread:$0]  (!%p23368_p5), %s24284_s4, 131072, %s23356_s26, [#allocation5], %s23232_s18, %s23232_s18, %s23233_s19  }
  0x2f   : > { %s22858_s25 = scalar_lea.hbm %s24251_s6, 512 }
  0x30   : > { %p22859_p9 = scmp.ne.s32.totalorder %s24251_s6, %s22858_s25  ;;  %p22865_p12 = scmp.lt.u32.totalorder %s22858_s25, %s24251_s6 }
  0x32   : > { %p22861_p10 = pnand %p22859_p9, %p23380_p7 }
  0x34   : > { %p22862_p11 = pneg %p22861_p10 }
  0x36   : > { %p22867_p13 = pnand %p22865_p12, %p22862_p11 }
  0x38   : > { %22870 = shalt.err (!%p22867_p13)
}
  0x39   : > { %s22871_s26 = scalar_lea.vmem %s23364_s0, 512  ;;  %p22879_p6 = scmp.lt.s32.totalorder %s23364_s0, %s23364_s0 }
  0x3a   : > { %p22872_p0 = scmp.ne.s32.totalorder %s23364_s0, %s22871_s26  ;;  %p22880_p8 = scmp.lt.s32.totalorder %s22871_s26, %s22871_s26 }
  0x3c   : > { %p22874_p1 = pnand %p22872_p0, %p23380_p7  ;;  %p22881_p9 = por %p22880_p8, %p22879_p6 }
  0x3e   : > { %p22875_p4 = pneg %p22874_p1 }
  0x40   : > { %p22882_p10 = pnand %p22881_p9, %p22875_p4 }
  0x42   : > { %22885 = shalt.err (!%p22882_p10)
}
  0x43   : > { %s23234_s17 = smov 64   ;;  %s23235_s2 = smov 4  }
  0x44   : > { %21009 = dma.hbm_to_vmem [thread:$0]  (!%p23368_p5), %s24251_s6, 512, %s23364_s0, [#allocation8], %s23234_s17, %s23234_s17, %s23235_s2  }
  0x45   : > { %s23236_s19 = smov [#allocation10]   ;;  %s23237_s20 = smov [#allocation13]  }
  0x46   : > { %s512_s1 = sshll.u32 %s23236_s19, 4  ;;  %s538_s21 = sshll.u32 %s23237_s20, 4  ;;  %s513_s1 = int_to_ptr.vmem [resolvable:$true] %s512_s1  ;;  %s539_s21 = int_to_ptr.vmem [resolvable:$true] %s538_s21 }
  0x47   : > { %s22886_s29 = scalar_lea.hbm %s24253_s8, 2048 }
  0x48   : > { %p22887_p11 = scmp.ne.s32.totalorder %s24253_s8, %s22886_s29  ;;  %p22893_p0 = scmp.lt.u32.totalorder %s22886_s29, %s24253_s8 }
  0x4a   : > { %p22889_p12 = pnand %p22887_p11, %p23380_p7 }
  0x4c   : > { %p22890_p13 = pneg %p22889_p12 }
  0x4e   : > { %p22895_p1 = pnand %p22893_p0, %p22890_p13 }
  0x50   : > { %22898 = shalt.err (!%p22895_p1)
}
  0x51   : > { %s22899_s0 = scalar_lea.vmem %s513_s1, 2048  ;;  %p22907_p9 = scmp.lt.s32.totalorder %s513_s1, %s513_s1 }
  0x52   : > { %p22900_p4 = scmp.ne.s32.totalorder %s513_s1, %s22899_s0  ;;  %p22908_p10 = scmp.lt.s32.totalorder %s22899_s0, %s22899_s0 }
  0x54   : > { %p22902_p6 = pnand %p22900_p4, %p23380_p7  ;;  %p22909_p2 = por %p22908_p10, %p22907_p9 }
  0x56   : > { %p22903_p8 = pneg %p22902_p6 }
  0x58   : > { %p22910_p3 = pnand %p22909_p2, %p22903_p8 }
  0x5a   : > { %22913 = shalt.err (!%p22910_p3)
}
  0x5b   : > { %s24269_s4 = smov 256   ;;  %s24271_s17 = smov 16  }
  0x5c   : > { %21015 = dma.hbm_to_vmem [thread:$0]  (!%p23368_p5), %s24253_s8, 2048, %s513_s1, [#allocation11], %s24269_s4, %s24269_s4, %s24271_s17  }
  0x5d   : > { %s22914_s18 = scalar_lea.hbm %s24255_s10, 16384 }
  0x5e   : > { %p22915_p2 = scmp.ne.s32.totalorder %s24255_s10, %s22914_s18  ;;  %p22921_p12 = scmp.lt.u32.totalorder %s22914_s18, %s24255_s10 }
  0x60   : > { %p22917_p3 = pnand %p22915_p2, %p23380_p7 }
  0x62   : > { %p22918_p11 = pneg %p22917_p3 }
  0x64   : > { %p22923_p13 = pnand %p22921_p12, %p22918_p11 }
  0x66   : > { %22926 = shalt.err (!%p22923_p13)
}
  0x67   : > { %s22927_s29 = scalar_lea.vmem %s539_s21, 16384  ;;  %p22935_p6 = scmp.lt.s32.totalorder %s539_s21, %s539_s21 }
  0x68   : > { %p22928_p0 = scmp.ne.s32.totalorder %s539_s21, %s22927_s29  ;;  %p22936_p8 = scmp.lt.s32.totalorder %s22927_s29, %s22927_s29 }
  0x6a   : > { %p22930_p1 = pnand %p22928_p0, %p23380_p7  ;;  %p22937_p9 = por %p22936_p8, %p22935_p6 }
  0x6c   : > { %p22931_p4 = pneg %p22930_p1 }
  0x6e   : > { %p22938_p10 = pnand %p22937_p9, %p22931_p4 }
  0x70   : > { %22941 = shalt.err (!%p22938_p10)
}
  0x71   : > { %21021 = dma.hbm_to_vmem [thread:$0]  (!%p23368_p5), %s24255_s10, 16384, %s539_s21, [#allocation14], %s24269_s4, %s24269_s4, %s24271_s17  }
  0x72   : > { %s23240_s0 = smov [#allocation16]   ;;  %s23241_s27 = smov [#allocation19]  }
  0x73   : > { %s564_s16 = sshll.u32 %s23240_s0, 4  ;;  %s590_s2 = sshll.u32 %s23241_s27, 4  ;;  %s565_s16 = int_to_ptr.vmem [resolvable:$true] %s564_s16  ;;  %s591_s2 = int_to_ptr.vmem [resolvable:$true] %s590_s2 }
  0x74   : > { %s22942_s19 = scalar_lea.hbm %s24257_s12, 16384 }
  0x75   : > { %p22943_p2 = scmp.ne.s32.totalorder %s24257_s12, %s22942_s19  ;;  %p22949_p12 = scmp.lt.u32.totalorder %s22942_s19, %s24257_s12 }
  0x77   : > { %p22945_p3 = pnand %p22943_p2, %p23380_p7 }
  0x79   : > { %p22946_p11 = pneg %p22945_p3 }
  0x7b   : > { %p22951_p13 = pnand %p22949_p12, %p22946_p11 }
  0x7d   : > { %22954 = shalt.err (!%p22951_p13)
}
  0x7e   : > { %s22955_s21 = scalar_lea.vmem %s565_s16, 16384  ;;  %p22963_p6 = scmp.lt.s32.totalorder %s565_s16, %s565_s16 }
  0x7f   : > { %p22956_p0 = scmp.ne.s32.totalorder %s565_s16, %s22955_s21  ;;  %p22964_p8 = scmp.lt.s32.totalorder %s22955_s21, %s22955_s21 }
  0x81   : > { %p22958_p1 = pnand %p22956_p0, %p23380_p7  ;;  %p22965_p9 = por %p22964_p8, %p22963_p6 }
  0x83   : > { %p22959_p4 = pneg %p22958_p1 }
  0x85   : > { %p22966_p10 = pnand %p22965_p9, %p22959_p4 }
  0x87   : > { %22969 = shalt.err (!%p22966_p10)
}
  0x88   : > { %21027 = dma.hbm_to_vmem [thread:$0]  (!%p23368_p5), %s24257_s12, 16384, %s565_s16, [#allocation17], %s24269_s4, %s24269_s4, %s24271_s17  }
  0x89   : > { %s22970_s24 = scalar_lea.hbm %s24259_s14, 8192 }
  0x8a   : > { %p22971_p2 = scmp.ne.s32.totalorder %s24259_s14, %s22970_s24  ;;  %p22977_p12 = scmp.lt.u32.totalorder %s22970_s24, %s24259_s14 }
  0x8c   : > { %p22973_p3 = pnand %p22971_p2, %p23380_p7 }
  0x8e   : > { %p22974_p11 = pneg %p22973_p3 }
  0x90   : > { %p22979_p13 = pnand %p22977_p12, %p22974_p11 }
  0x92   : > { %22982 = shalt.err (!%p22979_p13)
}
  0x93   : > { %s22983_s25 = scalar_lea.vmem %s591_s2, 8192  ;;  %p22991_p6 = scmp.lt.s32.totalorder %s591_s2, %s591_s2 }
  0x94   : > { %p22984_p0 = scmp.ne.s32.totalorder %s591_s2, %s22983_s25  ;;  %p22992_p8 = scmp.lt.s32.totalorder %s22983_s25, %s22983_s25 }
  0x96   : > { %p22986_p1 = pnand %p22984_p0, %p23380_p7  ;;  %p22993_p9 = por %p22992_p8, %p22991_p6 }
  0x98   : > { %p22987_p4 = pneg %p22986_p1 }
  0x9a   : > { %p22994_p10 = pnand %p22993_p9, %p22987_p4 }
  0x9c   : > { %22997 = shalt.err (!%p22994_p10)
}
  0x9d   : > { %s24273_s16 = smov 128   ;;  %s23243_s29 = smov 8  }
  0x9e   : > { %21033 = dma.hbm_to_vmem [thread:$0]  (!%p23368_p5), %s24259_s14, 8192, %s591_s2, [#allocation20], %s24273_s16, %s24273_s16, %s23243_s29  }
  0x9f   : > { %s23244_s26 = smov [#allocation2]   ;;  %s23245_s27 = smov [#allocation6]  }
  0xa0   : > { %s450_s0 = sshll.u32 %s23244_s26, 4  ;;  %s473_s24 = sshll.u32 %s23245_s27, 4  ;;  %s451_s0 = int_to_ptr.vmem [resolvable:$true] %s450_s0  ;;  %s474_s24 = int_to_ptr.vmem [resolvable:$true] %s473_s24 }
  0xa1   : > { %s22998_s20 = scalar_lea.hbm %s24248_s3, 640 }
  0xa2   : > { %p22999_p2 = scmp.ne.s32.totalorder %s24248_s3, %s22998_s20  ;;  %p23005_p12 = scmp.lt.u32.totalorder %s22998_s20, %s24248_s3 }
  0xa4   : > { %p23001_p3 = pnand %p22999_p2, %p23380_p7 }
  0xa6   : > { %p23002_p11 = pneg %p23001_p3 }
  0xa8   : > { %p23007_p13 = pnand %p23005_p12, %p23002_p11 }
  0xaa   : > { %23010 = shalt.err (!%p23007_p13)
}
  0xab   : > { %s23011_s2 = scalar_lea.vmem %s451_s0, 640  ;;  %p23019_p6 = scmp.lt.s32.totalorder %s451_s0, %s451_s0 }
  0xac   : > { %p23012_p0 = scmp.ne.s32.totalorder %s451_s0, %s23011_s2  ;;  %p23020_p8 = scmp.lt.s32.totalorder %s23011_s2, %s23011_s2 }
  0xae   : > { %p23014_p1 = pnand %p23012_p0, %p23380_p7  ;;  %p23021_p9 = por %p23020_p8, %p23019_p6 }
  0xb0   : > { %p23015_p4 = pneg %p23014_p1 }
  0xb2   : > { %p23022_p10 = pnand %p23021_p9, %p23015_p4 }
  0xb4   : > { %23025 = shalt.err (!%p23022_p10)
}
  0xb5   : > { %21000 = dma.hbm_to_vmem [thread:$0]  (!%p23368_p5), %s24248_s3, 640, %s451_s0, [#allocation3]  }
  0xb6   : > { %s23026_s26 = scalar_lea.hbm %s24250_s5, 32768 }
  0xb7   : > { %p23027_p2 = scmp.ne.s32.totalorder %s24250_s5, %s23026_s26  ;;  %p23033_p12 = scmp.lt.u32.totalorder %s23026_s26, %s24250_s5 }
  0xb9   : > { %p23029_p3 = pnand %p23027_p2, %p23380_p7 }
  0xbb   : > { %p23030_p11 = pneg %p23029_p3 }
  0xbd   : > { %p23035_p13 = pnand %p23033_p12, %p23030_p11 }
  0xbf   : > { %23038 = shalt.err (!%p23035_p13)
}
  0xc0   : > { %s23039_s23 = scalar_lea.vmem %s474_s24, 32768  ;;  %p23047_p6 = scmp.lt.s32.totalorder %s474_s24, %s474_s24 }
  0xc1   : > { %p23040_p0 = scmp.ne.s32.totalorder %s474_s24, %s23039_s23  ;;  %p23048_p8 = scmp.lt.s32.totalorder %s23039_s23, %s23039_s23 }
  0xc3   : > { %p23042_p1 = pnand %p23040_p0, %p23380_p7  ;;  %p23049_p9 = por %p23048_p8, %p23047_p6 }
  0xc5   : > { %p23043_p4 = pneg %p23042_p1 }
  0xc7   : > { %p23050_p10 = pnand %p23049_p9, %p23043_p4 }
  0xc9   : > { %23053 = shalt.err (!%p23050_p10)
}
  0xca   : > { %s24286_s0 = smov 16   ;;  %s24287_s25 = smov 256  }
  0xcb   : > { %21006 = dma.hbm_to_vmem [thread:$0]  (!%p23368_p5), %s24250_s5, 32768, %s474_s24, [#allocation5], %s24287_s25, %s24287_s25, %s24286_s0  }
  0xcc   : > { %s23246_s1 = smov [#allocation9]   ;;  %s23247_s17 = smov [#allocation12]  }
  0xcd   : > { %s499_s4 = sshll.u32 %s23246_s1, 4  ;;  %s525_s26 = sshll.u32 %s23247_s17, 4  ;;  %s500_s4 = int_to_ptr.vmem [resolvable:$true] %s499_s4  ;;  %s526_s26 = int_to_ptr.vmem [resolvable:$true] %s525_s26 }
  0xce   : > { %s23054_s19 = scalar_lea.hbm %s24252_s7, 16384 }
  0xcf   : > { %p23055_p2 = scmp.ne.s32.totalorder %s24252_s7, %s23054_s19  ;;  %p23061_p12 = scmp.lt.u32.totalorder %s23054_s19, %s24252_s7 }
  0xd1   : > { %p23057_p3 = pnand %p23055_p2, %p23380_p7 }
  0xd3   : > { %p23058_p11 = pneg %p23057_p3 }
  0xd5   : > { %p23063_p13 = pnand %p23061_p12, %p23058_p11 }
  0xd7   : > { %23066 = shalt.err (!%p23063_p13)
}
  0xd8   : > { %s23067_s24 = scalar_lea.vmem %s500_s4, 16384  ;;  %p23075_p6 = scmp.lt.s32.totalorder %s500_s4, %s500_s4 }
  0xd9   : > { %p23068_p0 = scmp.ne.s32.totalorder %s500_s4, %s23067_s24  ;;  %p23076_p8 = scmp.lt.s32.totalorder %s23067_s24, %s23067_s24 }
  0xdb   : > { %p23070_p1 = pnand %p23068_p0, %p23380_p7  ;;  %p23077_p9 = por %p23076_p8, %p23075_p6 }
  0xdd   : > { %p23071_p4 = pneg %p23070_p1 }
  0xdf   : > { %p23078_p10 = pnand %p23077_p9, %p23071_p4 }
  0xe1   : > { %23081 = shalt.err (!%p23078_p10)
}
  0xe2   : > { %21012 = dma.hbm_to_vmem [thread:$0]  (!%p23368_p5), %s24252_s7, 16384, %s500_s4, [#allocation8], %s24287_s25, %s24287_s25, %s24286_s0  }
  0xe3   : > { %s23082_s27 = scalar_lea.hbm %s24254_s9, 16384 }
  0xe4   : > { %p23083_p2 = scmp.ne.s32.totalorder %s24254_s9, %s23082_s27  ;;  %p23089_p12 = scmp.lt.u32.totalorder %s23082_s27, %s24254_s9 }
  0xe6   : > { %p23085_p3 = pnand %p23083_p2, %p23380_p7 }
  0xe8   : > { %p23086_p11 = pneg %p23085_p3 }
  0xea   : > { %p23091_p13 = pnand %p23089_p12, %p23086_p11 }
  0xec   : > { %23094 = shalt.err (!%p23091_p13)
}
  0xed   : > { %s23095_s2 = scalar_lea.vmem %s526_s26, 16384  ;;  %p23103_p6 = scmp.lt.s32.totalorder %s526_s26, %s526_s26 }
  0xee   : > { %p23096_p0 = scmp.ne.s32.totalorder %s526_s26, %s23095_s2  ;;  %p23104_p8 = scmp.lt.s32.totalorder %s23095_s2, %s23095_s2 }
  0xf0   : > { %p23098_p1 = pnand %p23096_p0, %p23380_p7  ;;  %p23105_p9 = por %p23104_p8, %p23103_p6 }
  0xf2   : > { %p23099_p4 = pneg %p23098_p1 }
  0xf4   : > { %p23106_p10 = pnand %p23105_p9, %p23099_p4 }
  0xf6   : > { %23109 = shalt.err (!%p23106_p10)
}
  0xf7   : > { %21018 = dma.hbm_to_vmem [thread:$0]  (!%p23368_p5), %s24254_s9, 16384, %s526_s26, [#allocation11], %s24287_s25, %s24287_s25, %s24286_s0  }
  0xf8   : > { %s23248_s16 = smov [#allocation15]   ;;  %s23249_s1 = smov [#allocation18]  }
  0xf9   : > { %s551_s21 = sshll.u32 %s23248_s16, 4  ;;  %s577_s17 = sshll.u32 %s23249_s1, 4  ;;  %s552_s21 = int_to_ptr.vmem [resolvable:$true] %s551_s21  ;;  %s578_s17 = int_to_ptr.vmem [resolvable:$true] %s577_s17 }
  0xfa   : > { %s23110_s19 = scalar_lea.hbm %s24256_s11, 16384 }
  0xfb   : > { %p23111_p2 = scmp.ne.s32.totalorder %s24256_s11, %s23110_s19  ;;  %p23117_p12 = scmp.lt.u32.totalorder %s23110_s19, %s24256_s11 }
  0xfd   : > { %p23113_p3 = pnand %p23111_p2, %p23380_p7 }
  0xff   : > { %p23114_p11 = pneg %p23113_p3 }
 0x101   : > { %p23119_p13 = pnand %p23117_p12, %p23114_p11 }
 0x103   : > { %23122 = shalt.err (!%p23119_p13)
}
 0x104   : > { %s23123_s26 = scalar_lea.vmem %s552_s21, 16384  ;;  %p23131_p6 = scmp.lt.s32.totalorder %s552_s21, %s552_s21 }
 0x105   : > { %p23124_p0 = scmp.ne.s32.totalorder %s552_s21, %s23123_s26  ;;  %p23132_p8 = scmp.lt.s32.totalorder %s23123_s26, %s23123_s26 }
 0x107   : > { %p23126_p1 = pnand %p23124_p0, %p23380_p7  ;;  %p23133_p9 = por %p23132_p8, %p23131_p6 }
 0x109   : > { %p23127_p4 = pneg %p23126_p1 }
 0x10b   : > { %p23134_p10 = pnand %p23133_p9, %p23127_p4 }
 0x10d   : > { %23137 = shalt.err (!%p23134_p10)
}
 0x10e   : > { %21024 = dma.hbm_to_vmem [thread:$0]  (!%p23368_p5), %s24256_s11, 16384, %s552_s21, [#allocation14], %s24287_s25, %s24287_s25, %s24286_s0  }
 0x10f   : > { %s23138_s18 = scalar_lea.hbm %s24258_s13, 16384 }
 0x110   : > { %p23139_p2 = scmp.ne.s32.totalorder %s24258_s13, %s23138_s18  ;;  %p23145_p12 = scmp.lt.u32.totalorder %s23138_s18, %s24258_s13 }
 0x112   : > { %p23141_p3 = pnand %p23139_p2, %p23380_p7 }
 0x114   : > { %p23142_p11 = pneg %p23141_p3 }
 0x116   : > { %p23147_p13 = pnand %p23145_p12, %p23142_p11 }
 0x118   : > { %23150 = shalt.err (!%p23147_p13)
}
 0x119   : > { %s23151_s4 = scalar_lea.vmem %s578_s17, 16384  ;;  %p23159_p6 = scmp.lt.s32.totalorder %s578_s17, %s578_s17 }
 0x11a   : > { %p23152_p0 = scmp.ne.s32.totalorder %s578_s17, %s23151_s4  ;;  %p23160_p8 = scmp.lt.s32.totalorder %s23151_s4, %s23151_s4 }
 0x11c   : > { %p23154_p1 = pnand %p23152_p0, %p23380_p7  ;;  %p23161_p9 = por %p23160_p8, %p23159_p6 }
 0x11e   : > { %p23155_p4 = pneg %p23154_p1 }
 0x120   : > { %p23162_p10 = pnand %p23161_p9, %p23155_p4 }
 0x122   : > { %23165 = shalt.err (!%p23162_p10)
}
 0x123   : > { %21030 = dma.hbm_to_vmem [thread:$0]  (!%p23368_p5), %s24258_s13, 16384, %s578_s17, [#allocation17], %s24287_s25, %s24287_s25, %s24286_s0  }
 0x124   : > { %s23250_s24 = smov [#allocation21]   ;;  %s23166_s18 = scalar_lea.hbm %s24260_s15, 4096 }
 0x125   : > { %s603_s16 = sshll.u32 %s23250_s24, 4  ;;  %p23167_p2 = scmp.ne.s32.totalorder %s24260_s15, %s23166_s18  ;;  %s604_s16 = int_to_ptr.vmem [resolvable:$true] %s603_s16 }
 0x126   : > { %p23173_p12 = scmp.lt.u32.totalorder %s23166_s18, %s24260_s15 }
 0x127   : > { %p23169_p3 = pnand %p23167_p2, %p23380_p7 }
 0x129   : > { %p23170_p11 = pneg %p23169_p3 }
 0x12b   : > { %p23175_p13 = pnand %p23173_p12, %p23170_p11 }
 0x12d   : > { %23178 = shalt.err (!%p23175_p13)
}
 0x12e   : > { %s23179_s0 = scalar_lea.vmem %s604_s16, 4096  ;;  %p23187_p6 = scmp.lt.s32.totalorder %s604_s16, %s604_s16 }
 0x12f   : > { %p23180_p0 = scmp.ne.s32.totalorder %s604_s16, %s23179_s0  ;;  %p23188_p8 = scmp.lt.s32.totalorder %s23179_s0, %s23179_s0 }
 0x131   : > { %p23182_p1 = pnand %p23180_p0, %p23380_p7  ;;  %p23189_p9 = por %p23188_p8, %p23187_p6 }
 0x133   : > { %p23183_p4 = pneg %p23182_p1 }
 0x135   : > { %p23190_p10 = pnand %p23189_p9, %p23183_p4 }
 0x137   : > { %23193 = shalt.err (!%p23190_p10)
}
 0x138   : > { %s24288_s25 = smov 128   ;;  %p24289_p2 = scmp.ne.s32.totalorder %s24282_s28, 0 }
 0x139   : > { %21036 = dma.hbm_to_vmem [thread:$0]  (!%p23368_p5), %s24260_s15, 4096, %s604_s16, [#allocation20], %s24288_s25, %s24288_s25, %s23243_s29  }
 0x13a   : > { %646 = sbr.rel (%p24289_p2) target bundleno = 4411 (0x113b), region = 88  ;;  %s24290_s22 = sld [smem:[#allocation30_spill]] (!%p24289_p2) }
 0x140   : > { %p24291_p7 = scmp.eq.s32.totalorder (!%p24289_p2), %s24290_s22, 0 }
 0x142   : > { %23199 = dma.done.wait (%p24291_p7), [#allocation3], 640   ;;  %p24292_p3 = pmov %p24291_p7 }
 0x144   : > { %23201 = vsyncadd (%p24292_p3), [#allocation3], 4294966656  ;;  %p24293_p11 = pmov %p24292_p3 }
 0x145   : > { %p24294_p12 = pmov %p24292_p3 }
 0x146   : > { %23203 = dma.done.wait (%p24293_p11), [#allocation5], 163840  }
 0x147   : > { %23205 = vsyncadd (%p24294_p12), [#allocation5], 4294803456  ;;  %p24295_p13 = pmov %p24292_p3 }
 0x148   : > { %p24296_p5 = pmov %p24292_p3 }
 0x149   : > { %23207 = dma.done.wait (%p24295_p13), [#allocation8], 16896  }
 0x14a   : > { %23209 = vsyncadd (%p24296_p5), [#allocation8], 4294950400  ;;  %p24297_p0 = pmov %p24292_p3 }
 0x14c   : > { %23211 = dma.done.wait (%p24297_p0), [#allocation11], 18432   ;;  %p24298_p1 = pmov %p24297_p0 }
 0x14d   : > { %p24299_p4 = pmov %p24297_p0 }
 0x14e   : > { %23213 = vsyncadd (%p24298_p1), [#allocation11], 4294948864 }
 0x14f   : > { %23215 = dma.done.wait (%p24299_p4), [#allocation14], 32768   ;;  %p24300_p6 = pmov %p24297_p0 }
 0x150   : > { %p24301_p8 = pmov %p24297_p0 }
 0x151   : > { %23217 = vsyncadd (%p24300_p6), [#allocation14], 4294934528 }
 0x152   : > { %23219 = dma.done.wait (%p24301_p8), [#allocation17], 32768   ;;  %p24302_p9 = pmov %p24297_p0 }
 0x153   : > { %p24303_p10 = pmov %p24297_p0 }
 0x154   : > { %23221 = vsyncadd (%p24302_p9), [#allocation17], 4294934528 }
 0x155   : > { %23223 = dma.done.wait (%p24303_p10), [#allocation20], 12288   ;;  %p24304_p2 = pmov %p24297_p0 }
 0x156   : > { %v809_v0 = vld [vmem:[#allocation4] sm:$0xff]  ;;  %v810_v2 = vld [vmem:[#allocation4 + $0x8] sm:$0xff]  ;;  %p756_p7 = scmp.lt.s32.totalorder %s24290_s22, 1  ;;  %s24305_s21 = sld [smem:[#allocation31_spill]]  ;;  %vm23253_vm0 = vmmov 0   ;;  %vm10961_vm1 = vcmask 523264  }
 0x157   : > { %23225 = vsyncadd (%p24304_p2), [#allocation20], 4294955008  ;;  %v813_v1 = vld [vmem:[#allocation4 + $0x20] sm:$0xff]  ;;  %v814_v4 = vld [vmem:[#allocation4 + $0x28] sm:$0xff]  ;;  %s24306_s27 = sld [smem:[#allocation32_spill]]  ;;  %s24307_s23 = sld [smem:[#allocation35_spill]] }
 0x158   : > { %v18298_v3 = vcombine.high %v809_v0, %v813_v1  ;;  %v18297_v5 = vcombine.low %v809_v0, %v813_v1  ;;  %v817_v6 = vld [vmem:[#allocation4 + $0x40] sm:$0xff]  ;;  %v18300_v8 = vcombine.high %v810_v2, %v814_v4  ;;  %v18299_v9 = vcombine.low %v810_v2, %v814_v4  ;;  %v818_v11 = vld [vmem:[#allocation4 + $0x48] sm:$0xff]  ;;  %s24312_s22 = smov (!%p756_p7, %s24290_s22), 1  ;;  %s24308_s19 = sld [smem:[#allocation33_spill]] }
 0x159   : > { %v821_v7 = vld [vmem:[#allocation4 + $0x60] sm:$0xff]  ;;  %v822_v12 = vld [vmem:[#allocation4 + $0x68] sm:$0xff]  ;;  %s20486_s28 = sshll.u32 %s24312_s22, 8  ;;  %s24060_s24 = sshll.u32 %s24312_s22, 4  ;;  %vm18012_vm2 = vcmask 7168   ;;  %vm18015_vm3 = vcmask 15360  }
 0x15a   : > { %v18306_v10 = vcombine.high %v817_v6, %v821_v7  ;;  %v825_v13 = vld [vmem:[#allocation4 + $0x80] sm:$0xff]  ;;  %7155 = vmatprep.subr.bf16.mxu0 %v18298_v3  ;;  %v18308_v14 = vcombine.high %v818_v11, %v822_v12  ;;  %v826_v16 = vld [vmem:[#allocation4 + $0x88] sm:$0xff]  ;;  %7579 = vmatprep.subr.bf16.mxu1 %v18300_v8  ;;  %v18305_v18 = vcombine.low %v817_v6, %v821_v7  ;;  %s23254_s2 = smov 1   ;;  %s24309_s17 = sld [smem:[#allocation36_spill]]  ;;  %vm18018_vm4 = vcmask 23552  }
 0x15b   : > { %v829_v15 = vld [vmem:[#allocation4 + $0xa0] sm:$0xff]  ;;  %v830_v17 = vld [vmem:[#allocation4 + $0xa8] sm:$0xff]  ;;  %7156 = vmatpush1.bf16.msra.mxu0 %v18297_v5  ;;  %7580 = vmatpush1.bf16.msra.mxu1 %v18299_v9  ;;  %v18307_v19 = vcombine.low %v818_v11, %v822_v12 }
 0x15c   : > { %7157 = vmatprep.subr.bf16.mxu0 %v18306_v10  ;;  %v18314_v20 = vcombine.high %v825_v13, %v829_v15  ;;  %7581 = vmatprep.subr.bf16.mxu1 %v18308_v14  ;;  %v18316_v21 = vcombine.high %v826_v16, %v830_v17  ;;  %v833_v22 = vld [vmem:[#allocation4 + $0xc0] sm:$0xff]  ;;  %v834_v24 = vld [vmem:[#allocation4 + $0xc8] sm:$0xff]  ;;  %v18313_v26 = vcombine.low %v825_v13, %v829_v15  ;;  %s23690_s26 = scalar_lea.vmem %s24305_s21, %s20486_s28 }
 0x15d   : > { %v837_v23 = vld [vmem:[#allocation4 + $0xe0] sm:$0xff]  ;;  %v838_v25 = vld [vmem:[#allocation4 + $0xe8] sm:$0xff]  ;;  %v18315_v27 = vcombine.low %v826_v16, %v830_v17  ;;  %v23693_v53 = vld [vmem:[%s23690_s26] sm:$0xff]  ;;  %s765_s18 = scalar_lea.vmem %s24306_s27, %s24060_s24 }
 0x15e   : > { %v18322_v28 = vcombine.high %v833_v22, %v837_v23  ;;  %v18324_v29 = vcombine.high %v834_v24, %v838_v25  ;;  %v841_v30 = vld [vmem:[#allocation4 + $0x100] sm:$0xff]  ;;  %v842_v32 = vld [vmem:[#allocation4 + $0x108] sm:$0xff]  ;;  %v18321_v34 = vcombine.low %v833_v22, %v837_v23  ;;  %v18323_v35 = vcombine.low %v834_v24, %v838_v25  ;;  %v23696_v54 = vld [vmem:[%s23690_s26 + $0x40] sm:$0xff]  ;;  %s770_s20 = scalar_lea.vmem %s24308_s19, %s24060_s24 }
 0x15f   : > { %7158 = vmatpush1.bf16.msra.mxu0 %v18305_v18  ;;  %7582 = vmatpush1.bf16.msra.mxu1 %v18307_v19  ;;  %v845_v31 = vld [vmem:[#allocation4 + $0x120] sm:$0xff]  ;;  %v846_v33 = vld [vmem:[#allocation4 + $0x128] sm:$0xff]  ;;  %v23700_v58 = vcombine.high %v23693_v53, %v23696_v54 }
 0x160   : > { %7159 = vmatprep.subr.bf16.mxu0 %v18314_v20  ;;  %7583 = vmatprep.subr.bf16.mxu1 %v18316_v21  ;;  %v18330_v36 = vcombine.high %v841_v30, %v845_v31  ;;  %v18332_v37 = vcombine.high %v842_v32, %v846_v33  ;;  %v849_v38 = vld [vmem:[#allocation4 + $0x140] sm:$0xff]  ;;  %v850_v40 = vld [vmem:[#allocation4 + $0x148] sm:$0xff]  ;;  %v18329_v42 = vcombine.low %v841_v30, %v845_v31  ;;  %s775_s4 = scalar_lea.vmem %s24309_s17, %s24060_s24 }
 0x161   : > { %v853_v39 = vld [vmem:[#allocation4 + $0x160] sm:$0xff]  ;;  %v854_v41 = vld [vmem:[#allocation4 + $0x168] sm:$0xff]  ;;  %v18331_v43 = vcombine.low %v842_v32, %v846_v33  ;;  %7187 = vmatprep.mubr.bf16.mxu0 %v23700_v58  ;;  %7611 = vmatprep.mubr.bf16.mxu1 %v23700_v58 }
 0x162   : > { %v18338_v44 = vcombine.high %v849_v38, %v853_v39  ;;  %v18340_v45 = vcombine.high %v850_v40, %v854_v41  ;;  %v857_v46 = vld [vmem:[#allocation4 + $0x180] sm:$0xff]  ;;  %v858_v48 = vld [vmem:[#allocation4 + $0x188] sm:$0xff]  ;;  %v18337_v50 = vcombine.low %v849_v38, %v853_v39  ;;  %v18339_v51 = vcombine.low %v850_v40, %v854_v41 }
 0x163   : > { %7160 = vmatpush1.bf16.msra.mxu0 %v18313_v26  ;;  %7584 = vmatpush1.bf16.msra.mxu1 %v18315_v27  ;;  %v861_v47 = vld [vmem:[#allocation4 + $0x1a0] sm:$0xff]  ;;  %v862_v49 = vld [vmem:[#allocation4 + $0x1a8] sm:$0xff] }
 0x164   : > { %7161 = vmatprep.subr.bf16.mxu0 %v18322_v28  ;;  %7585 = vmatprep.subr.bf16.mxu1 %v18324_v29  ;;  %v18346_v52 = vcombine.high %v857_v46, %v861_v47  ;;  %v18348_v55 = vcombine.high %v858_v48, %v862_v49  ;;  %v865_v56 = vld [vmem:[#allocation4 + $0x1c0] sm:$0xff]  ;;  %v866_v59 = vld [vmem:[#allocation4 + $0x1c8] sm:$0xff]  ;;  %v18345_v61 = vcombine.low %v857_v46, %v861_v47 }
 0x165   : > { %v869_v57 = vld [vmem:[#allocation4 + $0x1e0] sm:$0xff]  ;;  %v870_v60 = vld [vmem:[#allocation4 + $0x1e8] sm:$0xff]  ;;  %v18347_v62 = vcombine.low %v858_v48, %v862_v49 }
 0x166   : > { %v18354_v63 = vcombine.high %v865_v56, %v869_v57  ;;  %v18356_v0 = vcombine.high %v866_v59, %v870_v60  ;;  %v873_v1 = vld [vmem:[#allocation4 + $0x200] sm:$0xff]  ;;  %v874_v3 = vld [vmem:[#allocation4 + $0x208] sm:$0xff]  ;;  %v18353_v5 = vcombine.low %v865_v56, %v869_v57  ;;  %v18355_v6 = vcombine.low %v866_v59, %v870_v60 }
 0x167   : > { %7162 = vmatpush1.bf16.msra.mxu0 %v18321_v34  ;;  %7586 = vmatpush1.bf16.msra.mxu1 %v18323_v35  ;;  %v877_v2 = vld [vmem:[#allocation4 + $0x220] sm:$0xff]  ;;  %v878_v4 = vld [vmem:[#allocation4 + $0x228] sm:$0xff] }
 0x168   : > { %7163 = vmatprep.subr.bf16.mxu0 %v18330_v36  ;;  %7587 = vmatprep.subr.bf16.mxu1 %v18332_v37  ;;  %v18362_v7 = vcombine.high %v873_v1, %v877_v2  ;;  %v18364_v8 = vcombine.high %v874_v3, %v878_v4  ;;  %v881_v9 = vld [vmem:[#allocation4 + $0x240] sm:$0xff]  ;;  %v882_v11 = vld [vmem:[#allocation4 + $0x248] sm:$0xff]  ;;  %v18361_v13 = vcombine.low %v873_v1, %v877_v2 }
 0x169   : > { %v885_v10 = vld [vmem:[#allocation4 + $0x260] sm:$0xff]  ;;  %v886_v12 = vld [vmem:[#allocation4 + $0x268] sm:$0xff]  ;;  %v18363_v14 = vcombine.low %v874_v3, %v878_v4 }
 0x16a   : > { %v18370_v15 = vcombine.high %v881_v9, %v885_v10  ;;  %v18372_v16 = vcombine.high %v882_v11, %v886_v12  ;;  %v889_v17 = vld [vmem:[#allocation4 + $0x280] sm:$0xff]  ;;  %v890_v19 = vld [vmem:[#allocation4 + $0x288] sm:$0xff]  ;;  %v18369_v21 = vcombine.low %v881_v9, %v885_v10  ;;  %v18371_v22 = vcombine.low %v882_v11, %v886_v12 }
 0x16b   : > { %7164 = vmatpush1.bf16.msra.mxu0 %v18329_v42  ;;  %7588 = vmatpush1.bf16.msra.mxu1 %v18331_v43  ;;  %v893_v18 = vld [vmem:[#allocation4 + $0x2a0] sm:$0xff]  ;;  %v894_v20 = vld [vmem:[#allocation4 + $0x2a8] sm:$0xff] }
 0x16c   : > { %7165 = vmatprep.subr.bf16.mxu0 %v18338_v44  ;;  %7589 = vmatprep.subr.bf16.mxu1 %v18340_v45  ;;  %v18378_v23 = vcombine.high %v889_v17, %v893_v18  ;;  %v18380_v24 = vcombine.high %v890_v19, %v894_v20  ;;  %v897_v25 = vld [vmem:[#allocation4 + $0x2c0] sm:$0xff]  ;;  %v898_v27 = vld [vmem:[#allocation4 + $0x2c8] sm:$0xff]  ;;  %v18377_v29 = vcombine.low %v889_v17, %v893_v18  ;;  %v793_v17 = vld [vmem:[%s23690_s26 + $0x80] sm:$0xff] }
 0x16d   : > { %v901_v26 = vld [vmem:[#allocation4 + $0x2e0] sm:$0xff]  ;;  %v902_v28 = vld [vmem:[#allocation4 + $0x2e8] sm:$0xff]  ;;  %v18379_v30 = vcombine.low %v890_v19, %v894_v20  ;;  %v801_v18 = vld [vmem:[%s23690_s26 + $0xc0] sm:$0xff] }
 0x16e   : > { %v18386_v31 = vcombine.high %v897_v25, %v901_v26  ;;  %v18388_v32 = vcombine.high %v898_v27, %v902_v28  ;;  %v905_v33 = vld [vmem:[#allocation4 + $0x300] sm:$0xff]  ;;  %v906_v35 = vld [vmem:[#allocation4 + $0x308] sm:$0xff]  ;;  %v18385_v37 = vcombine.low %v897_v25, %v901_v26  ;;  %v18387_v38 = vcombine.low %v898_v27, %v902_v28 }
 0x16f   : > { %7166 = vmatpush1.bf16.msra.mxu0 %v18337_v50  ;;  %7590 = vmatpush1.bf16.msra.mxu1 %v18339_v51  ;;  %v909_v34 = vld [vmem:[#allocation4 + $0x320] sm:$0xff]  ;;  %v910_v36 = vld [vmem:[#allocation4 + $0x328] sm:$0xff]  ;;  %v23710_v25 = vcombine.high %v793_v17, %v801_v18 }
 0x170   : > { %7167 = vmatprep.subr.bf16.mxu0 %v18346_v52  ;;  %7591 = vmatprep.subr.bf16.mxu1 %v18348_v55  ;;  %v18394_v39 = vcombine.high %v905_v33, %v909_v34  ;;  %v18396_v40 = vcombine.high %v906_v35, %v910_v36  ;;  %v913_v41 = vld [vmem:[#allocation4 + $0x340] sm:$0xff]  ;;  %v914_v43 = vld [vmem:[#allocation4 + $0x348] sm:$0xff]  ;;  %v18393_v45 = vcombine.low %v905_v33, %v909_v34 }
 0x171   : > { %v917_v42 = vld [vmem:[#allocation4 + $0x360] sm:$0xff]  ;;  %v918_v44 = vld [vmem:[#allocation4 + $0x368] sm:$0xff]  ;;  %v18395_v46 = vcombine.low %v906_v35, %v910_v36  ;;  %v23722_v36 = vcombine.low %v793_v17, %v801_v18 }
 0x172   : > { %v18402_v47 = vcombine.high %v913_v41, %v917_v42  ;;  %v18404_v48 = vcombine.high %v914_v43, %v918_v44  ;;  %v921_v49 = vld [vmem:[#allocation4 + $0x380] sm:$0xff]  ;;  %v922_v51 = vld [vmem:[#allocation4 + $0x388] sm:$0xff]  ;;  %v18401_v55 = vcombine.low %v913_v41, %v917_v42  ;;  %v18403_v56 = vcombine.low %v914_v43, %v918_v44 }
 0x173   : > { %7168 = vmatpush1.bf16.msra.mxu0 %v18345_v61  ;;  %7592 = vmatpush1.bf16.msra.mxu1 %v18347_v62  ;;  %v925_v50 = vld [vmem:[#allocation4 + $0x3a0] sm:$0xff]  ;;  %v926_v52 = vld [vmem:[#allocation4 + $0x3a8] sm:$0xff] }
 0x174   : > { %7169 = vmatprep.subr.bf16.mxu0 %v18354_v63  ;;  %7593 = vmatprep.subr.bf16.mxu1 %v18356_v0  ;;  %v18410_v57 = vcombine.high %v921_v49, %v925_v50  ;;  %v18412_v59 = vcombine.high %v922_v51, %v926_v52  ;;  %v929_v60 = vld [vmem:[#allocation4 + $0x3c0] sm:$0xff]  ;;  %v930_v62 = vld [vmem:[#allocation4 + $0x3c8] sm:$0xff]  ;;  %v18409_v0 = vcombine.low %v921_v49, %v925_v50 }
 0x175   : > { %v933_v61 = vld [vmem:[#allocation4 + $0x3e0] sm:$0xff]  ;;  %v934_v63 = vld [vmem:[#allocation4 + $0x3e8] sm:$0xff]  ;;  %v18411_v1 = vcombine.low %v922_v51, %v926_v52 }
 0x176   : > { %v18418_v2 = vcombine.high %v929_v60, %v933_v61  ;;  %v18420_v3 = vcombine.high %v930_v62, %v934_v63  ;;  %v937_v4 = vld [vmem:[#allocation4 + $0x400] sm:$0xff]  ;;  %v18419_v9 = vcombine.low %v930_v62, %v934_v63  ;;  %v970_v42 = vld [vmem:[#allocation4 + $0x508] sm:$0xff] }
 0x177   : > { %7170 = vmatpush1.bf16.msra.mxu0 %v18353_v5  ;;  %7594 = vmatpush1.bf16.msra.mxu1 %v18355_v6  ;;  %v941_v5 = vld [vmem:[#allocation4 + $0x420] sm:$0xff]  ;;  %v938_v6 = vld [vmem:[#allocation4 + $0x408] sm:$0xff] }
 0x178   : > { %7171 = vmatprep.subr.bf16.mxu0 %v18362_v7  ;;  %7595 = vmatprep.subr.bf16.mxu1 %v18364_v8  ;;  %v942_v7 = vld [vmem:[#allocation4 + $0x428] sm:$0xff]  ;;  %v18417_v8 = vcombine.low %v929_v60, %v933_v61  ;;  %v18426_v10 = vcombine.high %v937_v4, %v941_v5  ;;  %v945_v12 = vld [vmem:[#allocation4 + $0x440] sm:$0xff]  ;;  %v18425_v19 = vcombine.low %v937_v4, %v941_v5 }
 0x179   : > { %v18428_v11 = vcombine.high %v938_v6, %v942_v7  ;;  %v18427_v20 = vcombine.low %v938_v6, %v942_v7  ;;  %v961_v27 = vld [vmem:[#allocation4 + $0x4c0] sm:$0xff]  ;;  %v974_v44 = vld [vmem:[#allocation4 + $0x528] sm:$0xff] }
 0x17a   : > { %v965_v28 = vld [vmem:[#allocation4 + $0x4e0] sm:$0xff]  ;;  %v978_v51 = vld [vmem:[#allocation4 + $0x548] sm:$0xff]  ;;  %v18460_v52 = vcombine.high %v970_v42, %v974_v44 }
 0x17b   : > { %7172 = vmatpush1.bf16.msra.mxu0 %v18361_v13  ;;  %7596 = vmatpush1.bf16.msra.mxu1 %v18363_v14  ;;  %v949_v13 = vld [vmem:[#allocation4 + $0x460] sm:$0xff]  ;;  %v946_v14 = vld [vmem:[#allocation4 + $0x448] sm:$0xff] }
 0x17c   : > { %7173 = vmatprep.subr.bf16.mxu0 %v18370_v15  ;;  %7597 = vmatprep.subr.bf16.mxu1 %v18372_v16  ;;  %v23706_v15 = vcombine.low %v23693_v53, %v23696_v54  ;;  %v950_v16 = vld [vmem:[#allocation4 + $0x468] sm:$0xff]  ;;  %v18433_v26 = vcombine.low %v945_v12, %v949_v13  ;;  %v23715_v33 = vld [vmem:[%s23690_s26 + $0x8] sm:$0xff] }
 0x17d   : > { %v954_v53 = vld [vmem:[#allocation4 + $0x488] sm:$0xff]  ;;  %v23719_v35 = vld [vmem:[%s23690_s26 + $0x48] sm:$0xff] }
 0x17e   : > { %v958_v54 = vld [vmem:[#allocation4 + $0x4a8] sm:$0xff]  ;;  %v973_v41 = vld [vmem:[#allocation4 + $0x520] sm:$0xff] }
 0x17f   : > { %7174 = vmatpush1.bf16.msra.mxu0 %v18369_v21  ;;  %7598 = vmatpush1.bf16.msra.mxu1 %v18371_v22  ;;  %v18434_v21 = vcombine.high %v945_v12, %v949_v13  ;;  %v18436_v22 = vcombine.high %v946_v14, %v950_v16  ;;  %v18444_v34 = vcombine.high %v954_v53, %v958_v54  ;;  %v977_v49 = vld [vmem:[#allocation4 + $0x540] sm:$0xff]  ;;  %v986_v62 = vld [vmem:[#allocation4 + $0x588] sm:$0xff] }
 0x180   : > { %7175 = vmatprep.subr.bf16.mxu0 %v18378_v23  ;;  %7599 = vmatprep.subr.bf16.mxu1 %v18380_v24  ;;  %v953_v23 = vld [vmem:[#allocation4 + $0x480] sm:$0xff]  ;;  %v994_v6 = vld [vmem:[#allocation4 + $0x5c8] sm:$0xff] }
 0x181   : > { %v957_v24 = vld [vmem:[#allocation4 + $0x4a0] sm:$0xff]  ;;  %v1006_v17 = vld [vmem:[#allocation4 + $0x628] sm:$0xff] }
 0x182   : > { %v981_v50 = vld [vmem:[#allocation4 + $0x560] sm:$0xff] }
 0x183   : > { %7176 = vmatpush1.bf16.msra.mxu0 %v18377_v29  ;;  %7600 = vmatpush1.bf16.msra.mxu1 %v18379_v30  ;;  %v18435_v29 = vcombine.low %v946_v14, %v950_v16  ;;  %v18442_v30 = vcombine.high %v953_v23, %v957_v24  ;;  %v985_v60 = vld [vmem:[#allocation4 + $0x580] sm:$0xff]  ;;  %v1002_v14 = vld [vmem:[#allocation4 + $0x608] sm:$0xff] }
 0x184   : > { %7177 = vmatprep.subr.bf16.mxu0 %v18386_v31  ;;  %7601 = vmatprep.subr.bf16.mxu1 %v18388_v32  ;;  %v962_v31 = vld [vmem:[#allocation4 + $0x4c8] sm:$0xff]  ;;  %v989_v61 = vld [vmem:[#allocation4 + $0x5a0] sm:$0xff] }
 0x185   : > { %v966_v32 = vld [vmem:[#allocation4 + $0x4e8] sm:$0xff]  ;;  %v993_v4 = vld [vmem:[#allocation4 + $0x5c0] sm:$0xff] }
 0x186   : > { %v18452_v43 = vcombine.high %v962_v31, %v966_v32  ;;  %v997_v5 = vld [vmem:[#allocation4 + $0x5e0] sm:$0xff] }
 0x187   : > { %7178 = vmatpush1.bf16.msra.mxu0 %v18385_v37  ;;  %7602 = vmatpush1.bf16.msra.mxu1 %v18387_v38  ;;  %v18441_v37 = vcombine.low %v953_v23, %v957_v24  ;;  %v18443_v38 = vcombine.low %v954_v53, %v958_v54  ;;  %v1001_v12 = vld [vmem:[#allocation4 + $0x600] sm:$0xff]  ;;  %v18481_v18 = vcombine.low %v993_v4, %v997_v5  ;;  %v1010_v23 = vld [vmem:[#allocation4 + $0x648] sm:$0xff] }
 0x188   : > { %7179 = vmatprep.subr.bf16.mxu0 %v18394_v39  ;;  %7603 = vmatprep.subr.bf16.mxu1 %v18396_v40  ;;  %v18450_v39 = vcombine.high %v961_v27, %v965_v28  ;;  %v969_v40 = vld [vmem:[#allocation4 + $0x500] sm:$0xff]  ;;  %v18492_v24 = vcombine.high %v1002_v14, %v1006_v17  ;;  %v1014_v53 = vld [vmem:[#allocation4 + $0x668] sm:$0xff] }
 0x189   : > { %v1005_v13 = vld [vmem:[#allocation4 + $0x620] sm:$0xff] }
 0x18a   : > { %v18489_v54 = vcombine.low %v1001_v12, %v1005_v13 }
 0x18b   : > { %7180 = vmatpush1.bf16.msra.mxu0 %v18393_v45  ;;  %7604 = vmatpush1.bf16.msra.mxu1 %v18395_v46  ;;  %v23726_v45 = vcombine.high %v23715_v33, %v23719_v35  ;;  %v18449_v46 = vcombine.low %v961_v27, %v965_v28  ;;  %v1017_v28 = vld [vmem:[#allocation4 + $0x680] sm:$0xff] }
 0x18c   : > { %7181 = vmatprep.subr.bf16.mxu0 %v18402_v47  ;;  %7605 = vmatprep.subr.bf16.mxu1 %v18404_v48  ;;  %v18451_v47 = vcombine.low %v962_v31, %v966_v32  ;;  %v18458_v48 = vcombine.high %v969_v40, %v973_v41  ;;  %v18500_v31 = vcombine.high %v1010_v23, %v1014_v53  ;;  %v1022_v32 = vld [vmem:[#allocation4 + $0x6a8] sm:$0xff] }
 0x18f   : > { %7182 = vmatpush1.bf16.msra.mxu0 %v18401_v55  ;;  %7606 = vmatpush1.bf16.msra.mxu1 %v18403_v56  ;;  %v982_v55 = vld [vmem:[#allocation4 + $0x568] sm:$0xff]  ;;  %v18457_v56 = vcombine.low %v969_v40, %v973_v41  ;;  %v1029_v40 = vld [vmem:[#allocation4 + $0x6e0] sm:$0xff] }
 0x190   : > { %7183 = vmatprep.subr.bf16.mxu0 %v18410_v57  ;;  %7607 = vmatprep.subr.bf16.mxu1 %v18412_v59  ;;  %v18459_v57 = vcombine.low %v970_v42, %v974_v44  ;;  %v18466_v59 = vcombine.high %v977_v49, %v981_v50  ;;  %v18468_v63 = vcombine.high %v978_v51, %v982_v55  ;;  %v1026_v41 = vld [vmem:[#allocation4 + $0x6c8] sm:$0xff] }
 0x193   : > { %7184 = vmatpush1.bf16.msra.mxu0 %v18409_v0  ;;  %7608 = vmatpush1.bf16.msra.mxu1 %v18411_v1  ;;  %v990_v0 = vld [vmem:[#allocation4 + $0x5a8] sm:$0xff]  ;;  %v18465_v1 = vcombine.low %v977_v49, %v981_v50  ;;  %v1037_v49 = vld [vmem:[#allocation4 + $0x720] sm:$0xff] }
 0x194   : > { %7185 = vmatprep.subr.bf16.mxu0 %v18418_v2  ;;  %7609 = vmatprep.subr.bf16.mxu1 %v18420_v3  ;;  %v18467_v2 = vcombine.low %v978_v51, %v982_v55  ;;  %v18474_v3 = vcombine.high %v985_v60, %v989_v61  ;;  %v18476_v7 = vcombine.high %v986_v62, %v990_v0  ;;  %v1034_v50 = vld [vmem:[#allocation4 + $0x708] sm:$0xff] }
 0x197   : > { %7186 = vmatpush1.bf16.msra.mxu0 %v18417_v8  ;;  %7610 = vmatpush1.bf16.msra.mxu1 %v18419_v9  ;;  %v998_v8 = vld [vmem:[#allocation4 + $0x5e8] sm:$0xff]  ;;  %v18473_v9 = vcombine.low %v985_v60, %v989_v61  ;;  %v1045_v60 = vld [vmem:[#allocation4 + $0x760] sm:$0xff] }
 0x198   : > { %7208 = vmatprep.subr.bf16.mxu0 %v18426_v10  ;;  %7632 = vmatprep.subr.bf16.mxu1 %v18428_v11  ;;  %v18475_v10 = vcombine.low %v986_v62, %v990_v0  ;;  %v18482_v11 = vcombine.high %v993_v4, %v997_v5  ;;  %v18484_v16 = vcombine.high %v994_v6, %v998_v8  ;;  %v1042_v61 = vld [vmem:[#allocation4 + $0x748] sm:$0xff]  ;;  %v1053_v4 = vld [vmem:[#allocation4 + $0x7a0] sm:$0xff] }
 0x199   : > { %v1050_v5 = vld [vmem:[#allocation4 + $0x788] sm:$0xff] }
 0x19a   : > { %7188 = vmatmul.mubr.bf16.vlgmr.msra.gmra.mrb[0].mxu0 %v23706_v15  ;;  %7612 = vmatmul.mubr.bf16.vlgmr.msra.gmra.mrb[0].mxu1 %v23706_v15 }
 0x19b   : > { %7209 = vmatpush1.bf16.msra.mxu0 %v18425_v19  ;;  %7633 = vmatpush1.bf16.msra.mxu1 %v18427_v20  ;;  %v18483_v19 = vcombine.low %v994_v6, %v998_v8  ;;  %v18490_v20 = vcombine.high %v1001_v12, %v1005_v13  ;;  %v1061_v12 = vld [vmem:[#allocation4 + $0x7e0] sm:$0xff]  ;;  %v1058_v13 = vld [vmem:[#allocation4 + $0x7c8] sm:$0xff] }
 0x19c   : > { %7210 = vmatprep.subr.bf16.mxu0 %v18434_v21  ;;  %7634 = vmatprep.subr.bf16.mxu1 %v18436_v22  ;;  %v1009_v21 = vld [vmem:[#allocation4 + $0x640] sm:$0xff] }
 0x19d   : > { %7197 = vmatprep.mubr.bf16.mxu0 %v23710_v25  ;;  %7621 = vmatprep.mubr.bf16.mxu1 %v23710_v25  ;;  %v1013_v22 = vld [vmem:[#allocation4 + $0x660] sm:$0xff] }
 0x19e   : > { %v18498_v27 = vcombine.high %v1009_v21, %v1013_v22 }
 0x19f   : > { %7211 = vmatpush1.bf16.msra.mxu0 %v18433_v26  ;;  %7635 = vmatpush1.bf16.msra.mxu1 %v18435_v29  ;;  %v18491_v26 = vcombine.low %v1002_v14, %v1006_v17  ;;  %v1021_v29 = vld [vmem:[#allocation4 + $0x6a0] sm:$0xff] }
 0x1a0   : > { %7212 = vmatprep.subr.bf16.mxu0 %v18442_v30  ;;  %7636 = vmatprep.subr.bf16.mxu1 %v18444_v34  ;;  %v1018_v30 = vld [vmem:[#allocation4 + $0x688] sm:$0xff]  ;;  %v18497_v34 = vcombine.low %v1009_v21, %v1013_v22  ;;  %v18505_v44 = vcombine.low %v1017_v28, %v1021_v29  ;;  %v1069_v22 = vld [vmem:[#allocation4 + $0x820] sm:$0xff] }
 0x1a1   : > { %v18508_v42 = vcombine.high %v1018_v30, %v1022_v32 }
 0x1a2   : > { %7198 = vmatmul.mubr.bf16.gmra.mrb[4].mxu0 %v23722_v36  ;;  %7622 = vmatmul.mubr.bf16.gmra.mrb[4].mxu1 %v23722_v36 }
 0x1a3   : > { %7213 = vmatpush1.bf16.msra.mxu0 %v18441_v37  ;;  %7637 = vmatpush1.bf16.msra.mxu1 %v18443_v38  ;;  %v18499_v37 = vcombine.low %v1010_v23, %v1014_v53  ;;  %v18506_v38 = vcombine.high %v1017_v28, %v1021_v29  ;;  %v1066_v23 = vld [vmem:[#allocation4 + $0x808] sm:$0xff] }
 0x1a4   : > { %7214 = vmatprep.subr.bf16.mxu0 %v18450_v39  ;;  %7638 = vmatprep.subr.bf16.mxu1 %v18452_v43  ;;  %v1025_v39 = vld [vmem:[#allocation4 + $0x6c0] sm:$0xff]  ;;  %v1030_v43 = vld [vmem:[#allocation4 + $0x6e8] sm:$0xff] }
 0x1a5   : > { %7240 = vmatprep.mubr.bf16.mxu0 %v23726_v45  ;;  %7664 = vmatprep.mubr.bf16.mxu1 %v23726_v45  ;;  %v18516_v51 = vcombine.high %v1026_v41, %v1030_v43  ;;  %v18513_v55 = vcombine.low %v1025_v39, %v1029_v40  ;;  %v1074_v29 = vld [vmem:[#allocation4 + $0x848] sm:$0xff] }
 0x1a7   : > { %7215 = vmatpush1.bf16.msra.mxu0 %v18449_v46  ;;  %7639 = vmatpush1.bf16.msra.mxu1 %v18451_v47  ;;  %v18507_v46 = vcombine.low %v1018_v30, %v1022_v32  ;;  %v18514_v47 = vcombine.high %v1025_v39, %v1029_v40  ;;  %v1078_v30 = vld [vmem:[#allocation4 + $0x868] sm:$0xff] }
 0x1a8   : > { %7216 = vmatprep.subr.bf16.mxu0 %v18458_v48  ;;  %7640 = vmatprep.subr.bf16.mxu1 %v18460_v52  ;;  %v1033_v48 = vld [vmem:[#allocation4 + $0x700] sm:$0xff]  ;;  %v1038_v52 = vld [vmem:[#allocation4 + $0x728] sm:$0xff] }
 0x1a9   : > { %v18524_v62 = vcombine.high %v1034_v50, %v1038_v52  ;;  %v18521_v0 = vcombine.low %v1033_v48, %v1037_v49 }
 0x1ab   : > { %7217 = vmatpush1.bf16.msra.mxu0 %v18457_v56  ;;  %7641 = vmatpush1.bf16.msra.mxu1 %v18459_v57  ;;  %v18515_v56 = vcombine.low %v1026_v41, %v1030_v43  ;;  %v18522_v57 = vcombine.high %v1033_v48, %v1037_v49  ;;  %v1081_v41 = vld [vmem:[#allocation4 + $0x880] sm:$0xff]  ;;  %v18563_v49 = vcombine.low %v1074_v29, %v1078_v30 }
 0x1ac   : > { %7218 = vmatprep.subr.bf16.mxu0 %v18466_v59  ;;  %7642 = vmatprep.subr.bf16.mxu1 %v18468_v63  ;;  %v1041_v59 = vld [vmem:[#allocation4 + $0x740] sm:$0xff]  ;;  %v1046_v63 = vld [vmem:[#allocation4 + $0x768] sm:$0xff] }
 0x1ad   : > { %v18532_v6 = vcombine.high %v1042_v61, %v1046_v63  ;;  %v18529_v8 = vcombine.low %v1041_v59, %v1045_v60  ;;  %v1085_v43 = vld [vmem:[#allocation4 + $0x8a0] sm:$0xff] }
 0x1ae   : > { %v1093_v48 = vld [vmem:[#allocation4 + $0x8e0] sm:$0xff] }
 0x1af   : > { %7219 = vmatpush1.bf16.msra.mxu0 %v18465_v1  ;;  %7643 = vmatpush1.bf16.msra.mxu1 %v18467_v2  ;;  %v18523_v1 = vcombine.low %v1034_v50, %v1038_v52  ;;  %v18530_v2 = vcombine.high %v1041_v59, %v1045_v60  ;;  %v18570_v50 = vcombine.high %v1081_v41, %v1085_v43  ;;  %v1094_v52 = vld [vmem:[#allocation4 + $0x8e8] sm:$0xff] }
 0x1b0   : > { %7220 = vmatprep.subr.bf16.mxu0 %v18474_v3  ;;  %7644 = vmatprep.subr.bf16.mxu1 %v18476_v7  ;;  %v1049_v3 = vld [vmem:[#allocation4 + $0x780] sm:$0xff]  ;;  %v1054_v7 = vld [vmem:[#allocation4 + $0x7a8] sm:$0xff]  ;;  %v18569_v60 = vcombine.low %v1081_v41, %v1085_v43 }
 0x1b1   : > { %v18540_v14 = vcombine.high %v1050_v5, %v1054_v7  ;;  %v18537_v17 = vcombine.low %v1049_v3, %v1053_v4 }
 0x1b3   : > { %7221 = vmatpush1.bf16.msra.mxu0 %v18473_v9  ;;  %7645 = vmatpush1.bf16.msra.mxu1 %v18475_v10  ;;  %v18531_v9 = vcombine.low %v1042_v61, %v1046_v63  ;;  %v18538_v10 = vcombine.high %v1049_v3, %v1053_v4  ;;  %v1097_v63 = vld [vmem:[#allocation4 + $0x900] sm:$0xff]  ;;  %v1102_v3 = vld [vmem:[#allocation4 + $0x928] sm:$0xff] }
 0x1b4   : > { %7222 = vmatprep.subr.bf16.mxu0 %v18482_v11  ;;  %7646 = vmatprep.subr.bf16.mxu1 %v18484_v16  ;;  %v1057_v11 = vld [vmem:[#allocation4 + $0x7c0] sm:$0xff]  ;;  %v1062_v16 = vld [vmem:[#allocation4 + $0x7e8] sm:$0xff] }
 0x1b5   : > { %v18548_v21 = vcombine.high %v1058_v13, %v1062_v16  ;;  %v18545_v53 = vcombine.low %v1057_v11, %v1061_v12 }
 0x1b7   : > { %7223 = vmatpush1.bf16.msra.mxu0 %v18481_v18  ;;  %7647 = vmatpush1.bf16.msra.mxu1 %v18483_v19  ;;  %v18539_v18 = vcombine.low %v1050_v5, %v1054_v7  ;;  %v18546_v19 = vcombine.high %v1057_v11, %v1061_v12  ;;  %v1110_v12 = vld [vmem:[#allocation4 + $0x968] sm:$0xff] }
 0x1b8   : > { %7224 = vmatprep.subr.bf16.mxu0 %v18490_v20  ;;  %7648 = vmatprep.subr.bf16.mxu1 %v18492_v24  ;;  %v1065_v20 = vld [vmem:[#allocation4 + $0x800] sm:$0xff]  ;;  %v1070_v24 = vld [vmem:[#allocation4 + $0x828] sm:$0xff] }
 0x1b9   : > { %v18554_v28 = vcombine.high %v1065_v20, %v1069_v22  ;;  %v18556_v32 = vcombine.high %v1066_v23, %v1070_v24  ;;  %v18555_v39 = vcombine.low %v1066_v23, %v1070_v24 }
 0x1bb   : > { %7225 = vmatpush1.bf16.msra.mxu0 %v18489_v54  ;;  %7649 = vmatpush1.bf16.msra.mxu1 %v18491_v26  ;;  %v1073_v54 = vld [vmem:[#allocation4 + $0x840] sm:$0xff] }
 0x1bc   : > { %7226 = vmatprep.subr.bf16.mxu0 %v18498_v27  ;;  %7650 = vmatprep.subr.bf16.mxu1 %v18500_v31  ;;  %v1077_v26 = vld [vmem:[#allocation4 + $0x860] sm:$0xff]  ;;  %v18547_v27 = vcombine.low %v1058_v13, %v1062_v16 }
 0x1bd   : > { %v794_v31 = vld [vmem:[%s23690_s26 + $0x88] sm:$0xff]  ;;  %v18562_v40 = vcombine.high %v1073_v54, %v1077_v26 }
 0x1bf   : > { %7227 = vmatpush1.bf16.msra.mxu0 %v18497_v34  ;;  %7651 = vmatpush1.bf16.msra.mxu1 %v18499_v37  ;;  %v802_v34 = vld [vmem:[%s23690_s26 + $0xc8] sm:$0xff]  ;;  %v23736_v37 = vcombine.low %v23715_v33, %v23719_v35  ;;  %v18561_v33 = vcombine.low %v1073_v54, %v1077_v26  ;;  %v1122_v26 = vld [vmem:[#allocation4 + $0x9c8] sm:$0xff] }
 0x1c0   : > { %7228 = vmatprep.subr.bf16.mxu0 %v18506_v38  ;;  %7652 = vmatprep.subr.bf16.mxu1 %v18508_v42  ;;  %v18553_v38 = vcombine.low %v1065_v20, %v1069_v22  ;;  %v18564_v42 = vcombine.high %v1074_v29, %v1078_v30  ;;  %v1089_v35 = vld [vmem:[#allocation4 + $0x8c0] sm:$0xff]  ;;  %v23750_v59 = vcombine.low %v794_v31, %v802_v34 }
 0x1c1   : > { %v18577_v5 = vcombine.low %v1089_v35, %v1093_v48  ;;  %v1125_v54 = vld [vmem:[#allocation4 + $0x9e0] sm:$0xff] }
 0x1c3   : > { %7229 = vmatpush1.bf16.msra.mxu0 %v18505_v44  ;;  %7653 = vmatpush1.bf16.msra.mxu1 %v18507_v46  ;;  %v1082_v44 = vld [vmem:[#allocation4 + $0x888] sm:$0xff] }
 0x1c4   : > { %7230 = vmatprep.subr.bf16.mxu0 %v18514_v47  ;;  %7654 = vmatprep.subr.bf16.mxu1 %v18516_v51  ;;  %v1086_v46 = vld [vmem:[#allocation4 + $0x8a8] sm:$0xff]  ;;  %v23738_v47 = vcombine.high %v794_v31, %v802_v34  ;;  %v1133_v34 = vld [vmem:[#allocation4 + $0xa20] sm:$0xff] }
 0x1c5   : > { %v1090_v51 = vld [vmem:[#allocation4 + $0x8c8] sm:$0xff]  ;;  %v18571_v61 = vcombine.low %v1082_v44, %v1086_v46 }
 0x1c7   : > { %7231 = vmatpush1.bf16.msra.mxu0 %v18513_v55  ;;  %7655 = vmatpush1.bf16.msra.mxu1 %v18515_v56  ;;  %v23743_v55 = vld [vmem:[%s23690_s26 + $0x10] sm:$0xff]  ;;  %v18572_v56 = vcombine.high %v1082_v44, %v1086_v46  ;;  %v1137_v44 = vld [vmem:[#allocation4 + $0xa40] sm:$0xff] }
 0x1c8   : > { %7232 = vmatprep.subr.bf16.mxu0 %v18522_v57  ;;  %7656 = vmatprep.subr.bf16.mxu1 %v18524_v62  ;;  %v23747_v57 = vld [vmem:[%s23690_s26 + $0x50] sm:$0xff]  ;;  %v18578_v62 = vcombine.high %v1089_v35, %v1093_v48  ;;  %v1141_v46 = vld [vmem:[#allocation4 + $0xa60] sm:$0xff] }
 0x1c9   : > { %v23754_v4 = vcombine.high %v23743_v55, %v23747_v57  ;;  %v1142_v48 = vld [vmem:[#allocation4 + $0xa68] sm:$0xff] }
 0x1cb   : > { %7233 = vmatpush1.bf16.msra.mxu0 %v18521_v0  ;;  %7657 = vmatpush1.bf16.msra.mxu1 %v18523_v1  ;;  %v1101_v0 = vld [vmem:[#allocation4 + $0x920] sm:$0xff]  ;;  %v1098_v1 = vld [vmem:[#allocation4 + $0x908] sm:$0xff] }
 0x1cc   : > { %7234 = vmatprep.subr.bf16.mxu0 %v18530_v2  ;;  %7658 = vmatprep.subr.bf16.mxu1 %v18532_v6  ;;  %v18580_v2 = vcombine.high %v1090_v51, %v1094_v52  ;;  %v18579_v6 = vcombine.low %v1090_v51, %v1094_v52  ;;  %v18586_v7 = vcombine.high %v1097_v63, %v1101_v0  ;;  %v1145_v52 = vld [vmem:[#allocation4 + $0xa80] sm:$0xff] }
 0x1cd   : > { %v18588_v11 = vcombine.high %v1098_v1, %v1102_v3  ;;  %v18585_v13 = vcombine.low %v1097_v63, %v1101_v0  ;;  %v18626_v51 = vcombine.high %v1137_v44, %v1141_v46  ;;  %v18625_v63 = vcombine.low %v1137_v44, %v1141_v46 }
 0x1cf   : > { %7235 = vmatpush1.bf16.msra.mxu0 %v18529_v8  ;;  %7659 = vmatpush1.bf16.msra.mxu1 %v18531_v9  ;;  %v1105_v8 = vld [vmem:[#allocation4 + $0x940] sm:$0xff] }
 0x1d0   : > { %7236 = vmatprep.subr.bf16.mxu0 %v18538_v10  ;;  %7660 = vmatprep.subr.bf16.mxu1 %v18540_v14  ;;  %v1109_v9 = vld [vmem:[#allocation4 + $0x960] sm:$0xff]  ;;  %v1106_v10 = vld [vmem:[#allocation4 + $0x948] sm:$0xff]  ;;  %v18587_v14 = vcombine.low %v1098_v1, %v1102_v3 }
 0x1d1   : > { %v18594_v16 = vcombine.high %v1105_v8, %v1109_v9  ;;  %v18596_v20 = vcombine.high %v1106_v10, %v1110_v12  ;;  %v18593_v22 = vcombine.low %v1105_v8, %v1109_v9  ;;  %v18595_v23 = vcombine.low %v1106_v10, %v1110_v12  ;;  %v1157_v3 = vld [vmem:[#allocation4 + $0xae0] sm:$0xff] }
 0x1d2   : > { %v1165_v12 = vld [vmem:[#allocation4 + $0xb20] sm:$0xff] }
 0x1d3   : > { %7237 = vmatpush1.bf16.msra.mxu0 %v18537_v17  ;;  %7661 = vmatpush1.bf16.msra.mxu1 %v18539_v18  ;;  %v1113_v17 = vld [vmem:[#allocation4 + $0x980] sm:$0xff] }
 0x1d4   : > { %7238 = vmatprep.subr.bf16.mxu0 %v18546_v19  ;;  %7662 = vmatprep.subr.bf16.mxu1 %v18548_v21  ;;  %v1117_v18 = vld [vmem:[#allocation4 + $0x9a0] sm:$0xff]  ;;  %v1114_v19 = vld [vmem:[#allocation4 + $0x988] sm:$0xff] }
 0x1d5   : > { %v1118_v21 = vld [vmem:[#allocation4 + $0x9a8] sm:$0xff]  ;;  %v18602_v24 = vcombine.high %v1113_v17, %v1117_v18  ;;  %v18601_v29 = vcombine.low %v1113_v17, %v1117_v18 }
 0x1d6   : > { %v18603_v30 = vcombine.low %v1114_v19, %v1118_v21 }
 0x1d7   : > { %7239 = vmatpush1.bf16.msra.mxu0 %v18545_v53  ;;  %7663 = vmatpush1.bf16.msra.mxu1 %v18547_v27  ;;  %v1121_v53 = vld [vmem:[#allocation4 + $0x9c0] sm:$0xff]  ;;  %v18604_v27 = vcombine.high %v1114_v19, %v1118_v21 }
 0x1d8   : > { %7261 = vmatprep.subr.bf16.mxu0 %v18554_v28  ;;  %7685 = vmatprep.subr.bf16.mxu1 %v18556_v32  ;;  %v1126_v28 = vld [vmem:[#allocation4 + $0x9e8] sm:$0xff]  ;;  %v18610_v31 = vcombine.high %v1121_v53, %v1125_v54  ;;  %v1129_v32 = vld [vmem:[#allocation4 + $0xa00] sm:$0xff]  ;;  %v18609_v41 = vcombine.low %v1121_v53, %v1125_v54 }
 0x1d9   : > { %v18618_v43 = vcombine.high %v1129_v32, %v1133_v34  ;;  %v1173_v21 = vld [vmem:[#allocation4 + $0xb60] sm:$0xff] }
 0x1da   : > { %7241 = vmatmul.mubr.bf16.vlgmr.msra.gmra.mrb[0].mxu0 %v23736_v37  ;;  %7665 = vmatmul.mubr.bf16.vlgmr.msra.gmra.mrb[0].mxu1 %v23736_v37 }
 0x1db   : > { %7262 = vmatpush1.bf16.msra.mxu0 %v18553_v38  ;;  %7686 = vmatpush1.bf16.msra.mxu1 %v18555_v39  ;;  %v1130_v38 = vld [vmem:[#allocation4 + $0xa08] sm:$0xff]  ;;  %v18612_v39 = vcombine.high %v1122_v26, %v1126_v28 }
 0x1dc   : > { %7263 = vmatprep.subr.bf16.mxu0 %v18562_v40  ;;  %7687 = vmatprep.subr.bf16.mxu1 %v18564_v42  ;;  %v1134_v40 = vld [vmem:[#allocation4 + $0xa28] sm:$0xff]  ;;  %v18611_v42 = vcombine.low %v1122_v26, %v1126_v28  ;;  %v1181_v28 = vld [vmem:[#allocation4 + $0xba0] sm:$0xff] }
 0x1dd   : > { %7250 = vmatprep.mubr.bf16.mxu0 %v23738_v47  ;;  %7674 = vmatprep.mubr.bf16.mxu1 %v23738_v47  ;;  %v18620_v35 = vcombine.high %v1130_v38, %v1134_v40 }
 0x1df   : > { %7264 = vmatpush1.bf16.msra.mxu0 %v18561_v33  ;;  %7688 = vmatpush1.bf16.msra.mxu1 %v18563_v49  ;;  %v1138_v33 = vld [vmem:[#allocation4 + $0xa48] sm:$0xff]  ;;  %v18617_v49 = vcombine.low %v1129_v32, %v1133_v34 }
 0x1e0   : > { %7265 = vmatprep.subr.bf16.mxu0 %v18570_v50  ;;  %7689 = vmatprep.subr.bf16.mxu1 %v18572_v56  ;;  %v18619_v50 = vcombine.low %v1130_v38, %v1134_v40  ;;  %v1149_v56 = vld [vmem:[#allocation4 + $0xaa0] sm:$0xff]  ;;  %v18627_v0 = vcombine.low %v1138_v33, %v1142_v48 }
 0x1e1   : > { %v18634_v1 = vcombine.high %v1145_v52, %v1149_v56  ;;  %v18633_v8 = vcombine.low %v1145_v52, %v1149_v56  ;;  %v1189_v40 = vld [vmem:[#allocation4 + $0xbe0] sm:$0xff] }
 0x1e2   : > { %7251 = vmatmul.mubr.bf16.gmra.mrb[4].mxu0 %v23750_v59  ;;  %7675 = vmatmul.mubr.bf16.gmra.mrb[4].mxu1 %v23750_v59  ;;  %v1201_v56 = vld [vmem:[#allocation4 + $0xc40] sm:$0xff] }
 0x1e3   : > { %7266 = vmatpush1.bf16.msra.mxu0 %v18569_v60  ;;  %7690 = vmatpush1.bf16.msra.mxu1 %v18571_v61  ;;  %v1146_v60 = vld [vmem:[#allocation4 + $0xa88] sm:$0xff]  ;;  %v18628_v61 = vcombine.high %v1138_v33, %v1142_v48 }
 0x1e4   : > { %7267 = vmatprep.subr.bf16.mxu0 %v18578_v62  ;;  %7691 = vmatprep.subr.bf16.mxu1 %v18580_v2  ;;  %v1150_v62 = vld [vmem:[#allocation4 + $0xaa8] sm:$0xff]  ;;  %v1153_v2 = vld [vmem:[#allocation4 + $0xac0] sm:$0xff] }
 0x1e5   : > { %7293 = vmatprep.mubr.bf16.mxu0 %v23754_v4  ;;  %7717 = vmatprep.mubr.bf16.mxu1 %v23754_v4  ;;  %v18635_v9 = vcombine.low %v1146_v60, %v1150_v62  ;;  %v18642_v10 = vcombine.high %v1153_v2, %v1157_v3  ;;  %v18641_v17 = vcombine.low %v1153_v2, %v1157_v3  ;;  %v803_v3 = vld [vmem:[%s23690_s26 + $0xd0] sm:$0xff] }
 0x1e7   : > { %7268 = vmatpush1.bf16.msra.mxu0 %v18577_v5  ;;  %7692 = vmatpush1.bf16.msra.mxu1 %v18579_v6  ;;  %v1154_v5 = vld [vmem:[#allocation4 + $0xac8] sm:$0xff]  ;;  %v18636_v6 = vcombine.high %v1146_v60, %v1150_v62  ;;  %v1205_v60 = vld [vmem:[#allocation4 + $0xc60] sm:$0xff] }
 0x1e8   : > { %7269 = vmatprep.subr.bf16.mxu0 %v18586_v7  ;;  %7693 = vmatprep.subr.bf16.mxu1 %v18588_v11  ;;  %v1158_v7 = vld [vmem:[#allocation4 + $0xae8] sm:$0xff]  ;;  %v1161_v11 = vld [vmem:[#allocation4 + $0xb00] sm:$0xff] }
 0x1e9   : > { %v18643_v18 = vcombine.low %v1154_v5, %v1158_v7  ;;  %v18650_v19 = vcombine.high %v1161_v11, %v1165_v12  ;;  %v18649_v53 = vcombine.low %v1161_v11, %v1165_v12  ;;  %v1213_v11 = vld [vmem:[#allocation4 + $0xca0] sm:$0xff]  ;;  %v1210_v12 = vld [vmem:[#allocation4 + $0xc88] sm:$0xff] }
 0x1eb   : > { %7270 = vmatpush1.bf16.msra.mxu0 %v18585_v13  ;;  %7694 = vmatpush1.bf16.msra.mxu1 %v18587_v14  ;;  %v1162_v13 = vld [vmem:[#allocation4 + $0xb08] sm:$0xff]  ;;  %v18644_v14 = vcombine.high %v1154_v5, %v1158_v7  ;;  %v23764_v5 = vcombine.low %v23743_v55, %v23747_v57  ;;  %v18689_v55 = vcombine.low %v1201_v56, %v1205_v60  ;;  %v1217_v57 = vld [vmem:[#allocation4 + $0xcc0] sm:$0xff] }
 0x1ec   : > { %7271 = vmatprep.subr.bf16.mxu0 %v18594_v16  ;;  %7695 = vmatprep.subr.bf16.mxu1 %v18596_v20  ;;  %v1166_v16 = vld [vmem:[#allocation4 + $0xb28] sm:$0xff]  ;;  %v1169_v20 = vld [vmem:[#allocation4 + $0xb40] sm:$0xff] }
 0x1ed   : > { %v18651_v54 = vcombine.low %v1162_v13, %v1166_v16  ;;  %v18658_v26 = vcombine.high %v1169_v20, %v1173_v21  ;;  %v18657_v32 = vcombine.low %v1169_v20, %v1173_v21  ;;  %v1222_v20 = vld [vmem:[#allocation4 + $0xce8] sm:$0xff]  ;;  %v23771_v21 = vld [vmem:[%s23690_s26 + $0x18] sm:$0xff] }
 0x1ef   : > { %7272 = vmatpush1.bf16.msra.mxu0 %v18593_v22  ;;  %7696 = vmatpush1.bf16.msra.mxu1 %v18595_v23  ;;  %v1170_v22 = vld [vmem:[#allocation4 + $0xb48] sm:$0xff]  ;;  %v18652_v23 = vcombine.high %v1162_v13, %v1166_v16  ;;  %v1221_v16 = vld [vmem:[#allocation4 + $0xce0] sm:$0xff] }
 0x1f0   : > { %7273 = vmatprep.subr.bf16.mxu0 %v18602_v24  ;;  %7697 = vmatprep.subr.bf16.mxu1 %v18604_v27  ;;  %v1174_v24 = vld [vmem:[#allocation4 + $0xb68] sm:$0xff]  ;;  %v1177_v27 = vld [vmem:[#allocation4 + $0xb80] sm:$0xff] }
 0x1f1   : > { %v18659_v34 = vcombine.low %v1170_v22, %v1174_v24  ;;  %v18666_v38 = vcombine.high %v1177_v27, %v1181_v28  ;;  %v18665_v44 = vcombine.low %v1177_v27, %v1181_v28  ;;  %v1214_v13 = vld [vmem:[#allocation4 + $0xca8] sm:$0xff]  ;;  %v1225_v27 = vld [vmem:[#allocation4 + $0xd00] sm:$0xff] }
 0x1f2   : > { %v1229_v28 = vld [vmem:[#allocation4 + $0xd20] sm:$0xff] }
 0x1f3   : > { %7274 = vmatpush1.bf16.msra.mxu0 %v18601_v29  ;;  %7698 = vmatpush1.bf16.msra.mxu1 %v18603_v30  ;;  %v1178_v29 = vld [vmem:[#allocation4 + $0xb88] sm:$0xff]  ;;  %v18660_v30 = vcombine.high %v1170_v22, %v1174_v24  ;;  %v18700_v22 = vcombine.high %v1210_v12, %v1214_v13 }
 0x1f4   : > { %7275 = vmatprep.subr.bf16.mxu0 %v18610_v31  ;;  %7699 = vmatprep.subr.bf16.mxu1 %v18612_v39  ;;  %v1182_v31 = vld [vmem:[#allocation4 + $0xba8] sm:$0xff]  ;;  %v1185_v39 = vld [vmem:[#allocation4 + $0xbc0] sm:$0xff] }
 0x1f5   : > { %v18667_v46 = vcombine.low %v1178_v29, %v1182_v31  ;;  %v18674_v33 = vcombine.high %v1185_v39, %v1189_v40  ;;  %v18673_v52 = vcombine.low %v1185_v39, %v1189_v40  ;;  %v18714_v39 = vcombine.high %v1225_v27, %v1229_v28  ;;  %v1233_v40 = vld [vmem:[#allocation4 + $0xd40] sm:$0xff] }
 0x1f7   : > { %7276 = vmatpush1.bf16.msra.mxu0 %v18609_v41  ;;  %7700 = vmatpush1.bf16.msra.mxu1 %v18611_v42  ;;  %v1186_v41 = vld [vmem:[#allocation4 + $0xbc8] sm:$0xff]  ;;  %v18668_v42 = vcombine.high %v1178_v29, %v1182_v31 }
 0x1f8   : > { %7277 = vmatprep.subr.bf16.mxu0 %v18618_v43  ;;  %7701 = vmatprep.subr.bf16.mxu1 %v18620_v35  ;;  %v1190_v43 = vld [vmem:[#allocation4 + $0xbe8] sm:$0xff]  ;;  %v1193_v35 = vld [vmem:[#allocation4 + $0xc00] sm:$0xff] }
 0x1f9   : > { %v18676_v48 = vcombine.high %v1186_v41, %v1190_v43  ;;  %v1226_v29 = vld [vmem:[#allocation4 + $0xd08] sm:$0xff] }
 0x1fa   : > { %v1230_v31 = vld [vmem:[#allocation4 + $0xd28] sm:$0xff] }
 0x1fb   : > { %7278 = vmatpush1.bf16.msra.mxu0 %v18617_v49  ;;  %7702 = vmatpush1.bf16.msra.mxu1 %v18619_v50  ;;  %v1197_v49 = vld [vmem:[#allocation4 + $0xc20] sm:$0xff]  ;;  %v1194_v50 = vld [vmem:[#allocation4 + $0xc08] sm:$0xff] }
 0x1fc   : > { %7279 = vmatprep.subr.bf16.mxu0 %v18626_v51  ;;  %7703 = vmatprep.subr.bf16.mxu1 %v18628_v61  ;;  %v1198_v51 = vld [vmem:[#allocation4 + $0xc28] sm:$0xff]  ;;  %v18675_v61 = vcombine.low %v1186_v41, %v1190_v43  ;;  %v18682_v62 = vcombine.high %v1193_v35, %v1197_v49  ;;  %v1237_v41 = vld [vmem:[#allocation4 + $0xd60] sm:$0xff]  ;;  %v18716_v43 = vcombine.high %v1226_v29, %v1230_v31 }
 0x1fd   : > { %v18684_v2 = vcombine.high %v1194_v50, %v1198_v51  ;;  %v18683_v7 = vcombine.low %v1194_v50, %v1198_v51  ;;  %v1242_v50 = vld [vmem:[#allocation4 + $0xd88] sm:$0xff] }
 0x1ff   : > { %7280 = vmatpush1.bf16.msra.mxu0 %v18625_v63  ;;  %7704 = vmatpush1.bf16.msra.mxu1 %v18627_v0  ;;  %v1202_v63 = vld [vmem:[#allocation4 + $0xc48] sm:$0xff] }
 0x200   : > { %7281 = vmatprep.subr.bf16.mxu0 %v18634_v1  ;;  %7705 = vmatprep.subr.bf16.mxu1 %v18636_v6  ;;  %v1206_v0 = vld [vmem:[#allocation4 + $0xc68] sm:$0xff]  ;;  %v18681_v6 = vcombine.low %v1193_v35, %v1197_v49  ;;  %v18722_v35 = vcombine.high %v1233_v40, %v1237_v41  ;;  %v1245_v49 = vld [vmem:[#allocation4 + $0xda0] sm:$0xff] }
 0x201   : > { %v795_v1 = vld [vmem:[%s23690_s26 + $0x90] sm:$0xff] }
 0x202   : > { %v23778_v24 = vcombine.low %v795_v1, %v803_v3 }
 0x203   : > { %7282 = vmatpush1.bf16.msra.mxu0 %v18633_v8  ;;  %7706 = vmatpush1.bf16.msra.mxu1 %v18635_v9  ;;  %v18690_v8 = vcombine.high %v1201_v56, %v1205_v60  ;;  %v1209_v9 = vld [vmem:[#allocation4 + $0xc80] sm:$0xff]  ;;  %v18721_v56 = vcombine.low %v1233_v40, %v1237_v41  ;;  %v1282_v41 = vld [vmem:[#allocation4 + $0xec8] sm:$0xff] }
 0x204   : > { %7283 = vmatprep.subr.bf16.mxu0 %v18642_v10  ;;  %7707 = vmatprep.subr.bf16.mxu1 %v18644_v14  ;;  %v18692_v10 = vcombine.high %v1202_v63, %v1206_v0  ;;  %v23766_v14 = vcombine.high %v795_v1, %v803_v3  ;;  %v1285_v40 = vld [vmem:[#allocation4 + $0xee0] sm:$0xff] }
 0x207   : > { %7284 = vmatpush1.bf16.msra.mxu0 %v18641_v17  ;;  %7708 = vmatpush1.bf16.msra.mxu1 %v18643_v18  ;;  %v18691_v17 = vcombine.low %v1202_v63, %v1206_v0  ;;  %v18698_v18 = vcombine.high %v1209_v9, %v1213_v11  ;;  %v1253_v63 = vld [vmem:[#allocation4 + $0xde0] sm:$0xff]  ;;  %v1250_v0 = vld [vmem:[#allocation4 + $0xdc8] sm:$0xff] }
 0x208   : > { %7285 = vmatprep.subr.bf16.mxu0 %v18650_v19  ;;  %7709 = vmatprep.subr.bf16.mxu1 %v18652_v23  ;;  %v1218_v19 = vld [vmem:[#allocation4 + $0xcc8] sm:$0xff]  ;;  %v23775_v23 = vld [vmem:[%s23690_s26 + $0x58] sm:$0xff] }
 0x20b   : > { %7286 = vmatpush1.bf16.msra.mxu0 %v18649_v53  ;;  %7710 = vmatpush1.bf16.msra.mxu1 %v18651_v54  ;;  %v18697_v53 = vcombine.low %v1209_v9, %v1213_v11  ;;  %v18699_v54 = vcombine.low %v1210_v12, %v1214_v13  ;;  %v1261_v9 = vld [vmem:[#allocation4 + $0xe20] sm:$0xff]  ;;  %v1262_v12 = vld [vmem:[#allocation4 + $0xe28] sm:$0xff] }
 0x20c   : > { %7287 = vmatprep.subr.bf16.mxu0 %v18658_v26  ;;  %7711 = vmatprep.subr.bf16.mxu1 %v18660_v30  ;;  %v18706_v26 = vcombine.high %v1217_v57, %v1221_v16  ;;  %v18708_v30 = vcombine.high %v1218_v19, %v1222_v20 }
 0x20f   : > { %7288 = vmatpush1.bf16.msra.mxu0 %v18657_v32  ;;  %7712 = vmatpush1.bf16.msra.mxu1 %v18659_v34  ;;  %v23782_v32 = vcombine.high %v23771_v21, %v23775_v23  ;;  %v18705_v34 = vcombine.low %v1217_v57, %v1221_v16  ;;  %v1265_v16 = vld [vmem:[#allocation4 + $0xe40] sm:$0xff] }
 0x210   : > { %7289 = vmatprep.subr.bf16.mxu0 %v18666_v38  ;;  %7713 = vmatprep.subr.bf16.mxu1 %v18668_v42  ;;  %v18707_v38 = vcombine.low %v1218_v19, %v1222_v20  ;;  %v1234_v42 = vld [vmem:[#allocation4 + $0xd48] sm:$0xff] }
 0x211   : > { %v1270_v20 = vld [vmem:[#allocation4 + $0xe68] sm:$0xff] }
 0x213   : > { %7290 = vmatpush1.bf16.msra.mxu0 %v18665_v44  ;;  %7714 = vmatpush1.bf16.msra.mxu1 %v18667_v46  ;;  %v1238_v44 = vld [vmem:[#allocation4 + $0xd68] sm:$0xff]  ;;  %v18713_v46 = vcombine.low %v1225_v27, %v1229_v28  ;;  %v1277_v27 = vld [vmem:[#allocation4 + $0xea0] sm:$0xff] }
 0x214   : > { %7291 = vmatprep.subr.bf16.mxu0 %v18674_v33  ;;  %7715 = vmatprep.subr.bf16.mxu1 %v18676_v48  ;;  %v18715_v33 = vcombine.low %v1226_v29, %v1230_v31  ;;  %v1241_v48 = vld [vmem:[#allocation4 + $0xd80] sm:$0xff]  ;;  %v18724_v51 = vcombine.high %v1234_v42, %v1238_v44  ;;  %v18723_v60 = vcombine.low %v1234_v42, %v1238_v44  ;;  %v1274_v28 = vld [vmem:[#allocation4 + $0xe88] sm:$0xff] }
 0x215   : > { %v18729_v3 = vcombine.low %v1241_v48, %v1245_v49 }
 0x217   : > { %7292 = vmatpush1.bf16.msra.mxu0 %v18673_v52  ;;  %7716 = vmatpush1.bf16.msra.mxu1 %v18675_v61  ;;  %v1246_v52 = vld [vmem:[#allocation4 + $0xda8] sm:$0xff]  ;;  %v18730_v61 = vcombine.high %v1241_v48, %v1245_v49  ;;  %v1293_v48 = vld [vmem:[#allocation4 + $0xf20] sm:$0xff] }
 0x218   : > { %7314 = vmatprep.subr.bf16.mxu0 %v18682_v62  ;;  %7738 = vmatprep.subr.bf16.mxu1 %v18684_v2  ;;  %v1249_v62 = vld [vmem:[#allocation4 + $0xdc0] sm:$0xff]  ;;  %v18732_v1 = vcombine.high %v1242_v50, %v1246_v52  ;;  %v1254_v2 = vld [vmem:[#allocation4 + $0xde8] sm:$0xff] }
 0x219   : > { %v18740_v11 = vcombine.high %v1250_v0, %v1254_v2  ;;  %v18737_v13 = vcombine.low %v1249_v62, %v1253_v63  ;;  %v1290_v49 = vld [vmem:[#allocation4 + $0xf08] sm:$0xff] }
 0x21a   : > { %7294 = vmatmul.mubr.bf16.vlgmr.msra.gmra.mrb[0].mxu0 %v23764_v5  ;;  %7718 = vmatmul.mubr.bf16.vlgmr.msra.gmra.mrb[0].mxu1 %v23764_v5 }
 0x21b   : > { %7315 = vmatpush1.bf16.msra.mxu0 %v18681_v6  ;;  %7739 = vmatpush1.bf16.msra.mxu1 %v18683_v7  ;;  %v18731_v6 = vcombine.low %v1242_v50, %v1246_v52  ;;  %v18738_v7 = vcombine.high %v1249_v62, %v1253_v63  ;;  %v1301_v62 = vld [vmem:[#allocation4 + $0xf60] sm:$0xff]  ;;  %v1298_v63 = vld [vmem:[#allocation4 + $0xf48] sm:$0xff] }
 0x21c   : > { %7316 = vmatprep.subr.bf16.mxu0 %v18690_v8  ;;  %7740 = vmatprep.subr.bf16.mxu1 %v18692_v10  ;;  %v1257_v8 = vld [vmem:[#allocation4 + $0xe00] sm:$0xff]  ;;  %v1258_v10 = vld [vmem:[#allocation4 + $0xe08] sm:$0xff] }
 0x21d   : > { %7303 = vmatprep.mubr.bf16.mxu0 %v23766_v14  ;;  %7727 = vmatprep.mubr.bf16.mxu1 %v23766_v14  ;;  %v18746_v57 = vcombine.high %v1257_v8, %v1261_v9  ;;  %v18748_v19 = vcombine.high %v1258_v10, %v1262_v12 }
 0x21f   : > { %7317 = vmatpush1.bf16.msra.mxu0 %v18689_v55  ;;  %7741 = vmatpush1.bf16.msra.mxu1 %v18691_v17  ;;  %v18739_v55 = vcombine.low %v1250_v0, %v1254_v2  ;;  %v1269_v17 = vld [vmem:[#allocation4 + $0xe60] sm:$0xff] }
 0x220   : > { %7318 = vmatprep.subr.bf16.mxu0 %v18698_v18  ;;  %7742 = vmatprep.subr.bf16.mxu1 %v18700_v22  ;;  %v1266_v18 = vld [vmem:[#allocation4 + $0xe48] sm:$0xff]  ;;  %v18745_v22 = vcombine.low %v1257_v8, %v1261_v9  ;;  %v18753_v31 = vcombine.low %v1265_v16, %v1269_v17  ;;  %v1309_v8 = vld [vmem:[#allocation4 + $0xfa0] sm:$0xff] }
 0x221   : > { %v18756_v29 = vcombine.high %v1266_v18, %v1270_v20  ;;  %v1306_v9 = vld [vmem:[#allocation4 + $0xf88] sm:$0xff] }
 0x222   : > { %7304 = vmatmul.mubr.bf16.gmra.mrb[4].mxu0 %v23778_v24  ;;  %7728 = vmatmul.mubr.bf16.gmra.mrb[4].mxu1 %v23778_v24 }
 0x223   : > { %7319 = vmatpush1.bf16.msra.mxu0 %v18697_v53  ;;  %7743 = vmatpush1.bf16.msra.mxu1 %v18699_v54  ;;  %v18747_v53 = vcombine.low %v1258_v10, %v1262_v12  ;;  %v18754_v54 = vcombine.high %v1265_v16, %v1269_v17  ;;  %v1317_v16 = vld [vmem:[#allocation4 + $0xfe0] sm:$0xff]  ;;  %v1314_v17 = vld [vmem:[#allocation4 + $0xfc8] sm:$0xff] }
 0x224   : > { %7320 = vmatprep.subr.bf16.mxu0 %v18706_v26  ;;  %7744 = vmatprep.subr.bf16.mxu1 %v18708_v30  ;;  %v1273_v26 = vld [vmem:[#allocation4 + $0xe80] sm:$0xff]  ;;  %v1278_v30 = vld [vmem:[#allocation4 + $0xea8] sm:$0xff] }
 0x225   : > { %7346 = vmatprep.mubr.bf16.mxu0 %v23782_v32  ;;  %7770 = vmatprep.mubr.bf16.mxu1 %v23782_v32  ;;  %v18764_v42 = vcombine.high %v1274_v28, %v1278_v30  ;;  %v18761_v44 = vcombine.low %v1273_v26, %v1277_v27 }
 0x227   : > { %7321 = vmatpush1.bf16.msra.mxu0 %v18705_v34  ;;  %7745 = vmatpush1.bf16.msra.mxu1 %v18707_v38  ;;  %v18755_v34 = vcombine.low %v1266_v18, %v1270_v20  ;;  %v18762_v38 = vcombine.high %v1273_v26, %v1277_v27  ;;  %v1325_v27 = vld [vmem:[#allocation4 + $0x1020] sm:$0xff] }
 0x228   : > { %7322 = vmatprep.subr.bf16.mxu0 %v18714_v39  ;;  %7746 = vmatprep.subr.bf16.mxu1 %v18716_v43  ;;  %v1281_v39 = vld [vmem:[#allocation4 + $0xec0] sm:$0xff]  ;;  %v1286_v43 = vld [vmem:[#allocation4 + $0xee8] sm:$0xff] }
 0x229   : > { %v18772_v50 = vcombine.high %v1282_v41, %v1286_v43  ;;  %v18769_v52 = vcombine.low %v1281_v39, %v1285_v40 }
 0x22b   : > { %7323 = vmatpush1.bf16.msra.mxu0 %v18713_v46  ;;  %7747 = vmatpush1.bf16.msra.mxu1 %v18715_v33  ;;  %v18763_v46 = vcombine.low %v1274_v28, %v1278_v30  ;;  %v18770_v33 = vcombine.high %v1281_v39, %v1285_v40  ;;  %v1322_v28 = vld [vmem:[#allocation4 + $0x1008] sm:$0xff] }
 0x22c   : > { %7324 = vmatprep.subr.bf16.mxu0 %v18722_v35  ;;  %7748 = vmatprep.subr.bf16.mxu1 %v18724_v51  ;;  %v1289_v35 = vld [vmem:[#allocation4 + $0xf00] sm:$0xff]  ;;  %v1294_v51 = vld [vmem:[#allocation4 + $0xf28] sm:$0xff] }
 0x22d   : > { %v18780_v0 = vcombine.high %v1290_v49, %v1294_v51  ;;  %v18777_v2 = vcombine.low %v1289_v35, %v1293_v48  ;;  %v1330_v40 = vld [vmem:[#allocation4 + $0x1048] sm:$0xff] }
 0x22f   : > { %7325 = vmatpush1.bf16.msra.mxu0 %v18721_v56  ;;  %7749 = vmatpush1.bf16.msra.mxu1 %v18723_v60  ;;  %v18771_v56 = vcombine.low %v1282_v41, %v1286_v43  ;;  %v18778_v60 = vcombine.high %v1289_v35, %v1293_v48  ;;  %v1334_v41 = vld [vmem:[#allocation4 + $0x1068] sm:$0xff] }
 0x230   : > { %7326 = vmatprep.subr.bf16.mxu0 %v18730_v61  ;;  %7750 = vmatprep.subr.bf16.mxu1 %v18732_v1  ;;  %v1297_v61 = vld [vmem:[#allocation4 + $0xf40] sm:$0xff]  ;;  %v1302_v1 = vld [vmem:[#allocation4 + $0xf68] sm:$0xff] }
 0x231   : > { %v18788_v10 = vcombine.high %v1298_v63, %v1302_v1  ;;  %v18785_v12 = vcombine.low %v1297_v61, %v1301_v62 }
 0x233   : > { %7327 = vmatpush1.bf16.msra.mxu0 %v18729_v3  ;;  %7751 = vmatpush1.bf16.msra.mxu1 %v18731_v6  ;;  %v18779_v3 = vcombine.low %v1290_v49, %v1294_v51  ;;  %v18786_v6 = vcombine.high %v1297_v61, %v1301_v62  ;;  %v1337_v49 = vld [vmem:[#allocation4 + $0x1080] sm:$0xff]  ;;  %v18819_v62 = vcombine.low %v1330_v40, %v1334_v41 }
 0x234   : > { %7328 = vmatprep.subr.bf16.mxu0 %v18738_v7  ;;  %7752 = vmatprep.subr.bf16.mxu1 %v18740_v11  ;;  %v1305_v7 = vld [vmem:[#allocation4 + $0xf80] sm:$0xff]  ;;  %v1310_v11 = vld [vmem:[#allocation4 + $0xfa8] sm:$0xff] }
 0x235   : > { %v18796_v18 = vcombine.high %v1306_v9, %v1310_v11  ;;  %v18793_v20 = vcombine.low %v1305_v7, %v1309_v8  ;;  %v1341_v51 = vld [vmem:[#allocation4 + $0x10a0] sm:$0xff] }
 0x236   : > { %v1349_v61 = vld [vmem:[#allocation4 + $0x10e0] sm:$0xff] }
 0x237   : > { %7329 = vmatpush1.bf16.msra.mxu0 %v18737_v13  ;;  %7753 = vmatpush1.bf16.msra.mxu1 %v18739_v55  ;;  %v18787_v13 = vcombine.low %v1298_v63, %v1302_v1  ;;  %v18794_v55 = vcombine.high %v1305_v7, %v1309_v8  ;;  %v18826_v63 = vcombine.high %v1337_v49, %v1341_v51  ;;  %v1350_v1 = vld [vmem:[#allocation4 + $0x10e8] sm:$0xff] }
 0x238   : > { %7330 = vmatprep.subr.bf16.mxu0 %v18746_v57  ;;  %7754 = vmatprep.subr.bf16.mxu1 %v18748_v19  ;;  %v1313_v57 = vld [vmem:[#allocation4 + $0xfc0] sm:$0xff]  ;;  %v1318_v19 = vld [vmem:[#allocation4 + $0xfe8] sm:$0xff]  ;;  %v18825_v8 = vcombine.low %v1337_v49, %v1341_v51 }
 0x239   : > { %v18804_v26 = vcombine.high %v1314_v17, %v1318_v19  ;;  %v18801_v30 = vcombine.low %v1313_v57, %v1317_v16 }
 0x23b   : > { %7331 = vmatpush1.bf16.msra.mxu0 %v18745_v22  ;;  %7755 = vmatpush1.bf16.msra.mxu1 %v18747_v53  ;;  %v18795_v22 = vcombine.low %v1306_v9, %v1310_v11  ;;  %v18802_v53 = vcombine.high %v1313_v57, %v1317_v16  ;;  %v1353_v11 = vld [vmem:[#allocation4 + $0x1100] sm:$0xff]  ;;  %v1358_v57 = vld [vmem:[#allocation4 + $0x1128] sm:$0xff] }
 0x23c   : > { %7332 = vmatprep.subr.bf16.mxu0 %v18754_v54  ;;  %7756 = vmatprep.subr.bf16.mxu1 %v18756_v29  ;;  %v1321_v54 = vld [vmem:[#allocation4 + $0x1000] sm:$0xff]  ;;  %v1326_v29 = vld [vmem:[#allocation4 + $0x1028] sm:$0xff] }
 0x23d   : > { %v18810_v39 = vcombine.high %v1321_v54, %v1325_v27  ;;  %v18812_v43 = vcombine.high %v1322_v28, %v1326_v29  ;;  %v18811_v35 = vcombine.low %v1322_v28, %v1326_v29 }
 0x23f   : > { %7333 = vmatpush1.bf16.msra.mxu0 %v18753_v31  ;;  %7757 = vmatpush1.bf16.msra.mxu1 %v18755_v34  ;;  %v1329_v31 = vld [vmem:[#allocation4 + $0x1040] sm:$0xff] }
 0x240   : > { %7334 = vmatprep.subr.bf16.mxu0 %v18762_v38  ;;  %7758 = vmatprep.subr.bf16.mxu1 %v18764_v42  ;;  %v1333_v34 = vld [vmem:[#allocation4 + $0x1060] sm:$0xff]  ;;  %v18803_v38 = vcombine.low %v1314_v17, %v1318_v19  ;;  %v796_v42 = vld [vmem:[%s23690_s26 + $0x98] sm:$0xff] }
 0x241   : > { %v18818_v48 = vcombine.high %v1329_v31, %v1333_v34 }
 0x243   : > { %7335 = vmatpush1.bf16.msra.mxu0 %v18761_v44  ;;  %7759 = vmatpush1.bf16.msra.mxu1 %v18763_v46  ;;  %v804_v44 = vld [vmem:[%s23690_s26 + $0xd8] sm:$0xff]  ;;  %v23792_v46 = vcombine.low %v23771_v21, %v23775_v23  ;;  %v18817_v21 = vcombine.low %v1329_v31, %v1333_v34  ;;  %v1345_v23 = vld [vmem:[#allocation4 + $0x10c0] sm:$0xff]  ;;  %v1370_v34 = vld [vmem:[#allocation4 + $0x1188] sm:$0xff] }
 0x244   : > { %7336 = vmatprep.subr.bf16.mxu0 %v18770_v33  ;;  %7760 = vmatprep.subr.bf16.mxu1 %v18772_v50  ;;  %v18809_v33 = vcombine.low %v1321_v54, %v1325_v27  ;;  %v18820_v50 = vcombine.high %v1330_v40, %v1334_v41  ;;  %v23806_v7 = vcombine.low %v796_v42, %v804_v44  ;;  %v1373_v31 = vld [vmem:[#allocation4 + $0x11a0] sm:$0xff] }
 0x245   : > { %v18833_v17 = vcombine.low %v1345_v23, %v1349_v61 }
 0x247   : > { %7337 = vmatpush1.bf16.msra.mxu0 %v18769_v52  ;;  %7761 = vmatpush1.bf16.msra.mxu1 %v18771_v56  ;;  %v1338_v52 = vld [vmem:[#allocation4 + $0x1088] sm:$0xff] }
 0x248   : > { %7338 = vmatprep.subr.bf16.mxu0 %v18778_v60  ;;  %7762 = vmatprep.subr.bf16.mxu1 %v18780_v0  ;;  %v1342_v56 = vld [vmem:[#allocation4 + $0x10a8] sm:$0xff]  ;;  %v23794_v60 = vcombine.high %v796_v42, %v804_v44  ;;  %v1381_v44 = vld [vmem:[#allocation4 + $0x11e0] sm:$0xff] }
 0x249   : > { %v1346_v0 = vld [vmem:[#allocation4 + $0x10c8] sm:$0xff]  ;;  %v18827_v9 = vcombine.low %v1338_v52, %v1342_v56 }
 0x24b   : > { %7339 = vmatpush1.bf16.msra.mxu0 %v18777_v2  ;;  %7763 = vmatpush1.bf16.msra.mxu1 %v18779_v3  ;;  %v23799_v2 = vld [vmem:[%s23690_s26 + $0x20] sm:$0xff]  ;;  %v18828_v3 = vcombine.high %v1338_v52, %v1342_v56  ;;  %v1385_v52 = vld [vmem:[#allocation4 + $0x1200] sm:$0xff] }
 0x24c   : > { %7340 = vmatprep.subr.bf16.mxu0 %v18786_v6  ;;  %7764 = vmatprep.subr.bf16.mxu1 %v18788_v10  ;;  %v23803_v6 = vld [vmem:[%s23690_s26 + $0x60] sm:$0xff]  ;;  %v18834_v10 = vcombine.high %v1345_v23, %v1349_v61  ;;  %v1389_v56 = vld [vmem:[#allocation4 + $0x1220] sm:$0xff]  ;;  %v1390_v61 = vld [vmem:[#allocation4 + $0x1228] sm:$0xff] }
 0x24d   : > { %v23810_v16 = vcombine.high %v23799_v2, %v23803_v6 }
 0x24f   : > { %7341 = vmatpush1.bf16.msra.mxu0 %v18785_v12  ;;  %7765 = vmatpush1.bf16.msra.mxu1 %v18787_v13  ;;  %v1357_v12 = vld [vmem:[#allocation4 + $0x1120] sm:$0xff]  ;;  %v1354_v13 = vld [vmem:[#allocation4 + $0x1108] sm:$0xff] }
 0x250   : > { %7342 = vmatprep.subr.bf16.mxu0 %v18794_v55  ;;  %7766 = vmatprep.subr.bf16.mxu1 %v18796_v18  ;;  %v18836_v55 = vcombine.high %v1346_v0, %v1350_v1  ;;  %v18835_v18 = vcombine.low %v1346_v0, %v1350_v1  ;;  %v18842_v19 = vcombine.high %v1353_v11, %v1357_v12  ;;  %v1393_v1 = vld [vmem:[#allocation4 + $0x1240] sm:$0xff] }
 0x251   : > { %v18844_v54 = vcombine.high %v1354_v13, %v1358_v57  ;;  %v18841_v27 = vcombine.low %v1353_v11, %v1357_v12  ;;  %v18843_v28 = vcombine.low %v1354_v13, %v1358_v57  ;;  %v18874_v0 = vcombine.high %v1385_v52, %v1389_v56  ;;  %v1405_v57 = vld [vmem:[#allocation4 + $0x12a0] sm:$0xff] }
 0x252   : > { %v18873_v11 = vcombine.low %v1385_v52, %v1389_v56 }
 0x253   : > { %7343 = vmatpush1.bf16.msra.mxu0 %v18793_v20  ;;  %7767 = vmatpush1.bf16.msra.mxu1 %v18795_v22  ;;  %v1361_v20 = vld [vmem:[#allocation4 + $0x1140] sm:$0xff] }
 0x254   : > { %7344 = vmatprep.subr.bf16.mxu0 %v18802_v53  ;;  %7768 = vmatprep.subr.bf16.mxu1 %v18804_v26  ;;  %v1365_v22 = vld [vmem:[#allocation4 + $0x1160] sm:$0xff]  ;;  %v1362_v53 = vld [vmem:[#allocation4 + $0x1148] sm:$0xff] }
 0x255   : > { %v1366_v26 = vld [vmem:[#allocation4 + $0x1168] sm:$0xff]  ;;  %v18850_v29 = vcombine.high %v1361_v20, %v1365_v22  ;;  %v18849_v40 = vcombine.low %v1361_v20, %v1365_v22 }
 0x256   : > { %v18851_v41 = vcombine.low %v1362_v53, %v1366_v26 }
 0x257   : > { %7345 = vmatpush1.bf16.msra.mxu0 %v18801_v30  ;;  %7769 = vmatpush1.bf16.msra.mxu1 %v18803_v38  ;;  %v1369_v30 = vld [vmem:[#allocation4 + $0x1180] sm:$0xff]  ;;  %v18852_v38 = vcombine.high %v1362_v53, %v1366_v26 }
 0x258   : > { %7367 = vmatprep.subr.bf16.mxu0 %v18810_v39  ;;  %7791 = vmatprep.subr.bf16.mxu1 %v18812_v43  ;;  %v1374_v39 = vld [vmem:[#allocation4 + $0x11a8] sm:$0xff]  ;;  %v18858_v42 = vcombine.high %v1369_v30, %v1373_v31  ;;  %v1377_v43 = vld [vmem:[#allocation4 + $0x11c0] sm:$0xff]  ;;  %v18857_v49 = vcombine.low %v1369_v30, %v1373_v31 }
 0x259   : > { %v18866_v51 = vcombine.high %v1377_v43, %v1381_v44  ;;  %v1413_v26 = vld [vmem:[#allocation4 + $0x12e0] sm:$0xff] }
 0x25a   : > { %7347 = vmatmul.mubr.bf16.vlgmr.msra.gmra.mrb[0].mxu0 %v23792_v46  ;;  %7771 = vmatmul.mubr.bf16.vlgmr.msra.gmra.mrb[0].mxu1 %v23792_v46 }
 0x25b   : > { %7368 = vmatpush1.bf16.msra.mxu0 %v18809_v33  ;;  %7792 = vmatpush1.bf16.msra.mxu1 %v18811_v35  ;;  %v1378_v33 = vld [vmem:[#allocation4 + $0x11c8] sm:$0xff]  ;;  %v18860_v35 = vcombine.high %v1370_v34, %v1374_v39 }
 0x25c   : > { %7369 = vmatprep.subr.bf16.mxu0 %v18818_v48  ;;  %7793 = vmatprep.subr.bf16.mxu1 %v18820_v50  ;;  %v1382_v48 = vld [vmem:[#allocation4 + $0x11e8] sm:$0xff]  ;;  %v18859_v50 = vcombine.low %v1370_v34, %v1374_v39  ;;  %v1421_v39 = vld [vmem:[#allocation4 + $0x1320] sm:$0xff] }
 0x25d   : > { %7356 = vmatprep.mubr.bf16.mxu0 %v23794_v60  ;;  %7780 = vmatprep.mubr.bf16.mxu1 %v23794_v60  ;;  %v18868_v23 = vcombine.high %v1378_v33, %v1382_v48 }
 0x25f   : > { %7370 = vmatpush1.bf16.msra.mxu0 %v18817_v21  ;;  %7794 = vmatpush1.bf16.msra.mxu1 %v18819_v62  ;;  %v1386_v21 = vld [vmem:[#allocation4 + $0x1208] sm:$0xff]  ;;  %v18865_v62 = vcombine.low %v1377_v43, %v1381_v44 }
 0x260   : > { %7371 = vmatprep.subr.bf16.mxu0 %v18826_v63  ;;  %7795 = vmatprep.subr.bf16.mxu1 %v18828_v3  ;;  %v18867_v63 = vcombine.low %v1378_v33, %v1382_v48  ;;  %v1397_v3 = vld [vmem:[#allocation4 + $0x1260] sm:$0xff]  ;;  %v18875_v12 = vcombine.low %v1386_v21, %v1390_v61 }
 0x261   : > { %v18882_v13 = vcombine.high %v1393_v1, %v1397_v3  ;;  %v18881_v20 = vcombine.low %v1393_v1, %v1397_v3  ;;  %v1429_v48 = vld [vmem:[#allocation4 + $0x1360] sm:$0xff] }
 0x262   : > { %7357 = vmatmul.mubr.bf16.gmra.mrb[4].mxu0 %v23806_v7  ;;  %7781 = vmatmul.mubr.bf16.gmra.mrb[4].mxu1 %v23806_v7 }
 0x263   : > { %7372 = vmatpush1.bf16.msra.mxu0 %v18825_v8  ;;  %7796 = vmatpush1.bf16.msra.mxu1 %v18827_v9  ;;  %v1394_v8 = vld [vmem:[#allocation4 + $0x1248] sm:$0xff]  ;;  %v18876_v9 = vcombine.high %v1386_v21, %v1390_v61  ;;  %v1437_v61 = vld [vmem:[#allocation4 + $0x13a0] sm:$0xff] }
 0x264   : > { %7373 = vmatprep.subr.bf16.mxu0 %v18834_v10  ;;  %7797 = vmatprep.subr.bf16.mxu1 %v18836_v55  ;;  %v1398_v10 = vld [vmem:[#allocation4 + $0x1268] sm:$0xff]  ;;  %v1401_v55 = vld [vmem:[#allocation4 + $0x1280] sm:$0xff] }
 0x265   : > { %7399 = vmatprep.mubr.bf16.mxu0 %v23810_v16  ;;  %7823 = vmatprep.mubr.bf16.mxu1 %v23810_v16  ;;  %v18883_v22 = vcombine.low %v1394_v8, %v1398_v10  ;;  %v18890_v53 = vcombine.high %v1401_v55, %v1405_v57  ;;  %v18889_v30 = vcombine.low %v1401_v55, %v1405_v57 }
 0x267   : > { %7374 = vmatpush1.bf16.msra.mxu0 %v18833_v17  ;;  %7798 = vmatpush1.bf16.msra.mxu1 %v18835_v18  ;;  %v1402_v17 = vld [vmem:[#allocation4 + $0x1288] sm:$0xff]  ;;  %v18884_v18 = vcombine.high %v1394_v8, %v1398_v10  ;;  %v1445_v10 = vld [vmem:[#allocation4 + $0x13e0] sm:$0xff] }
 0x268   : > { %7375 = vmatprep.subr.bf16.mxu0 %v18842_v19  ;;  %7799 = vmatprep.subr.bf16.mxu1 %v18844_v54  ;;  %v1406_v19 = vld [vmem:[#allocation4 + $0x12a8] sm:$0xff]  ;;  %v1409_v54 = vld [vmem:[#allocation4 + $0x12c0] sm:$0xff] }
 0x269   : > { %v18891_v31 = vcombine.low %v1402_v17, %v1406_v19  ;;  %v18898_v34 = vcombine.high %v1409_v54, %v1413_v26  ;;  %v18897_v43 = vcombine.low %v1409_v54, %v1413_v26  ;;  %v1457_v26 = vld [vmem:[#allocation4 + $0x1440] sm:$0xff] }
 0x26b   : > { %7376 = vmatpush1.bf16.msra.mxu0 %v18841_v27  ;;  %7800 = vmatpush1.bf16.msra.mxu1 %v18843_v28  ;;  %v1410_v27 = vld [vmem:[#allocation4 + $0x12c8] sm:$0xff]  ;;  %v18892_v28 = vcombine.high %v1402_v17, %v1406_v19 }
 0x26c   : > { %7377 = vmatprep.subr.bf16.mxu0 %v18850_v29  ;;  %7801 = vmatprep.subr.bf16.mxu1 %v18852_v38  ;;  %v1414_v29 = vld [vmem:[#allocation4 + $0x12e8] sm:$0xff]  ;;  %v1417_v38 = vld [vmem:[#allocation4 + $0x1300] sm:$0xff] }
 0x26d   : > { %v18899_v44 = vcombine.low %v1410_v27, %v1414_v29  ;;  %v18906_v33 = vcombine.high %v1417_v38, %v1421_v39  ;;  %v18905_v52 = vcombine.low %v1417_v38, %v1421_v39  ;;  %v805_v39 = vld [vmem:[%s23690_s26 + $0xe0] sm:$0xff] }
 0x26f   : > { %7378 = vmatpush1.bf16.msra.mxu0 %v18849_v40  ;;  %7802 = vmatpush1.bf16.msra.mxu1 %v18851_v41  ;;  %v1418_v40 = vld [vmem:[#allocation4 + $0x1308] sm:$0xff]  ;;  %v18900_v41 = vcombine.high %v1410_v27, %v1414_v29  ;;  %v1461_v27 = vld [vmem:[#allocation4 + $0x1460] sm:$0xff] }
 0x270   : > { %7379 = vmatprep.subr.bf16.mxu0 %v18858_v42  ;;  %7803 = vmatprep.subr.bf16.mxu1 %v18860_v35  ;;  %v1422_v42 = vld [vmem:[#allocation4 + $0x1328] sm:$0xff]  ;;  %v1425_v35 = vld [vmem:[#allocation4 + $0x1340] sm:$0xff] }
 0x271   : > { %v18907_v56 = vcombine.low %v1418_v40, %v1422_v42  ;;  %v18914_v21 = vcombine.high %v1425_v35, %v1429_v48  ;;  %v18913_v1 = vcombine.low %v1425_v35, %v1429_v48  ;;  %v1469_v35 = vld [vmem:[#allocation4 + $0x14a0] sm:$0xff]  ;;  %v1466_v48 = vld [vmem:[#allocation4 + $0x1488] sm:$0xff] }
 0x273   : > { %7380 = vmatpush1.bf16.msra.mxu0 %v18857_v49  ;;  %7804 = vmatpush1.bf16.msra.mxu1 %v18859_v50  ;;  %v1426_v49 = vld [vmem:[#allocation4 + $0x1348] sm:$0xff]  ;;  %v18908_v50 = vcombine.high %v1418_v40, %v1422_v42  ;;  %v23820_v40 = vcombine.low %v23799_v2, %v23803_v6  ;;  %v18945_v2 = vcombine.low %v1457_v26, %v1461_v27  ;;  %v1473_v6 = vld [vmem:[#allocation4 + $0x14c0] sm:$0xff] }
 0x274   : > { %7381 = vmatprep.subr.bf16.mxu0 %v18866_v51  ;;  %7805 = vmatprep.subr.bf16.mxu1 %v18868_v23  ;;  %v1430_v51 = vld [vmem:[#allocation4 + $0x1368] sm:$0xff]  ;;  %v1433_v23 = vld [vmem:[#allocation4 + $0x1380] sm:$0xff] }
 0x275   : > { %v18915_v3 = vcombine.low %v1426_v49, %v1430_v51  ;;  %v18922_v8 = vcombine.high %v1433_v23, %v1437_v61  ;;  %v18921_v55 = vcombine.low %v1433_v23, %v1437_v61  ;;  %v1478_v23 = vld [vmem:[#allocation4 + $0x14e8] sm:$0xff]  ;;  %v23827_v61 = vld [vmem:[%s23690_s26 + $0x28] sm:$0xff] }
 0x277   : > { %7382 = vmatpush1.bf16.msra.mxu0 %v18865_v62  ;;  %7806 = vmatpush1.bf16.msra.mxu1 %v18867_v63  ;;  %v1434_v62 = vld [vmem:[#allocation4 + $0x1388] sm:$0xff]  ;;  %v18916_v63 = vcombine.high %v1426_v49, %v1430_v51  ;;  %v1477_v51 = vld [vmem:[#allocation4 + $0x14e0] sm:$0xff] }
 0x278   : > { %7383 = vmatprep.subr.bf16.mxu0 %v18874_v0  ;;  %7807 = vmatprep.subr.bf16.mxu1 %v18876_v9  ;;  %v1438_v0 = vld [vmem:[#allocation4 + $0x13a8] sm:$0xff]  ;;  %v1441_v9 = vld [vmem:[#allocation4 + $0x13c0] sm:$0xff] }
 0x279   : > { %v18923_v57 = vcombine.low %v1434_v62, %v1438_v0  ;;  %v18930_v17 = vcombine.high %v1441_v9, %v1445_v10  ;;  %v18929_v54 = vcombine.low %v1441_v9, %v1445_v10  ;;  %v1470_v49 = vld [vmem:[#allocation4 + $0x14a8] sm:$0xff]  ;;  %v1481_v9 = vld [vmem:[#allocation4 + $0x1500] sm:$0xff] }
 0x27a   : > { %v1485_v10 = vld [vmem:[#allocation4 + $0x1520] sm:$0xff] }
 0x27b   : > { %7384 = vmatpush1.bf16.msra.mxu0 %v18873_v11  ;;  %7808 = vmatpush1.bf16.msra.mxu1 %v18875_v12  ;;  %v1442_v11 = vld [vmem:[#allocation4 + $0x13c8] sm:$0xff]  ;;  %v18924_v12 = vcombine.high %v1434_v62, %v1438_v0  ;;  %v18956_v62 = vcombine.high %v1466_v48, %v1470_v49 }
 0x27c   : > { %7385 = vmatprep.subr.bf16.mxu0 %v18882_v13  ;;  %7809 = vmatprep.subr.bf16.mxu1 %v18884_v18  ;;  %v1446_v13 = vld [vmem:[#allocation4 + $0x13e8] sm:$0xff]  ;;  %v1449_v18 = vld [vmem:[#allocation4 + $0x1400] sm:$0xff] }
 0x27d   : > { %v18932_v19 = vcombine.high %v1442_v11, %v1446_v13 }
 0x27f   : > { %7386 = vmatpush1.bf16.msra.mxu0 %v18881_v20  ;;  %7810 = vmatpush1.bf16.msra.mxu1 %v18883_v22  ;;  %v1453_v20 = vld [vmem:[#allocation4 + $0x1420] sm:$0xff]  ;;  %v1450_v22 = vld [vmem:[#allocation4 + $0x1408] sm:$0xff] }
 0x280   : > { %7387 = vmatprep.subr.bf16.mxu0 %v18890_v53  ;;  %7811 = vmatprep.subr.bf16.mxu1 %v18892_v28  ;;  %v1454_v53 = vld [vmem:[#allocation4 + $0x1428] sm:$0xff]  ;;  %v18931_v28 = vcombine.low %v1442_v11, %v1446_v13  ;;  %v18938_v29 = vcombine.high %v1449_v18, %v1453_v20 }
 0x281   : > { %v18940_v38 = vcombine.high %v1450_v22, %v1454_v53  ;;  %v18939_v42 = vcombine.low %v1450_v22, %v1454_v53  ;;  %v1482_v11 = vld [vmem:[#allocation4 + $0x1508] sm:$0xff] }
 0x282   : > { %v1486_v13 = vld [vmem:[#allocation4 + $0x1528] sm:$0xff] }
 0x283   : > { %7388 = vmatpush1.bf16.msra.mxu0 %v18889_v30  ;;  %7812 = vmatpush1.bf16.msra.mxu1 %v18891_v31  ;;  %v1458_v30 = vld [vmem:[#allocation4 + $0x1448] sm:$0xff]  ;;  %v18972_v53 = vcombine.high %v1482_v11, %v1486_v13 }
 0x284   : > { %7389 = vmatprep.subr.bf16.mxu0 %v18898_v34  ;;  %7813 = vmatprep.subr.bf16.mxu1 %v18900_v41  ;;  %v1462_v31 = vld [vmem:[#allocation4 + $0x1468] sm:$0xff]  ;;  %v797_v34 = vld [vmem:[%s23690_s26 + $0xa0] sm:$0xff]  ;;  %v18937_v41 = vcombine.low %v1449_v18, %v1453_v20  ;;  %v18970_v18 = vcombine.high %v1481_v9, %v1485_v10  ;;  %v1493_v20 = vld [vmem:[#allocation4 + $0x1560] sm:$0xff] }
 0x285   : > { %v23834_v0 = vcombine.low %v797_v34, %v805_v39  ;;  %v1490_v22 = vld [vmem:[#allocation4 + $0x1548] sm:$0xff] }
 0x287   : > { %7390 = vmatpush1.bf16.msra.mxu0 %v18897_v43  ;;  %7814 = vmatpush1.bf16.msra.mxu1 %v18899_v44  ;;  %v18946_v43 = vcombine.high %v1457_v26, %v1461_v27  ;;  %v1465_v44 = vld [vmem:[#allocation4 + $0x1480] sm:$0xff]  ;;  %v18969_v26 = vcombine.low %v1481_v9, %v1485_v10  ;;  %v18971_v27 = vcombine.low %v1482_v11, %v1486_v13  ;;  %v1522_v10 = vld [vmem:[#allocation4 + $0x1648] sm:$0xff] }
 0x288   : > { %7391 = vmatprep.subr.bf16.mxu0 %v18906_v33  ;;  %7815 = vmatprep.subr.bf16.mxu1 %v18908_v50  ;;  %v18948_v33 = vcombine.high %v1458_v30, %v1462_v31  ;;  %v23822_v50 = vcombine.high %v797_v34, %v805_v39  ;;  %v1525_v9 = vld [vmem:[#allocation4 + $0x1660] sm:$0xff] }
 0x28b   : > { %7392 = vmatpush1.bf16.msra.mxu0 %v18905_v52  ;;  %7816 = vmatpush1.bf16.msra.mxu1 %v18907_v56  ;;  %v18947_v52 = vcombine.low %v1458_v30, %v1462_v31  ;;  %v18954_v56 = vcombine.high %v1465_v44, %v1469_v35  ;;  %v1501_v30 = vld [vmem:[#allocation4 + $0x15a0] sm:$0xff]  ;;  %v1498_v31 = vld [vmem:[#allocation4 + $0x1588] sm:$0xff] }
 0x28c   : > { %7393 = vmatprep.subr.bf16.mxu0 %v18914_v21  ;;  %7817 = vmatprep.subr.bf16.mxu1 %v18916_v63  ;;  %v1474_v21 = vld [vmem:[#allocation4 + $0x14c8] sm:$0xff]  ;;  %v23831_v63 = vld [vmem:[%s23690_s26 + $0x68] sm:$0xff] }
 0x28f   : > { %7394 = vmatpush1.bf16.msra.mxu0 %v18913_v1  ;;  %7818 = vmatpush1.bf16.msra.mxu1 %v18915_v3  ;;  %v18953_v1 = vcombine.low %v1465_v44, %v1469_v35  ;;  %v18955_v3 = vcombine.low %v1466_v48, %v1470_v49  ;;  %v1509_v44 = vld [vmem:[#allocation4 + $0x15e0] sm:$0xff]  ;;  %v1510_v48 = vld [vmem:[#allocation4 + $0x15e8] sm:$0xff] }
 0x290   : > { %7395 = vmatprep.subr.bf16.mxu0 %v18922_v8  ;;  %7819 = vmatprep.subr.bf16.mxu1 %v18924_v12  ;;  %v18962_v8 = vcombine.high %v1473_v6, %v1477_v51  ;;  %v18964_v12 = vcombine.high %v1474_v21, %v1478_v23 }
 0x293   : > { %7396 = vmatpush1.bf16.msra.mxu0 %v18921_v55  ;;  %7820 = vmatpush1.bf16.msra.mxu1 %v18923_v57  ;;  %v23838_v55 = vcombine.high %v23827_v61, %v23831_v63  ;;  %v18961_v57 = vcombine.low %v1473_v6, %v1477_v51  ;;  %v1513_v51 = vld [vmem:[#allocation4 + $0x1600] sm:$0xff] }
 0x294   : > { %7397 = vmatprep.subr.bf16.mxu0 %v18930_v17  ;;  %7821 = vmatprep.subr.bf16.mxu1 %v18932_v19  ;;  %v18963_v17 = vcombine.low %v1474_v21, %v1478_v23  ;;  %v1489_v19 = vld [vmem:[#allocation4 + $0x1540] sm:$0xff]  ;;  %v1518_v23 = vld [vmem:[#allocation4 + $0x1628] sm:$0xff] }
 0x295   : > { %v18977_v39 = vcombine.low %v1489_v19, %v1493_v20 }
 0x297   : > { %7398 = vmatpush1.bf16.msra.mxu0 %v18929_v54  ;;  %7822 = vmatpush1.bf16.msra.mxu1 %v18931_v28  ;;  %v1494_v54 = vld [vmem:[#allocation4 + $0x1568] sm:$0xff]  ;;  %v18978_v28 = vcombine.high %v1489_v19, %v1493_v20  ;;  %v1533_v19 = vld [vmem:[#allocation4 + $0x16a0] sm:$0xff] }
 0x298   : > { %7420 = vmatprep.subr.bf16.mxu0 %v18938_v29  ;;  %7844 = vmatprep.subr.bf16.mxu1 %v18940_v38  ;;  %v1497_v29 = vld [vmem:[#allocation4 + $0x1580] sm:$0xff]  ;;  %v18980_v34 = vcombine.high %v1490_v22, %v1494_v54  ;;  %v1502_v38 = vld [vmem:[#allocation4 + $0x15a8] sm:$0xff] }
 0x299   : > { %v18988_v35 = vcombine.high %v1498_v31, %v1502_v38  ;;  %v18985_v49 = vcombine.low %v1497_v29, %v1501_v30  ;;  %v1530_v20 = vld [vmem:[#allocation4 + $0x1688] sm:$0xff] }
 0x29a   : > { %7400 = vmatmul.mubr.bf16.vlgmr.msra.gmra.mrb[0].mxu0 %v23820_v40  ;;  %7824 = vmatmul.mubr.bf16.vlgmr.msra.gmra.mrb[0].mxu1 %v23820_v40 }
 0x29b   : > { %7421 = vmatpush1.bf16.msra.mxu0 %v18937_v41  ;;  %7845 = vmatpush1.bf16.msra.mxu1 %v18939_v42  ;;  %v18979_v41 = vcombine.low %v1490_v22, %v1494_v54  ;;  %v18986_v42 = vcombine.high %v1497_v29, %v1501_v30  ;;  %v1541_v29 = vld [vmem:[#allocation4 + $0x16e0] sm:$0xff]  ;;  %v1538_v30 = vld [vmem:[#allocation4 + $0x16c8] sm:$0xff] }
 0x29c   : > { %7422 = vmatprep.subr.bf16.mxu0 %v18946_v43  ;;  %7846 = vmatprep.subr.bf16.mxu1 %v18948_v33  ;;  %v1505_v43 = vld [vmem:[#allocation4 + $0x15c0] sm:$0xff]  ;;  %v1506_v33 = vld [vmem:[#allocation4 + $0x15c8] sm:$0xff] }
 0x29d   : > { %7409 = vmatprep.mubr.bf16.mxu0 %v23822_v50  ;;  %7833 = vmatprep.mubr.bf16.mxu1 %v23822_v50  ;;  %v18994_v6 = vcombine.high %v1505_v43, %v1509_v44  ;;  %v18996_v21 = vcombine.high %v1506_v33, %v1510_v48 }
 0x29f   : > { %7423 = vmatpush1.bf16.msra.mxu0 %v18945_v2  ;;  %7847 = vmatpush1.bf16.msra.mxu1 %v18947_v52  ;;  %v18987_v2 = vcombine.low %v1498_v31, %v1502_v38  ;;  %v1517_v52 = vld [vmem:[#allocation4 + $0x1620] sm:$0xff] }
 0x2a0   : > { %7424 = vmatprep.subr.bf16.mxu0 %v18954_v56  ;;  %7848 = vmatprep.subr.bf16.mxu1 %v18956_v62  ;;  %v1514_v56 = vld [vmem:[#allocation4 + $0x1608] sm:$0xff]  ;;  %v18993_v62 = vcombine.low %v1505_v43, %v1509_v44  ;;  %v19001_v13 = vcombine.low %v1513_v51, %v1517_v52  ;;  %v1549_v43 = vld [vmem:[#allocation4 + $0x1720] sm:$0xff] }
 0x2a1   : > { %v19004_v11 = vcombine.high %v1514_v56, %v1518_v23  ;;  %v1546_v44 = vld [vmem:[#allocation4 + $0x1708] sm:$0xff] }
 0x2a2   : > { %7410 = vmatmul.mubr.bf16.gmra.mrb[4].mxu0 %v23834_v0  ;;  %7834 = vmatmul.mubr.bf16.gmra.mrb[4].mxu1 %v23834_v0 }
 0x2a3   : > { %7425 = vmatpush1.bf16.msra.mxu0 %v18953_v1  ;;  %7849 = vmatpush1.bf16.msra.mxu1 %v18955_v3  ;;  %v18995_v1 = vcombine.low %v1506_v33, %v1510_v48  ;;  %v19002_v3 = vcombine.high %v1513_v51, %v1517_v52  ;;  %v1557_v51 = vld [vmem:[#allocation4 + $0x1760] sm:$0xff]  ;;  %v1554_v52 = vld [vmem:[#allocation4 + $0x1748] sm:$0xff] }
 0x2a4   : > { %7426 = vmatprep.subr.bf16.mxu0 %v18962_v8  ;;  %7850 = vmatprep.subr.bf16.mxu1 %v18964_v12  ;;  %v1521_v8 = vld [vmem:[#allocation4 + $0x1640] sm:$0xff]  ;;  %v1526_v12 = vld [vmem:[#allocation4 + $0x1668] sm:$0xff] }
 0x2a5   : > { %7452 = vmatprep.mubr.bf16.mxu0 %v23838_v55  ;;  %7876 = vmatprep.mubr.bf16.mxu1 %v23838_v55  ;;  %v19012_v22 = vcombine.high %v1522_v10, %v1526_v12  ;;  %v19009_v54 = vcombine.low %v1521_v8, %v1525_v9 }
 0x2a7   : > { %7427 = vmatpush1.bf16.msra.mxu0 %v18961_v57  ;;  %7851 = vmatpush1.bf16.msra.mxu1 %v18963_v17  ;;  %v19003_v57 = vcombine.low %v1514_v56, %v1518_v23  ;;  %v19010_v17 = vcombine.high %v1521_v8, %v1525_v9  ;;  %v1565_v8 = vld [vmem:[#allocation4 + $0x17a0] sm:$0xff]  ;;  %v1562_v9 = vld [vmem:[#allocation4 + $0x1788] sm:$0xff] }
 0x2a8   : > { %7428 = vmatprep.subr.bf16.mxu0 %v18970_v18  ;;  %7852 = vmatprep.subr.bf16.mxu1 %v18972_v53  ;;  %v1529_v18 = vld [vmem:[#allocation4 + $0x1680] sm:$0xff]  ;;  %v1534_v53 = vld [vmem:[#allocation4 + $0x16a8] sm:$0xff] }
 0x2a9   : > { %v19020_v31 = vcombine.high %v1530_v20, %v1534_v53  ;;  %v19017_v38 = vcombine.low %v1529_v18, %v1533_v19 }
 0x2ab   : > { %7429 = vmatpush1.bf16.msra.mxu0 %v18969_v26  ;;  %7853 = vmatpush1.bf16.msra.mxu1 %v18971_v27  ;;  %v19011_v26 = vcombine.low %v1522_v10, %v1526_v12  ;;  %v19018_v27 = vcombine.high %v1529_v18, %v1533_v19  ;;  %v1573_v18 = vld [vmem:[#allocation4 + $0x17e0] sm:$0xff]  ;;  %v1570_v19 = vld [vmem:[#allocation4 + $0x17c8] sm:$0xff] }
 0x2ac   : > { %7430 = vmatprep.subr.bf16.mxu0 %v18978_v28  ;;  %7854 = vmatprep.subr.bf16.mxu1 %v18980_v34  ;;  %v1537_v28 = vld [vmem:[#allocation4 + $0x16c0] sm:$0xff]  ;;  %v1542_v34 = vld [vmem:[#allocation4 + $0x16e8] sm:$0xff] }
 0x2ad   : > { %v19028_v33 = vcombine.high %v1538_v30, %v1542_v34  ;;  %v19025_v48 = vcombine.low %v1537_v28, %v1541_v29 }
 0x2af   : > { %7431 = vmatpush1.bf16.msra.mxu0 %v18977_v39  ;;  %7855 = vmatpush1.bf16.msra.mxu1 %v18979_v41  ;;  %v19019_v39 = vcombine.low %v1530_v20, %v1534_v53  ;;  %v19026_v41 = vcombine.high %v1537_v28, %v1541_v29  ;;  %v1581_v28 = vld [vmem:[#allocation4 + $0x1820] sm:$0xff]  ;;  %v1578_v29 = vld [vmem:[#allocation4 + $0x1808] sm:$0xff] }
 0x2b0   : > { %7432 = vmatprep.subr.bf16.mxu0 %v18986_v42  ;;  %7856 = vmatprep.subr.bf16.mxu1 %v18988_v35  ;;  %v1545_v42 = vld [vmem:[#allocation4 + $0x1700] sm:$0xff]  ;;  %v1550_v35 = vld [vmem:[#allocation4 + $0x1728] sm:$0xff] }
 0x2b1   : > { %v19036_v56 = vcombine.high %v1546_v44, %v1550_v35  ;;  %v19033_v23 = vcombine.low %v1545_v42, %v1549_v43 }
 0x2b3   : > { %7433 = vmatpush1.bf16.msra.mxu0 %v18985_v49  ;;  %7857 = vmatpush1.bf16.msra.mxu1 %v18987_v2  ;;  %v19027_v49 = vcombine.low %v1538_v30, %v1542_v34  ;;  %v19034_v2 = vcombine.high %v1545_v42, %v1549_v43  ;;  %v1586_v43 = vld [vmem:[#allocation4 + $0x1848] sm:$0xff] }
 0x2b4   : > { %7434 = vmatprep.subr.bf16.mxu0 %v18994_v6  ;;  %7858 = vmatprep.subr.bf16.mxu1 %v18996_v21  ;;  %v1553_v6 = vld [vmem:[#allocation4 + $0x1740] sm:$0xff]  ;;  %v1558_v21 = vld [vmem:[#allocation4 + $0x1768] sm:$0xff] }
 0x2b5   : > { %v19044_v10 = vcombine.high %v1554_v52, %v1558_v21  ;;  %v19041_v12 = vcombine.low %v1553_v6, %v1557_v51 }
 0x2b7   : > { %7435 = vmatpush1.bf16.msra.mxu0 %v18993_v62  ;;  %7859 = vmatpush1.bf16.msra.mxu1 %v18995_v1  ;;  %v19035_v62 = vcombine.low %v1546_v44, %v1550_v35  ;;  %v19042_v1 = vcombine.high %v1553_v6, %v1557_v51  ;;  %v1590_v44 = vld [vmem:[#allocation4 + $0x1868] sm:$0xff] }
 0x2b8   : > { %7436 = vmatprep.subr.bf16.mxu0 %v19002_v3  ;;  %7860 = vmatprep.subr.bf16.mxu1 %v19004_v11  ;;  %v1561_v3 = vld [vmem:[#allocation4 + $0x1780] sm:$0xff]  ;;  %v1566_v11 = vld [vmem:[#allocation4 + $0x17a8] sm:$0xff] }
 0x2b9   : > { %v19052_v20 = vcombine.high %v1562_v9, %v1566_v11  ;;  %v19049_v53 = vcombine.low %v1561_v3, %v1565_v8 }
 0x2bb   : > { %7437 = vmatpush1.bf16.msra.mxu0 %v19001_v13  ;;  %7861 = vmatpush1.bf16.msra.mxu1 %v19003_v57  ;;  %v19043_v13 = vcombine.low %v1554_v52, %v1558_v21  ;;  %v19050_v57 = vcombine.high %v1561_v3, %v1565_v8  ;;  %v1593_v52 = vld [vmem:[#allocation4 + $0x1880] sm:$0xff]  ;;  %v1594_v21 = vld [vmem:[#allocation4 + $0x1888] sm:$0xff]  ;;  %v19075_v8 = vcombine.low %v1586_v43, %v1590_v44 }
 0x2bc   : > { %7438 = vmatprep.subr.bf16.mxu0 %v19010_v17  ;;  %7862 = vmatprep.subr.bf16.mxu1 %v19012_v22  ;;  %v1569_v17 = vld [vmem:[#allocation4 + $0x17c0] sm:$0xff]  ;;  %v1574_v22 = vld [vmem:[#allocation4 + $0x17e8] sm:$0xff] }
 0x2bd   : > { %v19060_v30 = vcombine.high %v1570_v19, %v1574_v22  ;;  %v19057_v34 = vcombine.low %v1569_v17, %v1573_v18  ;;  %v1605_v3 = vld [vmem:[#allocation4 + $0x18e0] sm:$0xff] }
 0x2bf   : > { %7439 = vmatpush1.bf16.msra.mxu0 %v19009_v54  ;;  %7863 = vmatpush1.bf16.msra.mxu1 %v19011_v26  ;;  %v19051_v54 = vcombine.low %v1562_v9, %v1566_v11  ;;  %v19058_v26 = vcombine.high %v1569_v17, %v1573_v18  ;;  %v1606_v11 = vld [vmem:[#allocation4 + $0x18e8] sm:$0xff] }
 0x2c0   : > { %7440 = vmatprep.subr.bf16.mxu0 %v19018_v27  ;;  %7864 = vmatprep.subr.bf16.mxu1 %v19020_v31  ;;  %v1577_v27 = vld [vmem:[#allocation4 + $0x1800] sm:$0xff]  ;;  %v1582_v31 = vld [vmem:[#allocation4 + $0x1828] sm:$0xff] }
 0x2c1   : > { %v19066_v42 = vcombine.high %v1577_v27, %v1581_v28  ;;  %v19068_v35 = vcombine.high %v1578_v29, %v1582_v31  ;;  %v19067_v6 = vcombine.low %v1578_v29, %v1582_v31 }
 0x2c3   : > { %7441 = vmatpush1.bf16.msra.mxu0 %v19017_v38  ;;  %7865 = vmatpush1.bf16.msra.mxu1 %v19019_v39  ;;  %v1585_v38 = vld [vmem:[#allocation4 + $0x1840] sm:$0xff] }
 0x2c4   : > { %7442 = vmatprep.subr.bf16.mxu0 %v19026_v41  ;;  %7866 = vmatprep.subr.bf16.mxu1 %v19028_v33  ;;  %v1589_v39 = vld [vmem:[#allocation4 + $0x1860] sm:$0xff]  ;;  %v19059_v41 = vcombine.low %v1570_v19, %v1574_v22 }
 0x2c5   : > { %v798_v33 = vld [vmem:[%s23690_s26 + $0xa8] sm:$0xff]  ;;  %v19074_v51 = vcombine.high %v1585_v38, %v1589_v39 }
 0x2c6   : > { %v1609_v22 = vld [vmem:[#allocation4 + $0x1900] sm:$0xff] }
 0x2c7   : > { %7443 = vmatpush1.bf16.msra.mxu0 %v19025_v48  ;;  %7867 = vmatpush1.bf16.msra.mxu1 %v19027_v49  ;;  %v806_v48 = vld [vmem:[%s23690_s26 + $0xe8] sm:$0xff]  ;;  %v23848_v49 = vcombine.low %v23827_v61, %v23831_v63  ;;  %v19073_v61 = vcombine.low %v1585_v38, %v1589_v39  ;;  %v1618_v39 = vld [vmem:[#allocation4 + $0x1948] sm:$0xff] }
 0x2c8   : > { %7444 = vmatprep.subr.bf16.mxu0 %v19034_v2  ;;  %7868 = vmatprep.subr.bf16.mxu1 %v19036_v56  ;;  %v19065_v2 = vcombine.low %v1577_v27, %v1581_v28  ;;  %v1597_v56 = vld [vmem:[#allocation4 + $0x18a0] sm:$0xff]  ;;  %v23862_v17 = vcombine.low %v798_v33, %v806_v48  ;;  %v1614_v27 = vld [vmem:[#allocation4 + $0x1928] sm:$0xff] }
 0x2c9   : > { %v1601_v63 = vld [vmem:[#allocation4 + $0x18c0] sm:$0xff]  ;;  %v19082_v9 = vcombine.high %v1593_v52, %v1597_v56  ;;  %v19081_v18 = vcombine.low %v1593_v52, %v1597_v56 }
 0x2ca   : > { %v19089_v29 = vcombine.low %v1601_v63, %v1605_v3  ;;  %v1621_v38 = vld [vmem:[#allocation4 + $0x1960] sm:$0xff] }
 0x2cb   : > { %7445 = vmatpush1.bf16.msra.mxu0 %v19033_v23  ;;  %7869 = vmatpush1.bf16.msra.mxu1 %v19035_v62  ;;  %v19076_v23 = vcombine.high %v1586_v43, %v1590_v44  ;;  %v1598_v62 = vld [vmem:[#allocation4 + $0x18a8] sm:$0xff] }
 0x2cc   : > { %7446 = vmatprep.subr.bf16.mxu0 %v19042_v1  ;;  %7870 = vmatprep.subr.bf16.mxu1 %v19044_v10  ;;  %v23850_v1 = vcombine.high %v798_v33, %v806_v48  ;;  %v1602_v10 = vld [vmem:[#allocation4 + $0x18c8] sm:$0xff]  ;;  %v19083_v19 = vcombine.low %v1594_v21, %v1598_v62  ;;  %v1629_v48 = vld [vmem:[#allocation4 + $0x19a0] sm:$0xff] }
 0x2cf   : > { %7447 = vmatpush1.bf16.msra.mxu0 %v19041_v12  ;;  %7871 = vmatpush1.bf16.msra.mxu1 %v19043_v13  ;;  %v23855_v12 = vld [vmem:[%s23690_s26 + $0x30] sm:$0xff]  ;;  %v19084_v13 = vcombine.high %v1594_v21, %v1598_v62  ;;  %v1637_v62 = vld [vmem:[#allocation4 + $0x19e0] sm:$0xff] }
 0x2d0   : > { %7448 = vmatprep.subr.bf16.mxu0 %v19050_v57  ;;  %7872 = vmatprep.subr.bf16.mxu1 %v19052_v20  ;;  %v23859_v57 = vld [vmem:[%s23690_s26 + $0x70] sm:$0xff]  ;;  %v19090_v20 = vcombine.high %v1601_v63, %v1605_v3 }
 0x2d1   : > { %v23866_v28 = vcombine.high %v23855_v12, %v23859_v57  ;;  %v1638_v3 = vld [vmem:[#allocation4 + $0x19e8] sm:$0xff] }
 0x2d3   : > { %7449 = vmatpush1.bf16.msra.mxu0 %v19049_v53  ;;  %7873 = vmatpush1.bf16.msra.mxu1 %v19051_v54  ;;  %v1613_v53 = vld [vmem:[#allocation4 + $0x1920] sm:$0xff]  ;;  %v1610_v54 = vld [vmem:[#allocation4 + $0x1908] sm:$0xff] }
 0x2d4   : > { %7450 = vmatprep.subr.bf16.mxu0 %v19058_v26  ;;  %7874 = vmatprep.subr.bf16.mxu1 %v19060_v30  ;;  %v19092_v26 = vcombine.high %v1602_v10, %v1606_v11  ;;  %v19091_v30 = vcombine.low %v1602_v10, %v1606_v11  ;;  %v19098_v31 = vcombine.high %v1609_v22, %v1613_v53  ;;  %v1641_v11 = vld [vmem:[#allocation4 + $0x1a00] sm:$0xff] }
 0x2d5   : > { %v19097_v43 = vcombine.low %v1609_v22, %v1613_v53  ;;  %v19099_v44 = vcombine.low %v1610_v54, %v1614_v27 }
 0x2d7   : > { %7451 = vmatpush1.bf16.msra.mxu0 %v19057_v34  ;;  %7875 = vmatpush1.bf16.msra.mxu1 %v19059_v41  ;;  %v1617_v34 = vld [vmem:[#allocation4 + $0x1940] sm:$0xff]  ;;  %v19100_v41 = vcombine.high %v1610_v54, %v1614_v27 }
 0x2d8   : > { %7473 = vmatprep.subr.bf16.mxu0 %v19066_v42  ;;  %7897 = vmatprep.subr.bf16.mxu1 %v19068_v35  ;;  %v1622_v42 = vld [vmem:[#allocation4 + $0x1968] sm:$0xff]  ;;  %v19106_v33 = vcombine.high %v1617_v34, %v1621_v38  ;;  %v1625_v35 = vld [vmem:[#allocation4 + $0x1980] sm:$0xff]  ;;  %v19105_v52 = vcombine.low %v1617_v34, %v1621_v38 }
 0x2d9   : > { %v19107_v56 = vcombine.low %v1618_v39, %v1622_v42  ;;  %v19114_v21 = vcombine.high %v1625_v35, %v1629_v48  ;;  %v1653_v27 = vld [vmem:[#allocation4 + $0x1a60] sm:$0xff] }
 0x2da   : > { %7453 = vmatmul.mubr.bf16.vlgmr.msra.gmra.mrb[0].mxu0 %v23848_v49  ;;  %7877 = vmatmul.mubr.bf16.vlgmr.msra.gmra.mrb[0].mxu1 %v23848_v49 }
 0x2db   : > { %7474 = vmatpush1.bf16.msra.mxu0 %v19065_v2  ;;  %7898 = vmatpush1.bf16.msra.mxu1 %v19067_v6  ;;  %v1626_v2 = vld [vmem:[#allocation4 + $0x1988] sm:$0xff]  ;;  %v19108_v6 = vcombine.high %v1618_v39, %v1622_v42  ;;  %v1661_v42 = vld [vmem:[#allocation4 + $0x1aa0] sm:$0xff] }
 0x2dc   : > { %7475 = vmatprep.subr.bf16.mxu0 %v19074_v51  ;;  %7899 = vmatprep.subr.bf16.mxu1 %v19076_v23  ;;  %v1630_v51 = vld [vmem:[#allocation4 + $0x19a8] sm:$0xff]  ;;  %v1633_v23 = vld [vmem:[#allocation4 + $0x19c0] sm:$0xff] }
 0x2dd   : > { %7462 = vmatprep.mubr.bf16.mxu0 %v23850_v1  ;;  %7886 = vmatprep.mubr.bf16.mxu1 %v23850_v1  ;;  %v19116_v63 = vcombine.high %v1626_v2, %v1630_v51  ;;  %v19122_v10 = vcombine.high %v1633_v23, %v1637_v62  ;;  %v19121_v22 = vcombine.low %v1633_v23, %v1637_v62 }
 0x2df   : > { %7476 = vmatpush1.bf16.msra.mxu0 %v19073_v61  ;;  %7900 = vmatpush1.bf16.msra.mxu1 %v19075_v8  ;;  %v1634_v61 = vld [vmem:[#allocation4 + $0x19c8] sm:$0xff]  ;;  %v19113_v8 = vcombine.low %v1625_v35, %v1629_v48 }
 0x2e0   : > { %7477 = vmatprep.subr.bf16.mxu0 %v19082_v9  ;;  %7901 = vmatprep.subr.bf16.mxu1 %v19084_v13  ;;  %v19115_v9 = vcombine.low %v1626_v2, %v1630_v51  ;;  %v1645_v13 = vld [vmem:[#allocation4 + $0x1a20] sm:$0xff]  ;;  %v19123_v53 = vcombine.low %v1634_v61, %v1638_v3 }
 0x2e1   : > { %v19130_v54 = vcombine.high %v1641_v11, %v1645_v13  ;;  %v19129_v34 = vcombine.low %v1641_v11, %v1645_v13  ;;  %v1669_v51 = vld [vmem:[#allocation4 + $0x1ae0] sm:$0xff] }
 0x2e2   : > { %7463 = vmatmul.mubr.bf16.gmra.mrb[4].mxu0 %v23862_v17  ;;  %7887 = vmatmul.mubr.bf16.gmra.mrb[4].mxu1 %v23862_v17 }
 0x2e3   : > { %7478 = vmatpush1.bf16.msra.mxu0 %v19081_v18  ;;  %7902 = vmatpush1.bf16.msra.mxu1 %v19083_v19  ;;  %v1642_v18 = vld [vmem:[#allocation4 + $0x1a08] sm:$0xff]  ;;  %v19124_v19 = vcombine.high %v1634_v61, %v1638_v3  ;;  %v1677_v3 = vld [vmem:[#allocation4 + $0x1b20] sm:$0xff] }
 0x2e4   : > { %7479 = vmatprep.subr.bf16.mxu0 %v19090_v20  ;;  %7903 = vmatprep.subr.bf16.mxu1 %v19092_v26  ;;  %v1646_v20 = vld [vmem:[#allocation4 + $0x1a28] sm:$0xff]  ;;  %v1649_v26 = vld [vmem:[#allocation4 + $0x1a40] sm:$0xff] }
 0x2e5   : > { %7505 = vmatprep.mubr.bf16.mxu0 %v23866_v28  ;;  %7929 = vmatprep.mubr.bf16.mxu1 %v23866_v28  ;;  %v19131_v38 = vcombine.low %v1642_v18, %v1646_v20  ;;  %v19138_v39 = vcombine.high %v1649_v26, %v1653_v27  ;;  %v19137_v35 = vcombine.low %v1649_v26, %v1653_v27 }
 0x2e7   : > { %7480 = vmatpush1.bf16.msra.mxu0 %v19089_v29  ;;  %7904 = vmatpush1.bf16.msra.mxu1 %v19091_v30  ;;  %v1650_v29 = vld [vmem:[#allocation4 + $0x1a48] sm:$0xff]  ;;  %v19132_v30 = vcombine.high %v1642_v18, %v1646_v20  ;;  %v1685_v20 = vld [vmem:[#allocation4 + $0x1b60] sm:$0xff] }
 0x2e8   : > { %7481 = vmatprep.subr.bf16.mxu0 %v19098_v31  ;;  %7905 = vmatprep.subr.bf16.mxu1 %v19100_v41  ;;  %v1654_v31 = vld [vmem:[#allocation4 + $0x1a68] sm:$0xff]  ;;  %v1657_v41 = vld [vmem:[#allocation4 + $0x1a80] sm:$0xff] }
 0x2e9   : > { %v19139_v48 = vcombine.low %v1650_v29, %v1654_v31  ;;  %v19146_v2 = vcombine.high %v1657_v41, %v1661_v42  ;;  %v19145_v23 = vcombine.low %v1657_v41, %v1661_v42 }
 0x2eb   : > { %7482 = vmatpush1.bf16.msra.mxu0 %v19097_v43  ;;  %7906 = vmatpush1.bf16.msra.mxu1 %v19099_v44  ;;  %v1658_v43 = vld [vmem:[#allocation4 + $0x1a88] sm:$0xff]  ;;  %v19140_v44 = vcombine.high %v1650_v29, %v1654_v31  ;;  %v1693_v31 = vld [vmem:[#allocation4 + $0x1ba0] sm:$0xff] }
 0x2ec   : > { %7483 = vmatprep.subr.bf16.mxu0 %v19106_v33  ;;  %7907 = vmatprep.subr.bf16.mxu1 %v19108_v6  ;;  %v1662_v33 = vld [vmem:[#allocation4 + $0x1aa8] sm:$0xff]  ;;  %v1665_v6 = vld [vmem:[#allocation4 + $0x1ac0] sm:$0xff] }
 0x2ed   : > { %v19147_v62 = vcombine.low %v1658_v43, %v1662_v33  ;;  %v19154_v61 = vcombine.high %v1665_v6, %v1669_v51  ;;  %v19153_v11 = vcombine.low %v1665_v6, %v1669_v51 }
 0x2ef   : > { %7484 = vmatpush1.bf16.msra.mxu0 %v19105_v52  ;;  %7908 = vmatpush1.bf16.msra.mxu1 %v19107_v56  ;;  %v1666_v52 = vld [vmem:[#allocation4 + $0x1ac8] sm:$0xff]  ;;  %v19148_v56 = vcombine.high %v1658_v43, %v1662_v33  ;;  %v1701_v33 = vld [vmem:[#allocation4 + $0x1be0] sm:$0xff] }
 0x2f0   : > { %7485 = vmatprep.subr.bf16.mxu0 %v19114_v21  ;;  %7909 = vmatprep.subr.bf16.mxu1 %v19116_v63  ;;  %v1670_v21 = vld [vmem:[#allocation4 + $0x1ae8] sm:$0xff]  ;;  %v1673_v63 = vld [vmem:[#allocation4 + $0x1b00] sm:$0xff] }
 0x2f1   : > { %v19155_v13 = vcombine.low %v1666_v52, %v1670_v21  ;;  %v19162_v18 = vcombine.high %v1673_v63, %v1677_v3  ;;  %v19161_v26 = vcombine.low %v1673_v63, %v1677_v3  ;;  %v1713_v3 = vld [vmem:[#allocation4 + $0x1c40] sm:$0xff] }
 0x2f3   : > { %7486 = vmatpush1.bf16.msra.mxu0 %v19113_v8  ;;  %7910 = vmatpush1.bf16.msra.mxu1 %v19115_v9  ;;  %v1674_v8 = vld [vmem:[#allocation4 + $0x1b08] sm:$0xff]  ;;  %v19156_v9 = vcombine.high %v1666_v52, %v1670_v21  ;;  %v1709_v21 = vld [vmem:[#allocation4 + $0x1c20] sm:$0xff] }
 0x2f4   : > { %7487 = vmatprep.subr.bf16.mxu0 %v19122_v10  ;;  %7911 = vmatprep.subr.bf16.mxu1 %v19124_v19  ;;  %v1678_v10 = vld [vmem:[#allocation4 + $0x1b28] sm:$0xff]  ;;  %v1681_v19 = vld [vmem:[#allocation4 + $0x1b40] sm:$0xff] }
 0x2f5   : > { %v19163_v27 = vcombine.low %v1674_v8, %v1678_v10  ;;  %v19170_v29 = vcombine.high %v1681_v19, %v1685_v20  ;;  %v19169_v41 = vcombine.low %v1681_v19, %v1685_v20  ;;  %v807_v20 = vld [vmem:[%s23690_s26 + $0xf0] sm:$0xff] }
 0x2f7   : > { %7488 = vmatpush1.bf16.msra.mxu0 %v19121_v22  ;;  %7912 = vmatpush1.bf16.msra.mxu1 %v19123_v53  ;;  %v1682_v22 = vld [vmem:[#allocation4 + $0x1b48] sm:$0xff]  ;;  %v19164_v53 = vcombine.high %v1674_v8, %v1678_v10  ;;  %v1717_v8 = vld [vmem:[#allocation4 + $0x1c60] sm:$0xff] }
 0x2f8   : > { %7489 = vmatprep.subr.bf16.mxu0 %v19130_v54  ;;  %7913 = vmatprep.subr.bf16.mxu1 %v19132_v30  ;;  %v1686_v54 = vld [vmem:[#allocation4 + $0x1b68] sm:$0xff]  ;;  %v1689_v30 = vld [vmem:[#allocation4 + $0x1b80] sm:$0xff] }
 0x2f9   : > { %v19171_v42 = vcombine.low %v1682_v22, %v1686_v54  ;;  %v19178_v43 = vcombine.high %v1689_v30, %v1693_v31  ;;  %v19177_v6 = vcombine.low %v1689_v30, %v1693_v31  ;;  %v1722_v30 = vld [vmem:[#allocation4 + $0x1c88] sm:$0xff] }
 0x2fb   : > { %7490 = vmatpush1.bf16.msra.mxu0 %v19129_v34  ;;  %7914 = vmatpush1.bf16.msra.mxu1 %v19131_v38  ;;  %v1690_v34 = vld [vmem:[#allocation4 + $0x1b88] sm:$0xff]  ;;  %v19172_v38 = vcombine.high %v1682_v22, %v1686_v54  ;;  %v23876_v22 = vcombine.low %v23855_v12, %v23859_v57  ;;  %v19201_v12 = vcombine.low %v1713_v3, %v1717_v8  ;;  %v1729_v57 = vld [vmem:[#allocation4 + $0x1cc0] sm:$0xff] }
 0x2fc   : > { %7491 = vmatprep.subr.bf16.mxu0 %v19138_v39  ;;  %7915 = vmatprep.subr.bf16.mxu1 %v19140_v44  ;;  %v1694_v39 = vld [vmem:[#allocation4 + $0x1ba8] sm:$0xff]  ;;  %v1697_v44 = vld [vmem:[#allocation4 + $0x1bc0] sm:$0xff] }
 0x2fd   : > { %v19179_v51 = vcombine.low %v1690_v34, %v1694_v39  ;;  %v19186_v52 = vcombine.high %v1697_v44, %v1701_v33  ;;  %v19185_v63 = vcombine.low %v1697_v44, %v1701_v33  ;;  %v1734_v44 = vld [vmem:[#allocation4 + $0x1ce8] sm:$0xff]  ;;  %v23883_v33 = vld [vmem:[%s23690_s26 + $0x38] sm:$0xff] }
 0x2ff   : > { %7492 = vmatpush1.bf16.msra.mxu0 %v19137_v35  ;;  %7916 = vmatpush1.bf16.msra.mxu1 %v19139_v48  ;;  %v1698_v35 = vld [vmem:[#allocation4 + $0x1bc8] sm:$0xff]  ;;  %v19180_v48 = vcombine.high %v1690_v34, %v1694_v39  ;;  %v1733_v39 = vld [vmem:[#allocation4 + $0x1ce0] sm:$0xff] }
 0x300   : > { %7493 = vmatprep.subr.bf16.mxu0 %v19146_v2  ;;  %7917 = vmatprep.subr.bf16.mxu1 %v19148_v56  ;;  %v1702_v2 = vld [vmem:[#allocation4 + $0x1be8] sm:$0xff]  ;;  %v1705_v56 = vld [vmem:[#allocation4 + $0x1c00] sm:$0xff] }
 0x301   : > { %v19194_v10 = vcombine.high %v1705_v56, %v1709_v21  ;;  %v1726_v34 = vld [vmem:[#allocation4 + $0x1ca8] sm:$0xff] }
 0x303   : > { %7494 = vmatpush1.bf16.msra.mxu0 %v19145_v23  ;;  %7918 = vmatpush1.bf16.msra.mxu1 %v19147_v62  ;;  %v1706_v23 = vld [vmem:[#allocation4 + $0x1c08] sm:$0xff]  ;;  %v19188_v62 = vcombine.high %v1698_v35, %v1702_v2 }
 0x304   : > { %7495 = vmatprep.subr.bf16.mxu0 %v19154_v61  ;;  %7919 = vmatprep.subr.bf16.mxu1 %v19156_v9  ;;  %v1710_v61 = vld [vmem:[#allocation4 + $0x1c28] sm:$0xff]  ;;  %v19187_v9 = vcombine.low %v1698_v35, %v1702_v2  ;;  %v19212_v35 = vcombine.high %v1722_v30, %v1726_v34 }
 0x305   : > { %v19196_v19 = vcombine.high %v1706_v23, %v1710_v61  ;;  %v19195_v54 = vcombine.low %v1706_v23, %v1710_v61  ;;  %v1738_v23 = vld [vmem:[#allocation4 + $0x1d08] sm:$0xff] }
 0x306   : > { %v1742_v61 = vld [vmem:[#allocation4 + $0x1d28] sm:$0xff] }
 0x307   : > { %7496 = vmatpush1.bf16.msra.mxu0 %v19153_v11  ;;  %7920 = vmatpush1.bf16.msra.mxu1 %v19155_v13  ;;  %v1714_v11 = vld [vmem:[#allocation4 + $0x1c48] sm:$0xff] }
 0x308   : > { %7497 = vmatprep.subr.bf16.mxu0 %v19162_v18  ;;  %7921 = vmatprep.subr.bf16.mxu1 %v19164_v53  ;;  %v1718_v13 = vld [vmem:[#allocation4 + $0x1c68] sm:$0xff]  ;;  %v19193_v53 = vcombine.low %v1705_v56, %v1709_v21  ;;  %v1737_v56 = vld [vmem:[#allocation4 + $0x1d00] sm:$0xff] }
 0x309   : > { %v799_v18 = vld [vmem:[%s23690_s26 + $0xb0] sm:$0xff]  ;;  %v19204_v31 = vcombine.high %v1714_v11, %v1718_v13  ;;  %v1741_v21 = vld [vmem:[#allocation4 + $0x1d20] sm:$0xff] }
 0x30a   : > { %v23890_v2 = vcombine.low %v799_v18, %v807_v20 }
 0x30b   : > { %7498 = vmatpush1.bf16.msra.mxu0 %v19161_v26  ;;  %7922 = vmatpush1.bf16.msra.mxu1 %v19163_v27  ;;  %v19202_v26 = vcombine.high %v1713_v3, %v1717_v8  ;;  %v1721_v27 = vld [vmem:[#allocation4 + $0x1c80] sm:$0xff]  ;;  %v19217_v3 = vcombine.low %v1729_v57, %v1733_v39 }
 0x30c   : > { %7499 = vmatprep.subr.bf16.mxu0 %v19170_v29  ;;  %7923 = vmatprep.subr.bf16.mxu1 %v19172_v38  ;;  %v1725_v29 = vld [vmem:[#allocation4 + $0x1ca0] sm:$0xff]  ;;  %v23878_v38 = vcombine.high %v799_v18, %v807_v20  ;;  %v19228_v18 = vcombine.high %v1738_v23, %v1742_v61  ;;  %v19225_v20 = vcombine.low %v1737_v56, %v1741_v21 }
 0x30f   : > { %7500 = vmatpush1.bf16.msra.mxu0 %v19169_v41  ;;  %7924 = vmatpush1.bf16.msra.mxu1 %v19171_v42  ;;  %v19203_v41 = vcombine.low %v1714_v11, %v1718_v13  ;;  %v19210_v42 = vcombine.high %v1721_v27, %v1725_v29  ;;  %v1749_v11 = vld [vmem:[#allocation4 + $0x1d60] sm:$0xff]  ;;  %v1746_v13 = vld [vmem:[#allocation4 + $0x1d48] sm:$0xff] }
 0x310   : > { %7501 = vmatprep.subr.bf16.mxu0 %v19178_v43  ;;  %7925 = vmatprep.subr.bf16.mxu1 %v19180_v48  ;;  %v1730_v43 = vld [vmem:[#allocation4 + $0x1cc8] sm:$0xff]  ;;  %v23887_v48 = vld [vmem:[%s23690_s26 + $0x78] sm:$0xff] }
 0x311   : > { %v19219_v8 = vcombine.low %v1730_v43, %v1734_v44 }
 0x313   : > { %7502 = vmatpush1.bf16.msra.mxu0 %v19177_v6  ;;  %7926 = vmatpush1.bf16.msra.mxu1 %v19179_v51  ;;  %v19209_v6 = vcombine.low %v1721_v27, %v1725_v29  ;;  %v19211_v51 = vcombine.low %v1722_v30, %v1726_v34  ;;  %v1757_v27 = vld [vmem:[#allocation4 + $0x1da0] sm:$0xff]  ;;  %v1754_v29 = vld [vmem:[#allocation4 + $0x1d88] sm:$0xff] }
 0x314   : > { %7503 = vmatprep.subr.bf16.mxu0 %v19186_v52  ;;  %7927 = vmatprep.subr.bf16.mxu1 %v19188_v62  ;;  %v19218_v52 = vcombine.high %v1729_v57, %v1733_v39  ;;  %v19220_v62 = vcombine.high %v1730_v43, %v1734_v44  ;;  %v1761_v39 = vld [vmem:[#allocation4 + $0x1dc0] sm:$0xff]  ;;  %v1766_v44 = vld [vmem:[#allocation4 + $0x1de8] sm:$0xff] }
 0x317   : > { %7504 = vmatpush1.bf16.msra.mxu0 %v19185_v63  ;;  %7928 = vmatpush1.bf16.msra.mxu1 %v19187_v9  ;;  %v23894_v63 = vcombine.high %v23883_v33, %v23887_v48  ;;  %v19226_v9 = vcombine.high %v1737_v56, %v1741_v21  ;;  %v1773_v56 = vld [vmem:[#allocation4 + $0x1e20] sm:$0xff]  ;;  %v1770_v21 = vld [vmem:[#allocation4 + $0x1e08] sm:$0xff] }
 0x318   : > { %7526 = vmatprep.subr.bf16.mxu0 %v19194_v10  ;;  %7950 = vmatprep.subr.bf16.mxu1 %v19196_v19  ;;  %v1745_v10 = vld [vmem:[#allocation4 + $0x1d40] sm:$0xff]  ;;  %v1750_v19 = vld [vmem:[#allocation4 + $0x1d68] sm:$0xff] }
 0x319   : > { %v19236_v30 = vcombine.high %v1746_v13, %v1750_v19  ;;  %v19233_v34 = vcombine.low %v1745_v10, %v1749_v11 }
 0x31a   : > { %7506 = vmatmul.mubr.bf16.vlgmr.msra.gmra.mrb[0].mxu0 %v23876_v22  ;;  %7930 = vmatmul.mubr.bf16.vlgmr.msra.gmra.mrb[0].mxu1 %v23876_v22 }
 0x31b   : > { %7527 = vmatpush1.bf16.msra.mxu0 %v19193_v53  ;;  %7951 = vmatpush1.bf16.msra.mxu1 %v19195_v54  ;;  %v19227_v53 = vcombine.low %v1738_v23, %v1742_v61  ;;  %v19234_v54 = vcombine.high %v1745_v10, %v1749_v11  ;;  %v1781_v10 = vld [vmem:[#allocation4 + $0x1e60] sm:$0xff]  ;;  %v1778_v11 = vld [vmem:[#allocation4 + $0x1e48] sm:$0xff] }
 0x31c   : > { %7528 = vmatprep.subr.bf16.mxu0 %v19202_v26  ;;  %7952 = vmatprep.subr.bf16.mxu1 %v19204_v31  ;;  %v1753_v26 = vld [vmem:[#allocation4 + $0x1d80] sm:$0xff]  ;;  %v1758_v31 = vld [vmem:[#allocation4 + $0x1da8] sm:$0xff] }
 0x31d   : > { %7515 = vmatprep.mubr.bf16.mxu0 %v23878_v38  ;;  %7939 = vmatprep.mubr.bf16.mxu1 %v23878_v38  ;;  %v19242_v57 = vcombine.high %v1753_v26, %v1757_v27  ;;  %v19244_v43 = vcombine.high %v1754_v29, %v1758_v31 }
 0x31f   : > { %7529 = vmatpush1.bf16.msra.mxu0 %v19201_v12  ;;  %7953 = vmatpush1.bf16.msra.mxu1 %v19203_v41  ;;  %v19235_v12 = vcombine.low %v1746_v13, %v1750_v19  ;;  %v1765_v41 = vld [vmem:[#allocation4 + $0x1de0] sm:$0xff] }
 0x320   : > { %7530 = vmatprep.subr.bf16.mxu0 %v19210_v42  ;;  %7954 = vmatprep.subr.bf16.mxu1 %v19212_v35  ;;  %v1762_v42 = vld [vmem:[#allocation4 + $0x1dc8] sm:$0xff]  ;;  %v19241_v35 = vcombine.low %v1753_v26, %v1757_v27  ;;  %v19249_v61 = vcombine.low %v1761_v39, %v1765_v41  ;;  %v1789_v26 = vld [vmem:[#allocation4 + $0x1ea0] sm:$0xff] }
 0x321   : > { %v19252_v23 = vcombine.high %v1762_v42, %v1766_v44  ;;  %v1786_v27 = vld [vmem:[#allocation4 + $0x1e88] sm:$0xff] }
 0x322   : > { %7516 = vmatmul.mubr.bf16.gmra.mrb[4].mxu0 %v23890_v2  ;;  %7940 = vmatmul.mubr.bf16.gmra.mrb[4].mxu1 %v23890_v2 }
 0x323   : > { %7531 = vmatpush1.bf16.msra.mxu0 %v19209_v6  ;;  %7955 = vmatpush1.bf16.msra.mxu1 %v19211_v51  ;;  %v19243_v6 = vcombine.low %v1754_v29, %v1758_v31  ;;  %v19250_v51 = vcombine.high %v1761_v39, %v1765_v41  ;;  %v1797_v39 = vld [vmem:[#allocation4 + $0x1ee0] sm:$0xff]  ;;  %v1794_v41 = vld [vmem:[#allocation4 + $0x1ec8] sm:$0xff] }
 0x324   : > { %7532 = vmatprep.subr.bf16.mxu0 %v19218_v52  ;;  %7956 = vmatprep.subr.bf16.mxu1 %v19220_v62  ;;  %v1769_v52 = vld [vmem:[#allocation4 + $0x1e00] sm:$0xff]  ;;  %v1774_v62 = vld [vmem:[#allocation4 + $0x1e28] sm:$0xff] }
 0x325   : > { %7558 = vmatprep.mubr.bf16.mxu0 %v23894_v63  ;;  %7982 = vmatprep.mubr.bf16.mxu1 %v23894_v63  ;;  %v19260_v13 = vcombine.high %v1770_v21, %v1774_v62  ;;  %v19257_v19 = vcombine.low %v1769_v52, %v1773_v56 }
 0x327   : > { %7533 = vmatpush1.bf16.msra.mxu0 %v19217_v3  ;;  %7957 = vmatpush1.bf16.msra.mxu1 %v19219_v8  ;;  %v19251_v3 = vcombine.low %v1762_v42, %v1766_v44  ;;  %v19258_v8 = vcombine.high %v1769_v52, %v1773_v56  ;;  %v1805_v52 = vld [vmem:[#allocation4 + $0x1f20] sm:$0xff]  ;;  %v1802_v56 = vld [vmem:[#allocation4 + $0x1f08] sm:$0xff] }
 0x328   : > { %7534 = vmatprep.subr.bf16.mxu0 %v19226_v9  ;;  %7958 = vmatprep.subr.bf16.mxu1 %v19228_v18  ;;  %v1777_v9 = vld [vmem:[#allocation4 + $0x1e40] sm:$0xff]  ;;  %v1782_v18 = vld [vmem:[#allocation4 + $0x1e68] sm:$0xff] }
 0x329   : > { %v19268_v29 = vcombine.high %v1778_v11, %v1782_v18  ;;  %v19265_v31 = vcombine.low %v1777_v9, %v1781_v10 }
 0x32b   : > { %7535 = vmatpush1.bf16.msra.mxu0 %v19225_v20  ;;  %7959 = vmatpush1.bf16.msra.mxu1 %v19227_v53  ;;  %v19259_v20 = vcombine.low %v1770_v21, %v1774_v62  ;;  %v19266_v53 = vcombine.high %v1777_v9, %v1781_v10  ;;  %v1813_v9 = vld [vmem:[#allocation4 + $0x1f60] sm:$0xff]  ;;  %v1810_v10 = vld [vmem:[#allocation4 + $0x1f48] sm:$0xff] }
 0x32c   : > { %7536 = vmatprep.subr.bf16.mxu0 %v19234_v54  ;;  %7960 = vmatprep.subr.bf16.mxu1 %v19236_v30  ;;  %v1785_v54 = vld [vmem:[#allocation4 + $0x1e80] sm:$0xff]  ;;  %v1790_v30 = vld [vmem:[#allocation4 + $0x1ea8] sm:$0xff] }
 0x32d   : > { %v19276_v42 = vcombine.high %v1786_v27, %v1790_v30  ;;  %v19273_v44 = vcombine.low %v1785_v54, %v1789_v26 }
 0x32f   : > { %7537 = vmatpush1.bf16.msra.mxu0 %v19233_v34  ;;  %7961 = vmatpush1.bf16.msra.mxu1 %v19235_v12  ;;  %v19267_v34 = vcombine.low %v1778_v11, %v1782_v18  ;;  %v19274_v12 = vcombine.high %v1785_v54, %v1789_v26  ;;  %v1821_v54 = vld [vmem:[#allocation4 + $0x1fa0] sm:$0xff]  ;;  %v1818_v26 = vld [vmem:[#allocation4 + $0x1f88] sm:$0xff] }
 0x330   : > { %7538 = vmatprep.subr.bf16.mxu0 %v19242_v57  ;;  %7962 = vmatprep.subr.bf16.mxu1 %v19244_v43  ;;  %v1793_v57 = vld [vmem:[#allocation4 + $0x1ec0] sm:$0xff]  ;;  %v1798_v43 = vld [vmem:[#allocation4 + $0x1ee8] sm:$0xff] }
 0x331   : > { %v19284_v21 = vcombine.high %v1794_v41, %v1798_v43  ;;  %v19281_v62 = vcombine.low %v1793_v57, %v1797_v39 }
 0x333   : > { %7539 = vmatpush1.bf16.msra.mxu0 %v19241_v35  ;;  %7963 = vmatpush1.bf16.msra.mxu1 %v19243_v6  ;;  %v19275_v35 = vcombine.low %v1786_v27, %v1790_v30  ;;  %v19282_v6 = vcombine.high %v1793_v57, %v1797_v39  ;;  %v1829_v57 = vld [vmem:[#allocation4 + $0x1fe0] sm:$0xff]  ;;  %v1826_v39 = vld [vmem:[#allocation4 + $0x1fc8] sm:$0xff] }
 0x334   : > { %7540 = vmatprep.subr.bf16.mxu0 %v19250_v51  ;;  %7964 = vmatprep.subr.bf16.mxu1 %v19252_v23  ;;  %v1801_v51 = vld [vmem:[#allocation4 + $0x1f00] sm:$0xff]  ;;  %v1806_v23 = vld [vmem:[#allocation4 + $0x1f28] sm:$0xff] }
 0x335   : > { %v19292_v11 = vcombine.high %v1802_v56, %v1806_v23  ;;  %v19289_v18 = vcombine.low %v1801_v51, %v1805_v52 }
 0x337   : > { %7541 = vmatpush1.bf16.msra.mxu0 %v19249_v61  ;;  %7965 = vmatpush1.bf16.msra.mxu1 %v19251_v3  ;;  %v19283_v61 = vcombine.low %v1794_v41, %v1798_v43  ;;  %v19290_v3 = vcombine.high %v1801_v51, %v1805_v52  ;;  %v815_v51 = vld [vmem:[#allocation4 + $0x30] sm:$0xff]  ;;  %v812_v52 = vld [vmem:[#allocation4 + $0x18] sm:$0xff] }
 0x338   : > { %7542 = vmatprep.subr.bf16.mxu0 %v19258_v8  ;;  %7966 = vmatprep.subr.bf16.mxu1 %v19260_v13  ;;  %v1809_v8 = vld [vmem:[#allocation4 + $0x1f40] sm:$0xff]  ;;  %v1814_v13 = vld [vmem:[#allocation4 + $0x1f68] sm:$0xff] }
 0x339   : > { %v19300_v27 = vcombine.high %v1810_v10, %v1814_v13  ;;  %v19297_v30 = vcombine.low %v1809_v8, %v1813_v9 }
 0x33b   : > { %7543 = vmatpush1.bf16.msra.mxu0 %v19257_v19  ;;  %7967 = vmatpush1.bf16.msra.mxu1 %v19259_v20  ;;  %v19291_v19 = vcombine.low %v1802_v56, %v1806_v23  ;;  %v19298_v20 = vcombine.high %v1809_v8, %v1813_v9  ;;  %v820_v9 = vld [vmem:[#allocation4 + $0x58] sm:$0xff] }
 0x33c   : > { %7544 = vmatprep.subr.bf16.mxu0 %v19266_v53  ;;  %7968 = vmatprep.subr.bf16.mxu1 %v19268_v29  ;;  %v1817_v53 = vld [vmem:[#allocation4 + $0x1f80] sm:$0xff]  ;;  %v1822_v29 = vld [vmem:[#allocation4 + $0x1fa8] sm:$0xff] }
 0x33d   : > { %v19308_v41 = vcombine.high %v1818_v26, %v1822_v29  ;;  %v19305_v43 = vcombine.low %v1817_v53, %v1821_v54 }
 0x33f   : > { %7545 = vmatpush1.bf16.msra.mxu0 %v19265_v31  ;;  %7969 = vmatpush1.bf16.msra.mxu1 %v19267_v34  ;;  %v19299_v31 = vcombine.low %v1810_v10, %v1814_v13  ;;  %v19306_v34 = vcombine.high %v1817_v53, %v1821_v54  ;;  %v824_v10 = vld [vmem:[#allocation4 + $0x78] sm:$0xff] }
 0x340   : > { %7546 = vmatprep.subr.bf16.mxu0 %v19274_v12  ;;  %7970 = vmatprep.subr.bf16.mxu1 %v19276_v42  ;;  %v1825_v12 = vld [vmem:[#allocation4 + $0x1fc0] sm:$0xff]  ;;  %v1830_v42 = vld [vmem:[#allocation4 + $0x1fe8] sm:$0xff] }
 0x341   : > { %v19316_v56 = vcombine.high %v1826_v39, %v1830_v42  ;;  %v19313_v23 = vcombine.low %v1825_v12, %v1829_v57 }
 0x343   : > { %7547 = vmatpush1.bf16.msra.mxu0 %v19273_v44  ;;  %7971 = vmatpush1.bf16.msra.mxu1 %v19275_v35  ;;  %v19307_v44 = vcombine.low %v1818_v26, %v1822_v29  ;;  %v19314_v35 = vcombine.high %v1825_v12, %v1829_v57  ;;  %v827_v26 = vld [vmem:[#allocation4 + $0x90] sm:$0xff]  ;;  %v828_v29 = vld [vmem:[#allocation4 + $0x98] sm:$0xff] }
 0x344   : > { %7548 = vmatprep.subr.bf16.mxu0 %v19282_v6  ;;  %7972 = vmatprep.subr.bf16.mxu1 %v19284_v21  ;;  %v811_v6 = vld [vmem:[#allocation4 + $0x10] sm:$0xff]  ;;  %v816_v21 = vld [vmem:[#allocation4 + $0x38] sm:$0xff] }
 0x345   : > { %v18302_v8 = vcombine.high %v811_v6, %v815_v51  ;;  %v18304_v13 = vcombine.high %v812_v52, %v816_v21  ;;  %v18303_v53 = vcombine.low %v812_v52, %v816_v21  ;;  %v835_v57 = vld [vmem:[#allocation4 + $0xd0] sm:$0xff]  ;;  %v844_v21 = vld [vmem:[#allocation4 + $0x118] sm:$0xff] }
 0x346   : > { %v843_v52 = vld [vmem:[#allocation4 + $0x110] sm:$0xff] }
 0x347   : > { %7549 = vmatpush1.bf16.msra.mxu0 %v19281_v62  ;;  %7973 = vmatpush1.bf16.msra.mxu1 %v19283_v61  ;;  %v819_v62 = vld [vmem:[#allocation4 + $0x50] sm:$0xff] }
 0x348   : > { %7550 = vmatprep.subr.bf16.mxu0 %v19290_v3  ;;  %7974 = vmatprep.subr.bf16.mxu1 %v19292_v11  ;;  %v823_v61 = vld [vmem:[#allocation4 + $0x70] sm:$0xff]  ;;  %v19315_v3 = vcombine.low %v1826_v39, %v1830_v42 }
 0x349   : > { %v800_v11 = vld [vmem:[%s23690_s26 + $0xb8] sm:$0xff]  ;;  %v18310_v54 = vcombine.high %v819_v62, %v823_v61 }
 0x34a   : > { %v839_v39 = vld [vmem:[#allocation4 + $0xf0] sm:$0xff] }
 0x34b   : > { %7551 = vmatpush1.bf16.msra.mxu0 %v19289_v18  ;;  %7975 = vmatpush1.bf16.msra.mxu1 %v19291_v19  ;;  %v808_v18 = vld [vmem:[%s23690_s26 + $0xf8] sm:$0xff]  ;;  %v23904_v19 = vcombine.low %v23883_v33, %v23887_v48  ;;  %v18309_v33 = vcombine.low %v819_v62, %v823_v61  ;;  %v18311_v48 = vcombine.low %v820_v9, %v824_v10  ;;  %v848_v62 = vld [vmem:[#allocation4 + $0x138] sm:$0xff] }
 0x34c   : > { %7552 = vmatprep.subr.bf16.mxu0 %v19298_v20  ;;  %7976 = vmatprep.subr.bf16.mxu1 %v19300_v27  ;;  %v18301_v20 = vcombine.low %v811_v6, %v815_v51  ;;  %v831_v27 = vld [vmem:[#allocation4 + $0xb0] sm:$0xff]  ;;  %v18326_v51 = vcombine.high %v835_v57, %v839_v39  ;;  %v18325_v61 = vcombine.low %v835_v57, %v839_v39  ;;  %v868_v39 = vld [vmem:[#allocation4 + $0x1d8] sm:$0xff] }
 0x34d   : > { %v18318_v12 = vcombine.high %v827_v26, %v831_v27  ;;  %v867_v57 = vld [vmem:[#allocation4 + $0x1d0] sm:$0xff] }
 0x34f   : > { %7553 = vmatpush1.bf16.msra.mxu0 %v19297_v30  ;;  %7977 = vmatpush1.bf16.msra.mxu1 %v19299_v31  ;;  %v18312_v30 = vcombine.high %v820_v9, %v824_v10  ;;  %v23906_v31 = vcombine.high %v800_v11, %v808_v18  ;;  %v851_v9 = vld [vmem:[#allocation4 + $0x150] sm:$0xff] }
 0x350   : > { %7554 = vmatprep.subr.bf16.mxu0 %v19306_v34  ;;  %7978 = vmatprep.subr.bf16.mxu1 %v19308_v41  ;;  %v832_v34 = vld [vmem:[#allocation4 + $0xb8] sm:$0xff]  ;;  %v855_v10 = vld [vmem:[#allocation4 + $0x170] sm:$0xff] }
 0x351   : > { %v836_v41 = vld [vmem:[#allocation4 + $0xd8] sm:$0xff]  ;;  %v18320_v42 = vcombine.high %v828_v29, %v832_v34  ;;  %v18319_v6 = vcombine.low %v828_v29, %v832_v34 }
 0x352   : > { %v860_v29 = vld [vmem:[#allocation4 + $0x198] sm:$0xff] }
 0x353   : > { %7555 = vmatpush1.bf16.msra.mxu0 %v19305_v43  ;;  %7979 = vmatpush1.bf16.msra.mxu1 %v19307_v44  ;;  %v840_v43 = vld [vmem:[#allocation4 + $0xf8] sm:$0xff]  ;;  %v23912_v44 = vcombine.low %v800_v11, %v808_v18 }
 0x354   : > { %7556 = vmatprep.subr.bf16.mxu0 %v19314_v35  ;;  %7980 = vmatprep.subr.bf16.mxu1 %v19316_v56  ;;  %v18317_v35 = vcombine.low %v827_v26, %v831_v27  ;;  %v847_v56 = vld [vmem:[#allocation4 + $0x130] sm:$0xff]  ;;  %v852_v11 = vld [vmem:[#allocation4 + $0x158] sm:$0xff] }
 0x355   : > { %v856_v18 = vld [vmem:[#allocation4 + $0x178] sm:$0xff]  ;;  %v859_v26 = vld [vmem:[#allocation4 + $0x190] sm:$0xff] }
 0x356   : > { %v863_v27 = vld [vmem:[#allocation4 + $0x1b0] sm:$0xff]  ;;  %v864_v34 = vld [vmem:[#allocation4 + $0x1b8] sm:$0xff] }
 0x357   : > { %7557 = vmatpush1.bf16.msra.mxu0 %v19313_v23  ;;  %7981 = vmatpush1.bf16.msra.mxu1 %v19315_v3  ;;  %v18328_v23 = vcombine.high %v836_v41, %v840_v43  ;;  %v18327_v3 = vcombine.low %v836_v41, %v840_v43  ;;  %v18352_v41 = vcombine.high %v860_v29, %v864_v34 }
 0x358   : > { %8003 = vmatprep.subr.bf16.mxu0 %v18302_v8  ;;  %8427 = vmatprep.subr.bf16.mxu1 %v18304_v13  ;;  %v18334_v8 = vcombine.high %v843_v52, %v847_v56  ;;  %v18336_v13 = vcombine.high %v844_v21, %v848_v62  ;;  %v18349_v43 = vcombine.low %v859_v26, %v863_v27 }
 0x35a   : > { %7559 = vmatmul.mubr.bf16.vlgmr.msra.gmra.mrb[0].mxu0 %v23904_v19  ;;  %7983 = vmatmul.mubr.bf16.vlgmr.msra.gmra.mrb[0].mxu1 %v23904_v19 }
 0x35b   : > { %8004 = vmatpush1.bf16.msra.mxu0 %v18301_v20  ;;  %8428 = vmatpush1.bf16.msra.mxu1 %v18303_v53  ;;  %v18333_v20 = vcombine.low %v843_v52, %v847_v56  ;;  %v18335_v53 = vcombine.low %v844_v21, %v848_v62  ;;  %v879_v52 = vld [vmem:[#allocation4 + $0x230] sm:$0xff]  ;;  %v876_v56 = vld [vmem:[#allocation4 + $0x218] sm:$0xff] }
 0x35c   : > { %8005 = vmatprep.subr.bf16.mxu0 %v18310_v54  ;;  %8429 = vmatprep.subr.bf16.mxu1 %v18312_v30  ;;  %v18342_v54 = vcombine.high %v851_v9, %v855_v10  ;;  %v18344_v30 = vcombine.high %v852_v11, %v856_v18 }
 0x35d   : > { %7568 = vmatprep.mubr.bf16.mxu0 %v23906_v31  ;;  %7992 = vmatprep.mubr.bf16.mxu1 %v23906_v31 }
 0x35f   : > { %8006 = vmatpush1.bf16.msra.mxu0 %v18309_v33  ;;  %8430 = vmatpush1.bf16.msra.mxu1 %v18311_v48  ;;  %v18341_v33 = vcombine.low %v851_v9, %v855_v10  ;;  %v18343_v48 = vcombine.low %v852_v11, %v856_v18  ;;  %v887_v9 = vld [vmem:[#allocation4 + $0x270] sm:$0xff]  ;;  %v884_v10 = vld [vmem:[#allocation4 + $0x258] sm:$0xff] }
 0x360   : > { %8007 = vmatprep.subr.bf16.mxu0 %v18318_v12  ;;  %8431 = vmatprep.subr.bf16.mxu1 %v18320_v42  ;;  %v18350_v12 = vcombine.high %v859_v26, %v863_v27  ;;  %v872_v42 = vld [vmem:[#allocation4 + $0x1f8] sm:$0xff]  ;;  %v895_v26 = vld [vmem:[#allocation4 + $0x2b0] sm:$0xff] }
 0x361   : > { %v18360_v21 = vcombine.high %v868_v39, %v872_v42  ;;  %v892_v27 = vld [vmem:[#allocation4 + $0x298] sm:$0xff] }
 0x362   : > { %7569 = vmatmul.mubr.bf16.gmra.mrb[4].mxu0 %v23912_v44  ;;  %7993 = vmatmul.mubr.bf16.gmra.mrb[4].mxu1 %v23912_v44 }
 0x363   : > { %8008 = vmatpush1.bf16.msra.mxu0 %v18317_v35  ;;  %8432 = vmatpush1.bf16.msra.mxu1 %v18319_v6  ;;  %v18351_v35 = vcombine.low %v860_v29, %v864_v34 }
 0x364   : > { %8009 = vmatprep.subr.bf16.mxu0 %v18326_v51  ;;  %8433 = vmatprep.subr.bf16.mxu1 %v18328_v23  ;;  %v875_v51 = vld [vmem:[#allocation4 + $0x210] sm:$0xff]  ;;  %v880_v23 = vld [vmem:[#allocation4 + $0x238] sm:$0xff] }
 0x365   : > { %8035 = vmatprep.mubr.bf16.mxu0 %v23700_v58  ;;  %8459 = vmatprep.mubr.bf16.mxu1 %v23700_v58  ;;  %v871_v58 = vld [vmem:[#allocation4 + $0x1f0] sm:$0xff]  ;;  %v18368_v11 = vcombine.high %v876_v56, %v880_v23  ;;  %v18365_v18 = vcombine.low %v875_v51, %v879_v52 }
 0x366   : > { %v18358_v6 = vcombine.high %v867_v57, %v871_v58  ;;  %v18357_v62 = vcombine.low %v867_v57, %v871_v58  ;;  %v903_v57 = vld [vmem:[#allocation4 + $0x2f0] sm:$0xff]  ;;  %v900_v58 = vld [vmem:[#allocation4 + $0x2d8] sm:$0xff] }
 0x367   : > { %8010 = vmatpush1.bf16.msra.mxu0 %v18325_v61  ;;  %8434 = vmatpush1.bf16.msra.mxu1 %v18327_v3  ;;  %v18359_v61 = vcombine.low %v868_v39, %v872_v42  ;;  %v18366_v3 = vcombine.high %v875_v51, %v879_v52  ;;  %v911_v51 = vld [vmem:[#allocation4 + $0x330] sm:$0xff]  ;;  %v908_v52 = vld [vmem:[#allocation4 + $0x318] sm:$0xff] }
 0x368   : > { %8011 = vmatprep.subr.bf16.mxu0 %v18334_v8  ;;  %8435 = vmatprep.subr.bf16.mxu1 %v18336_v13  ;;  %v883_v8 = vld [vmem:[#allocation4 + $0x250] sm:$0xff]  ;;  %v888_v13 = vld [vmem:[#allocation4 + $0x278] sm:$0xff] }
 0x369   : > { %v18376_v29 = vcombine.high %v884_v10, %v888_v13  ;;  %v18373_v34 = vcombine.low %v883_v8, %v887_v9 }
 0x36b   : > { %8012 = vmatpush1.bf16.msra.mxu0 %v18333_v20  ;;  %8436 = vmatpush1.bf16.msra.mxu1 %v18335_v53  ;;  %v18367_v20 = vcombine.low %v876_v56, %v880_v23  ;;  %v18374_v53 = vcombine.high %v883_v8, %v887_v9  ;;  %v919_v8 = vld [vmem:[#allocation4 + $0x370] sm:$0xff]  ;;  %v916_v9 = vld [vmem:[#allocation4 + $0x358] sm:$0xff] }
 0x36c   : > { %8013 = vmatprep.subr.bf16.mxu0 %v18342_v54  ;;  %8437 = vmatprep.subr.bf16.mxu1 %v18344_v30  ;;  %v891_v54 = vld [vmem:[#allocation4 + $0x290] sm:$0xff]  ;;  %v896_v30 = vld [vmem:[#allocation4 + $0x2b8] sm:$0xff] }
 0x36d   : > { %v18384_v39 = vcombine.high %v892_v27, %v896_v30  ;;  %v18381_v42 = vcombine.low %v891_v54, %v895_v26 }
 0x36f   : > { %8014 = vmatpush1.bf16.msra.mxu0 %v18341_v33  ;;  %8438 = vmatpush1.bf16.msra.mxu1 %v18343_v48  ;;  %v18375_v33 = vcombine.low %v884_v10, %v888_v13  ;;  %v18382_v48 = vcombine.high %v891_v54, %v895_v26  ;;  %v927_v54 = vld [vmem:[#allocation4 + $0x3b0] sm:$0xff]  ;;  %v924_v26 = vld [vmem:[#allocation4 + $0x398] sm:$0xff] }
 0x370   : > { %8015 = vmatprep.subr.bf16.mxu0 %v18350_v12  ;;  %8439 = vmatprep.subr.bf16.mxu1 %v18352_v41  ;;  %v899_v12 = vld [vmem:[#allocation4 + $0x2d0] sm:$0xff]  ;;  %v904_v41 = vld [vmem:[#allocation4 + $0x2f8] sm:$0xff] }
 0x371   : > { %v18392_v56 = vcombine.high %v900_v58, %v904_v41  ;;  %v18389_v23 = vcombine.low %v899_v12, %v903_v57 }
 0x373   : > { %8016 = vmatpush1.bf16.msra.mxu0 %v18349_v43  ;;  %8440 = vmatpush1.bf16.msra.mxu1 %v18351_v35  ;;  %v18383_v43 = vcombine.low %v892_v27, %v896_v30  ;;  %v18390_v35 = vcombine.high %v899_v12, %v903_v57  ;;  %v935_v12 = vld [vmem:[#allocation4 + $0x3f0] sm:$0xff]  ;;  %v932_v57 = vld [vmem:[#allocation4 + $0x3d8] sm:$0xff] }
 0x374   : > { %8017 = vmatprep.subr.bf16.mxu0 %v18358_v6  ;;  %8441 = vmatprep.subr.bf16.mxu1 %v18360_v21  ;;  %v907_v6 = vld [vmem:[#allocation4 + $0x310] sm:$0xff]  ;;  %v912_v21 = vld [vmem:[#allocation4 + $0x338] sm:$0xff] }
 0x375   : > { %v18400_v10 = vcombine.high %v908_v52, %v912_v21  ;;  %v18397_v13 = vcombine.low %v907_v6, %v911_v51 }
 0x377   : > { %8018 = vmatpush1.bf16.msra.mxu0 %v18357_v62  ;;  %8442 = vmatpush1.bf16.msra.mxu1 %v18359_v61  ;;  %v18391_v62 = vcombine.low %v900_v58, %v904_v41  ;;  %v18398_v61 = vcombine.high %v907_v6, %v911_v51  ;;  %v943_v6 = vld [vmem:[#allocation4 + $0x430] sm:$0xff]  ;;  %v940_v51 = vld [vmem:[#allocation4 + $0x418] sm:$0xff] }
 0x378   : > { %8019 = vmatprep.subr.bf16.mxu0 %v18366_v3  ;;  %8443 = vmatprep.subr.bf16.mxu1 %v18368_v11  ;;  %v915_v3 = vld [vmem:[#allocation4 + $0x350] sm:$0xff]  ;;  %v920_v11 = vld [vmem:[#allocation4 + $0x378] sm:$0xff] }
 0x379   : > { %v18408_v27 = vcombine.high %v916_v9, %v920_v11  ;;  %v18405_v30 = vcombine.low %v915_v3, %v919_v8 }
 0x37b   : > { %8020 = vmatpush1.bf16.msra.mxu0 %v18365_v18  ;;  %8444 = vmatpush1.bf16.msra.mxu1 %v18367_v20  ;;  %v18399_v18 = vcombine.low %v908_v52, %v912_v21  ;;  %v18406_v20 = vcombine.high %v915_v3, %v919_v8  ;;  %v951_v3 = vld [vmem:[#allocation4 + $0x470] sm:$0xff]  ;;  %v948_v8 = vld [vmem:[#allocation4 + $0x458] sm:$0xff] }
 0x37c   : > { %8021 = vmatprep.subr.bf16.mxu0 %v18374_v53  ;;  %8445 = vmatprep.subr.bf16.mxu1 %v18376_v29  ;;  %v923_v53 = vld [vmem:[#allocation4 + $0x390] sm:$0xff]  ;;  %v928_v29 = vld [vmem:[#allocation4 + $0x3b8] sm:$0xff] }
 0x37d   : > { %v18416_v58 = vcombine.high %v924_v26, %v928_v29  ;;  %v18413_v41 = vcombine.low %v923_v53, %v927_v54 }
 0x37f   : > { %8022 = vmatpush1.bf16.msra.mxu0 %v18373_v34  ;;  %8446 = vmatpush1.bf16.msra.mxu1 %v18375_v33  ;;  %v18407_v34 = vcombine.low %v916_v9, %v920_v11  ;;  %v18414_v33 = vcombine.high %v923_v53, %v927_v54  ;;  %v959_v53 = vld [vmem:[#allocation4 + $0x4b0] sm:$0xff]  ;;  %v956_v54 = vld [vmem:[#allocation4 + $0x498] sm:$0xff] }
 0x380   : > { %8023 = vmatprep.subr.bf16.mxu0 %v18382_v48  ;;  %8447 = vmatprep.subr.bf16.mxu1 %v18384_v39  ;;  %v931_v48 = vld [vmem:[#allocation4 + $0x3d0] sm:$0xff]  ;;  %v936_v39 = vld [vmem:[#allocation4 + $0x3f8] sm:$0xff] }
 0x381   : > { %v18424_v52 = vcombine.high %v932_v57, %v936_v39  ;;  %v18421_v21 = vcombine.low %v931_v48, %v935_v12 }
 0x383   : > { %8024 = vmatpush1.bf16.msra.mxu0 %v18381_v42  ;;  %8448 = vmatpush1.bf16.msra.mxu1 %v18383_v43  ;;  %v18415_v42 = vcombine.low %v924_v26, %v928_v29  ;;  %v18422_v43 = vcombine.high %v931_v48, %v935_v12  ;;  %v967_v48 = vld [vmem:[#allocation4 + $0x4f0] sm:$0xff]  ;;  %v964_v12 = vld [vmem:[#allocation4 + $0x4d8] sm:$0xff] }
 0x384   : > { %8025 = vmatprep.subr.bf16.mxu0 %v18390_v35  ;;  %8449 = vmatprep.subr.bf16.mxu1 %v18392_v56  ;;  %v939_v35 = vld [vmem:[#allocation4 + $0x410] sm:$0xff]  ;;  %v944_v56 = vld [vmem:[#allocation4 + $0x438] sm:$0xff] }
 0x385   : > { %v18432_v9 = vcombine.high %v940_v51, %v944_v56  ;;  %v18429_v11 = vcombine.low %v939_v35, %v943_v6 }
 0x387   : > { %8026 = vmatpush1.bf16.msra.mxu0 %v18389_v23  ;;  %8450 = vmatpush1.bf16.msra.mxu1 %v18391_v62  ;;  %v18423_v23 = vcombine.low %v932_v57, %v936_v39  ;;  %v18430_v62 = vcombine.high %v939_v35, %v943_v6  ;;  %v972_v35 = vld [vmem:[#allocation4 + $0x518] sm:$0xff] }
 0x388   : > { %8027 = vmatprep.subr.bf16.mxu0 %v18398_v61  ;;  %8451 = vmatprep.subr.bf16.mxu1 %v18400_v10  ;;  %v947_v61 = vld [vmem:[#allocation4 + $0x450] sm:$0xff]  ;;  %v952_v10 = vld [vmem:[#allocation4 + $0x478] sm:$0xff] }
 0x389   : > { %v18440_v26 = vcombine.high %v948_v8, %v952_v10  ;;  %v18437_v29 = vcombine.low %v947_v61, %v951_v3 }
 0x38b   : > { %8028 = vmatpush1.bf16.msra.mxu0 %v18397_v13  ;;  %8452 = vmatpush1.bf16.msra.mxu1 %v18399_v18  ;;  %v18431_v13 = vcombine.low %v940_v51, %v944_v56  ;;  %v18438_v18 = vcombine.high %v947_v61, %v951_v3  ;;  %v976_v51 = vld [vmem:[#allocation4 + $0x538] sm:$0xff] }
 0x38c   : > { %8029 = vmatprep.subr.bf16.mxu0 %v18406_v20  ;;  %8453 = vmatprep.subr.bf16.mxu1 %v18408_v27  ;;  %v955_v20 = vld [vmem:[#allocation4 + $0x490] sm:$0xff]  ;;  %v960_v27 = vld [vmem:[#allocation4 + $0x4b8] sm:$0xff]  ;;  %v18464_v61 = vcombine.high %v972_v35, %v976_v51 }
 0x38d   : > { %v18448_v57 = vcombine.high %v956_v54, %v960_v27  ;;  %v18445_v39 = vcombine.low %v955_v20, %v959_v53  ;;  %v984_v3 = vld [vmem:[#allocation4 + $0x578] sm:$0xff] }
 0x38f   : > { %8030 = vmatpush1.bf16.msra.mxu0 %v18405_v30  ;;  %8454 = vmatpush1.bf16.msra.mxu1 %v18407_v34  ;;  %v18439_v30 = vcombine.low %v948_v8, %v952_v10  ;;  %v18446_v34 = vcombine.high %v955_v20, %v959_v53  ;;  %v987_v10 = vld [vmem:[#allocation4 + $0x590] sm:$0xff]  ;;  %v992_v20 = vld [vmem:[#allocation4 + $0x5b8] sm:$0xff] }
 0x390   : > { %8031 = vmatprep.subr.bf16.mxu0 %v18414_v33  ;;  %8455 = vmatprep.subr.bf16.mxu1 %v18416_v58  ;;  %v963_v33 = vld [vmem:[#allocation4 + $0x4d0] sm:$0xff]  ;;  %v968_v58 = vld [vmem:[#allocation4 + $0x4f8] sm:$0xff] }
 0x391   : > { %v18456_v6 = vcombine.high %v964_v12, %v968_v58 }
 0x393   : > { %8032 = vmatpush1.bf16.msra.mxu0 %v18413_v41  ;;  %8456 = vmatpush1.bf16.msra.mxu1 %v18415_v42  ;;  %v18454_v41 = vcombine.high %v963_v33, %v967_v48  ;;  %v971_v42 = vld [vmem:[#allocation4 + $0x510] sm:$0xff] }
 0x394   : > { %8033 = vmatprep.subr.bf16.mxu0 %v18422_v43  ;;  %8457 = vmatprep.subr.bf16.mxu1 %v18424_v52  ;;  %v975_v43 = vld [vmem:[#allocation4 + $0x530] sm:$0xff]  ;;  %v18453_v52 = vcombine.low %v963_v33, %v967_v48 }
 0x395   : > { %v18462_v56 = vcombine.high %v971_v42, %v975_v43  ;;  %v18461_v8 = vcombine.low %v971_v42, %v975_v43 }
 0x397   : > { %8034 = vmatpush1.bf16.msra.mxu0 %v18421_v21  ;;  %8458 = vmatpush1.bf16.msra.mxu1 %v18423_v23  ;;  %v979_v21 = vld [vmem:[#allocation4 + $0x550] sm:$0xff] }
 0x398   : > { %8056 = vmatprep.subr.bf16.mxu0 %v18430_v62  ;;  %8480 = vmatprep.subr.bf16.mxu1 %v18432_v9  ;;  %v983_v23 = vld [vmem:[#allocation4 + $0x570] sm:$0xff]  ;;  %v980_v62 = vld [vmem:[#allocation4 + $0x558] sm:$0xff]  ;;  %v18463_v9 = vcombine.low %v972_v35, %v976_v51 }
 0x399   : > { %v18469_v53 = vcombine.low %v979_v21, %v983_v23  ;;  %v1015_v51 = vld [vmem:[#allocation4 + $0x670] sm:$0xff] }
 0x39a   : > { %8036 = vmatmul.mubr.bf16.vlgmr.msra.gmra.mrb[8].mxu0 %v23706_v15  ;;  %8460 = vmatmul.mubr.bf16.vlgmr.msra.gmra.mrb[8].mxu1 %v23706_v15  ;;  %v18447_v15 = vcombine.low %v956_v54, %v960_v27  ;;  %v18471_v54 = vcombine.low %v980_v62, %v984_v3  ;;  %v995_v27 = vld [vmem:[#allocation4 + $0x5d0] sm:$0xff] }
 0x39b   : > { %8057 = vmatpush1.bf16.msra.mxu0 %v18429_v11  ;;  %8481 = vmatpush1.bf16.msra.mxu1 %v18431_v13  ;;  %v991_v11 = vld [vmem:[#allocation4 + $0x5b0] sm:$0xff]  ;;  %v988_v13 = vld [vmem:[#allocation4 + $0x598] sm:$0xff] }
 0x39c   : > { %8058 = vmatprep.subr.bf16.mxu0 %v18438_v18  ;;  %8482 = vmatprep.subr.bf16.mxu1 %v18440_v26  ;;  %v18472_v18 = vcombine.high %v980_v62, %v984_v3  ;;  %v18478_v26 = vcombine.high %v987_v10, %v991_v11  ;;  %v18477_v33 = vcombine.low %v987_v10, %v991_v11  ;;  %v1023_v3 = vld [vmem:[#allocation4 + $0x6b0] sm:$0xff] }
 0x39d   : > { %8045 = vmatprep.mubr.bf16.mxu0 %v23710_v25  ;;  %8469 = vmatprep.mubr.bf16.mxu1 %v23710_v25  ;;  %v18455_v25 = vcombine.low %v964_v12, %v968_v58  ;;  %v18479_v48 = vcombine.low %v988_v13, %v992_v20  ;;  %v1007_v58 = vld [vmem:[#allocation4 + $0x630] sm:$0xff] }
 0x39f   : > { %8059 = vmatpush1.bf16.msra.mxu0 %v18437_v29  ;;  %8483 = vmatpush1.bf16.msra.mxu1 %v18439_v30  ;;  %v18480_v29 = vcombine.high %v988_v13, %v992_v20  ;;  %v996_v30 = vld [vmem:[#allocation4 + $0x5d8] sm:$0xff]  ;;  %v1031_v20 = vld [vmem:[#allocation4 + $0x6f0] sm:$0xff] }
 0x3a0   : > { %8060 = vmatprep.subr.bf16.mxu0 %v18446_v34  ;;  %8484 = vmatprep.subr.bf16.mxu1 %v18448_v57  ;;  %v1000_v34 = vld [vmem:[#allocation4 + $0x5f8] sm:$0xff]  ;;  %v1003_v57 = vld [vmem:[#allocation4 + $0x610] sm:$0xff] }
 0x3a1   : > { %v18487_v43 = vcombine.low %v996_v30, %v1000_v34  ;;  %v18494_v35 = vcombine.high %v1003_v57, %v1007_v58 }
 0x3a2   : > { %8046 = vmatmul.mubr.bf16.gmra.mrb[12].mxu0 %v23722_v36  ;;  %8470 = vmatmul.mubr.bf16.gmra.mrb[12].mxu1 %v23722_v36  ;;  %v18470_v36 = vcombine.high %v979_v21, %v983_v23  ;;  %v18493_v21 = vcombine.low %v1003_v57, %v1007_v58 }
 0x3a3   : > { %8061 = vmatpush1.bf16.msra.mxu0 %v18445_v39  ;;  %8485 = vmatpush1.bf16.msra.mxu1 %v18447_v15  ;;  %v1004_v39 = vld [vmem:[#allocation4 + $0x618] sm:$0xff]  ;;  %v18488_v15 = vcombine.high %v996_v30, %v1000_v34  ;;  %v1035_v30 = vld [vmem:[#allocation4 + $0x710] sm:$0xff] }
 0x3a4   : > { %8062 = vmatprep.subr.bf16.mxu0 %v18454_v41  ;;  %8486 = vmatprep.subr.bf16.mxu1 %v18456_v6  ;;  %v1008_v41 = vld [vmem:[#allocation4 + $0x638] sm:$0xff]  ;;  %v1011_v6 = vld [vmem:[#allocation4 + $0x650] sm:$0xff] }
 0x3a5   : > { %8088 = vmatprep.mubr.bf16.mxu0 %v23726_v45  ;;  %8512 = vmatprep.mubr.bf16.mxu1 %v23726_v45  ;;  %v999_v45 = vld [vmem:[#allocation4 + $0x5f0] sm:$0xff]  ;;  %v18495_v23 = vcombine.low %v1004_v39, %v1008_v41  ;;  %v18502_v62 = vcombine.high %v1011_v6, %v1015_v51  ;;  %v18501_v10 = vcombine.low %v1011_v6, %v1015_v51 }
 0x3a6   : > { %v18486_v12 = vcombine.high %v995_v27, %v999_v45  ;;  %v18485_v42 = vcombine.low %v995_v27, %v999_v45  ;;  %v1039_v34 = vld [vmem:[#allocation4 + $0x730] sm:$0xff] }
 0x3a7   : > { %8063 = vmatpush1.bf16.msra.mxu0 %v18453_v52  ;;  %8487 = vmatpush1.bf16.msra.mxu1 %v18455_v25  ;;  %v1012_v52 = vld [vmem:[#allocation4 + $0x658] sm:$0xff]  ;;  %v18496_v25 = vcombine.high %v1004_v39, %v1008_v41  ;;  %v18526_v39 = vcombine.high %v1035_v30, %v1039_v34  ;;  %v1047_v41 = vld [vmem:[#allocation4 + $0x770] sm:$0xff]  ;;  %v18525_v6 = vcombine.low %v1035_v30, %v1039_v34 }
 0x3a8   : > { %8064 = vmatprep.subr.bf16.mxu0 %v18462_v56  ;;  %8488 = vmatprep.subr.bf16.mxu1 %v18464_v61  ;;  %v1016_v56 = vld [vmem:[#allocation4 + $0x678] sm:$0xff]  ;;  %v1019_v61 = vld [vmem:[#allocation4 + $0x690] sm:$0xff] }
 0x3a9   : > { %v18503_v11 = vcombine.low %v1012_v52, %v1016_v56  ;;  %v18510_v13 = vcombine.high %v1019_v61, %v1023_v3  ;;  %v18509_v27 = vcombine.low %v1019_v61, %v1023_v3 }
 0x3ab   : > { %8065 = vmatpush1.bf16.msra.mxu0 %v18461_v8  ;;  %8489 = vmatpush1.bf16.msra.mxu1 %v18463_v9  ;;  %v1020_v8 = vld [vmem:[#allocation4 + $0x698] sm:$0xff]  ;;  %v18504_v9 = vcombine.high %v1012_v52, %v1016_v56  ;;  %v1055_v56 = vld [vmem:[#allocation4 + $0x7b0] sm:$0xff] }
 0x3ac   : > { %8066 = vmatprep.subr.bf16.mxu0 %v18470_v36  ;;  %8490 = vmatprep.subr.bf16.mxu1 %v18472_v18  ;;  %v1024_v36 = vld [vmem:[#allocation4 + $0x6b8] sm:$0xff]  ;;  %v1027_v18 = vld [vmem:[#allocation4 + $0x6d0] sm:$0xff] }
 0x3ad   : > { %v18511_v45 = vcombine.low %v1020_v8, %v1024_v36  ;;  %v18517_v57 = vcombine.low %v1027_v18, %v1031_v20 }
 0x3af   : > { %8067 = vmatpush1.bf16.msra.mxu0 %v18469_v53  ;;  %8491 = vmatpush1.bf16.msra.mxu1 %v18471_v54  ;;  %v1028_v53 = vld [vmem:[#allocation4 + $0x6d8] sm:$0xff]  ;;  %v18512_v54 = vcombine.high %v1020_v8, %v1024_v36  ;;  %v1063_v36 = vld [vmem:[#allocation4 + $0x7f0] sm:$0xff] }
 0x3b0   : > { %8068 = vmatprep.subr.bf16.mxu0 %v18478_v26  ;;  %8492 = vmatprep.subr.bf16.mxu1 %v18480_v29  ;;  %v1032_v26 = vld [vmem:[#allocation4 + $0x6f8] sm:$0xff]  ;;  %v18518_v29 = vcombine.high %v1027_v18, %v1031_v20 }
 0x3b1   : > { %v18519_v58 = vcombine.low %v1028_v53, %v1032_v26 }
 0x3b3   : > { %8069 = vmatpush1.bf16.msra.mxu0 %v18477_v33  ;;  %8493 = vmatpush1.bf16.msra.mxu1 %v18479_v48  ;;  %v1036_v33 = vld [vmem:[#allocation4 + $0x718] sm:$0xff]  ;;  %v18520_v48 = vcombine.high %v1028_v53, %v1032_v26  ;;  %v1071_v26 = vld [vmem:[#allocation4 + $0x830] sm:$0xff] }
 0x3b4   : > { %8070 = vmatprep.subr.bf16.mxu0 %v18486_v12  ;;  %8494 = vmatprep.subr.bf16.mxu1 %v18488_v15  ;;  %v1040_v12 = vld [vmem:[#allocation4 + $0x738] sm:$0xff]  ;;  %v1043_v15 = vld [vmem:[#allocation4 + $0x750] sm:$0xff] }
 0x3b5   : > { %v18527_v51 = vcombine.low %v1036_v33, %v1040_v12  ;;  %v18534_v52 = vcombine.high %v1043_v15, %v1047_v41  ;;  %v18533_v61 = vcombine.low %v1043_v15, %v1047_v41 }
 0x3b7   : > { %8071 = vmatpush1.bf16.msra.mxu0 %v18485_v42  ;;  %8495 = vmatpush1.bf16.msra.mxu1 %v18487_v43  ;;  %v1044_v42 = vld [vmem:[#allocation4 + $0x758] sm:$0xff]  ;;  %v18528_v43 = vcombine.high %v1036_v33, %v1040_v12  ;;  %v1079_v12 = vld [vmem:[#allocation4 + $0x870] sm:$0xff] }
 0x3b8   : > { %8072 = vmatprep.subr.bf16.mxu0 %v18494_v35  ;;  %8496 = vmatprep.subr.bf16.mxu1 %v18496_v25  ;;  %v1048_v35 = vld [vmem:[#allocation4 + $0x778] sm:$0xff]  ;;  %v1051_v25 = vld [vmem:[#allocation4 + $0x790] sm:$0xff] }
 0x3b9   : > { %v18535_v3 = vcombine.low %v1044_v42, %v1048_v35  ;;  %v18542_v8 = vcombine.high %v1051_v25, %v1055_v56  ;;  %v18541_v18 = vcombine.low %v1051_v25, %v1055_v56 }
 0x3bb   : > { %8073 = vmatpush1.bf16.msra.mxu0 %v18493_v21  ;;  %8497 = vmatpush1.bf16.msra.mxu1 %v18495_v23  ;;  %v1052_v21 = vld [vmem:[#allocation4 + $0x798] sm:$0xff]  ;;  %v18536_v23 = vcombine.high %v1044_v42, %v1048_v35  ;;  %v1087_v35 = vld [vmem:[#allocation4 + $0x8b0] sm:$0xff] }
 0x3bc   : > { %8074 = vmatprep.subr.bf16.mxu0 %v18502_v62  ;;  %8498 = vmatprep.subr.bf16.mxu1 %v18504_v9  ;;  %v1056_v62 = vld [vmem:[#allocation4 + $0x7b8] sm:$0xff]  ;;  %v1059_v9 = vld [vmem:[#allocation4 + $0x7d0] sm:$0xff] }
 0x3bd   : > { %v18543_v20 = vcombine.low %v1052_v21, %v1056_v62  ;;  %v18550_v53 = vcombine.high %v1059_v9, %v1063_v36  ;;  %v18549_v30 = vcombine.low %v1059_v9, %v1063_v36 }
 0x3bf   : > { %8075 = vmatpush1.bf16.msra.mxu0 %v18501_v10  ;;  %8499 = vmatpush1.bf16.msra.mxu1 %v18503_v11  ;;  %v1060_v10 = vld [vmem:[#allocation4 + $0x7d8] sm:$0xff]  ;;  %v18544_v11 = vcombine.high %v1052_v21, %v1056_v62  ;;  %v1095_v62 = vld [vmem:[#allocation4 + $0x8f0] sm:$0xff] }
 0x3c0   : > { %8076 = vmatprep.subr.bf16.mxu0 %v18510_v13  ;;  %8500 = vmatprep.subr.bf16.mxu1 %v18512_v54  ;;  %v1064_v13 = vld [vmem:[#allocation4 + $0x7f8] sm:$0xff]  ;;  %v1067_v54 = vld [vmem:[#allocation4 + $0x810] sm:$0xff] }
 0x3c1   : > { %v18551_v34 = vcombine.low %v1060_v10, %v1064_v13  ;;  %v18558_v33 = vcombine.high %v1067_v54, %v1071_v26  ;;  %v18557_v15 = vcombine.low %v1067_v54, %v1071_v26  ;;  %v1107_v26 = vld [vmem:[#allocation4 + $0x950] sm:$0xff] }
 0x3c3   : > { %8077 = vmatpush1.bf16.msra.mxu0 %v18509_v27  ;;  %8501 = vmatpush1.bf16.msra.mxu1 %v18511_v45  ;;  %v1068_v27 = vld [vmem:[#allocation4 + $0x818] sm:$0xff]  ;;  %v18552_v45 = vcombine.high %v1060_v10, %v1064_v13  ;;  %v1099_v10 = vld [vmem:[#allocation4 + $0x910] sm:$0xff] }
 0x3c4   : > { %8078 = vmatprep.subr.bf16.mxu0 %v18518_v29  ;;  %8502 = vmatprep.subr.bf16.mxu1 %v18520_v48  ;;  %v1072_v29 = vld [vmem:[#allocation4 + $0x838] sm:$0xff]  ;;  %v1075_v48 = vld [vmem:[#allocation4 + $0x850] sm:$0xff] }
 0x3c5   : > { %v18559_v41 = vcombine.low %v1068_v27, %v1072_v29  ;;  %v18566_v42 = vcombine.high %v1075_v48, %v1079_v12  ;;  %v18565_v25 = vcombine.low %v1075_v48, %v1079_v12  ;;  %v1100_v13 = vld [vmem:[#allocation4 + $0x918] sm:$0xff]  ;;  %v1115_v48 = vld [vmem:[#allocation4 + $0x990] sm:$0xff] }
 0x3c6   : > { %v1119_v12 = vld [vmem:[#allocation4 + $0x9b0] sm:$0xff] }
 0x3c7   : > { %8079 = vmatpush1.bf16.msra.mxu0 %v18517_v57  ;;  %8503 = vmatpush1.bf16.msra.mxu1 %v18519_v58  ;;  %v1076_v57 = vld [vmem:[#allocation4 + $0x858] sm:$0xff]  ;;  %v18560_v58 = vcombine.high %v1068_v27, %v1072_v29  ;;  %v1111_v27 = vld [vmem:[#allocation4 + $0x970] sm:$0xff] }
 0x3c8   : > { %8080 = vmatprep.subr.bf16.mxu0 %v18526_v39  ;;  %8504 = vmatprep.subr.bf16.mxu1 %v18528_v43  ;;  %v1080_v39 = vld [vmem:[#allocation4 + $0x878] sm:$0xff]  ;;  %v1083_v43 = vld [vmem:[#allocation4 + $0x890] sm:$0xff] }
 0x3c9   : > { %v18567_v56 = vcombine.low %v1076_v57, %v1080_v39  ;;  %v18574_v21 = vcombine.high %v1083_v43, %v1087_v35  ;;  %v18573_v9 = vcombine.low %v1083_v43, %v1087_v35  ;;  %v1123_v43 = vld [vmem:[#allocation4 + $0x9d0] sm:$0xff]  ;;  %v1124_v35 = vld [vmem:[#allocation4 + $0x9d8] sm:$0xff] }
 0x3cb   : > { %8081 = vmatpush1.bf16.msra.mxu0 %v18525_v6  ;;  %8505 = vmatpush1.bf16.msra.mxu1 %v18527_v51  ;;  %v1084_v6 = vld [vmem:[#allocation4 + $0x898] sm:$0xff]  ;;  %v18568_v51 = vcombine.high %v1076_v57, %v1080_v39 }
 0x3cc   : > { %8082 = vmatprep.subr.bf16.mxu0 %v18534_v52  ;;  %8506 = vmatprep.subr.bf16.mxu1 %v18536_v23  ;;  %v1088_v52 = vld [vmem:[#allocation4 + $0x8b8] sm:$0xff]  ;;  %v1091_v23 = vld [vmem:[#allocation4 + $0x8d0] sm:$0xff] }
 0x3cd   : > { %v18582_v36 = vcombine.high %v1091_v23, %v1095_v62  ;;  %v1116_v57 = vld [vmem:[#allocation4 + $0x998] sm:$0xff] }
 0x3ce   : > { %v1120_v39 = vld [vmem:[#allocation4 + $0x9b8] sm:$0xff] }
 0x3cf   : > { %8083 = vmatpush1.bf16.msra.mxu0 %v18533_v61  ;;  %8507 = vmatpush1.bf16.msra.mxu1 %v18535_v3  ;;  %v1092_v61 = vld [vmem:[#allocation4 + $0x8d8] sm:$0xff]  ;;  %v18576_v3 = vcombine.high %v1084_v6, %v1088_v52 }
 0x3d0   : > { %8084 = vmatprep.subr.bf16.mxu0 %v18542_v8  ;;  %8508 = vmatprep.subr.bf16.mxu1 %v18544_v11  ;;  %v1096_v8 = vld [vmem:[#allocation4 + $0x8f8] sm:$0xff]  ;;  %v1103_v11 = vld [vmem:[#allocation4 + $0x930] sm:$0xff] }
 0x3d1   : > { %v18590_v54 = vcombine.high %v1099_v10, %v1103_v11 }
 0x3d3   : > { %8085 = vmatpush1.bf16.msra.mxu0 %v18541_v18  ;;  %8509 = vmatpush1.bf16.msra.mxu1 %v18543_v20  ;;  %v18584_v18 = vcombine.high %v1092_v61, %v1096_v8  ;;  %v1104_v20 = vld [vmem:[#allocation4 + $0x938] sm:$0xff] }
 0x3d4   : > { %8086 = vmatprep.subr.bf16.mxu0 %v18550_v53  ;;  %8510 = vmatprep.subr.bf16.mxu1 %v18552_v45  ;;  %v18581_v53 = vcombine.low %v1091_v23, %v1095_v62  ;;  %v1108_v45 = vld [vmem:[#allocation4 + $0x958] sm:$0xff]  ;;  %v18592_v29 = vcombine.high %v1100_v13, %v1104_v20  ;;  %v1135_v23 = vld [vmem:[#allocation4 + $0xa30] sm:$0xff] }
 0x3d5   : > { %v1132_v62 = vld [vmem:[#allocation4 + $0xa18] sm:$0xff] }
 0x3d7   : > { %8087 = vmatpush1.bf16.msra.mxu0 %v18549_v30  ;;  %8511 = vmatpush1.bf16.msra.mxu1 %v18551_v34  ;;  %v1112_v30 = vld [vmem:[#allocation4 + $0x978] sm:$0xff]  ;;  %v18589_v34 = vcombine.low %v1099_v10, %v1103_v11  ;;  %v1139_v10 = vld [vmem:[#allocation4 + $0xa50] sm:$0xff] }
 0x3d8   : > { %8109 = vmatprep.subr.bf16.mxu0 %v18558_v33  ;;  %8533 = vmatprep.subr.bf16.mxu1 %v18560_v58  ;;  %v18591_v33 = vcombine.low %v1100_v13, %v1104_v20  ;;  %v18600_v58 = vcombine.high %v1108_v45, %v1112_v30  ;;  %v1143_v11 = vld [vmem:[#allocation4 + $0xa70] sm:$0xff]  ;;  %v1140_v13 = vld [vmem:[#allocation4 + $0xa58] sm:$0xff] }
 0x3da   : > { %8089 = vmatmul.mubr.bf16.vlgmr.msra.gmra.mrb[8].mxu0 %v23736_v37  ;;  %8513 = vmatmul.mubr.bf16.vlgmr.msra.gmra.mrb[8].mxu1 %v23736_v37  ;;  %v18575_v37 = vcombine.low %v1084_v6, %v1088_v52  ;;  %v18608_v6 = vcombine.high %v1116_v57, %v1120_v39  ;;  %v18605_v52 = vcombine.low %v1115_v48, %v1119_v12 }
 0x3db   : > { %8110 = vmatpush1.bf16.msra.mxu0 %v18557_v15  ;;  %8534 = vmatpush1.bf16.msra.mxu1 %v18559_v41  ;;  %v18597_v15 = vcombine.low %v1107_v26, %v1111_v27  ;;  %v18599_v41 = vcombine.low %v1108_v45, %v1112_v30  ;;  %v1148_v45 = vld [vmem:[#allocation4 + $0xa98] sm:$0xff]  ;;  %v18629_v30 = vcombine.low %v1139_v10, %v1143_v11 }
 0x3dc   : > { %8111 = vmatprep.subr.bf16.mxu0 %v18566_v42  ;;  %8535 = vmatprep.subr.bf16.mxu1 %v18568_v51  ;;  %v18606_v42 = vcombine.high %v1115_v48, %v1119_v12  ;;  %v1128_v51 = vld [vmem:[#allocation4 + $0x9f8] sm:$0xff]  ;;  %v1155_v48 = vld [vmem:[#allocation4 + $0xad0] sm:$0xff] }
 0x3dd   : > { %8098 = vmatprep.mubr.bf16.mxu0 %v23738_v47  ;;  %8522 = vmatprep.mubr.bf16.mxu1 %v23738_v47  ;;  %v18583_v47 = vcombine.low %v1092_v61, %v1096_v8  ;;  %v18616_v61 = vcombine.high %v1124_v35, %v1128_v51  ;;  %v1159_v12 = vld [vmem:[#allocation4 + $0xaf0] sm:$0xff] }
 0x3df   : > { %8112 = vmatpush1.bf16.msra.mxu0 %v18565_v25  ;;  %8536 = vmatpush1.bf16.msra.mxu1 %v18567_v56  ;;  %v18607_v25 = vcombine.low %v1116_v57, %v1120_v39  ;;  %v1156_v57 = vld [vmem:[#allocation4 + $0xad8] sm:$0xff] }
 0x3e0   : > { %8113 = vmatprep.subr.bf16.mxu0 %v18574_v21  ;;  %8537 = vmatprep.subr.bf16.mxu1 %v18576_v3  ;;  %v1131_v21 = vld [vmem:[#allocation4 + $0xa10] sm:$0xff]  ;;  %v1136_v3 = vld [vmem:[#allocation4 + $0xa38] sm:$0xff] }
 0x3e1   : > { %v18621_v20 = vcombine.low %v1131_v21, %v1135_v23 }
 0x3e2   : > { %8099 = vmatmul.mubr.bf16.gmra.mrb[12].mxu0 %v23750_v59  ;;  %8523 = vmatmul.mubr.bf16.gmra.mrb[12].mxu1 %v23750_v59  ;;  %v18598_v59 = vcombine.high %v1107_v26, %v1111_v27  ;;  %v1147_v26 = vld [vmem:[#allocation4 + $0xa90] sm:$0xff] }
 0x3e3   : > { %8114 = vmatpush1.bf16.msra.mxu0 %v18573_v9  ;;  %8538 = vmatpush1.bf16.msra.mxu1 %v18575_v37  ;;  %v18615_v9 = vcombine.low %v1124_v35, %v1128_v51  ;;  %v18622_v37 = vcombine.high %v1131_v21, %v1135_v23  ;;  %v1151_v27 = vld [vmem:[#allocation4 + $0xab0] sm:$0xff]  ;;  %v1164_v35 = vld [vmem:[#allocation4 + $0xb18] sm:$0xff]  ;;  %v18645_v51 = vcombine.low %v1155_v48, %v1159_v12 }
 0x3e4   : > { %8115 = vmatprep.subr.bf16.mxu0 %v18582_v36  ;;  %8539 = vmatprep.subr.bf16.mxu1 %v18584_v18  ;;  %v18624_v36 = vcombine.high %v1132_v62, %v1136_v3  ;;  %v1144_v18 = vld [vmem:[#allocation4 + $0xa78] sm:$0xff]  ;;  %v18637_v39 = vcombine.low %v1147_v26, %v1151_v27  ;;  %v1171_v21 = vld [vmem:[#allocation4 + $0xb50] sm:$0xff] }
 0x3e5   : > { %8141 = vmatprep.mubr.bf16.mxu0 %v23754_v4  ;;  %8565 = vmatprep.mubr.bf16.mxu1 %v23754_v4  ;;  %v1127_v4 = vld [vmem:[#allocation4 + $0x9f0] sm:$0xff] }
 0x3e6   : > { %v18614_v56 = vcombine.high %v1123_v43, %v1127_v4  ;;  %v18613_v8 = vcombine.low %v1123_v43, %v1127_v4  ;;  %v1163_v43 = vld [vmem:[#allocation4 + $0xb10] sm:$0xff] }
 0x3e7   : > { %8116 = vmatpush1.bf16.msra.mxu0 %v18581_v53  ;;  %8540 = vmatpush1.bf16.msra.mxu1 %v18583_v47  ;;  %v18623_v53 = vcombine.low %v1132_v62, %v1136_v3  ;;  %v18630_v47 = vcombine.high %v1139_v10, %v1143_v11  ;;  %v1167_v4 = vld [vmem:[#allocation4 + $0xb30] sm:$0xff]  ;;  %v1172_v62 = vld [vmem:[#allocation4 + $0xb58] sm:$0xff] }
 0x3e8   : > { %8117 = vmatprep.subr.bf16.mxu0 %v18590_v54  ;;  %8541 = vmatprep.subr.bf16.mxu1 %v18592_v29  ;;  %v18632_v54 = vcombine.high %v1140_v13, %v1144_v18  ;;  %v1152_v29 = vld [vmem:[#allocation4 + $0xab8] sm:$0xff]  ;;  %v1175_v23 = vld [vmem:[#allocation4 + $0xb70] sm:$0xff]  ;;  %v18653_v3 = vcombine.low %v1163_v43, %v1167_v4 }
 0x3e9   : > { %v1183_v10 = vld [vmem:[#allocation4 + $0xbb0] sm:$0xff]  ;;  %v1180_v11 = vld [vmem:[#allocation4 + $0xb98] sm:$0xff] }
 0x3eb   : > { %8118 = vmatpush1.bf16.msra.mxu0 %v18589_v34  ;;  %8542 = vmatpush1.bf16.msra.mxu1 %v18591_v33  ;;  %v18631_v34 = vcombine.low %v1140_v13, %v1144_v18  ;;  %v18638_v33 = vcombine.high %v1147_v26, %v1151_v27  ;;  %v1184_v13 = vld [vmem:[#allocation4 + $0xbb8] sm:$0xff]  ;;  %v18661_v18 = vcombine.low %v1171_v21, %v1175_v23  ;;  %v1191_v26 = vld [vmem:[#allocation4 + $0xbf0] sm:$0xff] }
 0x3ec   : > { %8119 = vmatprep.subr.bf16.mxu0 %v18598_v59  ;;  %8543 = vmatprep.subr.bf16.mxu1 %v18600_v58  ;;  %v18640_v59 = vcombine.high %v1148_v45, %v1152_v29  ;;  %v1160_v58 = vld [vmem:[#allocation4 + $0xaf8] sm:$0xff] }
 0x3ed   : > { %v1188_v27 = vld [vmem:[#allocation4 + $0xbd8] sm:$0xff] }
 0x3ef   : > { %8120 = vmatpush1.bf16.msra.mxu0 %v18597_v15  ;;  %8544 = vmatpush1.bf16.msra.mxu1 %v18599_v41  ;;  %v18639_v15 = vcombine.low %v1148_v45, %v1152_v29  ;;  %v18646_v41 = vcombine.high %v1155_v48, %v1159_v12  ;;  %v1192_v45 = vld [vmem:[#allocation4 + $0xbf8] sm:$0xff]  ;;  %v1199_v48 = vld [vmem:[#allocation4 + $0xc30] sm:$0xff] }
 0x3f0   : > { %8121 = vmatprep.subr.bf16.mxu0 %v18606_v42  ;;  %8545 = vmatprep.subr.bf16.mxu1 %v18608_v6  ;;  %v18648_v42 = vcombine.high %v1156_v57, %v1160_v58  ;;  %v1168_v6 = vld [vmem:[#allocation4 + $0xb38] sm:$0xff] }
 0x3f1   : > { %v1196_v12 = vld [vmem:[#allocation4 + $0xc18] sm:$0xff] }
 0x3f3   : > { %8122 = vmatpush1.bf16.msra.mxu0 %v18605_v52  ;;  %8546 = vmatpush1.bf16.msra.mxu1 %v18607_v25  ;;  %v18647_v52 = vcombine.low %v1156_v57, %v1160_v58  ;;  %v18654_v25 = vcombine.high %v1163_v43, %v1167_v4  ;;  %v1200_v57 = vld [vmem:[#allocation4 + $0xc38] sm:$0xff]  ;;  %v1207_v43 = vld [vmem:[#allocation4 + $0xc70] sm:$0xff] }
 0x3f4   : > { %8123 = vmatprep.subr.bf16.mxu0 %v18614_v56  ;;  %8547 = vmatprep.subr.bf16.mxu1 %v18616_v61  ;;  %v18656_v56 = vcombine.high %v1164_v35, %v1168_v6  ;;  %v1176_v61 = vld [vmem:[#allocation4 + $0xb78] sm:$0xff] }
 0x3f5   : > { %v1204_v4 = vld [vmem:[#allocation4 + $0xc58] sm:$0xff] }
 0x3f7   : > { %8124 = vmatpush1.bf16.msra.mxu0 %v18613_v8  ;;  %8548 = vmatpush1.bf16.msra.mxu1 %v18615_v9  ;;  %v18655_v8 = vcombine.low %v1164_v35, %v1168_v6  ;;  %v18662_v9 = vcombine.high %v1171_v21, %v1175_v23  ;;  %v1208_v35 = vld [vmem:[#allocation4 + $0xc78] sm:$0xff]  ;;  %v1215_v21 = vld [vmem:[#allocation4 + $0xcb0] sm:$0xff] }
 0x3f8   : > { %8125 = vmatprep.subr.bf16.mxu0 %v18622_v37  ;;  %8549 = vmatprep.subr.bf16.mxu1 %v18624_v36  ;;  %v18664_v37 = vcombine.high %v1172_v62, %v1176_v61  ;;  %v1179_v36 = vld [vmem:[#allocation4 + $0xb90] sm:$0xff]  ;;  %v1212_v23 = vld [vmem:[#allocation4 + $0xc98] sm:$0xff] }
 0x3f9   : > { %v18669_v29 = vcombine.low %v1179_v36, %v1183_v10 }
 0x3fb   : > { %8126 = vmatpush1.bf16.msra.mxu0 %v18621_v20  ;;  %8550 = vmatpush1.bf16.msra.mxu1 %v18623_v53  ;;  %v18663_v20 = vcombine.low %v1172_v62, %v1176_v61  ;;  %v18670_v53 = vcombine.high %v1179_v36, %v1183_v10  ;;  %v1216_v62 = vld [vmem:[#allocation4 + $0xcb8] sm:$0xff]  ;;  %v1223_v36 = vld [vmem:[#allocation4 + $0xcf0] sm:$0xff] }
 0x3fc   : > { %8127 = vmatprep.subr.bf16.mxu0 %v18630_v47  ;;  %8551 = vmatprep.subr.bf16.mxu1 %v18632_v54  ;;  %v18672_v47 = vcombine.high %v1180_v11, %v1184_v13  ;;  %v1187_v54 = vld [vmem:[#allocation4 + $0xbd0] sm:$0xff]  ;;  %v1220_v10 = vld [vmem:[#allocation4 + $0xcd8] sm:$0xff] }
 0x3fd   : > { %v18677_v58 = vcombine.low %v1187_v54, %v1191_v26 }
 0x3ff   : > { %8128 = vmatpush1.bf16.msra.mxu0 %v18629_v30  ;;  %8552 = vmatpush1.bf16.msra.mxu1 %v18631_v34  ;;  %v18671_v30 = vcombine.low %v1180_v11, %v1184_v13  ;;  %v18678_v34 = vcombine.high %v1187_v54, %v1191_v26  ;;  %v1224_v11 = vld [vmem:[#allocation4 + $0xcf8] sm:$0xff]  ;;  %v1835_v13 = vlaneseq  ;;  %v1231_v54 = vld [vmem:[#allocation4 + $0xd30] sm:$0xff] }
 0x400   : > { %8129 = vmatprep.subr.bf16.mxu0 %v18638_v33  ;;  %8553 = vmatprep.subr.bf16.mxu1 %v18640_v59  ;;  %v18680_v33 = vcombine.high %v1188_v27, %v1192_v45  ;;  %v1195_v59 = vld [vmem:[#allocation4 + $0xc10] sm:$0xff]  ;;  %v1228_v26 = vld [vmem:[#allocation4 + $0xd18] sm:$0xff] }
 0x401   : > { %v18685_v6 = vcombine.low %v1195_v59, %v1199_v48 }
 0x403   : > { %8130 = vmatpush1.bf16.msra.mxu0 %v18637_v39  ;;  %8554 = vmatpush1.bf16.msra.mxu1 %v18639_v15  ;;  %v18679_v39 = vcombine.low %v1188_v27, %v1192_v45  ;;  %v18686_v15 = vcombine.high %v1195_v59, %v1199_v48  ;;  %v1232_v27 = vld [vmem:[#allocation4 + $0xd38] sm:$0xff]  ;;  %v23938_v45 = vshrl.u32 %v1835_v13, 7  ;;  %v1239_v59 = vld [vmem:[#allocation4 + $0xd70] sm:$0xff] }
 0x404   : > { %8131 = vmatprep.subr.bf16.mxu0 %v18646_v41  ;;  %8555 = vmatprep.subr.bf16.mxu1 %v18648_v42  ;;  %v18688_v41 = vcombine.high %v1196_v12, %v1200_v57  ;;  %v1203_v42 = vld [vmem:[#allocation4 + $0xc50] sm:$0xff]  ;;  %v23971_v13 = vld [vmem:[#allocation4 + $0xdd8] sm:$0xff] }
 0x405   : > { %v18693_v61 = vcombine.low %v1203_v42, %v1207_v43  ;;  %v23944_v48 = vsub.s32 0, %v23938_v45 }
 0x407   : > { %8132 = vmatpush1.bf16.msra.mxu0 %v18645_v51  ;;  %8556 = vmatpush1.bf16.msra.mxu1 %v18647_v52  ;;  %v18687_v51 = vcombine.low %v1196_v12, %v1200_v57  ;;  %v18694_v52 = vcombine.high %v1203_v42, %v1207_v43  ;;  %v1236_v12 = vld [vmem:[#allocation4 + $0xd58] sm:$0xff]  ;;  %v23954_v42 = vsub.s32 3, %v23938_v45 }
 0x408   : > { %8133 = vmatprep.subr.bf16.mxu0 %v18654_v25  ;;  %8557 = vmatprep.subr.bf16.mxu1 %v18656_v56  ;;  %v18696_v25 = vcombine.high %v1204_v4, %v1208_v35  ;;  %v1211_v56 = vld [vmem:[#allocation4 + $0xc90] sm:$0xff]  ;;  %v1240_v57 = vld [vmem:[#allocation4 + $0xd78] sm:$0xff] }
 0x40b   : > { %8134 = vmatpush1.bf16.msra.mxu0 %v18653_v3  ;;  %8558 = vmatpush1.bf16.msra.mxu1 %v18655_v8  ;;  %v18695_v3 = vcombine.low %v1204_v4, %v1208_v35  ;;  %v18702_v8 = vcombine.high %v1211_v56, %v1215_v21  ;;  %v18728_v4 = vcombine.high %v1236_v12, %v1240_v57  ;;  %v1243_v35 = vld [vmem:[#allocation4 + $0xd90] sm:$0xff] }
 0x40c   : > { %8135 = vmatprep.subr.bf16.mxu0 %v18662_v9  ;;  %8559 = vmatprep.subr.bf16.mxu1 %v18664_v37  ;;  %v18704_v9 = vcombine.high %v1212_v23, %v1216_v62  ;;  %v1219_v37 = vld [vmem:[#allocation4 + $0xcd0] sm:$0xff] }
 0x40f   : > { %8136 = vmatpush1.bf16.msra.mxu0 %v18661_v18  ;;  %8560 = vmatpush1.bf16.msra.mxu1 %v18663_v20  ;;  %v18701_v18 = vcombine.low %v1211_v56, %v1215_v21  ;;  %v18710_v20 = vcombine.high %v1219_v37, %v1223_v36 }
 0x410   : > { %8137 = vmatprep.subr.bf16.mxu0 %v18670_v53  ;;  %8561 = vmatprep.subr.bf16.mxu1 %v18672_v47  ;;  %v18712_v53 = vcombine.high %v1220_v10, %v1224_v11  ;;  %v1227_v47 = vld [vmem:[#allocation4 + $0xd10] sm:$0xff] }
 0x413   : > { %8138 = vmatpush1.bf16.msra.mxu0 %v18669_v29  ;;  %8562 = vmatpush1.bf16.msra.mxu1 %v18671_v30  ;;  %v18709_v29 = vcombine.low %v1219_v37, %v1223_v36  ;;  %v18718_v30 = vcombine.high %v1227_v47, %v1231_v54  ;;  %v1255_v37 = vld [vmem:[#allocation4 + $0xdf0] sm:$0xff] }
 0x414   : > { %8139 = vmatprep.subr.bf16.mxu0 %v18678_v34  ;;  %8563 = vmatprep.subr.bf16.mxu1 %v18680_v33  ;;  %v18720_v34 = vcombine.high %v1228_v26, %v1232_v27  ;;  %v1235_v33 = vld [vmem:[#allocation4 + $0xd50] sm:$0xff] }
 0x415   : > { %v18726_v43 = vcombine.high %v1235_v33, %v1239_v59  ;;  %v18725_v21 = vcombine.low %v1235_v33, %v1239_v59 }
 0x417   : > { %8140 = vmatpush1.bf16.msra.mxu0 %v18677_v58  ;;  %8564 = vmatpush1.bf16.msra.mxu1 %v18679_v39  ;;  %v18717_v58 = vcombine.low %v1227_v47, %v1231_v54  ;;  %v23948_v39 = vsub.s32 2, %v23938_v45 }
 0x418   : > { %8162 = vmatprep.subr.bf16.mxu0 %v18686_v15  ;;  %8586 = vmatprep.subr.bf16.mxu1 %v18688_v41  ;;  %v23951_v15 = vsub.s32 1, %v23938_v45  ;;  %v18719_v41 = vcombine.low %v1228_v26, %v1232_v27 }
 0x41a   : > { %8142 = vmatmul.mubr.bf16.vlgmr.msra.gmra.mrb[8].mxu0 %v23764_v5  ;;  %8566 = vmatmul.mubr.bf16.vlgmr.msra.gmra.mrb[8].mxu1 %v23764_v5  ;;  %v18703_v5 = vcombine.low %v1212_v23, %v1216_v62  ;;  %v18727_v62 = vcombine.low %v1236_v12, %v1240_v57 }
 0x41b   : > { %8163 = vmatpush1.bf16.msra.mxu0 %v18685_v6  ;;  %8587 = vmatpush1.bf16.msra.mxu1 %v18687_v51  ;;  %v1244_v51 = vld [vmem:[#allocation4 + $0xd98] sm:$0xff] }
 0x41c   : > { %8164 = vmatprep.subr.bf16.mxu0 %v18694_v52  ;;  %8588 = vmatprep.subr.bf16.mxu1 %v18696_v25  ;;  %v1248_v52 = vld [vmem:[#allocation4 + $0xdb8] sm:$0xff] }
 0x41d   : > { %8151 = vmatprep.mubr.bf16.mxu0 %v23766_v14  ;;  %8575 = vmatprep.mubr.bf16.mxu1 %v23766_v14  ;;  %v18711_v14 = vcombine.low %v1220_v10, %v1224_v11  ;;  %v18735_v26 = vcombine.low %v1244_v51, %v1248_v52 }
 0x41f   : > { %8165 = vmatpush1.bf16.msra.mxu0 %v18693_v61  ;;  %8589 = vmatpush1.bf16.msra.mxu1 %v18695_v3 }
 0x420   : > { %8166 = vmatprep.subr.bf16.mxu0 %v18702_v8  ;;  %8590 = vmatprep.subr.bf16.mxu1 %v18704_v9  ;;  %v18736_v8 = vcombine.high %v1244_v51, %v1248_v52  ;;  %v23968_v9 = vld [vmem:[#allocation4 + $0xdd0] sm:$0xff]  ;;  %v1260_v51 = vld [vmem:[#allocation4 + $0xe18] sm:$0xff] }
 0x421   : > { %v18741_v57 = vcombine.low %v23968_v9, %v1255_v37  ;;  %v1264_v52 = vld [vmem:[#allocation4 + $0xe38] sm:$0xff] }
 0x422   : > { %8152 = vmatmul.mubr.bf16.gmra.mrb[12].mxu0 %v23778_v24  ;;  %8576 = vmatmul.mubr.bf16.gmra.mrb[12].mxu1 %v23778_v24  ;;  %v1833_v24 = vld [vmem:[#allocation2] sm:$0xff] }
 0x423   : > { %8167 = vmatpush1.bf16.msra.mxu0 %v18701_v18  ;;  %8591 = vmatpush1.bf16.msra.mxu1 %v18703_v5  ;;  %v23957_v6 = vrot.slane %v1833_v24, %v23944_v48  ;;  %v23960_v25 = vrot.slane %v1833_v24, %v23948_v39  ;;  %v23963_v56 = vrot.slane %v1833_v24, %v23951_v15  ;;  %v23973_v18 = vld [vmem:[#allocation4 + $0xdf8] sm:$0xff] }
 0x424   : > { %8168 = vmatprep.subr.bf16.mxu0 %v18710_v20  ;;  %8592 = vmatprep.subr.bf16.mxu1 %v18712_v53  ;;  %v23966_v23 = vrot.slane %v1833_v24, %v23954_v42  ;;  %v23985_v24 = vld [vmem:[#allocation4 + $0xe10] sm:$0xff] }
 0x425   : > { %8194 = vmatprep.mubr.bf16.mxu0 %v23782_v32  ;;  %8618 = vmatprep.mubr.bf16.mxu1 %v23782_v32  ;;  %v1247_v32 = vld [vmem:[#allocation4 + $0xdb0] sm:$0xff] }
 0x426   : > { %v18734_v61 = vcombine.high %v1243_v35, %v1247_v32  ;;  %v18733_v54 = vcombine.low %v1243_v35, %v1247_v32  ;;  %v18743_v32 = vcombine.low %v23971_v13, %v23973_v18 }
 0x427   : > { %8169 = vmatpush1.bf16.msra.mxu0 %v18709_v29  ;;  %8593 = vmatpush1.bf16.msra.mxu1 %v18711_v14 }
 0x428   : > { %8170 = vmatprep.subr.bf16.mxu0 %v18718_v30  ;;  %8594 = vmatprep.subr.bf16.mxu1 %v18720_v34  ;;  %v18742_v34 = vcombine.high %v23968_v9, %v1255_v37 }
 0x42b   : > { %8171 = vmatpush1.bf16.msra.mxu0 %v18717_v58  ;;  %8595 = vmatpush1.bf16.msra.mxu1 %v18719_v41  ;;  %v18744_v58 = vcombine.high %v23971_v13, %v23973_v18  ;;  %v23987_v41 = vld [vmem:[#allocation4 + $0xe30] sm:$0xff]  ;;  %v18752_v18 = vcombine.high %v1260_v51, %v1264_v52 }
 0x42c   : > { %8172 = vmatprep.subr.bf16.mxu0 %v18726_v43  ;;  %8596 = vmatprep.subr.bf16.mxu1 %v18728_v4 }
 0x42d   : > { %v7560_v3 = vpop.f32.mrb[0].mxu0  ;;  %v7984_v10 = vpop.f32.mrb[0].mxu1 }
 0x42e   : > { %v20529_v36 = vadd.f32 %v7560_v3, %v23957_v6  ;;  %v7562_v11 = vpop.f32.mrb[1].mxu0  ;;  %v20537_v5 = vadd.f32 %v7984_v10, %v23960_v25  ;;  %v7986_v53 = vpop.f32.mrb[1].mxu1 }
 0x42f   : > { %v20530_v20 = vadd.f32 %v7562_v11, %v23963_v56  ;;  %v7564_v47 = vpop.f32.mrb[2].mxu0  ;;  %8173 = vmatpush1.bf16.msra.mxu0 %v18725_v21  ;;  %v20538_v27 = vadd.f32 %v7986_v53, %v23966_v23  ;;  %v7988_v14 = vpop.f32.mrb[2].mxu1  ;;  %8597 = vmatpush1.bf16.msra.mxu1 %v18727_v62 }
 0x430   : > { %v20531_v29 = vadd.f32 %v7564_v47, %v23957_v6  ;;  %v7566_v30 = vpop.f32.mrb[3].mxu0  ;;  %8174 = vmatprep.subr.bf16.mxu0 %v18734_v61  ;;  %v20539_v33 = vadd.f32 %v7988_v14, %v23960_v25  ;;  %v7990_v12 = vpop.f32.mrb[3].mxu1  ;;  %8598 = vmatprep.subr.bf16.mxu1 %v18736_v8  ;;  %v8851_v43 = vmax.f32 %v20529_v36, 0.0  ;;  %v8853_v21 = vmax.f32 %v20537_v5, 0.0  ;;  %v1267_v5 = vld [vmem:[#allocation4 + $0xe50] sm:$0xff] }
 0x431   : > { %v20532_v59 = vadd.f32 %v7566_v30, %v23963_v56  ;;  %v20540_v35 = vadd.f32 %v7990_v12, %v23966_v23  ;;  %v8852_v62 = vmax.f32 %v20530_v20, 0.0  ;;  %v8854_v8 = vmax.f32 %v20538_v27, 0.0  ;;  %v1271_v20 = vld [vmem:[#allocation4 + $0xe70] sm:$0xff] }
 0x432   : > { %v8859_v4 = vmax.f32 %v20531_v29, 0.0  ;;  %v8861_v61 = vmax.f32 %v20539_v33, 0.0  ;;  %v18750_v36 = vcombine.high %v23985_v24, %v23987_v41  ;;  %v1272_v29 = vld [vmem:[#allocation4 + $0xe78] sm:$0xff]  ;;  %v18751_v12 = vcombine.low %v1260_v51, %v1264_v52 }
 0x433   : > { %v8860_v3 = vmax.f32 %v20532_v59, 0.0  ;;  %8175 = vmatpush1.bf16.msra.mxu0 %v18733_v54  ;;  %v8862_v37 = vmax.f32 %v20540_v35, 0.0  ;;  %8599 = vmatpush1.bf16.msra.mxu1 %v18735_v26  ;;  %v1268_v26 = vld [vmem:[#allocation4 + $0xe58] sm:$0xff]  ;;  %v18749_v59 = vcombine.low %v23985_v24, %v23987_v41  ;;  %v1279_v24 = vld [vmem:[#allocation4 + $0xeb0] sm:$0xff] }
 0x434   : > { %v23992_v9 = vpack.c.bf16 %v8859_v4, %v8851_v43  ;;  %8176 = vmatprep.subr.bf16.mxu0 %v18742_v34  ;;  %v23996_v10 = vpack.c.bf16 %v8861_v61, %v8853_v21  ;;  %8600 = vmatprep.subr.bf16.mxu1 %v18744_v58  ;;  %v18758_v21 = vcombine.high %v1267_v5, %v1271_v20 }
 0x435   : > { %v23998_v11 = vpack.c.bf16 %v8860_v3, %v8852_v62  ;;  %v7570_v13 = vpop.f32.mrb[4].mxu0  ;;  %v24000_v53 = vpack.c.bf16 %v8862_v37, %v8854_v8  ;;  %v7994_v54 = vpop.f32.mrb[4].mxu1  ;;  %v18760_v8 = vcombine.high %v1268_v26, %v1272_v29  ;;  %v1275_v37 = vld [vmem:[#allocation4 + $0xe90] sm:$0xff] }
 0x436   : > { %v20533_v47 = vadd.f32 %v7570_v13, %v23957_v6  ;;  %v7572_v27 = vpop.f32.mrb[5].mxu0  ;;  %v20541_v14 = vadd.f32 %v7994_v54, %v23960_v25  ;;  %v7996_v34 = vpop.f32.mrb[5].mxu1  ;;  %v1276_v13 = vld [vmem:[#allocation4 + $0xe98] sm:$0xff] }
 0x437   : > { %v20534_v30 = vadd.f32 %v7572_v27, %v23963_v56  ;;  %v7574_v33 = vpop.f32.mrb[6].mxu0  ;;  %8177 = vmatpush1.bf16.msra.mxu0 %v18741_v57  ;;  %v20542_v58 = vadd.f32 %v7996_v34, %v23966_v23  ;;  %v7998_v4 = vpop.f32.mrb[6].mxu1  ;;  %8601 = vmatpush1.bf16.msra.mxu1 %v18743_v32  ;;  %v18757_v57 = vcombine.low %v1267_v5, %v1271_v20  ;;  %v1280_v32 = vld [vmem:[#allocation4 + $0xeb8] sm:$0xff] }
 0x438   : > { %v20535_v43 = vadd.f32 %v7574_v33, %v23957_v6  ;;  %v7576_v35 = vpop.f32.mrb[7].mxu0  ;;  %8178 = vmatprep.subr.bf16.mxu0 %v18750_v36  ;;  %v20543_v62 = vadd.f32 %v7998_v4, %v23960_v25  ;;  %v8000_v3 = vpop.f32.mrb[7].mxu1  ;;  %8602 = vmatprep.subr.bf16.mxu1 %v18752_v18  ;;  %v8867_v41 = vmax.f32 %v20533_v47, 0.0  ;;  %v18759_v6 = vcombine.low %v1268_v26, %v1272_v29  ;;  %v1283_v26 = vld [vmem:[#allocation4 + $0xed0] sm:$0xff]  ;;  %v1288_v33 = vld [vmem:[#allocation4 + $0xef8] sm:$0xff] }
 0x439   : > { %v20536_v61 = vadd.f32 %v7576_v35, %v23963_v56  ;;  %v20544_v52 = vadd.f32 %v8000_v3, %v23966_v23  ;;  %v8869_v54 = vmax.f32 %v20541_v14, 0.0  ;;  %v8868_v36 = vmax.f32 %v20534_v30, 0.0  ;;  %v1287_v29 = vld [vmem:[#allocation4 + $0xef0] sm:$0xff]  ;;  %v1284_v30 = vld [vmem:[#allocation4 + $0xed8] sm:$0xff] }
 0x43a   : > { %v8875_v51 = vmax.f32 %v20535_v43, 0.0  ;;  %v8877_v27 = vmax.f32 %v20543_v62, 0.0  ;;  %v8870_v25 = vmax.f32 %v20542_v58, 0.0  ;;  %v18766_v5 = vcombine.high %v1275_v37, %v1279_v24  ;;  %v1291_v4 = vld [vmem:[#allocation4 + $0xf10] sm:$0xff]  ;;  %v1296_v62 = vld [vmem:[#allocation4 + $0xf38] sm:$0xff] }
 0x43b   : > { %v8876_v34 = vmax.f32 %v20536_v61, 0.0  ;;  %8179 = vmatpush1.bf16.msra.mxu0 %v18749_v59  ;;  %v8878_v18 = vmax.f32 %v20544_v52, 0.0  ;;  %8603 = vmatpush1.bf16.msra.mxu1 %v18751_v12  ;;  %v18768_v23 = vcombine.high %v1276_v13, %v1280_v32  ;;  %v18765_v59 = vcombine.low %v1275_v37, %v1279_v24  ;;  %v1295_v35 = vld [vmem:[#allocation4 + $0xf30] sm:$0xff]  ;;  %v1300_v24 = vld [vmem:[#allocation4 + $0xf58] sm:$0xff] }
 0x43c   : > { %v24012_v56 = vpack.c.bf16 %v8875_v51, %v8867_v41  ;;  %8180 = vmatprep.subr.bf16.mxu0 %v18758_v21  ;;  %v24014_v20 = vpack.c.bf16 %v8877_v27, %v8869_v54  ;;  %8604 = vmatprep.subr.bf16.mxu1 %v18760_v8  ;;  %v18767_v58 = vcombine.low %v1276_v13, %v1280_v32  ;;  %v1292_v21 = vld [vmem:[#allocation4 + $0xf18] sm:$0xff]  ;;  %v1303_v37 = vld [vmem:[#allocation4 + $0xf70] sm:$0xff] }
 0x43d   : > { %v24016_v47 = vpack.c.bf16 %v8876_v34, %v8868_v36  ;;  %v24018_v14 = vpack.c.bf16 %v8878_v18, %v8870_v25  ;;  %v18774_v12 = vcombine.high %v1283_v26, %v1287_v29  ;;  %v18776_v43 = vcombine.high %v1284_v30, %v1288_v33  ;;  %v1304_v51 = vld [vmem:[#allocation4 + $0xf78] sm:$0xff]  ;;  %v1307_v54 = vld [vmem:[#allocation4 + $0xf90] sm:$0xff] }
 0x43e   : > { %v18773_v61 = vcombine.low %v1283_v26, %v1287_v29  ;;  %v18775_v3 = vcombine.low %v1284_v30, %v1288_v33  ;;  %v18782_v8 = vcombine.high %v1291_v4, %v1295_v35  ;;  %v18784_v41 = vcombine.high %v1292_v21, %v1296_v62  ;;  %v1311_v36 = vld [vmem:[#allocation4 + $0xfb0] sm:$0xff]  ;;  %v1308_v27 = vld [vmem:[#allocation4 + $0xf98] sm:$0xff] }
 0x43f   : > { %8181 = vmatpush1.bf16.msra.mxu0 %v18757_v57  ;;  %8605 = vmatpush1.bf16.msra.mxu1 %v18759_v6  ;;  %v1299_v57 = vld [vmem:[#allocation4 + $0xf50] sm:$0xff]  ;;  %v18781_v52 = vcombine.low %v1291_v4, %v1295_v35  ;;  %v18783_v6 = vcombine.low %v1292_v21, %v1296_v62  ;;  %v18792_v32 = vcombine.high %v1300_v24, %v1304_v51  ;;  %v1312_v34 = vld [vmem:[#allocation4 + $0xfb8] sm:$0xff] }
 0x440   : > { %8182 = vmatprep.subr.bf16.mxu0 %v18766_v5  ;;  %8606 = vmatprep.subr.bf16.mxu1 %v18768_v23  ;;  %v18790_v13 = vcombine.high %v1299_v57, %v1303_v37  ;;  %v18789_v25 = vcombine.low %v1299_v57, %v1303_v37  ;;  %v18791_v18 = vcombine.low %v1300_v24, %v1304_v51  ;;  %v1315_v26 = vld [vmem:[#allocation4 + $0xfd0] sm:$0xff]  ;;  %v1316_v30 = vld [vmem:[#allocation4 + $0xfd8] sm:$0xff] }
 0x441   : > { %v18798_v5 = vcombine.high %v1307_v54, %v1311_v36  ;;  %v18800_v23 = vcombine.high %v1308_v27, %v1312_v34  ;;  %v1319_v29 = vld [vmem:[#allocation4 + $0xff0] sm:$0xff]  ;;  %v1320_v33 = vld [vmem:[#allocation4 + $0xff8] sm:$0xff] }
 0x442   : > { %v1323_v4 = vld [vmem:[#allocation4 + $0x1010] sm:$0xff]  ;;  %v1324_v21 = vld [vmem:[#allocation4 + $0x1018] sm:$0xff] }
 0x443   : > { %8183 = vmatpush1.bf16.msra.mxu0 %v18765_v59  ;;  %8607 = vmatpush1.bf16.msra.mxu1 %v18767_v58  ;;  %v18797_v59 = vcombine.low %v1307_v54, %v1311_v36  ;;  %v18799_v58 = vcombine.low %v1308_v27, %v1312_v34  ;;  %v1327_v35 = vld [vmem:[#allocation4 + $0x1030] sm:$0xff]  ;;  %v1328_v62 = vld [vmem:[#allocation4 + $0x1038] sm:$0xff] }
 0x444   : > { %8184 = vmatprep.subr.bf16.mxu0 %v18774_v12  ;;  %8608 = vmatprep.subr.bf16.mxu1 %v18776_v43  ;;  %v18806_v12 = vcombine.high %v1315_v26, %v1319_v29  ;;  %v18808_v43 = vcombine.high %v1316_v30, %v1320_v33  ;;  %v1331_v57 = vld [vmem:[#allocation4 + $0x1050] sm:$0xff]  ;;  %v1332_v24 = vld [vmem:[#allocation4 + $0x1058] sm:$0xff] }
 0x445   : > { %v1335_v37 = vld [vmem:[#allocation4 + $0x1070] sm:$0xff]  ;;  %v1336_v51 = vld [vmem:[#allocation4 + $0x1078] sm:$0xff] }
 0x446   : > { %v1339_v54 = vld [vmem:[#allocation4 + $0x1090] sm:$0xff]  ;;  %v1340_v27 = vld [vmem:[#allocation4 + $0x1098] sm:$0xff] }
 0x447   : > { %8185 = vmatpush1.bf16.msra.mxu0 %v18773_v61  ;;  %8609 = vmatpush1.bf16.msra.mxu1 %v18775_v3  ;;  %v18805_v61 = vcombine.low %v1315_v26, %v1319_v29  ;;  %v18807_v3 = vcombine.low %v1316_v30, %v1320_v33  ;;  %v1343_v36 = vld [vmem:[#allocation4 + $0x10b0] sm:$0xff]  ;;  %v1344_v34 = vld [vmem:[#allocation4 + $0x10b8] sm:$0xff] }
 0x448   : > { %8186 = vmatprep.subr.bf16.mxu0 %v18782_v8  ;;  %8610 = vmatprep.subr.bf16.mxu1 %v18784_v41  ;;  %v18814_v8 = vcombine.high %v1323_v4, %v1327_v35  ;;  %v18816_v41 = vcombine.high %v1324_v21, %v1328_v62  ;;  %v1347_v26 = vld [vmem:[#allocation4 + $0x10d0] sm:$0xff]  ;;  %v1348_v30 = vld [vmem:[#allocation4 + $0x10d8] sm:$0xff] }
 0x449   : > { %v1351_v29 = vld [vmem:[#allocation4 + $0x10f0] sm:$0xff]  ;;  %v1352_v33 = vld [vmem:[#allocation4 + $0x10f8] sm:$0xff] }
 0x44b   : > { %8187 = vmatpush1.bf16.msra.mxu0 %v18781_v52  ;;  %8611 = vmatpush1.bf16.msra.mxu1 %v18783_v6  ;;  %v18813_v52 = vcombine.low %v1323_v4, %v1327_v35  ;;  %v18815_v6 = vcombine.low %v1324_v21, %v1328_v62  ;;  %v1359_v4 = vld [vmem:[#allocation4 + $0x1130] sm:$0xff]  ;;  %v1356_v35 = vld [vmem:[#allocation4 + $0x1118] sm:$0xff]  ;;  %v18837_v62 = vcombine.low %v1347_v26, %v1351_v29 }
 0x44c   : > { %8188 = vmatprep.subr.bf16.mxu0 %v18790_v13  ;;  %8612 = vmatprep.subr.bf16.mxu1 %v18792_v32  ;;  %v18822_v13 = vcombine.high %v1331_v57, %v1335_v37  ;;  %v18824_v32 = vcombine.high %v1332_v24, %v1336_v51  ;;  %v1360_v21 = vld [vmem:[#allocation4 + $0x1138] sm:$0xff] }
 0x44f   : > { %8189 = vmatpush1.bf16.msra.mxu0 %v18789_v25  ;;  %8613 = vmatpush1.bf16.msra.mxu1 %v18791_v18  ;;  %v18821_v25 = vcombine.low %v1331_v57, %v1335_v37  ;;  %v18823_v18 = vcombine.low %v1332_v24, %v1336_v51  ;;  %v1364_v57 = vld [vmem:[#allocation4 + $0x1158] sm:$0xff]  ;;  %v18847_v51 = vcombine.low %v1356_v35, %v1360_v21 }
 0x450   : > { %8190 = vmatprep.subr.bf16.mxu0 %v18798_v5  ;;  %8614 = vmatprep.subr.bf16.mxu1 %v18800_v23  ;;  %v18830_v5 = vcombine.high %v1339_v54, %v1343_v36  ;;  %v18832_v23 = vcombine.high %v1340_v27, %v1344_v34  ;;  %v1368_v37 = vld [vmem:[#allocation4 + $0x1178] sm:$0xff] }
 0x453   : > { %8191 = vmatpush1.bf16.msra.mxu0 %v18797_v59  ;;  %8615 = vmatpush1.bf16.msra.mxu1 %v18799_v58  ;;  %v18829_v59 = vcombine.low %v1339_v54, %v1343_v36  ;;  %v18838_v58 = vcombine.high %v1347_v26, %v1351_v29  ;;  %v1376_v54 = vld [vmem:[#allocation4 + $0x11b8] sm:$0xff] }
 0x454   : > { %8192 = vmatprep.subr.bf16.mxu0 %v18806_v12  ;;  %8616 = vmatprep.subr.bf16.mxu1 %v18808_v43  ;;  %v18840_v12 = vcombine.high %v1348_v30, %v1352_v33  ;;  %v1355_v43 = vld [vmem:[#allocation4 + $0x1110] sm:$0xff] }
 0x455   : > { %v18845_v24 = vcombine.low %v1355_v43, %v1359_v4 }
 0x457   : > { %8193 = vmatpush1.bf16.msra.mxu0 %v18805_v61  ;;  %8617 = vmatpush1.bf16.msra.mxu1 %v18807_v3  ;;  %v18846_v61 = vcombine.high %v1355_v43, %v1359_v4  ;;  %v18848_v3 = vcombine.high %v1356_v35, %v1360_v21 }
 0x458   : > { %8215 = vmatprep.subr.bf16.mxu0 %v18814_v8  ;;  %8639 = vmatprep.subr.bf16.mxu1 %v18816_v41  ;;  %v1363_v8 = vld [vmem:[#allocation4 + $0x1150] sm:$0xff] }
 0x459   : > { %v1367_v41 = vld [vmem:[#allocation4 + $0x1170] sm:$0xff] }
 0x45a   : > { %8195 = vmatmul.mubr.bf16.vlgmr.msra.gmra.mrb[8].mxu0 %v23792_v46  ;;  %8619 = vmatmul.mubr.bf16.vlgmr.msra.gmra.mrb[8].mxu1 %v23792_v46  ;;  %v18831_v46 = vcombine.low %v1340_v27, %v1344_v34  ;;  %v18853_v36 = vcombine.low %v1363_v8, %v1367_v41  ;;  %v18855_v27 = vcombine.low %v1364_v57, %v1368_v37 }
 0x45b   : > { %8216 = vmatpush1.bf16.msra.mxu0 %v18813_v52  ;;  %8640 = vmatpush1.bf16.msra.mxu1 %v18815_v6  ;;  %v18856_v52 = vcombine.high %v1364_v57, %v1368_v37  ;;  %v1371_v6 = vld [vmem:[#allocation4 + $0x1190] sm:$0xff] }
 0x45c   : > { %8217 = vmatprep.subr.bf16.mxu0 %v18822_v13  ;;  %8641 = vmatprep.subr.bf16.mxu1 %v18824_v32  ;;  %v1375_v13 = vld [vmem:[#allocation4 + $0x11b0] sm:$0xff]  ;;  %v1372_v32 = vld [vmem:[#allocation4 + $0x1198] sm:$0xff] }
 0x45d   : > { %8204 = vmatprep.mubr.bf16.mxu0 %v23794_v60  ;;  %8628 = vmatprep.mubr.bf16.mxu1 %v23794_v60  ;;  %v18839_v60 = vcombine.low %v1348_v30, %v1352_v33  ;;  %v18862_v34 = vcombine.high %v1371_v6, %v1375_v13  ;;  %v18861_v26 = vcombine.low %v1371_v6, %v1375_v13 }
 0x45e   : > { %v18863_v29 = vcombine.low %v1372_v32, %v1376_v54 }
 0x45f   : > { %8218 = vmatpush1.bf16.msra.mxu0 %v18821_v25  ;;  %8642 = vmatpush1.bf16.msra.mxu1 %v18823_v18  ;;  %v1379_v25 = vld [vmem:[#allocation4 + $0x11d0] sm:$0xff] }
 0x460   : > { %8219 = vmatprep.subr.bf16.mxu0 %v18830_v5  ;;  %8643 = vmatprep.subr.bf16.mxu1 %v18832_v23  ;;  %v1383_v18 = vld [vmem:[#allocation4 + $0x11f0] sm:$0xff]  ;;  %v1380_v5 = vld [vmem:[#allocation4 + $0x11d8] sm:$0xff] }
 0x461   : > { %v1384_v23 = vld [vmem:[#allocation4 + $0x11f8] sm:$0xff]  ;;  %v18870_v30 = vcombine.high %v1379_v25, %v1383_v18  ;;  %v18869_v43 = vcombine.low %v1379_v25, %v1383_v18 }
 0x462   : > { %8205 = vmatmul.mubr.bf16.gmra.mrb[12].mxu0 %v23806_v7  ;;  %8629 = vmatmul.mubr.bf16.gmra.mrb[12].mxu1 %v23806_v7  ;;  %v18854_v7 = vcombine.high %v1363_v8, %v1367_v41  ;;  %v18872_v33 = vcombine.high %v1380_v5, %v1384_v23  ;;  %v18871_v4 = vcombine.low %v1380_v5, %v1384_v23 }
 0x463   : > { %8220 = vmatpush1.bf16.msra.mxu0 %v18829_v59  ;;  %8644 = vmatpush1.bf16.msra.mxu1 %v18831_v46  ;;  %v1387_v59 = vld [vmem:[#allocation4 + $0x1210] sm:$0xff] }
 0x464   : > { %8221 = vmatprep.subr.bf16.mxu0 %v18838_v58  ;;  %8645 = vmatprep.subr.bf16.mxu1 %v18840_v12  ;;  %v1391_v46 = vld [vmem:[#allocation4 + $0x1230] sm:$0xff]  ;;  %v1388_v58 = vld [vmem:[#allocation4 + $0x1218] sm:$0xff] }
 0x465   : > { %8247 = vmatprep.mubr.bf16.mxu0 %v23810_v16  ;;  %8671 = vmatprep.mubr.bf16.mxu1 %v23810_v16  ;;  %v18864_v16 = vcombine.high %v1372_v32, %v1376_v54  ;;  %v1392_v12 = vld [vmem:[#allocation4 + $0x1238] sm:$0xff]  ;;  %v18878_v35 = vcombine.high %v1387_v59, %v1391_v46  ;;  %v18877_v8 = vcombine.low %v1387_v59, %v1391_v46 }
 0x466   : > { %v18880_v21 = vcombine.high %v1388_v58, %v1392_v12  ;;  %v18879_v41 = vcombine.low %v1388_v58, %v1392_v12 }
 0x467   : > { %8222 = vmatpush1.bf16.msra.mxu0 %v18837_v62  ;;  %8646 = vmatpush1.bf16.msra.mxu1 %v18839_v60  ;;  %v1395_v62 = vld [vmem:[#allocation4 + $0x1250] sm:$0xff] }
 0x468   : > { %8223 = vmatprep.subr.bf16.mxu0 %v18846_v61  ;;  %8647 = vmatprep.subr.bf16.mxu1 %v18848_v3  ;;  %v1399_v60 = vld [vmem:[#allocation4 + $0x1270] sm:$0xff]  ;;  %v1396_v61 = vld [vmem:[#allocation4 + $0x1258] sm:$0xff] }
 0x469   : > { %v1400_v3 = vld [vmem:[#allocation4 + $0x1278] sm:$0xff]  ;;  %v18886_v57 = vcombine.high %v1395_v62, %v1399_v60  ;;  %v18885_v6 = vcombine.low %v1395_v62, %v1399_v60 }
 0x46a   : > { %v18888_v37 = vcombine.high %v1396_v61, %v1400_v3  ;;  %v18887_v13 = vcombine.low %v1396_v61, %v1400_v3 }
 0x46b   : > { %8224 = vmatpush1.bf16.msra.mxu0 %v18845_v24  ;;  %8648 = vmatpush1.bf16.msra.mxu1 %v18847_v51  ;;  %v1403_v24 = vld [vmem:[#allocation4 + $0x1290] sm:$0xff] }
 0x46c   : > { %8225 = vmatprep.subr.bf16.mxu0 %v18854_v7  ;;  %8649 = vmatprep.subr.bf16.mxu1 %v18856_v52  ;;  %v1407_v51 = vld [vmem:[#allocation4 + $0x12b0] sm:$0xff]  ;;  %v1404_v7 = vld [vmem:[#allocation4 + $0x1298] sm:$0xff] }
 0x46d   : > { %v1408_v52 = vld [vmem:[#allocation4 + $0x12b8] sm:$0xff]  ;;  %v18894_v32 = vcombine.high %v1403_v24, %v1407_v51  ;;  %v18893_v25 = vcombine.low %v1403_v24, %v1407_v51 }
 0x46e   : > { %v18896_v54 = vcombine.high %v1404_v7, %v1408_v52  ;;  %v18895_v18 = vcombine.low %v1404_v7, %v1408_v52 }
 0x46f   : > { %8226 = vmatpush1.bf16.msra.mxu0 %v18853_v36  ;;  %8650 = vmatpush1.bf16.msra.mxu1 %v18855_v27  ;;  %v1411_v36 = vld [vmem:[#allocation4 + $0x12d0] sm:$0xff] }
 0x470   : > { %8227 = vmatprep.subr.bf16.mxu0 %v18862_v34  ;;  %8651 = vmatprep.subr.bf16.mxu1 %v18864_v16  ;;  %v1415_v27 = vld [vmem:[#allocation4 + $0x12f0] sm:$0xff]  ;;  %v1412_v34 = vld [vmem:[#allocation4 + $0x12d8] sm:$0xff] }
 0x471   : > { %v1416_v16 = vld [vmem:[#allocation4 + $0x12f8] sm:$0xff]  ;;  %v18902_v5 = vcombine.high %v1411_v36, %v1415_v27  ;;  %v18901_v59 = vcombine.low %v1411_v36, %v1415_v27 }
 0x472   : > { %v18904_v23 = vcombine.high %v1412_v34, %v1416_v16  ;;  %v18903_v46 = vcombine.low %v1412_v34, %v1416_v16 }
 0x473   : > { %8228 = vmatpush1.bf16.msra.mxu0 %v18861_v26  ;;  %8652 = vmatpush1.bf16.msra.mxu1 %v18863_v29  ;;  %v1419_v26 = vld [vmem:[#allocation4 + $0x1310] sm:$0xff] }
 0x474   : > { %8229 = vmatprep.subr.bf16.mxu0 %v18870_v30  ;;  %8653 = vmatprep.subr.bf16.mxu1 %v18872_v33  ;;  %v1423_v29 = vld [vmem:[#allocation4 + $0x1330] sm:$0xff]  ;;  %v1420_v30 = vld [vmem:[#allocation4 + $0x1318] sm:$0xff] }
 0x475   : > { %v1424_v33 = vld [vmem:[#allocation4 + $0x1338] sm:$0xff]  ;;  %v18910_v58 = vcombine.high %v1419_v26, %v1423_v29  ;;  %v18909_v62 = vcombine.low %v1419_v26, %v1423_v29 }
 0x476   : > { %v18912_v12 = vcombine.high %v1420_v30, %v1424_v33  ;;  %v18911_v60 = vcombine.low %v1420_v30, %v1424_v33 }
 0x477   : > { %8230 = vmatpush1.bf16.msra.mxu0 %v18869_v43  ;;  %8654 = vmatpush1.bf16.msra.mxu1 %v18871_v4  ;;  %v1427_v43 = vld [vmem:[#allocation4 + $0x1350] sm:$0xff] }
 0x478   : > { %8231 = vmatprep.subr.bf16.mxu0 %v18878_v35  ;;  %8655 = vmatprep.subr.bf16.mxu1 %v18880_v21  ;;  %v1431_v4 = vld [vmem:[#allocation4 + $0x1370] sm:$0xff]  ;;  %v1428_v35 = vld [vmem:[#allocation4 + $0x1358] sm:$0xff] }
 0x479   : > { %v1432_v21 = vld [vmem:[#allocation4 + $0x1378] sm:$0xff]  ;;  %v18918_v61 = vcombine.high %v1427_v43, %v1431_v4  ;;  %v18917_v24 = vcombine.low %v1427_v43, %v1431_v4 }
 0x47a   : > { %v18920_v3 = vcombine.high %v1428_v35, %v1432_v21  ;;  %v18919_v51 = vcombine.low %v1428_v35, %v1432_v21 }
 0x47b   : > { %8232 = vmatpush1.bf16.msra.mxu0 %v18877_v8  ;;  %8656 = vmatpush1.bf16.msra.mxu1 %v18879_v41  ;;  %v1435_v8 = vld [vmem:[#allocation4 + $0x1390] sm:$0xff] }
 0x47c   : > { %8233 = vmatprep.subr.bf16.mxu0 %v18886_v57  ;;  %8657 = vmatprep.subr.bf16.mxu1 %v18888_v37  ;;  %v1439_v41 = vld [vmem:[#allocation4 + $0x13b0] sm:$0xff]  ;;  %v1436_v57 = vld [vmem:[#allocation4 + $0x1398] sm:$0xff] }
 0x47d   : > { %v1440_v37 = vld [vmem:[#allocation4 + $0x13b8] sm:$0xff]  ;;  %v18926_v7 = vcombine.high %v1435_v8, %v1439_v41  ;;  %v18925_v36 = vcombine.low %v1435_v8, %v1439_v41 }
 0x47e   : > { %v18928_v52 = vcombine.high %v1436_v57, %v1440_v37  ;;  %v18927_v27 = vcombine.low %v1436_v57, %v1440_v37 }
 0x47f   : > { %8234 = vmatpush1.bf16.msra.mxu0 %v18885_v6  ;;  %8658 = vmatpush1.bf16.msra.mxu1 %v18887_v13  ;;  %v1443_v6 = vld [vmem:[#allocation4 + $0x13d0] sm:$0xff] }
 0x480   : > { %8235 = vmatprep.subr.bf16.mxu0 %v18894_v32  ;;  %8659 = vmatprep.subr.bf16.mxu1 %v18896_v54  ;;  %v1447_v13 = vld [vmem:[#allocation4 + $0x13f0] sm:$0xff]  ;;  %v1444_v32 = vld [vmem:[#allocation4 + $0x13d8] sm:$0xff] }
 0x481   : > { %v1448_v54 = vld [vmem:[#allocation4 + $0x13f8] sm:$0xff]  ;;  %v18934_v34 = vcombine.high %v1443_v6, %v1447_v13  ;;  %v18933_v26 = vcombine.low %v1443_v6, %v1447_v13 }
 0x482   : > { %v18936_v16 = vcombine.high %v1444_v32, %v1448_v54  ;;  %v18935_v29 = vcombine.low %v1444_v32, %v1448_v54  ;;  %v1483_v54 = vld [vmem:[#allocation4 + $0x1510] sm:$0xff] }
 0x483   : > { %8236 = vmatpush1.bf16.msra.mxu0 %v18893_v25  ;;  %8660 = vmatpush1.bf16.msra.mxu1 %v18895_v18  ;;  %v1451_v25 = vld [vmem:[#allocation4 + $0x1410] sm:$0xff] }
 0x484   : > { %8237 = vmatprep.subr.bf16.mxu0 %v18902_v5  ;;  %8661 = vmatprep.subr.bf16.mxu1 %v18904_v23  ;;  %v1455_v18 = vld [vmem:[#allocation4 + $0x1430] sm:$0xff]  ;;  %v1452_v5 = vld [vmem:[#allocation4 + $0x1418] sm:$0xff] }
 0x485   : > { %v1456_v23 = vld [vmem:[#allocation4 + $0x1438] sm:$0xff]  ;;  %v18942_v30 = vcombine.high %v1451_v25, %v1455_v18  ;;  %v18941_v43 = vcombine.low %v1451_v25, %v1455_v18 }
 0x486   : > { %v18944_v33 = vcombine.high %v1452_v5, %v1456_v23  ;;  %v18943_v4 = vcombine.low %v1452_v5, %v1456_v23  ;;  %v1491_v5 = vld [vmem:[#allocation4 + $0x1550] sm:$0xff] }
 0x487   : > { %8238 = vmatpush1.bf16.msra.mxu0 %v18901_v59  ;;  %8662 = vmatpush1.bf16.msra.mxu1 %v18903_v46  ;;  %v1459_v59 = vld [vmem:[#allocation4 + $0x1450] sm:$0xff] }
 0x488   : > { %8239 = vmatprep.subr.bf16.mxu0 %v18910_v58  ;;  %8663 = vmatprep.subr.bf16.mxu1 %v18912_v12  ;;  %v1463_v46 = vld [vmem:[#allocation4 + $0x1470] sm:$0xff]  ;;  %v1460_v58 = vld [vmem:[#allocation4 + $0x1458] sm:$0xff] }
 0x489   : > { %v1464_v12 = vld [vmem:[#allocation4 + $0x1478] sm:$0xff]  ;;  %v18950_v35 = vcombine.high %v1459_v59, %v1463_v46  ;;  %v18949_v8 = vcombine.low %v1459_v59, %v1463_v46  ;;  %v1495_v23 = vld [vmem:[#allocation4 + $0x1570] sm:$0xff] }
 0x48a   : > { %v18952_v21 = vcombine.high %v1460_v58, %v1464_v12  ;;  %v18951_v41 = vcombine.low %v1460_v58, %v1464_v12  ;;  %v1499_v46 = vld [vmem:[#allocation4 + $0x1590] sm:$0xff]  ;;  %v1500_v12 = vld [vmem:[#allocation4 + $0x1598] sm:$0xff] }
 0x48b   : > { %8240 = vmatpush1.bf16.msra.mxu0 %v18909_v62  ;;  %8664 = vmatpush1.bf16.msra.mxu1 %v18911_v60  ;;  %v1467_v62 = vld [vmem:[#allocation4 + $0x1490] sm:$0xff] }
 0x48c   : > { %8241 = vmatprep.subr.bf16.mxu0 %v18918_v61  ;;  %8665 = vmatprep.subr.bf16.mxu1 %v18920_v3  ;;  %v1471_v60 = vld [vmem:[#allocation4 + $0x14b0] sm:$0xff]  ;;  %v1468_v61 = vld [vmem:[#allocation4 + $0x1498] sm:$0xff] }
 0x48d   : > { %v1472_v3 = vld [vmem:[#allocation4 + $0x14b8] sm:$0xff]  ;;  %v18958_v57 = vcombine.high %v1467_v62, %v1471_v60  ;;  %v18957_v6 = vcombine.low %v1467_v62, %v1471_v60  ;;  %v1503_v58 = vld [vmem:[#allocation4 + $0x15b0] sm:$0xff] }
 0x48e   : > { %v18960_v37 = vcombine.high %v1468_v61, %v1472_v3  ;;  %v1507_v62 = vld [vmem:[#allocation4 + $0x15d0] sm:$0xff] }
 0x48f   : > { %8242 = vmatpush1.bf16.msra.mxu0 %v18917_v24  ;;  %8666 = vmatpush1.bf16.msra.mxu1 %v18919_v51  ;;  %v1475_v24 = vld [vmem:[#allocation4 + $0x14d0] sm:$0xff] }
 0x490   : > { %8243 = vmatprep.subr.bf16.mxu0 %v18926_v7  ;;  %8667 = vmatprep.subr.bf16.mxu1 %v18928_v52  ;;  %v1479_v51 = vld [vmem:[#allocation4 + $0x14f0] sm:$0xff]  ;;  %v1476_v7 = vld [vmem:[#allocation4 + $0x14d8] sm:$0xff] }
 0x491   : > { %v1480_v52 = vld [vmem:[#allocation4 + $0x14f8] sm:$0xff]  ;;  %v18966_v13 = vcombine.high %v1475_v24, %v1479_v51  ;;  %v1511_v60 = vld [vmem:[#allocation4 + $0x15f0] sm:$0xff] }
 0x492   : > { %v18968_v32 = vcombine.high %v1476_v7, %v1480_v52 }
 0x493   : > { %8244 = vmatpush1.bf16.msra.mxu0 %v18925_v36  ;;  %8668 = vmatpush1.bf16.msra.mxu1 %v18927_v27  ;;  %v1487_v36 = vld [vmem:[#allocation4 + $0x1530] sm:$0xff]  ;;  %v1484_v27 = vld [vmem:[#allocation4 + $0x1518] sm:$0xff] }
 0x494   : > { %8245 = vmatprep.subr.bf16.mxu0 %v18934_v34  ;;  %8669 = vmatprep.subr.bf16.mxu1 %v18936_v16  ;;  %v1488_v34 = vld [vmem:[#allocation4 + $0x1538] sm:$0xff]  ;;  %v18965_v16 = vcombine.low %v1475_v24, %v1479_v51  ;;  %v18974_v25 = vcombine.high %v1483_v54, %v1487_v36  ;;  %v1515_v24 = vld [vmem:[#allocation4 + $0x1610] sm:$0xff] }
 0x495   : > { %v18976_v18 = vcombine.high %v1484_v27, %v1488_v34  ;;  %v1519_v51 = vld [vmem:[#allocation4 + $0x1630] sm:$0xff] }
 0x497   : > { %8246 = vmatpush1.bf16.msra.mxu0 %v18933_v26  ;;  %8670 = vmatpush1.bf16.msra.mxu1 %v18935_v29  ;;  %v1492_v26 = vld [vmem:[#allocation4 + $0x1558] sm:$0xff] }
 0x498   : > { %8268 = vmatprep.subr.bf16.mxu0 %v18942_v30  ;;  %8692 = vmatprep.subr.bf16.mxu1 %v18944_v33  ;;  %v1496_v29 = vld [vmem:[#allocation4 + $0x1578] sm:$0xff]  ;;  %v18973_v30 = vcombine.low %v1483_v54, %v1487_v36  ;;  %v18975_v33 = vcombine.low %v1484_v27, %v1488_v34  ;;  %v1523_v54 = vld [vmem:[#allocation4 + $0x1650] sm:$0xff] }
 0x499   : > { %v18984_v59 = vcombine.high %v1492_v26, %v1496_v29  ;;  %v1527_v36 = vld [vmem:[#allocation4 + $0x1670] sm:$0xff]  ;;  %v1524_v27 = vld [vmem:[#allocation4 + $0x1658] sm:$0xff] }
 0x49a   : > { %8248 = vmatmul.mubr.bf16.vlgmr.msra.gmra.mrb[8].mxu0 %v23820_v40  ;;  %8672 = vmatmul.mubr.bf16.vlgmr.msra.gmra.mrb[8].mxu1 %v23820_v40  ;;  %v18959_v40 = vcombine.low %v1468_v61, %v1472_v3  ;;  %v1508_v61 = vld [vmem:[#allocation4 + $0x15d8] sm:$0xff] }
 0x49b   : > { %8269 = vmatpush1.bf16.msra.mxu0 %v18941_v43  ;;  %8693 = vmatpush1.bf16.msra.mxu1 %v18943_v4  ;;  %v1504_v43 = vld [vmem:[#allocation4 + $0x15b8] sm:$0xff]  ;;  %v18981_v4 = vcombine.low %v1491_v5, %v1495_v23 }
 0x49c   : > { %8270 = vmatprep.subr.bf16.mxu0 %v18950_v35  ;;  %8694 = vmatprep.subr.bf16.mxu1 %v18952_v21  ;;  %v18983_v35 = vcombine.low %v1492_v26, %v1496_v29  ;;  %v18990_v21 = vcombine.high %v1499_v46, %v1503_v58  ;;  %v1512_v3 = vld [vmem:[#allocation4 + $0x15f8] sm:$0xff] }
 0x49d   : > { %8257 = vmatprep.mubr.bf16.mxu0 %v23822_v50  ;;  %8681 = vmatprep.mubr.bf16.mxu1 %v23822_v50  ;;  %v18967_v50 = vcombine.low %v1476_v7, %v1480_v52  ;;  %v1516_v7 = vld [vmem:[#allocation4 + $0x1618] sm:$0xff] }
 0x49e   : > { %v1520_v52 = vld [vmem:[#allocation4 + $0x1638] sm:$0xff] }
 0x49f   : > { %8271 = vmatpush1.bf16.msra.mxu0 %v18949_v8  ;;  %8695 = vmatpush1.bf16.msra.mxu1 %v18951_v41  ;;  %v18989_v8 = vcombine.low %v1499_v46, %v1503_v58  ;;  %v18991_v41 = vcombine.low %v1500_v12, %v1504_v43  ;;  %v1528_v34 = vld [vmem:[#allocation4 + $0x1678] sm:$0xff]  ;;  %v1539_v46 = vld [vmem:[#allocation4 + $0x16d0] sm:$0xff] }
 0x4a0   : > { %8272 = vmatprep.subr.bf16.mxu0 %v18958_v57  ;;  %8696 = vmatprep.subr.bf16.mxu1 %v18960_v37  ;;  %v18998_v57 = vcombine.high %v1507_v62, %v1511_v60  ;;  %v19000_v37 = vcombine.high %v1508_v61, %v1512_v3  ;;  %v1532_v26 = vld [vmem:[#allocation4 + $0x1698] sm:$0xff]  ;;  %v1543_v58 = vld [vmem:[#allocation4 + $0x16f0] sm:$0xff] }
 0x4a1   : > { %v1536_v29 = vld [vmem:[#allocation4 + $0x16b8] sm:$0xff] }
 0x4a2   : > { %8258 = vmatmul.mubr.bf16.gmra.mrb[12].mxu0 %v23834_v0  ;;  %8682 = vmatmul.mubr.bf16.gmra.mrb[12].mxu1 %v23834_v0  ;;  %v18982_v0 = vcombine.high %v1491_v5, %v1495_v23  ;;  %v1531_v5 = vld [vmem:[#allocation4 + $0x1690] sm:$0xff] }
 0x4a3   : > { %8273 = vmatpush1.bf16.msra.mxu0 %v18957_v6  ;;  %8697 = vmatpush1.bf16.msra.mxu1 %v18959_v40  ;;  %v18997_v6 = vcombine.low %v1507_v62, %v1511_v60  ;;  %v18999_v40 = vcombine.low %v1508_v61, %v1512_v3  ;;  %v1535_v23 = vld [vmem:[#allocation4 + $0x16b0] sm:$0xff]  ;;  %v1548_v61 = vld [vmem:[#allocation4 + $0x1718] sm:$0xff] }
 0x4a4   : > { %8274 = vmatprep.subr.bf16.mxu0 %v18966_v13  ;;  %8698 = vmatprep.subr.bf16.mxu1 %v18968_v32  ;;  %v19006_v13 = vcombine.high %v1515_v24, %v1519_v51  ;;  %v19008_v32 = vcombine.high %v1516_v7, %v1520_v52  ;;  %v1547_v62 = vld [vmem:[#allocation4 + $0x1710] sm:$0xff]  ;;  %v1552_v3 = vld [vmem:[#allocation4 + $0x1738] sm:$0xff] }
 0x4a5   : > { %8300 = vmatprep.mubr.bf16.mxu0 %v23838_v55  ;;  %8724 = vmatprep.mubr.bf16.mxu1 %v23838_v55  ;;  %v18992_v55 = vcombine.high %v1500_v12, %v1504_v43  ;;  %v1540_v12 = vld [vmem:[#allocation4 + $0x16d8] sm:$0xff]  ;;  %v1551_v60 = vld [vmem:[#allocation4 + $0x1730] sm:$0xff] }
 0x4a6   : > { %v1544_v43 = vld [vmem:[#allocation4 + $0x16f8] sm:$0xff] }
 0x4a7   : > { %8275 = vmatpush1.bf16.msra.mxu0 %v18965_v16  ;;  %8699 = vmatpush1.bf16.msra.mxu1 %v18967_v50  ;;  %v19005_v16 = vcombine.low %v1515_v24, %v1519_v51  ;;  %v19007_v50 = vcombine.low %v1516_v7, %v1520_v52  ;;  %v1555_v24 = vld [vmem:[#allocation4 + $0x1750] sm:$0xff]  ;;  %v1556_v7 = vld [vmem:[#allocation4 + $0x1758] sm:$0xff] }
 0x4a8   : > { %8276 = vmatprep.subr.bf16.mxu0 %v18974_v25  ;;  %8700 = vmatprep.subr.bf16.mxu1 %v18976_v18  ;;  %v19014_v25 = vcombine.high %v1523_v54, %v1527_v36  ;;  %v19016_v18 = vcombine.high %v1524_v27, %v1528_v34  ;;  %v1559_v51 = vld [vmem:[#allocation4 + $0x1770] sm:$0xff]  ;;  %v1560_v52 = vld [vmem:[#allocation4 + $0x1778] sm:$0xff] }
 0x4ab   : > { %8277 = vmatpush1.bf16.msra.mxu0 %v18973_v30  ;;  %8701 = vmatpush1.bf16.msra.mxu1 %v18975_v33  ;;  %v19013_v30 = vcombine.low %v1523_v54, %v1527_v36  ;;  %v19015_v33 = vcombine.low %v1524_v27, %v1528_v34  ;;  %v1563_v54 = vld [vmem:[#allocation4 + $0x1790] sm:$0xff]  ;;  %v1564_v27 = vld [vmem:[#allocation4 + $0x1798] sm:$0xff] }
 0x4ac   : > { %8278 = vmatprep.subr.bf16.mxu0 %v18982_v0  ;;  %8702 = vmatprep.subr.bf16.mxu1 %v18984_v59  ;;  %v19022_v0 = vcombine.high %v1531_v5, %v1535_v23  ;;  %v19024_v59 = vcombine.high %v1532_v26, %v1536_v29  ;;  %v1567_v36 = vld [vmem:[#allocation4 + $0x17b0] sm:$0xff]  ;;  %v1568_v34 = vld [vmem:[#allocation4 + $0x17b8] sm:$0xff] }
 0x4af   : > { %8279 = vmatpush1.bf16.msra.mxu0 %v18981_v4  ;;  %8703 = vmatpush1.bf16.msra.mxu1 %v18983_v35  ;;  %v19021_v4 = vcombine.low %v1531_v5, %v1535_v23  ;;  %v19023_v35 = vcombine.low %v1532_v26, %v1536_v29  ;;  %v1571_v5 = vld [vmem:[#allocation4 + $0x17d0] sm:$0xff]  ;;  %v1572_v26 = vld [vmem:[#allocation4 + $0x17d8] sm:$0xff] }
 0x4b0   : > { %8280 = vmatprep.subr.bf16.mxu0 %v18990_v21  ;;  %8704 = vmatprep.subr.bf16.mxu1 %v18992_v55  ;;  %v19030_v21 = vcombine.high %v1539_v46, %v1543_v58  ;;  %v19032_v55 = vcombine.high %v1540_v12, %v1544_v43  ;;  %v1575_v23 = vld [vmem:[#allocation4 + $0x17f0] sm:$0xff]  ;;  %v1576_v29 = vld [vmem:[#allocation4 + $0x17f8] sm:$0xff] }
 0x4b3   : > { %8281 = vmatpush1.bf16.msra.mxu0 %v18989_v8  ;;  %8705 = vmatpush1.bf16.msra.mxu1 %v18991_v41  ;;  %v19029_v8 = vcombine.low %v1539_v46, %v1543_v58  ;;  %v19031_v41 = vcombine.low %v1540_v12, %v1544_v43  ;;  %v1579_v46 = vld [vmem:[#allocation4 + $0x1810] sm:$0xff]  ;;  %v1580_v12 = vld [vmem:[#allocation4 + $0x1818] sm:$0xff] }
 0x4b4   : > { %8282 = vmatprep.subr.bf16.mxu0 %v18998_v57  ;;  %8706 = vmatprep.subr.bf16.mxu1 %v19000_v37  ;;  %v19038_v57 = vcombine.high %v1547_v62, %v1551_v60  ;;  %v19040_v37 = vcombine.high %v1548_v61, %v1552_v3  ;;  %v1583_v58 = vld [vmem:[#allocation4 + $0x1830] sm:$0xff]  ;;  %v1584_v43 = vld [vmem:[#allocation4 + $0x1838] sm:$0xff] }
 0x4b7   : > { %8283 = vmatpush1.bf16.msra.mxu0 %v18997_v6  ;;  %8707 = vmatpush1.bf16.msra.mxu1 %v18999_v40  ;;  %v19037_v6 = vcombine.low %v1547_v62, %v1551_v60  ;;  %v19039_v40 = vcombine.low %v1548_v61, %v1552_v3  ;;  %v1587_v62 = vld [vmem:[#allocation4 + $0x1850] sm:$0xff]  ;;  %v1588_v61 = vld [vmem:[#allocation4 + $0x1858] sm:$0xff] }
 0x4b8   : > { %8284 = vmatprep.subr.bf16.mxu0 %v19006_v13  ;;  %8708 = vmatprep.subr.bf16.mxu1 %v19008_v32  ;;  %v19046_v13 = vcombine.high %v1555_v24, %v1559_v51  ;;  %v19048_v32 = vcombine.high %v1556_v7, %v1560_v52  ;;  %v1591_v60 = vld [vmem:[#allocation4 + $0x1870] sm:$0xff]  ;;  %v1592_v3 = vld [vmem:[#allocation4 + $0x1878] sm:$0xff] }
 0x4bb   : > { %8285 = vmatpush1.bf16.msra.mxu0 %v19005_v16  ;;  %8709 = vmatpush1.bf16.msra.mxu1 %v19007_v50  ;;  %v19045_v16 = vcombine.low %v1555_v24, %v1559_v51  ;;  %v19047_v50 = vcombine.low %v1556_v7, %v1560_v52  ;;  %v1595_v24 = vld [vmem:[#allocation4 + $0x1890] sm:$0xff]  ;;  %v1596_v7 = vld [vmem:[#allocation4 + $0x1898] sm:$0xff] }
 0x4bc   : > { %8286 = vmatprep.subr.bf16.mxu0 %v19014_v25  ;;  %8710 = vmatprep.subr.bf16.mxu1 %v19016_v18  ;;  %v19054_v25 = vcombine.high %v1563_v54, %v1567_v36  ;;  %v19056_v18 = vcombine.high %v1564_v27, %v1568_v34  ;;  %v1599_v51 = vld [vmem:[#allocation4 + $0x18b0] sm:$0xff]  ;;  %v1600_v52 = vld [vmem:[#allocation4 + $0x18b8] sm:$0xff] }
 0x4bf   : > { %8287 = vmatpush1.bf16.msra.mxu0 %v19013_v30  ;;  %8711 = vmatpush1.bf16.msra.mxu1 %v19015_v33  ;;  %v19053_v30 = vcombine.low %v1563_v54, %v1567_v36  ;;  %v19055_v33 = vcombine.low %v1564_v27, %v1568_v34  ;;  %v1603_v54 = vld [vmem:[#allocation4 + $0x18d0] sm:$0xff]  ;;  %v1604_v27 = vld [vmem:[#allocation4 + $0x18d8] sm:$0xff] }
 0x4c0   : > { %8288 = vmatprep.subr.bf16.mxu0 %v19022_v0  ;;  %8712 = vmatprep.subr.bf16.mxu1 %v19024_v59  ;;  %v19062_v0 = vcombine.high %v1571_v5, %v1575_v23  ;;  %v19064_v59 = vcombine.high %v1572_v26, %v1576_v29  ;;  %v1607_v36 = vld [vmem:[#allocation4 + $0x18f0] sm:$0xff]  ;;  %v1608_v34 = vld [vmem:[#allocation4 + $0x18f8] sm:$0xff] }
 0x4c3   : > { %8289 = vmatpush1.bf16.msra.mxu0 %v19021_v4  ;;  %8713 = vmatpush1.bf16.msra.mxu1 %v19023_v35  ;;  %v19061_v4 = vcombine.low %v1571_v5, %v1575_v23  ;;  %v19063_v35 = vcombine.low %v1572_v26, %v1576_v29  ;;  %v1615_v5 = vld [vmem:[#allocation4 + $0x1930] sm:$0xff]  ;;  %v1612_v23 = vld [vmem:[#allocation4 + $0x1918] sm:$0xff]  ;;  %v19093_v29 = vcombine.low %v1603_v54, %v1607_v36 }
 0x4c4   : > { %8290 = vmatprep.subr.bf16.mxu0 %v19030_v21  ;;  %8714 = vmatprep.subr.bf16.mxu1 %v19032_v55  ;;  %v19070_v21 = vcombine.high %v1579_v46, %v1583_v58  ;;  %v19072_v55 = vcombine.high %v1580_v12, %v1584_v43  ;;  %v1616_v26 = vld [vmem:[#allocation4 + $0x1938] sm:$0xff] }
 0x4c7   : > { %8291 = vmatpush1.bf16.msra.mxu0 %v19029_v8  ;;  %8715 = vmatpush1.bf16.msra.mxu1 %v19031_v41  ;;  %v19069_v8 = vcombine.low %v1579_v46, %v1583_v58  ;;  %v19071_v41 = vcombine.low %v1580_v12, %v1584_v43  ;;  %v1620_v46 = vld [vmem:[#allocation4 + $0x1958] sm:$0xff]  ;;  %v19103_v43 = vcombine.low %v1612_v23, %v1616_v26 }
 0x4c8   : > { %8292 = vmatprep.subr.bf16.mxu0 %v19038_v57  ;;  %8716 = vmatprep.subr.bf16.mxu1 %v19040_v37  ;;  %v19078_v57 = vcombine.high %v1587_v62, %v1591_v60  ;;  %v19080_v37 = vcombine.high %v1588_v61, %v1592_v3  ;;  %v1624_v58 = vld [vmem:[#allocation4 + $0x1978] sm:$0xff] }
 0x4cb   : > { %8293 = vmatpush1.bf16.msra.mxu0 %v19037_v6  ;;  %8717 = vmatpush1.bf16.msra.mxu1 %v19039_v40  ;;  %v19077_v6 = vcombine.low %v1587_v62, %v1591_v60  ;;  %v19079_v40 = vcombine.low %v1588_v61, %v1592_v3  ;;  %v1632_v62 = vld [vmem:[#allocation4 + $0x19b8] sm:$0xff]  ;;  %v19111_v61 = vcombine.low %v1620_v46, %v1624_v58 }
 0x4cc   : > { %8294 = vmatprep.subr.bf16.mxu0 %v19046_v13  ;;  %8718 = vmatprep.subr.bf16.mxu1 %v19048_v32  ;;  %v19086_v13 = vcombine.high %v1595_v24, %v1599_v51  ;;  %v19088_v32 = vcombine.high %v1596_v7, %v1600_v52 }
 0x4cf   : > { %8295 = vmatpush1.bf16.msra.mxu0 %v19045_v16  ;;  %8719 = vmatpush1.bf16.msra.mxu1 %v19047_v50  ;;  %v19085_v16 = vcombine.low %v1595_v24, %v1599_v51  ;;  %v19094_v50 = vcombine.high %v1603_v54, %v1607_v36 }
 0x4d0   : > { %8296 = vmatprep.subr.bf16.mxu0 %v19054_v25  ;;  %8720 = vmatprep.subr.bf16.mxu1 %v19056_v18  ;;  %v19096_v25 = vcombine.high %v1604_v27, %v1608_v34  ;;  %v1611_v18 = vld [vmem:[#allocation4 + $0x1910] sm:$0xff] }
 0x4d1   : > { %v19101_v12 = vcombine.low %v1611_v18, %v1615_v5 }
 0x4d3   : > { %8297 = vmatpush1.bf16.msra.mxu0 %v19053_v30  ;;  %8721 = vmatpush1.bf16.msra.mxu1 %v19055_v33  ;;  %v19102_v30 = vcombine.high %v1611_v18, %v1615_v5  ;;  %v19104_v33 = vcombine.high %v1612_v23, %v1616_v26 }
 0x4d4   : > { %8298 = vmatprep.subr.bf16.mxu0 %v19062_v0  ;;  %8722 = vmatprep.subr.bf16.mxu1 %v19064_v59  ;;  %v1619_v0 = vld [vmem:[#allocation4 + $0x1950] sm:$0xff] }
 0x4d5   : > { %v1623_v59 = vld [vmem:[#allocation4 + $0x1970] sm:$0xff] }
 0x4d6   : > { %v19109_v60 = vcombine.low %v1619_v0, %v1623_v59 }
 0x4d7   : > { %8299 = vmatpush1.bf16.msra.mxu0 %v19061_v4  ;;  %8723 = vmatpush1.bf16.msra.mxu1 %v19063_v35  ;;  %v19112_v4 = vcombine.high %v1620_v46, %v1624_v58  ;;  %v1627_v35 = vld [vmem:[#allocation4 + $0x1990] sm:$0xff] }
 0x4d8   : > { %8321 = vmatprep.subr.bf16.mxu0 %v19070_v21  ;;  %8745 = vmatprep.subr.bf16.mxu1 %v19072_v55  ;;  %v1631_v21 = vld [vmem:[#allocation4 + $0x19b0] sm:$0xff]  ;;  %v1628_v55 = vld [vmem:[#allocation4 + $0x1998] sm:$0xff] }
 0x4d9   : > { %v19118_v3 = vcombine.high %v1627_v35, %v1631_v21  ;;  %v19117_v24 = vcombine.low %v1627_v35, %v1631_v21  ;;  %v19119_v51 = vcombine.low %v1628_v55, %v1632_v62 }
 0x4da   : > { %8301 = vmatmul.mubr.bf16.vlgmr.msra.gmra.mrb[8].mxu0 %v23848_v49  ;;  %8725 = vmatmul.mubr.bf16.vlgmr.msra.gmra.mrb[8].mxu1 %v23848_v49  ;;  %v19087_v49 = vcombine.low %v1596_v7, %v1600_v52 }
 0x4db   : > { %8322 = vmatpush1.bf16.msra.mxu0 %v19069_v8  ;;  %8746 = vmatpush1.bf16.msra.mxu1 %v19071_v41  ;;  %v1635_v8 = vld [vmem:[#allocation4 + $0x19d0] sm:$0xff] }
 0x4dc   : > { %8323 = vmatprep.subr.bf16.mxu0 %v19078_v57  ;;  %8747 = vmatprep.subr.bf16.mxu1 %v19080_v37  ;;  %v1639_v41 = vld [vmem:[#allocation4 + $0x19f0] sm:$0xff]  ;;  %v1636_v57 = vld [vmem:[#allocation4 + $0x19d8] sm:$0xff] }
 0x4dd   : > { %8310 = vmatprep.mubr.bf16.mxu0 %v23850_v1  ;;  %8734 = vmatprep.mubr.bf16.mxu1 %v23850_v1  ;;  %v19095_v1 = vcombine.low %v1604_v27, %v1608_v34  ;;  %v1640_v37 = vld [vmem:[#allocation4 + $0x19f8] sm:$0xff]  ;;  %v19126_v7 = vcombine.high %v1635_v8, %v1639_v41  ;;  %v19125_v54 = vcombine.low %v1635_v8, %v1639_v41 }
 0x4de   : > { %v19128_v52 = vcombine.high %v1636_v57, %v1640_v37  ;;  %v19127_v36 = vcombine.low %v1636_v57, %v1640_v37 }
 0x4df   : > { %8324 = vmatpush1.bf16.msra.mxu0 %v19077_v6  ;;  %8748 = vmatpush1.bf16.msra.mxu1 %v19079_v40  ;;  %v1643_v6 = vld [vmem:[#allocation4 + $0x1a10] sm:$0xff] }
 0x4e0   : > { %8325 = vmatprep.subr.bf16.mxu0 %v19086_v13  ;;  %8749 = vmatprep.subr.bf16.mxu1 %v19088_v32  ;;  %v1647_v40 = vld [vmem:[#allocation4 + $0x1a30] sm:$0xff]  ;;  %v1644_v13 = vld [vmem:[#allocation4 + $0x1a18] sm:$0xff] }
 0x4e1   : > { %v1648_v32 = vld [vmem:[#allocation4 + $0x1a38] sm:$0xff]  ;;  %v19134_v27 = vcombine.high %v1643_v6, %v1647_v40  ;;  %v19133_v18 = vcombine.low %v1643_v6, %v1647_v40 }
 0x4e2   : > { %8311 = vmatmul.mubr.bf16.gmra.mrb[12].mxu0 %v23862_v17  ;;  %8735 = vmatmul.mubr.bf16.gmra.mrb[12].mxu1 %v23862_v17  ;;  %v19110_v17 = vcombine.high %v1619_v0, %v1623_v59  ;;  %v19136_v34 = vcombine.high %v1644_v13, %v1648_v32  ;;  %v19135_v5 = vcombine.low %v1644_v13, %v1648_v32 }
 0x4e3   : > { %8326 = vmatpush1.bf16.msra.mxu0 %v19085_v16  ;;  %8750 = vmatpush1.bf16.msra.mxu1 %v19087_v49  ;;  %v1651_v16 = vld [vmem:[#allocation4 + $0x1a50] sm:$0xff] }
 0x4e4   : > { %8327 = vmatprep.subr.bf16.mxu0 %v19094_v50  ;;  %8751 = vmatprep.subr.bf16.mxu1 %v19096_v25  ;;  %v1655_v49 = vld [vmem:[#allocation4 + $0x1a70] sm:$0xff]  ;;  %v1652_v50 = vld [vmem:[#allocation4 + $0x1a58] sm:$0xff] }
 0x4e5   : > { %8353 = vmatprep.mubr.bf16.mxu0 %v23866_v28  ;;  %8777 = vmatprep.mubr.bf16.mxu1 %v23866_v28  ;;  %v19120_v28 = vcombine.high %v1628_v55, %v1632_v62  ;;  %v1656_v25 = vld [vmem:[#allocation4 + $0x1a78] sm:$0xff]  ;;  %v19142_v23 = vcombine.high %v1651_v16, %v1655_v49  ;;  %v19141_v0 = vcombine.low %v1651_v16, %v1655_v49 }
 0x4e6   : > { %v19144_v26 = vcombine.high %v1652_v50, %v1656_v25  ;;  %v19143_v59 = vcombine.low %v1652_v50, %v1656_v25 }
 0x4e7   : > { %8328 = vmatpush1.bf16.msra.mxu0 %v19093_v29  ;;  %8752 = vmatpush1.bf16.msra.mxu1 %v19095_v1  ;;  %v1659_v29 = vld [vmem:[#allocation4 + $0x1a90] sm:$0xff] }
 0x4e8   : > { %8329 = vmatprep.subr.bf16.mxu0 %v19102_v30  ;;  %8753 = vmatprep.subr.bf16.mxu1 %v19104_v33  ;;  %v1663_v1 = vld [vmem:[#allocation4 + $0x1ab0] sm:$0xff]  ;;  %v1660_v30 = vld [vmem:[#allocation4 + $0x1a98] sm:$0xff] }
 0x4e9   : > { %v1664_v33 = vld [vmem:[#allocation4 + $0x1ab8] sm:$0xff]  ;;  %v19150_v46 = vcombine.high %v1659_v29, %v1663_v1  ;;  %v19149_v35 = vcombine.low %v1659_v29, %v1663_v1 }
 0x4ea   : > { %v19152_v58 = vcombine.high %v1660_v30, %v1664_v33  ;;  %v19151_v21 = vcombine.low %v1660_v30, %v1664_v33 }
 0x4eb   : > { %8330 = vmatpush1.bf16.msra.mxu0 %v19101_v12  ;;  %8754 = vmatpush1.bf16.msra.mxu1 %v19103_v43  ;;  %v1667_v12 = vld [vmem:[#allocation4 + $0x1ad0] sm:$0xff] }
 0x4ec   : > { %8331 = vmatprep.subr.bf16.mxu0 %v19110_v17  ;;  %8755 = vmatprep.subr.bf16.mxu1 %v19112_v4  ;;  %v1671_v43 = vld [vmem:[#allocation4 + $0x1af0] sm:$0xff]  ;;  %v1668_v17 = vld [vmem:[#allocation4 + $0x1ad8] sm:$0xff] }
 0x4ed   : > { %v1672_v4 = vld [vmem:[#allocation4 + $0x1af8] sm:$0xff]  ;;  %v19158_v55 = vcombine.high %v1667_v12, %v1671_v43  ;;  %v19157_v8 = vcombine.low %v1667_v12, %v1671_v43 }
 0x4ee   : > { %v19160_v62 = vcombine.high %v1668_v17, %v1672_v4  ;;  %v19159_v41 = vcombine.low %v1668_v17, %v1672_v4 }
 0x4ef   : > { %8332 = vmatpush1.bf16.msra.mxu0 %v19109_v60  ;;  %8756 = vmatpush1.bf16.msra.mxu1 %v19111_v61  ;;  %v1675_v60 = vld [vmem:[#allocation4 + $0x1b10] sm:$0xff] }
 0x4f0   : > { %8333 = vmatprep.subr.bf16.mxu0 %v19118_v3  ;;  %8757 = vmatprep.subr.bf16.mxu1 %v19120_v28  ;;  %v1679_v61 = vld [vmem:[#allocation4 + $0x1b30] sm:$0xff]  ;;  %v1676_v3 = vld [vmem:[#allocation4 + $0x1b18] sm:$0xff] }
 0x4f1   : > { %v1680_v28 = vld [vmem:[#allocation4 + $0x1b38] sm:$0xff]  ;;  %v19166_v57 = vcombine.high %v1675_v60, %v1679_v61  ;;  %v19165_v6 = vcombine.low %v1675_v60, %v1679_v61 }
 0x4f2   : > { %v19168_v37 = vcombine.high %v1676_v3, %v1680_v28  ;;  %v19167_v40 = vcombine.low %v1676_v3, %v1680_v28 }
 0x4f3   : > { %8334 = vmatpush1.bf16.msra.mxu0 %v19117_v24  ;;  %8758 = vmatpush1.bf16.msra.mxu1 %v19119_v51  ;;  %v1683_v24 = vld [vmem:[#allocation4 + $0x1b50] sm:$0xff] }
 0x4f4   : > { %8335 = vmatprep.subr.bf16.mxu0 %v19126_v7  ;;  %8759 = vmatprep.subr.bf16.mxu1 %v19128_v52  ;;  %v1687_v51 = vld [vmem:[#allocation4 + $0x1b70] sm:$0xff]  ;;  %v1684_v7 = vld [vmem:[#allocation4 + $0x1b58] sm:$0xff] }
 0x4f5   : > { %v1688_v52 = vld [vmem:[#allocation4 + $0x1b78] sm:$0xff]  ;;  %v19174_v13 = vcombine.high %v1683_v24, %v1687_v51  ;;  %v19173_v16 = vcombine.low %v1683_v24, %v1687_v51 }
 0x4f6   : > { %v19176_v32 = vcombine.high %v1684_v7, %v1688_v52  ;;  %v19175_v49 = vcombine.low %v1684_v7, %v1688_v52 }
 0x4f7   : > { %8336 = vmatpush1.bf16.msra.mxu0 %v19125_v54  ;;  %8760 = vmatpush1.bf16.msra.mxu1 %v19127_v36  ;;  %v1691_v54 = vld [vmem:[#allocation4 + $0x1b90] sm:$0xff] }
 0x4f8   : > { %8337 = vmatprep.subr.bf16.mxu0 %v19134_v27  ;;  %8761 = vmatprep.subr.bf16.mxu1 %v19136_v34  ;;  %v1695_v36 = vld [vmem:[#allocation4 + $0x1bb0] sm:$0xff]  ;;  %v1692_v27 = vld [vmem:[#allocation4 + $0x1b98] sm:$0xff] }
 0x4f9   : > { %v1696_v34 = vld [vmem:[#allocation4 + $0x1bb8] sm:$0xff]  ;;  %v19182_v50 = vcombine.high %v1691_v54, %v1695_v36  ;;  %v19181_v29 = vcombine.low %v1691_v54, %v1695_v36 }
 0x4fa   : > { %v19184_v25 = vcombine.high %v1692_v27, %v1696_v34  ;;  %v19183_v1 = vcombine.low %v1692_v27, %v1696_v34  ;;  %v1739_v34 = vld [vmem:[#allocation4 + $0x1d10] sm:$0xff] }
 0x4fb   : > { %8338 = vmatpush1.bf16.msra.mxu0 %v19133_v18  ;;  %8762 = vmatpush1.bf16.msra.mxu1 %v19135_v5  ;;  %v1699_v18 = vld [vmem:[#allocation4 + $0x1bd0] sm:$0xff] }
 0x4fc   : > { %8339 = vmatprep.subr.bf16.mxu0 %v19142_v23  ;;  %8763 = vmatprep.subr.bf16.mxu1 %v19144_v26  ;;  %v1703_v5 = vld [vmem:[#allocation4 + $0x1bf0] sm:$0xff]  ;;  %v1700_v23 = vld [vmem:[#allocation4 + $0x1bd8] sm:$0xff] }
 0x4fd   : > { %v1704_v26 = vld [vmem:[#allocation4 + $0x1bf8] sm:$0xff]  ;;  %v19190_v30 = vcombine.high %v1699_v18, %v1703_v5  ;;  %v19189_v12 = vcombine.low %v1699_v18, %v1703_v5 }
 0x4fe   : > { %v19192_v33 = vcombine.high %v1700_v23, %v1704_v26  ;;  %v19191_v43 = vcombine.low %v1700_v23, %v1704_v26  ;;  %v1747_v23 = vld [vmem:[#allocation4 + $0x1d50] sm:$0xff] }
 0x4ff   : > { %8340 = vmatpush1.bf16.msra.mxu0 %v19141_v0  ;;  %8764 = vmatpush1.bf16.msra.mxu1 %v19143_v59  ;;  %v1707_v0 = vld [vmem:[#allocation4 + $0x1c10] sm:$0xff] }
 0x500   : > { %8341 = vmatprep.subr.bf16.mxu0 %v19150_v46  ;;  %8765 = vmatprep.subr.bf16.mxu1 %v19152_v58  ;;  %v1711_v59 = vld [vmem:[#allocation4 + $0x1c30] sm:$0xff]  ;;  %v1708_v46 = vld [vmem:[#allocation4 + $0x1c18] sm:$0xff] }
 0x501   : > { %v1712_v58 = vld [vmem:[#allocation4 + $0x1c38] sm:$0xff]  ;;  %v19198_v17 = vcombine.high %v1707_v0, %v1711_v59  ;;  %v19197_v60 = vcombine.low %v1707_v0, %v1711_v59  ;;  %v1751_v26 = vld [vmem:[#allocation4 + $0x1d70] sm:$0xff] }
 0x502   : > { %v19200_v4 = vcombine.high %v1708_v46, %v1712_v58  ;;  %v19199_v61 = vcombine.low %v1708_v46, %v1712_v58  ;;  %v1755_v59 = vld [vmem:[#allocation4 + $0x1d90] sm:$0xff]  ;;  %v1756_v58 = vld [vmem:[#allocation4 + $0x1d98] sm:$0xff] }
 0x503   : > { %8342 = vmatpush1.bf16.msra.mxu0 %v19149_v35  ;;  %8766 = vmatpush1.bf16.msra.mxu1 %v19151_v21  ;;  %v1715_v35 = vld [vmem:[#allocation4 + $0x1c50] sm:$0xff] }
 0x504   : > { %8343 = vmatprep.subr.bf16.mxu0 %v19158_v55  ;;  %8767 = vmatprep.subr.bf16.mxu1 %v19160_v62  ;;  %v1719_v21 = vld [vmem:[#allocation4 + $0x1c70] sm:$0xff]  ;;  %v1716_v55 = vld [vmem:[#allocation4 + $0x1c58] sm:$0xff] }
 0x505   : > { %v1720_v62 = vld [vmem:[#allocation4 + $0x1c78] sm:$0xff]  ;;  %v19206_v3 = vcombine.high %v1715_v35, %v1719_v21  ;;  %v19205_v24 = vcombine.low %v1715_v35, %v1719_v21  ;;  %v1759_v46 = vld [vmem:[#allocation4 + $0x1db0] sm:$0xff] }
 0x506   : > { %v19208_v28 = vcombine.high %v1716_v55, %v1720_v62  ;;  %v19207_v51 = vcombine.low %v1716_v55, %v1720_v62  ;;  %v1763_v35 = vld [vmem:[#allocation4 + $0x1dd0] sm:$0xff]  ;;  %v1764_v55 = vld [vmem:[#allocation4 + $0x1dd8] sm:$0xff] }
 0x507   : > { %8344 = vmatpush1.bf16.msra.mxu0 %v19157_v8  ;;  %8768 = vmatpush1.bf16.msra.mxu1 %v19159_v41  ;;  %v1723_v8 = vld [vmem:[#allocation4 + $0x1c90] sm:$0xff]  ;;  %v1768_v62 = vld [vmem:[#allocation4 + $0x1df8] sm:$0xff] }
 0x508   : > { %8345 = vmatprep.subr.bf16.mxu0 %v19166_v57  ;;  %8769 = vmatprep.subr.bf16.mxu1 %v19168_v37  ;;  %v1727_v41 = vld [vmem:[#allocation4 + $0x1cb0] sm:$0xff]  ;;  %v1724_v57 = vld [vmem:[#allocation4 + $0x1c98] sm:$0xff] }
 0x509   : > { %v1728_v37 = vld [vmem:[#allocation4 + $0x1cb8] sm:$0xff]  ;;  %v19214_v7 = vcombine.high %v1723_v8, %v1727_v41  ;;  %v19213_v54 = vcombine.low %v1723_v8, %v1727_v41  ;;  %v1767_v21 = vld [vmem:[#allocation4 + $0x1df0] sm:$0xff] }
 0x50a   : > { %v19216_v52 = vcombine.high %v1724_v57, %v1728_v37  ;;  %v1771_v8 = vld [vmem:[#allocation4 + $0x1e10] sm:$0xff] }
 0x50b   : > { %8346 = vmatpush1.bf16.msra.mxu0 %v19165_v6  ;;  %8770 = vmatpush1.bf16.msra.mxu1 %v19167_v40  ;;  %v1731_v6 = vld [vmem:[#allocation4 + $0x1cd0] sm:$0xff] }
 0x50c   : > { %8347 = vmatprep.subr.bf16.mxu0 %v19174_v13  ;;  %8771 = vmatprep.subr.bf16.mxu1 %v19176_v32  ;;  %v1735_v40 = vld [vmem:[#allocation4 + $0x1cf0] sm:$0xff]  ;;  %v1732_v13 = vld [vmem:[#allocation4 + $0x1cd8] sm:$0xff] }
 0x50d   : > { %v1736_v32 = vld [vmem:[#allocation4 + $0x1cf8] sm:$0xff]  ;;  %v19222_v36 = vcombine.high %v1731_v6, %v1735_v40  ;;  %v1775_v41 = vld [vmem:[#allocation4 + $0x1e30] sm:$0xff] }
 0x50e   : > { %v19224_v27 = vcombine.high %v1732_v13, %v1736_v32 }
 0x50f   : > { %8348 = vmatpush1.bf16.msra.mxu0 %v19173_v16  ;;  %8772 = vmatpush1.bf16.msra.mxu1 %v19175_v49  ;;  %v1743_v16 = vld [vmem:[#allocation4 + $0x1d30] sm:$0xff]  ;;  %v1740_v49 = vld [vmem:[#allocation4 + $0x1d18] sm:$0xff] }
 0x510   : > { %8349 = vmatprep.subr.bf16.mxu0 %v19182_v50  ;;  %8773 = vmatprep.subr.bf16.mxu1 %v19184_v25  ;;  %v1744_v50 = vld [vmem:[#allocation4 + $0x1d38] sm:$0xff]  ;;  %v19221_v25 = vcombine.low %v1731_v6, %v1735_v40  ;;  %v19230_v18 = vcombine.high %v1739_v34, %v1743_v16  ;;  %v1779_v6 = vld [vmem:[#allocation4 + $0x1e50] sm:$0xff] }
 0x511   : > { %v19232_v5 = vcombine.high %v1740_v49, %v1744_v50  ;;  %v1783_v40 = vld [vmem:[#allocation4 + $0x1e70] sm:$0xff] }
 0x513   : > { %8350 = vmatpush1.bf16.msra.mxu0 %v19181_v29  ;;  %8774 = vmatpush1.bf16.msra.mxu1 %v19183_v1  ;;  %v1748_v29 = vld [vmem:[#allocation4 + $0x1d58] sm:$0xff] }
 0x514   : > { %8351 = vmatprep.subr.bf16.mxu0 %v19190_v30  ;;  %8775 = vmatprep.subr.bf16.mxu1 %v19192_v33  ;;  %v1752_v1 = vld [vmem:[#allocation4 + $0x1d78] sm:$0xff]  ;;  %v19229_v30 = vcombine.low %v1739_v34, %v1743_v16  ;;  %v19231_v33 = vcombine.low %v1740_v49, %v1744_v50  ;;  %v1787_v34 = vld [vmem:[#allocation4 + $0x1e90] sm:$0xff] }
 0x515   : > { %v19240_v0 = vcombine.high %v1748_v29, %v1752_v1  ;;  %v1791_v16 = vld [vmem:[#allocation4 + $0x1eb0] sm:$0xff]  ;;  %v1788_v49 = vld [vmem:[#allocation4 + $0x1e98] sm:$0xff] }
 0x516   : > { %v1792_v50 = vld [vmem:[#allocation4 + $0x1eb8] sm:$0xff] }
 0x517   : > { %8352 = vmatpush1.bf16.msra.mxu0 %v19189_v12  ;;  %8776 = vmatpush1.bf16.msra.mxu1 %v19191_v43  ;;  %v1760_v12 = vld [vmem:[#allocation4 + $0x1db8] sm:$0xff]  ;;  %v19237_v43 = vcombine.low %v1747_v23, %v1751_v26 }
 0x518   : > { %8374 = vmatprep.subr.bf16.mxu0 %v19198_v17  ;;  %8798 = vmatprep.subr.bf16.mxu1 %v19200_v4  ;;  %v19239_v17 = vcombine.low %v1748_v29, %v1752_v1  ;;  %v19246_v4 = vcombine.high %v1755_v59, %v1759_v46  ;;  %v1796_v29 = vld [vmem:[#allocation4 + $0x1ed8] sm:$0xff] }
 0x519   : > { %v1800_v1 = vld [vmem:[#allocation4 + $0x1ef8] sm:$0xff] }
 0x51a   : > { %8354 = vmatmul.mubr.bf16.vlgmr.msra.gmra.mrb[8].mxu0 %v23876_v22  ;;  %8778 = vmatmul.mubr.bf16.vlgmr.msra.gmra.mrb[8].mxu1 %v23876_v22  ;;  %v19215_v22 = vcombine.low %v1724_v57, %v1728_v37  ;;  %v1772_v57 = vld [vmem:[#allocation4 + $0x1e18] sm:$0xff] }
 0x51b   : > { %8375 = vmatpush1.bf16.msra.mxu0 %v19197_v60  ;;  %8799 = vmatpush1.bf16.msra.mxu1 %v19199_v61  ;;  %v19245_v60 = vcombine.low %v1755_v59, %v1759_v46  ;;  %v19247_v61 = vcombine.low %v1756_v58, %v1760_v12  ;;  %v1776_v37 = vld [vmem:[#allocation4 + $0x1e38] sm:$0xff]  ;;  %v1803_v59 = vld [vmem:[#allocation4 + $0x1f10] sm:$0xff] }
 0x51c   : > { %8376 = vmatprep.subr.bf16.mxu0 %v19206_v3  ;;  %8800 = vmatprep.subr.bf16.mxu1 %v19208_v28  ;;  %v19254_v3 = vcombine.high %v1763_v35, %v1767_v21  ;;  %v19256_v28 = vcombine.high %v1764_v55, %v1768_v62  ;;  %v1807_v46 = vld [vmem:[#allocation4 + $0x1f30] sm:$0xff] }
 0x51d   : > { %8363 = vmatprep.mubr.bf16.mxu0 %v23878_v38  ;;  %8787 = vmatprep.mubr.bf16.mxu1 %v23878_v38  ;;  %v19223_v38 = vcombine.low %v1732_v13, %v1736_v32  ;;  %v1780_v13 = vld [vmem:[#allocation4 + $0x1e58] sm:$0xff] }
 0x51e   : > { %v1784_v32 = vld [vmem:[#allocation4 + $0x1e78] sm:$0xff] }
 0x51f   : > { %8377 = vmatpush1.bf16.msra.mxu0 %v19205_v24  ;;  %8801 = vmatpush1.bf16.msra.mxu1 %v19207_v51  ;;  %v19253_v24 = vcombine.low %v1763_v35, %v1767_v21  ;;  %v19255_v51 = vcombine.low %v1764_v55, %v1768_v62  ;;  %v1811_v35 = vld [vmem:[#allocation4 + $0x1f50] sm:$0xff]  ;;  %v1812_v55 = vld [vmem:[#allocation4 + $0x1f58] sm:$0xff] }
 0x520   : > { %8378 = vmatprep.subr.bf16.mxu0 %v19214_v7  ;;  %8802 = vmatprep.subr.bf16.mxu1 %v19216_v52  ;;  %v19262_v7 = vcombine.high %v1771_v8, %v1775_v41  ;;  %v19264_v52 = vcombine.high %v1772_v57, %v1776_v37  ;;  %v1815_v21 = vld [vmem:[#allocation4 + $0x1f70] sm:$0xff]  ;;  %v1816_v62 = vld [vmem:[#allocation4 + $0x1f78] sm:$0xff] }
 0x522   : > { %8364 = vmatmul.mubr.bf16.gmra.mrb[12].mxu0 %v23890_v2  ;;  %8788 = vmatmul.mubr.bf16.gmra.mrb[12].mxu1 %v23890_v2  ;;  %v19238_v2 = vcombine.high %v1747_v23, %v1751_v26  ;;  %v1795_v23 = vld [vmem:[#allocation4 + $0x1ed0] sm:$0xff] }
 0x523   : > { %8379 = vmatpush1.bf16.msra.mxu0 %v19213_v54  ;;  %8803 = vmatpush1.bf16.msra.mxu1 %v19215_v22  ;;  %v19261_v54 = vcombine.low %v1771_v8, %v1775_v41  ;;  %v19263_v22 = vcombine.low %v1772_v57, %v1776_v37  ;;  %v1799_v26 = vld [vmem:[#allocation4 + $0x1ef0] sm:$0xff]  ;;  %v1820_v57 = vld [vmem:[#allocation4 + $0x1f98] sm:$0xff] }
 0x524   : > { %8380 = vmatprep.subr.bf16.mxu0 %v19222_v36  ;;  %8804 = vmatprep.subr.bf16.mxu1 %v19224_v27  ;;  %v19270_v36 = vcombine.high %v1779_v6, %v1783_v40  ;;  %v19272_v27 = vcombine.high %v1780_v13, %v1784_v32  ;;  %v1819_v8 = vld [vmem:[#allocation4 + $0x1f90] sm:$0xff]  ;;  %v1824_v37 = vld [vmem:[#allocation4 + $0x1fb8] sm:$0xff] }
 0x525   : > { %8406 = vmatprep.mubr.bf16.mxu0 %v23894_v63  ;;  %8830 = vmatprep.mubr.bf16.mxu1 %v23894_v63  ;;  %v19248_v63 = vcombine.high %v1756_v58, %v1760_v12  ;;  %v1804_v58 = vld [vmem:[#allocation4 + $0x1f18] sm:$0xff]  ;;  %v1823_v41 = vld [vmem:[#allocation4 + $0x1fb0] sm:$0xff] }
 0x526   : > { %v1808_v12 = vld [vmem:[#allocation4 + $0x1f38] sm:$0xff] }
 0x527   : > { %8381 = vmatpush1.bf16.msra.mxu0 %v19221_v25  ;;  %8805 = vmatpush1.bf16.msra.mxu1 %v19223_v38  ;;  %v19269_v25 = vcombine.low %v1779_v6, %v1783_v40  ;;  %v19271_v38 = vcombine.low %v1780_v13, %v1784_v32  ;;  %v1827_v6 = vld [vmem:[#allocation4 + $0x1fd0] sm:$0xff]  ;;  %v1828_v13 = vld [vmem:[#allocation4 + $0x1fd8] sm:$0xff] }
 0x528   : > { %8382 = vmatprep.subr.bf16.mxu0 %v19230_v18  ;;  %8806 = vmatprep.subr.bf16.mxu1 %v19232_v5  ;;  %v19278_v18 = vcombine.high %v1787_v34, %v1791_v16  ;;  %v19280_v5 = vcombine.high %v1788_v49, %v1792_v50  ;;  %v1831_v40 = vld [vmem:[#allocation4 + $0x1ff0] sm:$0xff]  ;;  %v1832_v32 = vld [vmem:[#allocation4 + $0x1ff8] sm:$0xff] }
 0x52b   : > { %8383 = vmatpush1.bf16.msra.mxu0 %v19229_v30  ;;  %8807 = vmatpush1.bf16.msra.mxu1 %v19231_v33  ;;  %v19277_v30 = vcombine.low %v1787_v34, %v1791_v16  ;;  %v19279_v33 = vcombine.low %v1788_v49, %v1792_v50  ;;  %v19317_v34 = vcombine.low %v1827_v6, %v1831_v40  ;;  %v21099_v49 = vld [vmem:[#allocation6 + $0x4] ss:$16 sps:$4 sm:$0xff]   ;;  %v21102_v50 = vld [vmem:[#allocation6 + $0xc] ss:$16 sps:$4 sm:$0xff]  }
 0x52c   : > { %8384 = vmatprep.subr.bf16.mxu0 %v19238_v2  ;;  %8808 = vmatprep.subr.bf16.mxu1 %v19240_v0  ;;  %v19286_v2 = vcombine.high %v1795_v23, %v1799_v26  ;;  %v19288_v0 = vcombine.high %v1796_v29, %v1800_v1  ;;  %v19319_v16 = vcombine.low %v1828_v13, %v1832_v32 }
 0x52f   : > { %8385 = vmatpush1.bf16.msra.mxu0 %v19237_v43  ;;  %8809 = vmatpush1.bf16.msra.mxu1 %v19239_v17  ;;  %v19285_v43 = vcombine.low %v1795_v23, %v1799_v26  ;;  %v19287_v17 = vcombine.low %v1796_v29, %v1800_v1  ;;  %v21103_v23 = vld [vmem:[#allocation6 + $0x20] ss:$16 sps:$4 sm:$0xff]   ;;  %v21106_v26 = vld [vmem:[#allocation6 + $0x28] ss:$16 sps:$4 sm:$0xff]   ;;  %v21111_v29 = vld [vmem:[#allocation6 + $0x44] ss:$16 sps:$4 sm:$0xff]  }
 0x530   : > { %8386 = vmatprep.subr.bf16.mxu0 %v19246_v4  ;;  %8810 = vmatprep.subr.bf16.mxu1 %v19248_v63  ;;  %v19294_v4 = vcombine.high %v1803_v59, %v1807_v46  ;;  %v19296_v63 = vcombine.high %v1804_v58, %v1808_v12  ;;  %v21114_v1 = vld [vmem:[#allocation6 + $0x4c] ss:$16 sps:$4 sm:$0xff]  }
 0x533   : > { %8387 = vmatpush1.bf16.msra.mxu0 %v19245_v60  ;;  %8811 = vmatpush1.bf16.msra.mxu1 %v19247_v61  ;;  %v19293_v60 = vcombine.low %v1803_v59, %v1807_v46  ;;  %v19295_v61 = vcombine.low %v1804_v58, %v1808_v12  ;;  %v21118_v59 = vld [vmem:[#allocation6 + $0x68] ss:$16 sps:$4 sm:$0xff]   ;;  %v21126_v46 = vld [vmem:[#allocation6 + $0x8c] ss:$16 sps:$4 sm:$0xff]   ;;  %v21121_v12 = vld [vmem:[#allocation6 + $0x80] ss:$16 sps:$4 sm:$0xff]  }
 0x534   : > { %8388 = vmatprep.subr.bf16.mxu0 %v19254_v3  ;;  %8812 = vmatprep.subr.bf16.mxu1 %v19256_v28  ;;  %v19302_v3 = vcombine.high %v1811_v35, %v1815_v21  ;;  %v19304_v28 = vcombine.high %v1812_v55, %v1816_v62  ;;  %v10889_v58 = vld [vmem:[%s765_s18] sm:$0xff] }
 0x537   : > { %8389 = vmatpush1.bf16.msra.mxu0 %v19253_v24  ;;  %8813 = vmatpush1.bf16.msra.mxu1 %v19255_v51  ;;  %v19301_v24 = vcombine.low %v1811_v35, %v1815_v21  ;;  %v19303_v51 = vcombine.low %v1812_v55, %v1816_v62  ;;  %v21130_v35 = vld [vmem:[#allocation6 + $0xa8] ss:$16 sps:$4 sm:$0xff]   ;;  %v21135_v21 = vld [vmem:[#allocation6 + $0xc4] ss:$16 sps:$4 sm:$0xff]   ;;  %v21138_v55 = vld [vmem:[#allocation6 + $0xcc] ss:$16 sps:$4 sm:$0xff]  }
 0x538   : > { %8390 = vmatprep.subr.bf16.mxu0 %v19262_v7  ;;  %8814 = vmatprep.subr.bf16.mxu1 %v19264_v52  ;;  %v19310_v7 = vcombine.high %v1819_v8, %v1823_v41  ;;  %v19312_v52 = vcombine.high %v1820_v57, %v1824_v37  ;;  %v21133_v62 = vld [vmem:[#allocation6 + $0xc0] ss:$16 sps:$4 sm:$0xff]  }
 0x53b   : > { %8391 = vmatpush1.bf16.msra.mxu0 %v19261_v54  ;;  %8815 = vmatpush1.bf16.msra.mxu1 %v19263_v22  ;;  %v19309_v54 = vcombine.low %v1819_v8, %v1823_v41  ;;  %v19311_v22 = vcombine.low %v1820_v57, %v1824_v37  ;;  %v21142_v8 = vld [vmem:[#allocation6 + $0xe8] ss:$16 sps:$4 sm:$0xff]   ;;  %v21147_v41 = vld [vmem:[#allocation6 + $0x104] ss:$16 sps:$4 sm:$0xff]   ;;  %v21150_v57 = vld [vmem:[#allocation6 + $0x10c] ss:$16 sps:$4 sm:$0xff]  }
 0x53c   : > { %8392 = vmatprep.subr.bf16.mxu0 %v19270_v36  ;;  %8816 = vmatprep.subr.bf16.mxu1 %v19272_v27  ;;  %v19318_v36 = vcombine.high %v1827_v6, %v1831_v40  ;;  %v19320_v27 = vcombine.high %v1828_v13, %v1832_v32  ;;  %v21145_v37 = vld [vmem:[#allocation6 + $0x100] ss:$16 sps:$4 sm:$0xff]   ;;  %v21154_v6 = vld [vmem:[#allocation6 + $0x128] ss:$16 sps:$4 sm:$0xff]   ;;  %v21159_v40 = vld [vmem:[#allocation6 + $0x144] ss:$16 sps:$4 sm:$0xff]  }
 0x53d   : > { %v21162_v13 = vld [vmem:[#allocation6 + $0x14c] ss:$16 sps:$4 sm:$0xff]   ;;  %v21157_v32 = vld [vmem:[#allocation6 + $0x140] ss:$16 sps:$4 sm:$0xff]  }
 0x53f   : > { %8393 = vmatpush1.bf16.msra.mxu0 %v19269_v25  ;;  %8817 = vmatpush1.bf16.msra.mxu1 %v19271_v38  ;;  %v21097_v25 = vld [vmem:[#allocation6] ss:$16 sps:$4 sm:$0xff]   ;;  %v21100_v38 = vld [vmem:[#allocation6 + $0x8] ss:$16 sps:$4 sm:$0xff]  }
 0x540   : > { %8394 = vmatprep.subr.bf16.mxu0 %v19278_v18  ;;  %8818 = vmatprep.subr.bf16.mxu1 %v19280_v5  ;;  %v21105_v18 = vld [vmem:[#allocation6 + $0x24] ss:$16 sps:$4 sm:$0xff]   ;;  %v21108_v5 = vld [vmem:[#allocation6 + $0x2c] ss:$16 sps:$4 sm:$0xff]  }
 0x543   : > { %8395 = vmatpush1.bf16.msra.mxu0 %v19277_v30  ;;  %8819 = vmatpush1.bf16.msra.mxu1 %v19279_v33  ;;  %v21109_v30 = vld [vmem:[#allocation6 + $0x40] ss:$16 sps:$4 sm:$0xff]   ;;  %v21112_v33 = vld [vmem:[#allocation6 + $0x48] ss:$16 sps:$4 sm:$0xff]  }
 0x544   : > { %8396 = vmatprep.subr.bf16.mxu0 %v19286_v2  ;;  %8820 = vmatprep.subr.bf16.mxu1 %v19288_v0  ;;  %v21120_v2 = vld [vmem:[#allocation6 + $0x6c] ss:$16 sps:$4 sm:$0xff]   ;;  %v21115_v0 = vld [vmem:[#allocation6 + $0x60] ss:$16 sps:$4 sm:$0xff]  }
 0x547   : > { %8397 = vmatpush1.bf16.msra.mxu0 %v19285_v43  ;;  %8821 = vmatpush1.bf16.msra.mxu1 %v19287_v17  ;;  %v21124_v43 = vld [vmem:[#allocation6 + $0x88] ss:$16 sps:$4 sm:$0xff]   ;;  %v21129_v17 = vld [vmem:[#allocation6 + $0xa4] ss:$16 sps:$4 sm:$0xff]  }
 0x548   : > { %8398 = vmatprep.subr.bf16.mxu0 %v19294_v4  ;;  %8822 = vmatprep.subr.bf16.mxu1 %v19296_v63  ;;  %v10890_v4 = vld [vmem:[%s765_s18 + $0x8] sm:$0xff] }
 0x549   : > { %v21127_v63 = vld [vmem:[#allocation6 + $0xa0] ss:$16 sps:$4 sm:$0xff]  }
 0x54b   : > { %8399 = vmatpush1.bf16.msra.mxu0 %v19293_v60  ;;  %8823 = vmatpush1.bf16.msra.mxu1 %v19295_v61  ;;  %v21136_v60 = vld [vmem:[#allocation6 + $0xc8] ss:$16 sps:$4 sm:$0xff]   ;;  %v21141_v61 = vld [vmem:[#allocation6 + $0xe4] ss:$16 sps:$4 sm:$0xff]  }
 0x54c   : > { %8400 = vmatprep.subr.bf16.mxu0 %v19302_v3  ;;  %8824 = vmatprep.subr.bf16.mxu1 %v19304_v28  ;;  %v21144_v3 = vld [vmem:[#allocation6 + $0xec] ss:$16 sps:$4 sm:$0xff]   ;;  %v21139_v28 = vld [vmem:[#allocation6 + $0xe0] ss:$16 sps:$4 sm:$0xff]  }
 0x54f   : > { %8401 = vmatpush1.bf16.msra.mxu0 %v19301_v24  ;;  %8825 = vmatpush1.bf16.msra.mxu1 %v19303_v51  ;;  %v21148_v24 = vld [vmem:[#allocation6 + $0x108] ss:$16 sps:$4 sm:$0xff]   ;;  %v21153_v51 = vld [vmem:[#allocation6 + $0x124] ss:$16 sps:$4 sm:$0xff]  }
 0x550   : > { %8402 = vmatprep.subr.bf16.mxu0 %v19310_v7  ;;  %8826 = vmatprep.subr.bf16.mxu1 %v19312_v52  ;;  %v21156_v7 = vld [vmem:[#allocation6 + $0x12c] ss:$16 sps:$4 sm:$0xff]   ;;  %v21151_v52 = vld [vmem:[#allocation6 + $0x120] ss:$16 sps:$4 sm:$0xff]  }
 0x553   : > { %8403 = vmatpush1.bf16.msra.mxu0 %v19309_v54  ;;  %8827 = vmatpush1.bf16.msra.mxu1 %v19311_v22  ;;  %v21160_v54 = vld [vmem:[#allocation6 + $0x148] ss:$16 sps:$4 sm:$0xff]   ;;  %v21165_v22 = vld [vmem:[#allocation6 + $0x164] ss:$16 sps:$4 sm:$0xff]  }
 0x554   : > { %8404 = vmatprep.subr.bf16.mxu0 %v19318_v36  ;;  %8828 = vmatprep.subr.bf16.mxu1 %v19320_v27  ;;  %v21168_v36 = vld [vmem:[#allocation6 + $0x16c] ss:$16 sps:$4 sm:$0xff]   ;;  %v21163_v27 = vld [vmem:[#allocation6 + $0x160] ss:$16 sps:$4 sm:$0xff]  }
 0x557   : > { %8405 = vmatpush1.bf16.msra.mxu0 %v19317_v34  ;;  %8829 = vmatpush1.bf16.msra.mxu1 %v19319_v16  ;;  %v21166_v34 = vld [vmem:[#allocation6 + $0x168] ss:$16 sps:$4 sm:$0xff]   ;;  %v21171_v16 = vld [vmem:[#allocation6 + $0x184] ss:$16 sps:$4 sm:$0xff]  }
 0x558   : > { %10457 = vmatprep.subr.bf16.mxu0 %v21099_v49  ;;  %10669 = vmatprep.subr.bf16.mxu1 %v21102_v50  ;;  %v21174_v49 = vld [vmem:[#allocation6 + $0x18c] ss:$16 sps:$4 sm:$0xff]   ;;  %v21169_v50 = vld [vmem:[#allocation6 + $0x180] ss:$16 sps:$4 sm:$0xff]  }
 0x55a   : > { %8407 = vmatmul.mubr.bf16.vlgmr.msra.gmra.mrb[8].mxu0 %v23904_v19  ;;  %8831 = vmatmul.mubr.bf16.vlgmr.msra.gmra.mrb[8].mxu1 %v23904_v19  ;;  %v21117_v19 = vld [vmem:[#allocation6 + $0x64] ss:$16 sps:$4 sm:$0xff]  }
 0x55b   : > { %10458 = vmatpush1.bf16.msra.mxu0 %v21097_v25  ;;  %10670 = vmatpush1.bf16.msra.mxu1 %v21100_v38  ;;  %v21172_v25 = vld [vmem:[#allocation6 + $0x188] ss:$16 sps:$4 sm:$0xff]   ;;  %v21177_v38 = vld [vmem:[#allocation6 + $0x1a4] ss:$16 sps:$4 sm:$0xff]  }
 0x55c   : > { %10459 = vmatprep.subr.bf16.mxu0 %v21105_v18  ;;  %10671 = vmatprep.subr.bf16.mxu1 %v21108_v5  ;;  %v21180_v18 = vld [vmem:[#allocation6 + $0x1ac] ss:$16 sps:$4 sm:$0xff]   ;;  %v21175_v5 = vld [vmem:[#allocation6 + $0x1a0] ss:$16 sps:$4 sm:$0xff]  }
 0x55d   : > { %8416 = vmatprep.mubr.bf16.mxu0 %v23906_v31  ;;  %8840 = vmatprep.mubr.bf16.mxu1 %v23906_v31  ;;  %v21123_v31 = vld [vmem:[#allocation6 + $0x84] ss:$16 sps:$4 sm:$0xff]  }
 0x55f   : > { %10460 = vmatpush1.bf16.msra.mxu0 %v21103_v23  ;;  %10672 = vmatpush1.bf16.msra.mxu1 %v21106_v26  ;;  %v21178_v23 = vld [vmem:[#allocation6 + $0x1a8] ss:$16 sps:$4 sm:$0xff]   ;;  %v21183_v26 = vld [vmem:[#allocation6 + $0x1c4] ss:$16 sps:$4 sm:$0xff]  }
 0x560   : > { %10461 = vmatprep.subr.bf16.mxu0 %v21111_v29  ;;  %10673 = vmatprep.subr.bf16.mxu1 %v21114_v1  ;;  %v21186_v29 = vld [vmem:[#allocation6 + $0x1cc] ss:$16 sps:$4 sm:$0xff]   ;;  %v21181_v1 = vld [vmem:[#allocation6 + $0x1c0] ss:$16 sps:$4 sm:$0xff]  }
 0x562   : > { %8417 = vmatmul.mubr.bf16.gmra.mrb[12].mxu0 %v23912_v44  ;;  %8841 = vmatmul.mubr.bf16.gmra.mrb[12].mxu1 %v23912_v44  ;;  %v23251_v44 = vmov 0  }
 0x563   : > { %10462 = vmatpush1.bf16.msra.mxu0 %v21109_v30  ;;  %10489 = vmatprep.mubr.bf16.mxu0 %v23998_v11  ;;  %v21184_v30 = vld [vmem:[#allocation6 + $0x1c8] ss:$16 sps:$4 sm:$0xff]  }
 0x564   : > { %10674 = vmatpush1.bf16.msra.mxu1 %v21112_v33  ;;  %10701 = vmatprep.mubr.bf16.mxu1 %v23998_v11  ;;  %v21132_v11 = vld [vmem:[#allocation6 + $0xac] ss:$16 sps:$4 sm:$0xff]   ;;  %v21189_v33 = vld [vmem:[#allocation6 + $0x1e4] ss:$16 sps:$4 sm:$0xff]  }
 0x565   : > { %10463 = vmatprep.subr.bf16.mxu0 %v21117_v19  ;;  %10675 = vmatprep.subr.bf16.mxu1 %v21120_v2  ;;  %v21192_v19 = vld [vmem:[#allocation6 + $0x1ec] ss:$16 sps:$4 sm:$0xff]   ;;  %v21187_v2 = vld [vmem:[#allocation6 + $0x1e0] ss:$16 sps:$4 sm:$0xff]  }
 0x566   : > { %21096 = vset.pattern.permute.xlu0 %v23251_v44 }
 0x567   : > { %10464 = vmatpush1.bf16.msra.mxu0 %v21115_v0  ;;  %10894 = vperm.xlu0 %21096, %v10889_v58   ;;  %v21190_v0 = vld [vmem:[#allocation6 + $0x1e8] ss:$16 sps:$4 sm:$0xff]  }
 0x568   : > { %10676 = vmatpush1.bf16.msra.mxu1 %v21118_v59  ;;  %10465 = vmatprep.subr.bf16.mxu0 %v21123_v31  ;;  %v21195_v59 = vld [vmem:[#allocation6 + $0x204] ss:$16 sps:$4 sm:$0xff]   ;;  %v21198_v31 = vld [vmem:[#allocation6 + $0x20c] ss:$16 sps:$4 sm:$0xff]   ;;  %v21196_v58 = vld [vmem:[#allocation6 + $0x208] ss:$16 sps:$4 sm:$0xff]  }
 0x569   : > { %10677 = vmatprep.subr.bf16.mxu1 %v21126_v46  ;;  %v21193_v46 = vld [vmem:[#allocation6 + $0x200] ss:$16 sps:$4 sm:$0xff]  }
 0x56b   : > { %10466 = vmatpush1.bf16.msra.mxu0 %v21121_v12  ;;  %10899 = vperm.xlu0 %21096, %v10890_v4   ;;  %v21201_v12 = vld [vmem:[#allocation6 + $0x224] ss:$16 sps:$4 sm:$0xff]   ;;  %v21202_v4 = vld [vmem:[#allocation6 + $0x228] ss:$16 sps:$4 sm:$0xff]  }
 0x56c   : > { %10678 = vmatpush1.bf16.msra.mxu1 %v21124_v43  ;;  %10467 = vmatprep.subr.bf16.mxu0 %v21129_v17  ;;  %v21204_v43 = vld [vmem:[#allocation6 + $0x22c] ss:$16 sps:$4 sm:$0xff]   ;;  %v21199_v17 = vld [vmem:[#allocation6 + $0x220] ss:$16 sps:$4 sm:$0xff]  }
 0x56d   : > { %10679 = vmatprep.subr.bf16.mxu1 %v21132_v11  ;;  %v21207_v11 = vld [vmem:[#allocation6 + $0x244] ss:$16 sps:$4 sm:$0xff]  }
 0x56f   : > { %10468 = vmatpush1.bf16.msra.mxu0 %v21127_v63  ;;  %v21210_v63 = vld [vmem:[#allocation6 + $0x24c] ss:$16 sps:$4 sm:$0xff]  }
 0x570   : > { %10680 = vmatpush1.bf16.msra.mxu1 %v21130_v35  ;;  %10469 = vmatprep.subr.bf16.mxu0 %v21135_v21  ;;  %v21205_v35 = vld [vmem:[#allocation6 + $0x240] ss:$16 sps:$4 sm:$0xff]   ;;  %v21208_v21 = vld [vmem:[#allocation6 + $0x248] ss:$16 sps:$4 sm:$0xff]  }
 0x571   : > { %10681 = vmatprep.subr.bf16.mxu1 %v21138_v55  ;;  %v21213_v55 = vld [vmem:[#allocation6 + $0x264] ss:$16 sps:$4 sm:$0xff]  }
 0x573   : > { %10470 = vmatpush1.bf16.msra.mxu0 %v21133_v62  ;;  %v21214_v62 = vld [vmem:[#allocation6 + $0x268] ss:$16 sps:$4 sm:$0xff]  }
 0x574   : > { %10682 = vmatpush1.bf16.msra.mxu1 %v21136_v60  ;;  %10471 = vmatprep.subr.bf16.mxu0 %v21141_v61  ;;  %v21219_v60 = vld [vmem:[#allocation6 + $0x284] ss:$16 sps:$4 sm:$0xff]   ;;  %v21222_v61 = vld [vmem:[#allocation6 + $0x28c] ss:$16 sps:$4 sm:$0xff]  }
 0x575   : > { %10683 = vmatprep.subr.bf16.mxu1 %v21144_v3  ;;  %v21217_v3 = vld [vmem:[#allocation6 + $0x280] ss:$16 sps:$4 sm:$0xff]  }
 0x577   : > { %10472 = vmatpush1.bf16.msra.mxu0 %v21139_v28  ;;  %v21220_v28 = vld [vmem:[#allocation6 + $0x288] ss:$16 sps:$4 sm:$0xff]  }
 0x578   : > { %10684 = vmatpush1.bf16.msra.mxu1 %v21142_v8  ;;  %10473 = vmatprep.subr.bf16.mxu0 %v21147_v41  ;;  %v21225_v8 = vld [vmem:[#allocation6 + $0x2a4] ss:$16 sps:$4 sm:$0xff]   ;;  %v21223_v41 = vld [vmem:[#allocation6 + $0x2a0] ss:$16 sps:$4 sm:$0xff]  }
 0x579   : > { %10685 = vmatprep.subr.bf16.mxu1 %v21150_v57  ;;  %v21231_v57 = vld [vmem:[#allocation6 + $0x2c4] ss:$16 sps:$4 sm:$0xff]  }
 0x57b   : > { %10474 = vmatpush1.bf16.msra.mxu0 %v21145_v37  ;;  %v21234_v37 = vld [vmem:[#allocation6 + $0x2cc] ss:$16 sps:$4 sm:$0xff]  }
 0x57c   : > { %10686 = vmatpush1.bf16.msra.mxu1 %v21148_v24  ;;  %10475 = vmatprep.subr.bf16.mxu0 %v21153_v51  ;;  %v21229_v24 = vld [vmem:[#allocation6 + $0x2c0] ss:$16 sps:$4 sm:$0xff]   ;;  %v21232_v51 = vld [vmem:[#allocation6 + $0x2c8] ss:$16 sps:$4 sm:$0xff]  }
 0x57d   : > { %10687 = vmatprep.subr.bf16.mxu1 %v21156_v7  ;;  %v21237_v7 = vld [vmem:[#allocation6 + $0x2e4] ss:$16 sps:$4 sm:$0xff]  }
 0x57f   : > { %10476 = vmatpush1.bf16.msra.mxu0 %v21151_v52  ;;  %v21240_v52 = vld [vmem:[#allocation6 + $0x2ec] ss:$16 sps:$4 sm:$0xff]  }
 0x580   : > { %10688 = vmatpush1.bf16.msra.mxu1 %v21154_v6  ;;  %10477 = vmatprep.subr.bf16.mxu0 %v21159_v40  ;;  %v21235_v6 = vld [vmem:[#allocation6 + $0x2e0] ss:$16 sps:$4 sm:$0xff]   ;;  %v21238_v40 = vld [vmem:[#allocation6 + $0x2e8] ss:$16 sps:$4 sm:$0xff]  }
 0x581   : > { %10689 = vmatprep.subr.bf16.mxu1 %v21162_v13  ;;  %v21243_v13 = vld [vmem:[#allocation6 + $0x304] ss:$16 sps:$4 sm:$0xff]  }
 0x583   : > { %10478 = vmatpush1.bf16.msra.mxu0 %v21157_v32  ;;  %v21246_v32 = vld [vmem:[#allocation6 + $0x30c] ss:$16 sps:$4 sm:$0xff]  }
 0x584   : > { %10690 = vmatpush1.bf16.msra.mxu1 %v21160_v54  ;;  %10479 = vmatprep.subr.bf16.mxu0 %v21165_v22  ;;  %v21241_v54 = vld [vmem:[#allocation6 + $0x300] ss:$16 sps:$4 sm:$0xff]   ;;  %v21244_v22 = vld [vmem:[#allocation6 + $0x308] ss:$16 sps:$4 sm:$0xff]  }
 0x585   : > { %10691 = vmatprep.subr.bf16.mxu1 %v21168_v36  ;;  %v21249_v36 = vld [vmem:[#allocation6 + $0x324] ss:$16 sps:$4 sm:$0xff]  }
 0x587   : > { %10480 = vmatpush1.bf16.msra.mxu0 %v21163_v27  ;;  %v21252_v27 = vld [vmem:[#allocation6 + $0x32c] ss:$16 sps:$4 sm:$0xff]  }
 0x588   : > { %10692 = vmatpush1.bf16.msra.mxu1 %v21166_v34  ;;  %10481 = vmatprep.subr.bf16.mxu0 %v21171_v16  ;;  %v21247_v34 = vld [vmem:[#allocation6 + $0x320] ss:$16 sps:$4 sm:$0xff]   ;;  %v21250_v16 = vld [vmem:[#allocation6 + $0x328] ss:$16 sps:$4 sm:$0xff]  }
 0x589   : > { %10693 = vmatprep.subr.bf16.mxu1 %v21174_v49  ;;  %v21255_v49 = vld [vmem:[#allocation6 + $0x344] ss:$16 sps:$4 sm:$0xff]  }
 0x58b   : > { %10482 = vmatpush1.bf16.msra.mxu0 %v21169_v50  ;;  %v21258_v50 = vld [vmem:[#allocation6 + $0x34c] ss:$16 sps:$4 sm:$0xff]  }
 0x58c   : > { %10694 = vmatpush1.bf16.msra.mxu1 %v21172_v25  ;;  %10483 = vmatprep.subr.bf16.mxu0 %v21177_v38  ;;  %v21253_v25 = vld [vmem:[#allocation6 + $0x340] ss:$16 sps:$4 sm:$0xff]   ;;  %v21256_v38 = vld [vmem:[#allocation6 + $0x348] ss:$16 sps:$4 sm:$0xff]  }
 0x58d   : > { %10695 = vmatprep.subr.bf16.mxu1 %v21180_v18  ;;  %v21261_v18 = vld [vmem:[#allocation6 + $0x364] ss:$16 sps:$4 sm:$0xff]  }
 0x58f   : > { %10484 = vmatpush1.bf16.msra.mxu0 %v21175_v5  ;;  %v21264_v5 = vld [vmem:[#allocation6 + $0x36c] ss:$16 sps:$4 sm:$0xff]  }
 0x590   : > { %10696 = vmatpush1.bf16.msra.mxu1 %v21178_v23  ;;  %10485 = vmatprep.subr.bf16.mxu0 %v21183_v26  ;;  %v21259_v23 = vld [vmem:[#allocation6 + $0x360] ss:$16 sps:$4 sm:$0xff]   ;;  %v21262_v26 = vld [vmem:[#allocation6 + $0x368] ss:$16 sps:$4 sm:$0xff]  }
 0x591   : > { %10697 = vmatprep.subr.bf16.mxu1 %v21186_v29  ;;  %v21267_v29 = vld [vmem:[#allocation6 + $0x384] ss:$16 sps:$4 sm:$0xff]  }
 0x593   : > { %10486 = vmatpush1.bf16.msra.mxu0 %v21181_v1  ;;  %v21270_v1 = vld [vmem:[#allocation6 + $0x38c] ss:$16 sps:$4 sm:$0xff]  }
 0x594   : > { %10698 = vmatpush1.bf16.msra.mxu1 %v21184_v30  ;;  %10487 = vmatprep.subr.bf16.mxu0 %v21189_v33  ;;  %v21265_v30 = vld [vmem:[#allocation6 + $0x380] ss:$16 sps:$4 sm:$0xff]   ;;  %v21268_v33 = vld [vmem:[#allocation6 + $0x388] ss:$16 sps:$4 sm:$0xff]  }
 0x595   : > { %10699 = vmatprep.subr.bf16.mxu1 %v21192_v19  ;;  %v21273_v19 = vld [vmem:[#allocation6 + $0x3a4] ss:$16 sps:$4 sm:$0xff]  }
 0x597   : > { %10488 = vmatpush1.bf16.msra.mxu0 %v21187_v2  ;;  %v21276_v2 = vld [vmem:[#allocation6 + $0x3ac] ss:$16 sps:$4 sm:$0xff]  }
 0x598   : > { %10700 = vmatpush1.bf16.msra.mxu1 %v21190_v0  ;;  %10510 = vmatprep.subr.bf16.mxu0 %v21195_v59  ;;  %v21271_v0 = vld [vmem:[#allocation6 + $0x3a0] ss:$16 sps:$4 sm:$0xff]   ;;  %v21274_v59 = vld [vmem:[#allocation6 + $0x3a8] ss:$16 sps:$4 sm:$0xff]  }
 0x599   : > { %10722 = vmatprep.subr.bf16.mxu1 %v21198_v31  ;;  %v21279_v31 = vld [vmem:[#allocation6 + $0x3c4] ss:$16 sps:$4 sm:$0xff]  }
 0x59a   : > { %10490 = vmatmul.mubr.bf16.vlgmr.msra.gmra.mrb[16].mxu0 %v23992_v9 }
 0x59b   : > { %10702 = vmatmul.mubr.bf16.vlgmr.msra.gmra.mrb[16].mxu1 %v23992_v9  ;;  %10499 = vmatprep.mubr.bf16.mxu0 %v24016_v47  ;;  %v21216_v9 = vld [vmem:[#allocation6 + $0x26c] ss:$16 sps:$4 sm:$0xff]  }
 0x59c   : > { %10511 = vmatpush1.bf16.msra.mxu0 %v21193_v46  ;;  %10711 = vmatprep.mubr.bf16.mxu1 %v24016_v47  ;;  %v21211_v47 = vld [vmem:[#allocation6 + $0x260] ss:$16 sps:$4 sm:$0xff]   ;;  %v21282_v46 = vld [vmem:[#allocation6 + $0x3cc] ss:$16 sps:$4 sm:$0xff]  }
 0x59d   : > { %10723 = vmatpush1.bf16.msra.mxu1 %v21196_v58  ;;  %10512 = vmatprep.subr.bf16.mxu0 %v21201_v12  ;;  %v21277_v58 = vld [vmem:[#allocation6 + $0x3c0] ss:$16 sps:$4 sm:$0xff]   ;;  %v21280_v12 = vld [vmem:[#allocation6 + $0x3c8] ss:$16 sps:$4 sm:$0xff]  }
 0x59e   : > { %10724 = vmatprep.subr.bf16.mxu1 %v21204_v43  ;;  %v21285_v43 = vld [vmem:[#allocation6 + $0x3e4] ss:$16 sps:$4 sm:$0xff]  }
 0x5a0   : > { %10513 = vmatpush1.bf16.msra.mxu0 %v21199_v17  ;;  %v21288_v17 = vld [vmem:[#allocation6 + $0x3ec] ss:$16 sps:$4 sm:$0xff]  }
 0x5a1   : > { %10725 = vmatpush1.bf16.msra.mxu1 %v21202_v4  ;;  %10514 = vmatprep.subr.bf16.mxu0 %v21207_v11  ;;  %v21283_v4 = vld [vmem:[#allocation6 + $0x3e0] ss:$16 sps:$4 sm:$0xff]   ;;  %v21286_v11 = vld [vmem:[#allocation6 + $0x3e8] ss:$16 sps:$4 sm:$0xff]  }
 0x5a2   : > { %10500 = vmatmul.mubr.bf16.gmra.mrb[20].mxu0 %v24012_v56  ;;  %10726 = vmatprep.subr.bf16.mxu1 %v21210_v63  ;;  %v21291_v63 = vld [vmem:[#allocation6 + $0x404] ss:$16 sps:$4 sm:$0xff]  }
 0x5a3   : > { %10712 = vmatmul.mubr.bf16.gmra.mrb[20].mxu1 %v24012_v56  ;;  %10542 = vmatprep.mubr.bf16.mxu0 %v24000_v53  ;;  %v21228_v56 = vld [vmem:[#allocation6 + $0x2ac] ss:$16 sps:$4 sm:$0xff]  }
 0x5a4   : > { %10515 = vmatpush1.bf16.msra.mxu0 %v21205_v35  ;;  %10754 = vmatprep.mubr.bf16.mxu1 %v24000_v53  ;;  %v21226_v53 = vld [vmem:[#allocation6 + $0x2a8] ss:$16 sps:$4 sm:$0xff]   ;;  %v21294_v35 = vld [vmem:[#allocation6 + $0x40c] ss:$16 sps:$4 sm:$0xff]  }
 0x5a5   : > { %10727 = vmatpush1.bf16.msra.mxu1 %v21208_v21  ;;  %10516 = vmatprep.subr.bf16.mxu0 %v21213_v55  ;;  %v21289_v21 = vld [vmem:[#allocation6 + $0x400] ss:$16 sps:$4 sm:$0xff]   ;;  %v21292_v55 = vld [vmem:[#allocation6 + $0x408] ss:$16 sps:$4 sm:$0xff]  }
 0x5a6   : > { %10728 = vmatprep.subr.bf16.mxu1 %v21216_v9  ;;  %v21297_v9 = vld [vmem:[#allocation6 + $0x424] ss:$16 sps:$4 sm:$0xff]  }
 0x5a8   : > { %10517 = vmatpush1.bf16.msra.mxu0 %v21211_v47  ;;  %v21300_v47 = vld [vmem:[#allocation6 + $0x42c] ss:$16 sps:$4 sm:$0xff]  }
 0x5a9   : > { %10729 = vmatpush1.bf16.msra.mxu1 %v21214_v62  ;;  %10518 = vmatprep.subr.bf16.mxu0 %v21219_v60  ;;  %v21295_v62 = vld [vmem:[#allocation6 + $0x420] ss:$16 sps:$4 sm:$0xff]   ;;  %v21298_v60 = vld [vmem:[#allocation6 + $0x428] ss:$16 sps:$4 sm:$0xff]  }
 0x5aa   : > { %10730 = vmatprep.subr.bf16.mxu1 %v21222_v61  ;;  %v21303_v61 = vld [vmem:[#allocation6 + $0x444] ss:$16 sps:$4 sm:$0xff]  }
 0x5ac   : > { %10519 = vmatpush1.bf16.msra.mxu0 %v21217_v3  ;;  %v21306_v3 = vld [vmem:[#allocation6 + $0x44c] ss:$16 sps:$4 sm:$0xff]  }
 0x5ad   : > { %10731 = vmatpush1.bf16.msra.mxu1 %v21220_v28  ;;  %10520 = vmatprep.subr.bf16.mxu0 %v21225_v8  ;;  %v21301_v28 = vld [vmem:[#allocation6 + $0x440] ss:$16 sps:$4 sm:$0xff]   ;;  %v21304_v8 = vld [vmem:[#allocation6 + $0x448] ss:$16 sps:$4 sm:$0xff]  }
 0x5ae   : > { %10732 = vmatprep.subr.bf16.mxu1 %v21228_v56  ;;  %v21309_v56 = vld [vmem:[#allocation6 + $0x464] ss:$16 sps:$4 sm:$0xff]  }
 0x5b0   : > { %10521 = vmatpush1.bf16.msra.mxu0 %v21223_v41  ;;  %v21310_v41 = vld [vmem:[#allocation6 + $0x468] ss:$16 sps:$4 sm:$0xff]  }
 0x5b1   : > { %10733 = vmatpush1.bf16.msra.mxu1 %v21226_v53  ;;  %10522 = vmatprep.subr.bf16.mxu0 %v21231_v57  ;;  %v21315_v53 = vld [vmem:[#allocation6 + $0x484] ss:$16 sps:$4 sm:$0xff]   ;;  %v21318_v57 = vld [vmem:[#allocation6 + $0x48c] ss:$16 sps:$4 sm:$0xff]  }
 0x5b2   : > { %10734 = vmatprep.subr.bf16.mxu1 %v21234_v37  ;;  %v21313_v37 = vld [vmem:[#allocation6 + $0x480] ss:$16 sps:$4 sm:$0xff]  }
 0x5b4   : > { %10523 = vmatpush1.bf16.msra.mxu0 %v21229_v24  ;;  %v21316_v24 = vld [vmem:[#allocation6 + $0x488] ss:$16 sps:$4 sm:$0xff]  }
 0x5b5   : > { %10735 = vmatpush1.bf16.msra.mxu1 %v21232_v51  ;;  %10524 = vmatprep.subr.bf16.mxu0 %v21237_v7  ;;  %v21321_v51 = vld [vmem:[#allocation6 + $0x4a4] ss:$16 sps:$4 sm:$0xff]   ;;  %v21324_v7 = vld [vmem:[#allocation6 + $0x4ac] ss:$16 sps:$4 sm:$0xff]  }
 0x5b6   : > { %10736 = vmatprep.subr.bf16.mxu1 %v21240_v52  ;;  %v21319_v52 = vld [vmem:[#allocation6 + $0x4a0] ss:$16 sps:$4 sm:$0xff]  }
 0x5b8   : > { %10525 = vmatpush1.bf16.msra.mxu0 %v21235_v6  ;;  %v21327_v6 = vld [vmem:[#allocation6 + $0x4c4] ss:$16 sps:$4 sm:$0xff]  }
 0x5b9   : > { %10737 = vmatpush1.bf16.msra.mxu1 %v21238_v40  ;;  %10526 = vmatprep.subr.bf16.mxu0 %v21243_v13  ;;  %v21330_v40 = vld [vmem:[#allocation6 + $0x4cc] ss:$16 sps:$4 sm:$0xff]   ;;  %v21325_v13 = vld [vmem:[#allocation6 + $0x4c0] ss:$16 sps:$4 sm:$0xff]  }
 0x5ba   : > { %10738 = vmatprep.subr.bf16.mxu1 %v21246_v32  ;;  %v21328_v32 = vld [vmem:[#allocation6 + $0x4c8] ss:$16 sps:$4 sm:$0xff]  }
 0x5bc   : > { %10527 = vmatpush1.bf16.msra.mxu0 %v21241_v54  ;;  %v21333_v54 = vld [vmem:[#allocation6 + $0x4e4] ss:$16 sps:$4 sm:$0xff]  }
 0x5bd   : > { %10739 = vmatpush1.bf16.msra.mxu1 %v21244_v22  ;;  %10528 = vmatprep.subr.bf16.mxu0 %v21249_v36  ;;  %v21336_v22 = vld [vmem:[#allocation6 + $0x4ec] ss:$16 sps:$4 sm:$0xff]   ;;  %v21331_v36 = vld [vmem:[#allocation6 + $0x4e0] ss:$16 sps:$4 sm:$0xff]  }
 0x5be   : > { %10740 = vmatprep.subr.bf16.mxu1 %v21252_v27  ;;  %v21334_v27 = vld [vmem:[#allocation6 + $0x4e8] ss:$16 sps:$4 sm:$0xff]  }
 0x5c0   : > { %10529 = vmatpush1.bf16.msra.mxu0 %v21247_v34  ;;  %v21339_v34 = vld [vmem:[#allocation6 + $0x504] ss:$16 sps:$4 sm:$0xff]  }
 0x5c1   : > { %10741 = vmatpush1.bf16.msra.mxu1 %v21250_v16  ;;  %10530 = vmatprep.subr.bf16.mxu0 %v21255_v49  ;;  %v21342_v16 = vld [vmem:[#allocation6 + $0x50c] ss:$16 sps:$4 sm:$0xff]   ;;  %v21337_v49 = vld [vmem:[#allocation6 + $0x500] ss:$16 sps:$4 sm:$0xff]  }
 0x5c2   : > { %10742 = vmatprep.subr.bf16.mxu1 %v21258_v50  ;;  %v21340_v50 = vld [vmem:[#allocation6 + $0x508] ss:$16 sps:$4 sm:$0xff]  }
 0x5c4   : > { %10531 = vmatpush1.bf16.msra.mxu0 %v21253_v25  ;;  %v21345_v25 = vld [vmem:[#allocation6 + $0x524] ss:$16 sps:$4 sm:$0xff]  }
 0x5c5   : > { %10743 = vmatpush1.bf16.msra.mxu1 %v21256_v38  ;;  %10532 = vmatprep.subr.bf16.mxu0 %v21261_v18  ;;  %v21348_v38 = vld [vmem:[#allocation6 + $0x52c] ss:$16 sps:$4 sm:$0xff]   ;;  %v21343_v18 = vld [vmem:[#allocation6 + $0x520] ss:$16 sps:$4 sm:$0xff]  }
 0x5c6   : > { %10744 = vmatprep.subr.bf16.mxu1 %v21264_v5  ;;  %v21346_v5 = vld [vmem:[#allocation6 + $0x528] ss:$16 sps:$4 sm:$0xff]  }
 0x5c8   : > { %10533 = vmatpush1.bf16.msra.mxu0 %v21259_v23  ;;  %v21351_v23 = vld [vmem:[#allocation6 + $0x544] ss:$16 sps:$4 sm:$0xff]  }
 0x5c9   : > { %10745 = vmatpush1.bf16.msra.mxu1 %v21262_v26  ;;  %10534 = vmatprep.subr.bf16.mxu0 %v21267_v29  ;;  %v21354_v26 = vld [vmem:[#allocation6 + $0x54c] ss:$16 sps:$4 sm:$0xff]   ;;  %v21349_v29 = vld [vmem:[#allocation6 + $0x540] ss:$16 sps:$4 sm:$0xff]  }
 0x5ca   : > { %10746 = vmatprep.subr.bf16.mxu1 %v21270_v1  ;;  %v21352_v1 = vld [vmem:[#allocation6 + $0x548] ss:$16 sps:$4 sm:$0xff]  }
 0x5cc   : > { %10535 = vmatpush1.bf16.msra.mxu0 %v21265_v30  ;;  %v21357_v30 = vld [vmem:[#allocation6 + $0x564] ss:$16 sps:$4 sm:$0xff]  }
 0x5cd   : > { %10747 = vmatpush1.bf16.msra.mxu1 %v21268_v33  ;;  %10536 = vmatprep.subr.bf16.mxu0 %v21273_v19  ;;  %v21360_v33 = vld [vmem:[#allocation6 + $0x56c] ss:$16 sps:$4 sm:$0xff]   ;;  %v21355_v19 = vld [vmem:[#allocation6 + $0x560] ss:$16 sps:$4 sm:$0xff]  }
 0x5ce   : > { %10748 = vmatprep.subr.bf16.mxu1 %v21276_v2  ;;  %v21358_v2 = vld [vmem:[#allocation6 + $0x568] ss:$16 sps:$4 sm:$0xff]  }
 0x5d0   : > { %10537 = vmatpush1.bf16.msra.mxu0 %v21271_v0  ;;  %v21363_v0 = vld [vmem:[#allocation6 + $0x584] ss:$16 sps:$4 sm:$0xff]  }
 0x5d1   : > { %10749 = vmatpush1.bf16.msra.mxu1 %v21274_v59  ;;  %10538 = vmatprep.subr.bf16.mxu0 %v21279_v31  ;;  %v21366_v59 = vld [vmem:[#allocation6 + $0x58c] ss:$16 sps:$4 sm:$0xff]   ;;  %v21361_v31 = vld [vmem:[#allocation6 + $0x580] ss:$16 sps:$4 sm:$0xff]  }
 0x5d2   : > { %10750 = vmatprep.subr.bf16.mxu1 %v21282_v46  ;;  %v21364_v46 = vld [vmem:[#allocation6 + $0x588] ss:$16 sps:$4 sm:$0xff]  }
 0x5d4   : > { %10539 = vmatpush1.bf16.msra.mxu0 %v21277_v58  ;;  %v21369_v58 = vld [vmem:[#allocation6 + $0x5a4] ss:$16 sps:$4 sm:$0xff]  }
 0x5d5   : > { %10751 = vmatpush1.bf16.msra.mxu1 %v21280_v12  ;;  %10540 = vmatprep.subr.bf16.mxu0 %v21285_v43  ;;  %v21372_v12 = vld [vmem:[#allocation6 + $0x5ac] ss:$16 sps:$4 sm:$0xff]   ;;  %v21367_v43 = vld [vmem:[#allocation6 + $0x5a0] ss:$16 sps:$4 sm:$0xff]  }
 0x5d6   : > { %10752 = vmatprep.subr.bf16.mxu1 %v21288_v17  ;;  %v21370_v17 = vld [vmem:[#allocation6 + $0x5a8] ss:$16 sps:$4 sm:$0xff]  }
 0x5d8   : > { %10541 = vmatpush1.bf16.msra.mxu0 %v21283_v4  ;;  %v21375_v4 = vld [vmem:[#allocation6 + $0x5c4] ss:$16 sps:$4 sm:$0xff]  }
 0x5d9   : > { %10753 = vmatpush1.bf16.msra.mxu1 %v21286_v11  ;;  %10563 = vmatprep.subr.bf16.mxu0 %v21291_v63  ;;  %v21378_v11 = vld [vmem:[#allocation6 + $0x5cc] ss:$16 sps:$4 sm:$0xff]   ;;  %v21373_v63 = vld [vmem:[#allocation6 + $0x5c0] ss:$16 sps:$4 sm:$0xff]  }
 0x5da   : > { %10775 = vmatprep.subr.bf16.mxu1 %v21294_v35  ;;  %v21376_v35 = vld [vmem:[#allocation6 + $0x5c8] ss:$16 sps:$4 sm:$0xff]  }
 0x5db   : > { %10543 = vmatmul.mubr.bf16.vlgmr.msra.gmra.mrb[16].mxu0 %v23996_v10 }
 0x5dc   : > { %10755 = vmatmul.mubr.bf16.vlgmr.msra.gmra.mrb[16].mxu1 %v23996_v10  ;;  %10552 = vmatprep.mubr.bf16.mxu0 %v24018_v14  ;;  %v21312_v10 = vld [vmem:[#allocation6 + $0x46c] ss:$16 sps:$4 sm:$0xff]  }
 0x5dd   : > { %10764 = vmatprep.mubr.bf16.mxu1 %v24018_v14  ;;  %10564 = vmatpush1.bf16.msra.mxu0 %v21289_v21  ;;  %v21307_v14 = vld [vmem:[#allocation6 + $0x460] ss:$16 sps:$4 sm:$0xff]   ;;  %v21381_v21 = vld [vmem:[#allocation6 + $0x5e4] ss:$16 sps:$4 sm:$0xff]  }
 0x5de   : > { %10776 = vmatpush1.bf16.msra.mxu1 %v21292_v55  ;;  %10565 = vmatprep.subr.bf16.mxu0 %v21297_v9  ;;  %v21384_v55 = vld [vmem:[#allocation6 + $0x5ec] ss:$16 sps:$4 sm:$0xff]   ;;  %v21379_v9 = vld [vmem:[#allocation6 + $0x5e0] ss:$16 sps:$4 sm:$0xff]  }
 0x5df   : > { %10777 = vmatprep.subr.bf16.mxu1 %v21300_v47  ;;  %v21382_v47 = vld [vmem:[#allocation6 + $0x5e8] ss:$16 sps:$4 sm:$0xff]  }
 0x5e1   : > { %10566 = vmatpush1.bf16.msra.mxu0 %v21295_v62  ;;  %v21387_v62 = vld [vmem:[#allocation6 + $0x604] ss:$16 sps:$4 sm:$0xff]  }
 0x5e2   : > { %10778 = vmatpush1.bf16.msra.mxu1 %v21298_v60  ;;  %10567 = vmatprep.subr.bf16.mxu0 %v21303_v61  ;;  %v21390_v60 = vld [vmem:[#allocation6 + $0x60c] ss:$16 sps:$4 sm:$0xff]   ;;  %v1853_v61 = vsub.s32 4, %v23938_v45 }
 0x5e3   : > { %10553 = vmatmul.mubr.bf16.gmra.mrb[20].mxu0 %v24014_v20  ;;  %10779 = vmatprep.subr.bf16.mxu1 %v21306_v3  ;;  %v1861_v3 = vsub.s32 6, %v23938_v45 }
 0x5e4   : > { %10765 = vmatmul.mubr.bf16.gmra.mrb[20].mxu1 %v24014_v20  ;;  %v21322_v20 = vld [vmem:[#allocation6 + $0x4a8] ss:$16 sps:$4 sm:$0xff]  }
 0x5e5   : > { %10568 = vmatpush1.bf16.msra.mxu0 %v21301_v28  ;;  %v1857_v28 = vsub.s32 5, %v23938_v45 }
 0x5e6   : > { %10780 = vmatpush1.bf16.msra.mxu1 %v21304_v8  ;;  %10569 = vmatprep.subr.bf16.mxu0 %v21309_v56  ;;  %v1865_v8 = vsub.s32 7, %v23938_v45  ;;  %v22829_v56 = vld [vmem:[#allocation2] sm:$0xff] }
 0x5e7   : > { %10781 = vmatprep.subr.bf16.mxu1 %v21312_v10  ;;  %v1854_v10 = vrot.slane %v22829_v56, %v1853_v61 }
 0x5e9   : > { %10570 = vmatpush1.bf16.msra.mxu0 %v21307_v14  ;;  %v1862_v14 = vrot.slane %v22829_v56, %v1861_v3 }
 0x5ea   : > { %10782 = vmatpush1.bf16.msra.mxu1 %v21310_v41  ;;  %10571 = vmatprep.subr.bf16.mxu0 %v21315_v53  ;;  %v1858_v41 = vrot.slane %v22829_v56, %v1857_v28  ;;  %v1866_v53 = vrot.slane %v22829_v56, %v1865_v8  ;;  %v21399_v28 = vld [vmem:[#allocation6 + $0x644] ss:$16 sps:$4 sm:$0xff]   ;;  %v21402_v8 = vld [vmem:[#allocation6 + $0x64c] ss:$16 sps:$4 sm:$0xff]  }
 0x5eb   : > { %10783 = vmatprep.subr.bf16.mxu1 %v21318_v57 }
 0x5ed   : > { %10572 = vmatpush1.bf16.msra.mxu0 %v21313_v37 }
 0x5ee   : > { %10784 = vmatpush1.bf16.msra.mxu1 %v21316_v24  ;;  %10573 = vmatprep.subr.bf16.mxu0 %v21321_v51 }
 0x5ef   : > { %10785 = vmatprep.subr.bf16.mxu1 %v21324_v7 }
 0x5f1   : > { %10574 = vmatpush1.bf16.msra.mxu0 %v21319_v52 }
 0x5f2   : > { %10786 = vmatpush1.bf16.msra.mxu1 %v21322_v20  ;;  %10575 = vmatprep.subr.bf16.mxu0 %v21327_v6 }
 0x5f3   : > { %10787 = vmatprep.subr.bf16.mxu1 %v21330_v40 }
 0x5f5   : > { %10576 = vmatpush1.bf16.msra.mxu0 %v21325_v13 }
 0x5f6   : > { %10788 = vmatpush1.bf16.msra.mxu1 %v21328_v32  ;;  %10577 = vmatprep.subr.bf16.mxu0 %v21333_v54 }
 0x5f7   : > { %10789 = vmatprep.subr.bf16.mxu1 %v21336_v22 }
 0x5f9   : > { %10578 = vmatpush1.bf16.msra.mxu0 %v21331_v36 }
 0x5fa   : > { %10790 = vmatpush1.bf16.msra.mxu1 %v21334_v27  ;;  %10579 = vmatprep.subr.bf16.mxu0 %v21339_v34 }
 0x5fb   : > { %10791 = vmatprep.subr.bf16.mxu1 %v21342_v16 }
 0x5fd   : > { %10580 = vmatpush1.bf16.msra.mxu0 %v21337_v49 }
 0x5fe   : > { %10792 = vmatpush1.bf16.msra.mxu1 %v21340_v50  ;;  %10581 = vmatprep.subr.bf16.mxu0 %v21345_v25 }
 0x5ff   : > { %10793 = vmatprep.subr.bf16.mxu1 %v21348_v38 }
 0x601   : > { %10582 = vmatpush1.bf16.msra.mxu0 %v21343_v18 }
 0x602   : > { %10794 = vmatpush1.bf16.msra.mxu1 %v21346_v5  ;;  %10583 = vmatprep.subr.bf16.mxu0 %v21351_v23 }
 0x603   : > { %10795 = vmatprep.subr.bf16.mxu1 %v21354_v26 }
 0x605   : > { %10584 = vmatpush1.bf16.msra.mxu0 %v21349_v29 }
 0x606   : > { %10796 = vmatpush1.bf16.msra.mxu1 %v21352_v1  ;;  %10585 = vmatprep.subr.bf16.mxu0 %v21357_v30  ;;  %v21385_v30 = vld [vmem:[#allocation6 + $0x600] ss:$16 sps:$4 sm:$0xff]  }
 0x607   : > { %10797 = vmatprep.subr.bf16.mxu1 %v21360_v33  ;;  %v21388_v33 = vld [vmem:[#allocation6 + $0x608] ss:$16 sps:$4 sm:$0xff]  }
 0x609   : > { %10586 = vmatpush1.bf16.msra.mxu0 %v21355_v19 }
 0x60a   : > { %10798 = vmatpush1.bf16.msra.mxu1 %v21358_v2  ;;  %10587 = vmatprep.subr.bf16.mxu0 %v21363_v0 }
 0x60b   : > { %10799 = vmatprep.subr.bf16.mxu1 %v21366_v59 }
 0x60d   : > { %10588 = vmatpush1.bf16.msra.mxu0 %v21361_v31  ;;  %v21393_v31 = vld [vmem:[#allocation6 + $0x624] ss:$16 sps:$4 sm:$0xff]  }
 0x60e   : > { %10800 = vmatpush1.bf16.msra.mxu1 %v21364_v46  ;;  %10589 = vmatprep.subr.bf16.mxu0 %v21369_v58  ;;  %v21396_v46 = vld [vmem:[#allocation6 + $0x62c] ss:$16 sps:$4 sm:$0xff]  }
 0x60f   : > { %10801 = vmatprep.subr.bf16.mxu1 %v21372_v12 }
 0x611   : > { %10590 = vmatpush1.bf16.msra.mxu0 %v21367_v43 }
 0x612   : > { %10802 = vmatpush1.bf16.msra.mxu1 %v21370_v17  ;;  %10591 = vmatprep.subr.bf16.mxu0 %v21375_v4 }
 0x613   : > { %10803 = vmatprep.subr.bf16.mxu1 %v21378_v11 }
 0x615   : > { %10592 = vmatpush1.bf16.msra.mxu0 %v21373_v63 }
 0x616   : > { %10804 = vmatpush1.bf16.msra.mxu1 %v21376_v35  ;;  %10593 = vmatprep.subr.bf16.mxu0 %v21381_v21 }
 0x617   : > { %10805 = vmatprep.subr.bf16.mxu1 %v21384_v55 }
 0x619   : > { %10594 = vmatpush1.bf16.msra.mxu0 %v21379_v9 }
 0x61a   : > { %10806 = vmatpush1.bf16.msra.mxu1 %v21382_v47  ;;  %10616 = vmatprep.subr.bf16.mxu0 %v21387_v62  ;;  %v21391_v47 = vld [vmem:[#allocation6 + $0x620] ss:$16 sps:$4 sm:$0xff]   ;;  %v21394_v62 = vld [vmem:[#allocation6 + $0x628] ss:$16 sps:$4 sm:$0xff]  }
 0x61b   : > { %10828 = vmatprep.subr.bf16.mxu1 %v21390_v60 }
 0x62d   : > { %v8408_v57 = vpop.f32.mrb[8].mxu0  ;;  %v8832_v24 = vpop.f32.mrb[8].mxu1 }
 0x62e   : > { %v20545_v37 = vadd.f32 %v8408_v57, %v1854_v10  ;;  %v8410_v51 = vpop.f32.mrb[9].mxu0  ;;  %v20553_v7 = vadd.f32 %v8832_v24, %v1862_v14  ;;  %v8834_v20 = vpop.f32.mrb[9].mxu1 }
 0x62f   : > { %v20546_v52 = vadd.f32 %v8410_v51, %v1858_v41  ;;  %v8412_v6 = vpop.f32.mrb[10].mxu0  ;;  %v20554_v40 = vadd.f32 %v8834_v20, %v1866_v53  ;;  %v8836_v32 = vpop.f32.mrb[10].mxu1  ;;  %v21400_v20 = vld [vmem:[#allocation6 + $0x648] ss:$16 sps:$4 sm:$0xff]  }
 0x630   : > { %v20547_v13 = vadd.f32 %v8412_v6, %v1854_v10  ;;  %v8414_v54 = vpop.f32.mrb[11].mxu0  ;;  %v20555_v22 = vadd.f32 %v8836_v32, %v1862_v14  ;;  %v8838_v45 = vpop.f32.mrb[11].mxu1  ;;  %v8855_v27 = vmax.f32 %v20545_v37, 0.0  ;;  %v8857_v49 = vmax.f32 %v20553_v7, 0.0  ;;  %v21406_v32 = vld [vmem:[#allocation6 + $0x668] ss:$16 sps:$4 sm:$0xff]  }
 0x631   : > { %v20548_v36 = vadd.f32 %v8414_v54, %v1858_v41  ;;  %v20556_v16 = vadd.f32 %v8838_v45, %v1866_v53  ;;  %v8856_v50 = vmax.f32 %v20546_v52, 0.0  ;;  %v8858_v18 = vmax.f32 %v20554_v40, 0.0  ;;  %v21397_v52 = vld [vmem:[#allocation6 + $0x640] ss:$16 sps:$4 sm:$0xff]   ;;  %v21408_v40 = vld [vmem:[#allocation6 + $0x66c] ss:$16 sps:$4 sm:$0xff]  }
 0x632   : > { %v8863_v34 = vmax.f32 %v20547_v13, 0.0  ;;  %v8865_v25 = vmax.f32 %v20555_v22, 0.0  ;;  %v21403_v13 = vld [vmem:[#allocation6 + $0x660] ss:$16 sps:$4 sm:$0xff]   ;;  %v21411_v54 = vld [vmem:[#allocation6 + $0x684] ss:$16 sps:$4 sm:$0xff]  }
 0x633   : > { %v8864_v38 = vmax.f32 %v20548_v36, 0.0  ;;  %v8866_v23 = vmax.f32 %v20556_v16, 0.0  ;;  %v21414_v22 = vld [vmem:[#allocation6 + $0x68c] ss:$16 sps:$4 sm:$0xff]   ;;  %v21409_v36 = vld [vmem:[#allocation6 + $0x680] ss:$16 sps:$4 sm:$0xff]  }
 0x634   : > { %v8887_v5 = vpack.c.bf16 %v8863_v34, %v8855_v27  ;;  %v24086_v26 = vpack.c.bf16 %v8865_v25, %v8857_v49  ;;  %v21412_v45 = vld [vmem:[#allocation6 + $0x688] ss:$16 sps:$4 sm:$0xff]   ;;  %v21417_v27 = vld [vmem:[#allocation6 + $0x6a4] ss:$16 sps:$4 sm:$0xff]   ;;  %v21420_v34 = vld [vmem:[#allocation6 + $0x6ac] ss:$16 sps:$4 sm:$0xff]  }
 0x635   : > { %v8888_v29 = vpack.c.bf16 %v8864_v38, %v8856_v50  ;;  %v8418_v1 = vpop.f32.mrb[12].mxu0  ;;  %v8890_v19 = vpack.c.bf16 %v8866_v23, %v8858_v18  ;;  %v8842_v0 = vpop.f32.mrb[12].mxu1  ;;  %v21415_v16 = vld [vmem:[#allocation6 + $0x6a0] ss:$16 sps:$4 sm:$0xff]   ;;  %v21418_v49 = vld [vmem:[#allocation6 + $0x6a8] ss:$16 sps:$4 sm:$0xff]  }
 0x636   : > { %v20549_v2 = vadd.f32 %v8418_v1, %v1854_v10  ;;  %v8420_v59 = vpop.f32.mrb[13].mxu0  ;;  %v20557_v58 = vadd.f32 %v8842_v0, %v1862_v14  ;;  %v8844_v43 = vpop.f32.mrb[13].mxu1  ;;  %v21423_v50 = vld [vmem:[#allocation6 + $0x6c4] ss:$16 sps:$4 sm:$0xff]   ;;  %v21426_v25 = vld [vmem:[#allocation6 + $0x6cc] ss:$16 sps:$4 sm:$0xff]  }
 0x637   : > { %v20550_v12 = vadd.f32 %v8420_v59, %v1858_v41  ;;  %v8422_v17 = vpop.f32.mrb[14].mxu0  ;;  %10595 = vmatprep.mubr.bf16.mxu0 %v8888_v29  ;;  %10807 = vmatprep.mubr.bf16.mxu1 %v8888_v29  ;;  %v20558_v4 = vadd.f32 %v8844_v43, %v1866_v53  ;;  %v8846_v63 = vpop.f32.mrb[14].mxu1  ;;  %v21421_v38 = vld [vmem:[#allocation6 + $0x6c0] ss:$16 sps:$4 sm:$0xff]   ;;  %v21424_v18 = vld [vmem:[#allocation6 + $0x6c8] ss:$16 sps:$4 sm:$0xff]  }
 0x638   : > { %v20551_v11 = vadd.f32 %v8422_v17, %v1854_v10  ;;  %v8424_v35 = vpop.f32.mrb[15].mxu0  ;;  %10596 = vmatmul.mubr.bf16.vlgmr.msra.gmra.mrb[16].mxu0 %v8887_v5  ;;  %10808 = vmatmul.mubr.bf16.vlgmr.msra.gmra.mrb[16].mxu1 %v8887_v5  ;;  %v20559_v21 = vadd.f32 %v8846_v63, %v1862_v14  ;;  %v8848_v9 = vpop.f32.mrb[15].mxu1  ;;  %v8871_v60 = vmax.f32 %v20549_v2, 0.0  ;;  %v8873_v56 = vmax.f32 %v20557_v58, 0.0  ;;  %v21429_v5 = vld [vmem:[#allocation6 + $0x6e4] ss:$16 sps:$4 sm:$0xff]  }
 0x639   : > { %v20552_v55 = vadd.f32 %v8424_v35, %v1858_v41  ;;  %10617 = vmatpush1.bf16.msra.mxu0 %v21385_v30  ;;  %10829 = vmatpush1.bf16.msra.mxu1 %v21388_v33  ;;  %v20560_v3 = vadd.f32 %v8848_v9, %v1866_v53  ;;  %v8872_v10 = vmax.f32 %v20550_v12, 0.0  ;;  %v8874_v24 = vmax.f32 %v20558_v4, 0.0  ;;  %v21405_v53 = vld [vmem:[#allocation6 + $0x664] ss:$16 sps:$4 sm:$0xff]   ;;  %v21432_v23 = vld [vmem:[#allocation6 + $0x6ec] ss:$16 sps:$4 sm:$0xff]  }
 0x63a   : > { %v8879_v61 = vmax.f32 %v20551_v11, 0.0  ;;  %10618 = vmatprep.subr.bf16.mxu0 %v21393_v31  ;;  %10830 = vmatprep.subr.bf16.mxu1 %v21396_v46  ;;  %v8881_v57 = vmax.f32 %v20559_v21, 0.0  ;;  %v21427_v29 = vld [vmem:[#allocation6 + $0x6e0] ss:$16 sps:$4 sm:$0xff]   ;;  %v21430_v1 = vld [vmem:[#allocation6 + $0x6e8] ss:$16 sps:$4 sm:$0xff]  }
 0x63b   : > { %v8880_v37 = vmax.f32 %v20552_v55, 0.0  ;;  %v8882_v14 = vmax.f32 %v20560_v3, 0.0  ;;  %v21435_v30 = vld [vmem:[#allocation6 + $0x704] ss:$16 sps:$4 sm:$0xff]   ;;  %v21438_v33 = vld [vmem:[#allocation6 + $0x70c] ss:$16 sps:$4 sm:$0xff]  }
 0x63c   : > { %v8895_v51 = vpack.c.bf16 %v8879_v61, %v8871_v60  ;;  %v24088_v41 = vpack.c.bf16 %v8881_v57, %v8873_v56  ;;  %v21436_v2 = vld [vmem:[#allocation6 + $0x708] ss:$16 sps:$4 sm:$0xff]   ;;  %v21441_v0 = vld [vmem:[#allocation6 + $0x724] ss:$16 sps:$4 sm:$0xff]   ;;  %v21444_v59 = vld [vmem:[#allocation6 + $0x72c] ss:$16 sps:$4 sm:$0xff]  }
 0x63d   : > { %v8896_v7 = vpack.c.bf16 %v8880_v37, %v8872_v10  ;;  %10619 = vmatpush1.bf16.msra.mxu0 %v21391_v47  ;;  %10831 = vmatpush1.bf16.msra.mxu1 %v21394_v62  ;;  %v24090_v6 = vpack.c.bf16 %v8882_v14, %v8874_v24  ;;  %v21439_v31 = vld [vmem:[#allocation6 + $0x720] ss:$16 sps:$4 sm:$0xff]   ;;  %v21442_v46 = vld [vmem:[#allocation6 + $0x728] ss:$16 sps:$4 sm:$0xff]   ;;  %v21447_v58 = vld [vmem:[#allocation6 + $0x744] ss:$16 sps:$4 sm:$0xff]   ;;  %v10895_v14 = vpop.permute.xlu0 %10894 }
 0x63e   : > { %10620 = vmatprep.subr.bf16.mxu0 %v21399_v28  ;;  %10832 = vmatprep.subr.bf16.mxu1 %v21402_v8  ;;  %v21450_v12 = vld [vmem:[#allocation6 + $0x74c] ss:$16 sps:$4 sm:$0xff]   ;;  %v21445_v43 = vld [vmem:[#allocation6 + $0x740] ss:$16 sps:$4 sm:$0xff]   ;;  %v21448_v17 = vld [vmem:[#allocation6 + $0x748] ss:$16 sps:$4 sm:$0xff]  }
 0x63f   : > { %10605 = vmatprep.mubr.bf16.mxu0 %v8896_v7  ;;  %10817 = vmatprep.mubr.bf16.mxu1 %v8896_v7  ;;  %v21453_v4 = vld [vmem:[#allocation6 + $0x764] ss:$16 sps:$4 sm:$0xff]   ;;  %v21456_v11 = vld [vmem:[#allocation6 + $0x76c] ss:$16 sps:$4 sm:$0xff]   ;;  %v21451_v63 = vld [vmem:[#allocation6 + $0x760] ss:$16 sps:$4 sm:$0xff]  }
 0x640   : > { %10606 = vmatmul.mubr.bf16.gmra.mrb[20].mxu0 %v8895_v51  ;;  %10818 = vmatmul.mubr.bf16.gmra.mrb[20].mxu1 %v8895_v51  ;;  %v21454_v35 = vld [vmem:[#allocation6 + $0x768] ss:$16 sps:$4 sm:$0xff]   ;;  %v21459_v21 = vld [vmem:[#allocation6 + $0x784] ss:$16 sps:$4 sm:$0xff]   ;;  %v21462_v55 = vld [vmem:[#allocation6 + $0x78c] ss:$16 sps:$4 sm:$0xff]  }
 0x641   : > { %10621 = vmatpush1.bf16.msra.mxu0 %v21397_v52  ;;  %10833 = vmatpush1.bf16.msra.mxu1 %v21400_v20  ;;  %v21457_v9 = vld [vmem:[#allocation6 + $0x780] ss:$16 sps:$4 sm:$0xff]   ;;  %v21460_v47 = vld [vmem:[#allocation6 + $0x788] ss:$16 sps:$4 sm:$0xff]   ;;  %v21465_v62 = vld [vmem:[#allocation6 + $0x7a4] ss:$16 sps:$4 sm:$0xff]  }
 0x642   : > { %10648 = vmatprep.mubr.bf16.mxu0 %v8890_v19  ;;  %10860 = vmatprep.mubr.bf16.mxu1 %v8890_v19  ;;  %v21433_v19 = vld [vmem:[#allocation6 + $0x700] ss:$16 sps:$4 sm:$0xff]   ;;  %v21468_v60 = vld [vmem:[#allocation6 + $0x7ac] ss:$16 sps:$4 sm:$0xff]   ;;  %v21466_v3 = vld [vmem:[#allocation6 + $0x7a8] ss:$16 sps:$4 sm:$0xff]  }
 0x643   : > { %10622 = vmatprep.subr.bf16.mxu0 %v21405_v53  ;;  %10834 = vmatprep.subr.bf16.mxu1 %v21408_v40  ;;  %v21463_v61 = vld [vmem:[#allocation6 + $0x7a0] ss:$16 sps:$4 sm:$0xff]   ;;  %v21471_v28 = vld [vmem:[#allocation6 + $0x7c4] ss:$16 sps:$4 sm:$0xff]   ;;  %v21474_v8 = vld [vmem:[#allocation6 + $0x7cc] ss:$16 sps:$4 sm:$0xff]   ;;  %v10900_v53 = vpop.permute.xlu0 %10899 }
 0x644   : > { %v21469_v56 = vld [vmem:[#allocation6 + $0x7c0] ss:$16 sps:$4 sm:$0xff]   ;;  %v21472_v10 = vld [vmem:[#allocation6 + $0x7c8] ss:$16 sps:$4 sm:$0xff]   ;;  %v21477_v57 = vld [vmem:[#allocation6 + $0x7e4] ss:$16 sps:$4 sm:$0xff]  }
 0x645   : > { %10623 = vmatpush1.bf16.msra.mxu0 %v21403_v13  ;;  %10835 = vmatpush1.bf16.msra.mxu1 %v21406_v32  ;;  %v21480_v37 = vld [vmem:[#allocation6 + $0x7ec] ss:$16 sps:$4 sm:$0xff]   ;;  %v21475_v24 = vld [vmem:[#allocation6 + $0x7e0] ss:$16 sps:$4 sm:$0xff]   ;;  %v21478_v51 = vld [vmem:[#allocation6 + $0x7e8] ss:$16 sps:$4 sm:$0xff]  }
 0x646   : > { %10624 = vmatprep.subr.bf16.mxu0 %v21411_v54  ;;  %10836 = vmatprep.subr.bf16.mxu1 %v21414_v22  ;;  %v23252_v7 = vmov 0.0   ;;  %v21481_v52 = vld [vmem:[#allocation7] sm:$0xff]   ;;  %v21482_v40 = vld [vmem:[#allocation7 + $0x8] sm:$0xff]   ;;  %v21483_v22 = vld [vmem:[#allocation7 + $0x10] sm:$0xff]  }
 0x647   : > { %v19577_v20 = vld [vmem:[#allocation2 + $0xc] ss:$0 sm:$0xff]  ;;  %v19578_v54 = vld [vmem:[#allocation2 + $0xd] ss:$0 sm:$0xff] }
 0x648   : > { %v10908_v13 = vmul.f32 %v19577_v20, %v10895_v14  ;;  %v10909_v32 = vmul.f32 %v19577_v20, %v10900_v53 }
 0x649   : > { %10625 = vmatpush1.bf16.msra.mxu0 %v21409_v36  ;;  %10837 = vmatpush1.bf16.msra.mxu1 %v21412_v45 }
 0x64a   : > { %10626 = vmatprep.subr.bf16.mxu0 %v21417_v27  ;;  %10838 = vmatprep.subr.bf16.mxu1 %v21420_v34  ;;  %v10917_v36 = vadd.f32 %v19578_v54, %v10908_v13  ;;  %v10918_v45 = vadd.f32 %v19578_v54, %v10909_v32 }
 0x64c   : > { %v10920_v27 = vmax.f32 %v10918_v45, 0.0 }
 0x64d   : > { %10627 = vmatpush1.bf16.msra.mxu0 %v21415_v16  ;;  %10839 = vmatpush1.bf16.msra.mxu1 %v21418_v49  ;;  %v21487_v16 = vld [vmem:[#allocation10 + $0x4] ss:$16 sps:$4 sm:$0xff]   ;;  %v21490_v49 = vld [vmem:[#allocation10 + $0xc] ss:$16 sps:$4 sm:$0xff]  }
 0x64e   : > { %10628 = vmatprep.subr.bf16.mxu0 %v21423_v50  ;;  %10840 = vmatprep.subr.bf16.mxu1 %v21426_v25  ;;  %v21485_v50 = vld [vmem:[#allocation10] ss:$16 sps:$4 sm:$0xff]   ;;  %v21493_v25 = vld [vmem:[#allocation10 + $0x24] ss:$16 sps:$4 sm:$0xff]  }
 0x651   : > { %10629 = vmatpush1.bf16.msra.mxu0 %v21421_v38  ;;  %10841 = vmatpush1.bf16.msra.mxu1 %v21424_v18  ;;  %v21496_v38 = vld [vmem:[#allocation10 + $0x2c] ss:$16 sps:$4 sm:$0xff]   ;;  %v21491_v18 = vld [vmem:[#allocation10 + $0x20] ss:$16 sps:$4 sm:$0xff]  }
 0x652   : > { %10630 = vmatprep.subr.bf16.mxu0 %v21429_v5  ;;  %10842 = vmatprep.subr.bf16.mxu1 %v21432_v23  ;;  %v21494_v5 = vld [vmem:[#allocation10 + $0x28] ss:$16 sps:$4 sm:$0xff]   ;;  %v21499_v23 = vld [vmem:[#allocation10 + $0x44] ss:$16 sps:$4 sm:$0xff]  }
 0x655   : > { %10631 = vmatpush1.bf16.msra.mxu0 %v21427_v29  ;;  %10843 = vmatpush1.bf16.msra.mxu1 %v21430_v1  ;;  %v21502_v29 = vld [vmem:[#allocation10 + $0x4c] ss:$16 sps:$4 sm:$0xff]   ;;  %v21497_v1 = vld [vmem:[#allocation10 + $0x40] ss:$16 sps:$4 sm:$0xff]  }
 0x656   : > { %10632 = vmatprep.subr.bf16.mxu0 %v21435_v30  ;;  %10844 = vmatprep.subr.bf16.mxu1 %v21438_v33  ;;  %v21505_v30 = vld [vmem:[#allocation10 + $0x64] ss:$16 sps:$4 sm:$0xff]   ;;  %v21508_v33 = vld [vmem:[#allocation10 + $0x6c] ss:$16 sps:$4 sm:$0xff]  }
 0x659   : > { %10633 = vmatpush1.bf16.msra.mxu0 %v21433_v19  ;;  %10845 = vmatpush1.bf16.msra.mxu1 %v21436_v2  ;;  %v21503_v19 = vld [vmem:[#allocation10 + $0x60] ss:$16 sps:$4 sm:$0xff]   ;;  %v21506_v2 = vld [vmem:[#allocation10 + $0x68] ss:$16 sps:$4 sm:$0xff]  }
 0x65a   : > { %10634 = vmatprep.subr.bf16.mxu0 %v21441_v0  ;;  %10846 = vmatprep.subr.bf16.mxu1 %v21444_v59  ;;  %v21511_v0 = vld [vmem:[#allocation9 + $0x4] ss:$16 sps:$4 sm:$0xff]   ;;  %v21514_v59 = vld [vmem:[#allocation9 + $0xc] ss:$16 sps:$4 sm:$0xff]  }
 0x65d   : > { %10635 = vmatpush1.bf16.msra.mxu0 %v21439_v31  ;;  %10847 = vmatpush1.bf16.msra.mxu1 %v21442_v46  ;;  %v9155_v31 = vld [vmem:[#allocation2 + $0x8] sm:$0xf] }
 0x65e   : > { %10636 = vmatprep.subr.bf16.mxu0 %v21447_v58  ;;  %10848 = vmatprep.subr.bf16.mxu1 %v21450_v12  ;;  %v9160_v46 = vrot.slane %v9155_v31, %v23944_v48  ;;  %v9168_v58 = vrot.slane %v9155_v31, %v23948_v39 }
 0x661   : > { %10637 = vmatpush1.bf16.msra.mxu0 %v21445_v43  ;;  %10849 = vmatpush1.bf16.msra.mxu1 %v21448_v17  ;;  %v9164_v17 = vrot.slane %v9155_v31, %v23951_v15 }
 0x662   : > { %10638 = vmatprep.subr.bf16.mxu0 %v21453_v4  ;;  %10850 = vmatprep.subr.bf16.mxu1 %v21456_v11  ;;  %v9172_v4 = vrot.slane %v9155_v31, %v23954_v42  ;;  %v21526_v31 = vld [vmem:[#allocation9 + $0x4c] ss:$16 sps:$4 sm:$0xff]  }
 0x665   : > { %10639 = vmatpush1.bf16.msra.mxu0 %v21451_v63  ;;  %10851 = vmatpush1.bf16.msra.mxu1 %v21454_v35 }
 0x666   : > { %10640 = vmatprep.subr.bf16.mxu0 %v21459_v21  ;;  %10852 = vmatprep.subr.bf16.mxu1 %v21462_v55 }
 0x669   : > { %10641 = vmatpush1.bf16.msra.mxu0 %v21457_v9  ;;  %10853 = vmatpush1.bf16.msra.mxu1 %v21460_v47 }
 0x66a   : > { %10642 = vmatprep.subr.bf16.mxu0 %v21465_v62  ;;  %10854 = vmatprep.subr.bf16.mxu1 %v21468_v60 }
 0x66d   : > { %10643 = vmatpush1.bf16.msra.mxu0 %v21463_v61  ;;  %10855 = vmatpush1.bf16.msra.mxu1 %v21466_v3 }
 0x66e   : > { %10644 = vmatprep.subr.bf16.mxu0 %v21471_v28  ;;  %10856 = vmatprep.subr.bf16.mxu1 %v21474_v8 }
 0x671   : > { %10645 = vmatpush1.bf16.msra.mxu0 %v21469_v56  ;;  %10857 = vmatpush1.bf16.msra.mxu1 %v21472_v10 }
 0x672   : > { %10646 = vmatprep.subr.bf16.mxu0 %v21477_v57  ;;  %10858 = vmatprep.subr.bf16.mxu1 %v21480_v37 }
 0x675   : > { %10647 = vmatpush1.bf16.msra.mxu0 %v21475_v24  ;;  %10859 = vmatpush1.bf16.msra.mxu1 %v21478_v51 }
 0x676   : > { %20517 = vmatprep.subr.bf16.mxu0 %v23252_v7  ;;  %11234 = vmatprep.subr.bf16.mxu1 %v21487_v16 }
 0x678   : > { %10649 = vmatmul.mubr.bf16.vlgmr.msra.gmra.mrb[16].mxu0 %v24086_v26  ;;  %10861 = vmatmul.mubr.bf16.vlgmr.msra.gmra.mrb[16].mxu1 %v24086_v26  ;;  %v21484_v26 = vld [vmem:[#allocation7 + $0x18] sm:$0xff]  }
 0x679   : > { %10658 = vmatprep.mubr.bf16.mxu0 %v24090_v6  ;;  %10870 = vmatprep.mubr.bf16.mxu1 %v24090_v6  ;;  %v10919_v6 = vmax.f32 %v10917_v36, 0.0 }
 0x67a   : > { %20518 = vmatpush3.bf16.msra.mxu0 %v21481_v52  ;;  %11235 = vmatpush1.bf16.msra.mxu1 %v21485_v50 }
 0x67b   : > { %20519 = vmatprep.subr.bf16.mxu0 %v23252_v7  ;;  %v10921_v34 = vpack.c.bf16 %v10920_v27, %v10919_v6  ;;  %11236 = vmatprep.subr.bf16.mxu1 %v21493_v25 }
 0x67e   : > { %20520 = vmatpush3.bf16.msra.mxu0 %v21482_v40  ;;  %11237 = vmatpush1.bf16.msra.mxu1 %v21491_v18 }
 0x67f   : > { %20521 = vmatprep.subr.bf16.mxu0 %v23252_v7  ;;  %11238 = vmatprep.subr.bf16.mxu1 %v21499_v23 }
 0x680   : > { %10659 = vmatmul.mubr.bf16.gmra.mrb[20].mxu0 %v24088_v41  ;;  %10871 = vmatmul.mubr.bf16.gmra.mrb[20].mxu1 %v24088_v41  ;;  %v21488_v41 = vld [vmem:[#allocation10 + $0x8] ss:$16 sps:$4 sm:$0xff]  }
 0x681   : > { %20525 = vmatprep.mubr.msk.bf16.mxu0 %vm23253_vm0, %v23252_v7  ;;  %11266 = vmatprep.mubr.bf16.mxu1 %v23251_v44 }
 0x682   : > { %20522 = vmatpush3.bf16.msra.mxu0 %v21483_v22  ;;  %11239 = vmatpush1.bf16.msra.mxu1 %v21497_v1  ;;  %v21509_v1 = vld [vmem:[#allocation9] ss:$16 sps:$4 sm:$0xff]  }
 0x683   : > { %20523 = vmatprep.subr.bf16.mxu0 %v23252_v7  ;;  %11240 = vmatprep.subr.bf16.mxu1 %v21505_v30 }
 0x686   : > { %20524 = vmatpush3.bf16.msra.mxu0 %v21484_v26  ;;  %11241 = vmatpush1.bf16.msra.mxu1 %v21503_v19  ;;  %v21520_v19 = vld [vmem:[#allocation9 + $0x2c] ss:$16 sps:$4 sm:$0xff]  }
 0x687   : > { %11277 = vmatprep.subr.bf16.mxu0 %v21490_v49  ;;  %11960 = vmatprep.subr.bf16.mxu1 %v21511_v0  ;;  %v21518_v0 = vld [vmem:[#allocation9 + $0x28] ss:$16 sps:$4 sm:$0xff]  }
 0x689   : > { %20526 = vmatmul.mubr.msk.bf16.vlgmr.msra.gmra.mrb[24].mxu0 %vm10961_vm1, %v10921_v34 }
 0x68a   : > { %11309 = vmatprep.mubr.bf16.mxu0 %v23251_v44  ;;  %11278 = vmatpush1.bf16.msra.mxu0 %v21488_v41  ;;  %v21500_v44 = vld [vmem:[#allocation10 + $0x48] ss:$16 sps:$4 sm:$0xff]   ;;  %v19579_v41 = vld [vmem:[#allocation2 + $0xe] ss:$0 sm:$0xff] }
 0x68b   : > { %11279 = vmatprep.subr.bf16.mxu0 %v21496_v38 }
 0x68e   : > { %11280 = vmatpush1.bf16.msra.mxu0 %v21494_v5 }
 0x68f   : > { %11281 = vmatprep.subr.bf16.mxu0 %v21502_v29 }
 0x692   : > { %11282 = vmatpush1.bf16.msra.mxu0 %v21500_v44  ;;  %v21512_v44 = vld [vmem:[#allocation9 + $0x8] ss:$16 sps:$4 sm:$0xff]  }
 0x693   : > { %11283 = vmatprep.subr.bf16.mxu0 %v21508_v33  ;;  %v21517_v33 = vld [vmem:[#allocation9 + $0x24] ss:$16 sps:$4 sm:$0xff]  }
 0x696   : > { %11284 = vmatpush1.bf16.msra.mxu0 %v21506_v2  ;;  %v21515_v2 = vld [vmem:[#allocation9 + $0x20] ss:$16 sps:$4 sm:$0xff]  }
 0x697   : > { %12046 = vmatprep.subr.bf16.mxu0 %v21514_v59  ;;  %v21523_v59 = vld [vmem:[#allocation9 + $0x44] ss:$16 sps:$4 sm:$0xff]  }
 0x74b   : > { %v10650_v12 = vpop.f32.mrb[16].mxu0  ;;  %v10862_v43 = vpop.f32.mrb[16].mxu1 }
 0x74c   : > { %v10652_v11 = vpop.f32.mrb[17].mxu0  ;;  %v10864_v63 = vpop.f32.mrb[17].mxu1  ;;  %v20561_v55 = vadd.f32 %v10650_v12, %v9160_v46  ;;  %v20569_v9 = vadd.f32 %v10862_v43, %v9168_v58  ;;  %v21529_v12 = vld [vmem:[#allocation9 + $0x64] ss:$16 sps:$4 sm:$0xff]   ;;  %v21532_v43 = vld [vmem:[#allocation9 + $0x6c] ss:$16 sps:$4 sm:$0xff]  }
 0x74d   : > { %v10654_v35 = vpop.f32.mrb[18].mxu0  ;;  %v10866_v21 = vpop.f32.mrb[18].mxu1  ;;  %v20562_v3 = vadd.f32 %v10652_v11, %v9164_v17  ;;  %v20570_v28 = vadd.f32 %v10864_v63, %v9172_v4  ;;  %v21535_v11 = vld [vmem:[#allocation9 + $0x84] ss:$16 sps:$4 sm:$0xff]   ;;  %v21538_v63 = vld [vmem:[#allocation9 + $0x8c] ss:$16 sps:$4 sm:$0xff]  }
 0x74e   : > { %v20563_v47 = vadd.f32 %v10654_v35, %v9160_v46  ;;  %v20571_v62 = vadd.f32 %v10866_v21, %v9168_v58  ;;  %v10656_v60 = vpop.f32.mrb[19].mxu0  ;;  %v10868_v61 = vpop.f32.mrb[19].mxu1  ;;  %v21533_v35 = vld [vmem:[#allocation9 + $0x80] ss:$16 sps:$4 sm:$0xff]   ;;  %v21536_v21 = vld [vmem:[#allocation9 + $0x88] ss:$16 sps:$4 sm:$0xff]  }
 0x74f   : > { %v20564_v8 = vadd.f32 %v10656_v60, %v9164_v17  ;;  %v20572_v56 = vadd.f32 %v10868_v61, %v9172_v4  ;;  %v21547_v60 = vld [vmem:[#allocation9 + $0xc4] ss:$16 sps:$4 sm:$0xff]   ;;  %v21550_v61 = vld [vmem:[#allocation9 + $0xcc] ss:$16 sps:$4 sm:$0xff]  }
 0x750   : > { %v24105_v10 = vpack.c.bf16 %v20563_v47, %v20561_v55  ;;  %v24107_v57 = vpack.c.bf16 %v20571_v62, %v20569_v9  ;;  %v21541_v55 = vld [vmem:[#allocation9 + $0xa4] ss:$16 sps:$4 sm:$0xff]   ;;  %v21544_v9 = vld [vmem:[#allocation9 + $0xac] ss:$16 sps:$4 sm:$0xff]   ;;  %v21539_v47 = vld [vmem:[#allocation9 + $0xa0] ss:$16 sps:$4 sm:$0xff]  }
 0x751   : > { %v10882_v37 = vpack.c.bf16 %v20564_v8, %v20562_v3  ;;  %v24109_v24 = vpack.c.bf16 %v20572_v56, %v20570_v28  ;;  %v21542_v62 = vld [vmem:[#allocation9 + $0xa8] ss:$16 sps:$4 sm:$0xff]   ;;  %v21545_v3 = vld [vmem:[#allocation9 + $0xc0] ss:$16 sps:$4 sm:$0xff]   ;;  %v21553_v8 = vld [vmem:[#allocation9 + $0xe4] ss:$16 sps:$4 sm:$0xff]  }
 0x752   : > { %v21548_v28 = vld [vmem:[#allocation9 + $0xc8] ss:$16 sps:$4 sm:$0xff]   ;;  %v21556_v56 = vld [vmem:[#allocation9 + $0xec] ss:$16 sps:$4 sm:$0xff]  }
 0x753   : > { %v10660_v51 = vpop.f32.mrb[20].mxu0  ;;  %v10872_v14 = vpop.f32.mrb[20].mxu1 }
 0x754   : > { %v20565_v7 = vadd.f32 %v10660_v51, %v9160_v46  ;;  %v20573_v52 = vadd.f32 %v10872_v14, %v9168_v58  ;;  %v10662_v20 = vpop.f32.mrb[21].mxu0  ;;  %v10874_v53 = vpop.f32.mrb[21].mxu1  ;;  %v21554_v51 = vld [vmem:[#allocation9 + $0xe8] ss:$16 sps:$4 sm:$0xff]   ;;  %v21559_v14 = vld [vmem:[#allocation9 + $0x104] ss:$16 sps:$4 sm:$0xff]  }
 0x755   : > { %v20566_v40 = vadd.f32 %v10662_v20, %v9164_v17  ;;  %v20574_v13 = vadd.f32 %v10874_v53, %v9172_v4  ;;  %v10664_v32 = vpop.f32.mrb[22].mxu0  ;;  %v10876_v54 = vpop.f32.mrb[22].mxu1  ;;  %v21560_v20 = vld [vmem:[#allocation9 + $0x108] ss:$16 sps:$4 sm:$0xff]   ;;  %v21565_v53 = vld [vmem:[#allocation9 + $0x124] ss:$16 sps:$4 sm:$0xff]  }
 0x756   : > { %v20567_v22 = vadd.f32 %v10664_v32, %v9160_v46  ;;  %v20575_v36 = vadd.f32 %v10876_v54, %v9168_v58  ;;  %v10666_v45 = vpop.f32.mrb[23].mxu0  ;;  %v10878_v26 = vpop.f32.mrb[23].mxu1  ;;  %v21521_v46 = vld [vmem:[#allocation9 + $0x40] ss:$16 sps:$4 sm:$0xff]   ;;  %v21524_v58 = vld [vmem:[#allocation9 + $0x48] ss:$16 sps:$4 sm:$0xff]  }
 0x757   : > { %v20568_v6 = vadd.f32 %v10666_v45, %v9164_v17  ;;  %v20576_v27 = vadd.f32 %v10878_v26, %v9172_v4  ;;  %v21527_v17 = vld [vmem:[#allocation9 + $0x60] ss:$16 sps:$4 sm:$0xff]   ;;  %v21530_v4 = vld [vmem:[#allocation9 + $0x68] ss:$16 sps:$4 sm:$0xff]   ;;  %v21571_v54 = vld [vmem:[#allocation9 + $0x144] ss:$16 sps:$4 sm:$0xff]  }
 0x758   : > { %v24111_v34 = vpack.c.bf16 %v20567_v22, %v20565_v7  ;;  %v24113_v16 = vpack.c.bf16 %v20575_v36, %v20573_v52  ;;  %v21562_v7 = vld [vmem:[#allocation9 + $0x10c] ss:$16 sps:$4 sm:$0xff]   ;;  %v21557_v52 = vld [vmem:[#allocation9 + $0x100] ss:$16 sps:$4 sm:$0xff]   ;;  %v21566_v32 = vld [vmem:[#allocation9 + $0x128] ss:$16 sps:$4 sm:$0xff]  }
 0x759   : > { %v24115_v49 = vpack.c.bf16 %v20568_v6, %v20566_v40  ;;  %v24117_v50 = vpack.c.bf16 %v20576_v27, %v20574_v13  ;;  %v21568_v40 = vld [vmem:[#allocation9 + $0x12c] ss:$16 sps:$4 sm:$0xff]   ;;  %v21563_v13 = vld [vmem:[#allocation9 + $0x120] ss:$16 sps:$4 sm:$0xff]   ;;  %v21572_v45 = vld [vmem:[#allocation9 + $0x148] ss:$16 sps:$4 sm:$0xff]  }
 0x75a   : > { %v21574_v22 = vld [vmem:[#allocation9 + $0x14c] ss:$16 sps:$4 sm:$0xff]   ;;  %v21569_v36 = vld [vmem:[#allocation9 + $0x140] ss:$16 sps:$4 sm:$0xff]   ;;  %v21577_v26 = vld [vmem:[#allocation9 + $0x164] ss:$16 sps:$4 sm:$0xff]  }
 0x75b   : > { %v21580_v6 = vld [vmem:[#allocation9 + $0x16c] ss:$16 sps:$4 sm:$0xff]   ;;  %v21575_v27 = vld [vmem:[#allocation9 + $0x160] ss:$16 sps:$4 sm:$0xff]  }
 0x75c   : > { %v10999_v25 = vpop.f32.mrb[24].mxu0 }
 0x75d   : > { %v20527_v38 = vpop.f32.mrb[25].mxu0  ;;  %v11000_v5 = vadd.f32 %v19579_v41, %v10999_v25  ;;  %v21583_v25 = vld [vmem:[#allocation9 + $0x184] ss:$16 sps:$4 sm:$0xff]  }
 0x75e   : > { %v11002_v18 = vpop.f32.mrb[26].mxu0  ;;  %v21586_v38 = vld [vmem:[#allocation9 + $0x18c] ss:$16 sps:$4 sm:$0xff]  }
 0x75f   : > { %v11003_v23 = vadd.f32 %v19579_v41, %v11002_v18  ;;  %v20528_v29 = vpop.f32.mrb[27].mxu0  ;;  %v21578_v41 = vld [vmem:[#allocation9 + $0x168] ss:$16 sps:$4 sm:$0xff]   ;;  %v21581_v18 = vld [vmem:[#allocation9 + $0x180] ss:$16 sps:$4 sm:$0xff]  }
 0x760   : > { %v21592_v29 = vld [vmem:[#allocation9 + $0x1ac] ss:$16 sps:$4 sm:$0xff]  }
 0x761   : > { %v11006_v30 = vpack.c.bf16 %v11003_v23, %v11000_v5  ;;  %v21584_v5 = vld [vmem:[#allocation9 + $0x188] ss:$16 sps:$4 sm:$0xff]   ;;  %v21589_v23 = vld [vmem:[#allocation9 + $0x1a4] ss:$16 sps:$4 sm:$0xff]  }
 0x763   : > { %19601 = vmatmul.mubr.msk.bf16.vlgmr.msra.gmra.mrb[24].mxu1 %vm10961_vm1, %v11006_v30  ;;  %19602 = vmatmul.mubr.msk.bf16.vlgmr.msra.gmra.mrb[28].mxu0 %vm10961_vm1, %v11006_v30  ;;  %v21595_v30 = vld [vmem:[#allocation9 + $0x1c4] ss:$16 sps:$4 sm:$0xff]  }
 0x764   : > { %11961 = vmatpush1.bf16.msra.mxu1 %v21509_v1  ;;  %12047 = vmatpush1.bf16.msra.mxu0 %v21512_v44  ;;  %v21587_v1 = vld [vmem:[#allocation9 + $0x1a0] ss:$16 sps:$4 sm:$0xff]   ;;  %v21590_v44 = vld [vmem:[#allocation9 + $0x1a8] ss:$16 sps:$4 sm:$0xff]  }
 0x765   : > { %11992 = vmatprep.mubr.bf16.mxu1 %v10882_v37  ;;  %12078 = vmatprep.mubr.bf16.mxu0 %v10882_v37  ;;  %v21551_v37 = vld [vmem:[#allocation9 + $0xe0] ss:$16 sps:$4 sm:$0xff]  }
 0x766   : > { %11962 = vmatprep.subr.bf16.mxu1 %v21517_v33  ;;  %12048 = vmatprep.subr.bf16.mxu0 %v21520_v19  ;;  %v21598_v33 = vld [vmem:[#allocation9 + $0x1cc] ss:$16 sps:$4 sm:$0xff]   ;;  %v21593_v19 = vld [vmem:[#allocation9 + $0x1c0] ss:$16 sps:$4 sm:$0xff]  }
 0x768   : > { %11963 = vmatpush1.bf16.msra.mxu1 %v21515_v2  ;;  %12049 = vmatpush1.bf16.msra.mxu0 %v21518_v0  ;;  %v21596_v2 = vld [vmem:[#allocation9 + $0x1c8] ss:$16 sps:$4 sm:$0xff]   ;;  %v21601_v0 = vld [vmem:[#allocation9 + $0x1e4] ss:$16 sps:$4 sm:$0xff]  }
 0x769   : > { %11964 = vmatprep.subr.bf16.mxu1 %v21523_v59  ;;  %12050 = vmatprep.subr.bf16.mxu0 %v21526_v31  ;;  %v21604_v59 = vld [vmem:[#allocation9 + $0x1ec] ss:$16 sps:$4 sm:$0xff]   ;;  %v21599_v31 = vld [vmem:[#allocation9 + $0x1e0] ss:$16 sps:$4 sm:$0xff]  }
 0x76c   : > { %11965 = vmatpush1.bf16.msra.mxu1 %v21521_v46  ;;  %12051 = vmatpush1.bf16.msra.mxu0 %v21524_v58  ;;  %v21602_v46 = vld [vmem:[#allocation9 + $0x1e8] ss:$16 sps:$4 sm:$0xff]   ;;  %v21607_v58 = vld [vmem:[#allocation9 + $0x204] ss:$16 sps:$4 sm:$0xff]  }
 0x76d   : > { %11966 = vmatprep.subr.bf16.mxu1 %v21529_v12  ;;  %12052 = vmatprep.subr.bf16.mxu0 %v21532_v43  ;;  %v21610_v12 = vld [vmem:[#allocation9 + $0x20c] ss:$16 sps:$4 sm:$0xff]   ;;  %v21605_v43 = vld [vmem:[#allocation9 + $0x200] ss:$16 sps:$4 sm:$0xff]  }
 0x770   : > { %11967 = vmatpush1.bf16.msra.mxu1 %v21527_v17  ;;  %12053 = vmatpush1.bf16.msra.mxu0 %v21530_v4  ;;  %v21608_v17 = vld [vmem:[#allocation9 + $0x208] ss:$16 sps:$4 sm:$0xff]   ;;  %v21613_v4 = vld [vmem:[#allocation9 + $0x224] ss:$16 sps:$4 sm:$0xff]  }
 0x771   : > { %11968 = vmatprep.subr.bf16.mxu1 %v21535_v11  ;;  %12054 = vmatprep.subr.bf16.mxu0 %v21538_v63  ;;  %v21616_v11 = vld [vmem:[#allocation9 + $0x22c] ss:$16 sps:$4 sm:$0xff]   ;;  %v21611_v63 = vld [vmem:[#allocation9 + $0x220] ss:$16 sps:$4 sm:$0xff]  }
 0x774   : > { %11969 = vmatpush1.bf16.msra.mxu1 %v21533_v35  ;;  %12055 = vmatpush1.bf16.msra.mxu0 %v21536_v21  ;;  %v21614_v35 = vld [vmem:[#allocation9 + $0x228] ss:$16 sps:$4 sm:$0xff]   ;;  %v21619_v21 = vld [vmem:[#allocation9 + $0x244] ss:$16 sps:$4 sm:$0xff]  }
 0x775   : > { %11970 = vmatprep.subr.bf16.mxu1 %v21541_v55  ;;  %12056 = vmatprep.subr.bf16.mxu0 %v21544_v9  ;;  %v21622_v55 = vld [vmem:[#allocation9 + $0x24c] ss:$16 sps:$4 sm:$0xff]   ;;  %v21617_v9 = vld [vmem:[#allocation9 + $0x240] ss:$16 sps:$4 sm:$0xff]  }
 0x778   : > { %11971 = vmatpush1.bf16.msra.mxu1 %v21539_v47  ;;  %12057 = vmatpush1.bf16.msra.mxu0 %v21542_v62  ;;  %v21620_v47 = vld [vmem:[#allocation9 + $0x248] ss:$16 sps:$4 sm:$0xff]   ;;  %v21625_v62 = vld [vmem:[#allocation9 + $0x264] ss:$16 sps:$4 sm:$0xff]  }
 0x779   : > { %11972 = vmatprep.subr.bf16.mxu1 %v21547_v60  ;;  %12058 = vmatprep.subr.bf16.mxu0 %v21550_v61  ;;  %v21623_v60 = vld [vmem:[#allocation9 + $0x260] ss:$16 sps:$4 sm:$0xff]   ;;  %v21626_v61 = vld [vmem:[#allocation9 + $0x268] ss:$16 sps:$4 sm:$0xff]  }
 0x77c   : > { %11973 = vmatpush1.bf16.msra.mxu1 %v21545_v3  ;;  %12059 = vmatpush1.bf16.msra.mxu0 %v21548_v28  ;;  %v21631_v3 = vld [vmem:[#allocation9 + $0x284] ss:$16 sps:$4 sm:$0xff]   ;;  %v21629_v28 = vld [vmem:[#allocation9 + $0x280] ss:$16 sps:$4 sm:$0xff]  }
 0x77d   : > { %11974 = vmatprep.subr.bf16.mxu1 %v21553_v8  ;;  %12060 = vmatprep.subr.bf16.mxu0 %v21556_v56  ;;  %v21632_v8 = vld [vmem:[#allocation9 + $0x288] ss:$16 sps:$4 sm:$0xff]   ;;  %v21637_v56 = vld [vmem:[#allocation9 + $0x2a4] ss:$16 sps:$4 sm:$0xff]  }
 0x780   : > { %11975 = vmatpush1.bf16.msra.mxu1 %v21551_v37  ;;  %12061 = vmatpush1.bf16.msra.mxu0 %v21554_v51  ;;  %v21640_v37 = vld [vmem:[#allocation9 + $0x2ac] ss:$16 sps:$4 sm:$0xff]   ;;  %v21635_v51 = vld [vmem:[#allocation9 + $0x2a0] ss:$16 sps:$4 sm:$0xff]  }
 0x781   : > { %11976 = vmatprep.subr.bf16.mxu1 %v21559_v14  ;;  %12062 = vmatprep.subr.bf16.mxu0 %v21562_v7  ;;  %v21638_v14 = vld [vmem:[#allocation9 + $0x2a8] ss:$16 sps:$4 sm:$0xff]   ;;  %v21643_v7 = vld [vmem:[#allocation9 + $0x2c4] ss:$16 sps:$4 sm:$0xff]  }
 0x784   : > { %11977 = vmatpush1.bf16.msra.mxu1 %v21557_v52  ;;  %12063 = vmatpush1.bf16.msra.mxu0 %v21560_v20  ;;  %v21646_v52 = vld [vmem:[#allocation9 + $0x2cc] ss:$16 sps:$4 sm:$0xff]   ;;  %v21641_v20 = vld [vmem:[#allocation9 + $0x2c0] ss:$16 sps:$4 sm:$0xff]  }
 0x785   : > { %11978 = vmatprep.subr.bf16.mxu1 %v21565_v53  ;;  %12064 = vmatprep.subr.bf16.mxu0 %v21568_v40  ;;  %v21644_v53 = vld [vmem:[#allocation9 + $0x2c8] ss:$16 sps:$4 sm:$0xff]   ;;  %v21649_v40 = vld [vmem:[#allocation9 + $0x2e4] ss:$16 sps:$4 sm:$0xff]  }
 0x788   : > { %11979 = vmatpush1.bf16.msra.mxu1 %v21563_v13  ;;  %12065 = vmatpush1.bf16.msra.mxu0 %v21566_v32  ;;  %v21652_v13 = vld [vmem:[#allocation9 + $0x2ec] ss:$16 sps:$4 sm:$0xff]   ;;  %v21647_v32 = vld [vmem:[#allocation9 + $0x2e0] ss:$16 sps:$4 sm:$0xff]  }
 0x789   : > { %11980 = vmatprep.subr.bf16.mxu1 %v21571_v54  ;;  %12066 = vmatprep.subr.bf16.mxu0 %v21574_v22  ;;  %v21650_v54 = vld [vmem:[#allocation9 + $0x2e8] ss:$16 sps:$4 sm:$0xff]   ;;  %v21655_v22 = vld [vmem:[#allocation9 + $0x304] ss:$16 sps:$4 sm:$0xff]  }
 0x78c   : > { %11981 = vmatpush1.bf16.msra.mxu1 %v21569_v36  ;;  %12067 = vmatpush1.bf16.msra.mxu0 %v21572_v45  ;;  %v21658_v36 = vld [vmem:[#allocation9 + $0x30c] ss:$16 sps:$4 sm:$0xff]   ;;  %v21653_v45 = vld [vmem:[#allocation9 + $0x300] ss:$16 sps:$4 sm:$0xff]  }
 0x78d   : > { %11982 = vmatprep.subr.bf16.mxu1 %v21577_v26  ;;  %12068 = vmatprep.subr.bf16.mxu0 %v21580_v6  ;;  %v21656_v26 = vld [vmem:[#allocation9 + $0x308] ss:$16 sps:$4 sm:$0xff]   ;;  %v21661_v6 = vld [vmem:[#allocation9 + $0x324] ss:$16 sps:$4 sm:$0xff]  }
 0x790   : > { %11983 = vmatpush1.bf16.msra.mxu1 %v21575_v27  ;;  %12069 = vmatpush1.bf16.msra.mxu0 %v21578_v41  ;;  %v21664_v27 = vld [vmem:[#allocation9 + $0x32c] ss:$16 sps:$4 sm:$0xff]   ;;  %v21659_v41 = vld [vmem:[#allocation9 + $0x320] ss:$16 sps:$4 sm:$0xff]  }
 0x791   : > { %11984 = vmatprep.subr.bf16.mxu1 %v21583_v25  ;;  %12070 = vmatprep.subr.bf16.mxu0 %v21586_v38  ;;  %v21662_v25 = vld [vmem:[#allocation9 + $0x328] ss:$16 sps:$4 sm:$0xff]   ;;  %v21667_v38 = vld [vmem:[#allocation9 + $0x344] ss:$16 sps:$4 sm:$0xff]  }
 0x794   : > { %11985 = vmatpush1.bf16.msra.mxu1 %v21581_v18  ;;  %12071 = vmatpush1.bf16.msra.mxu0 %v21584_v5  ;;  %v21670_v18 = vld [vmem:[#allocation9 + $0x34c] ss:$16 sps:$4 sm:$0xff]   ;;  %v21665_v5 = vld [vmem:[#allocation9 + $0x340] ss:$16 sps:$4 sm:$0xff]  }
 0x795   : > { %11986 = vmatprep.subr.bf16.mxu1 %v21589_v23  ;;  %12072 = vmatprep.subr.bf16.mxu0 %v21592_v29  ;;  %v21668_v23 = vld [vmem:[#allocation9 + $0x348] ss:$16 sps:$4 sm:$0xff]   ;;  %v21673_v29 = vld [vmem:[#allocation9 + $0x364] ss:$16 sps:$4 sm:$0xff]  }
 0x798   : > { %11987 = vmatpush1.bf16.msra.mxu1 %v21587_v1  ;;  %12073 = vmatpush1.bf16.msra.mxu0 %v21590_v44  ;;  %v21676_v1 = vld [vmem:[#allocation9 + $0x36c] ss:$16 sps:$4 sm:$0xff]   ;;  %v21671_v44 = vld [vmem:[#allocation9 + $0x360] ss:$16 sps:$4 sm:$0xff]  }
 0x799   : > { %11988 = vmatprep.subr.bf16.mxu1 %v21595_v30  ;;  %12074 = vmatprep.subr.bf16.mxu0 %v21598_v33  ;;  %v21674_v30 = vld [vmem:[#allocation9 + $0x368] ss:$16 sps:$4 sm:$0xff]   ;;  %v21679_v33 = vld [vmem:[#allocation9 + $0x384] ss:$16 sps:$4 sm:$0xff]  }
 0x79c   : > { %11989 = vmatpush1.bf16.msra.mxu1 %v21593_v19  ;;  %12075 = vmatpush1.bf16.msra.mxu0 %v21596_v2  ;;  %v21682_v19 = vld [vmem:[#allocation9 + $0x38c] ss:$16 sps:$4 sm:$0xff]   ;;  %v21677_v2 = vld [vmem:[#allocation9 + $0x380] ss:$16 sps:$4 sm:$0xff]  }
 0x79d   : > { %11990 = vmatprep.subr.bf16.mxu1 %v21601_v0  ;;  %12076 = vmatprep.subr.bf16.mxu0 %v21604_v59  ;;  %v21680_v0 = vld [vmem:[#allocation9 + $0x388] ss:$16 sps:$4 sm:$0xff]   ;;  %v21685_v59 = vld [vmem:[#allocation9 + $0x3a4] ss:$16 sps:$4 sm:$0xff]  }
 0x7a0   : > { %11991 = vmatpush1.bf16.msra.mxu1 %v21599_v31  ;;  %12077 = vmatpush1.bf16.msra.mxu0 %v21602_v46  ;;  %v21688_v31 = vld [vmem:[#allocation9 + $0x3ac] ss:$16 sps:$4 sm:$0xff]   ;;  %v21683_v46 = vld [vmem:[#allocation9 + $0x3a0] ss:$16 sps:$4 sm:$0xff]  }
 0x7a1   : > { %12003 = vmatprep.subr.bf16.mxu1 %v21607_v58  ;;  %12089 = vmatprep.subr.bf16.mxu0 %v21610_v12  ;;  %v21686_v58 = vld [vmem:[#allocation9 + $0x3a8] ss:$16 sps:$4 sm:$0xff]   ;;  %v21691_v12 = vld [vmem:[#allocation9 + $0x3c4] ss:$16 sps:$4 sm:$0xff]  }
 0x7a3   : > { %11993 = vmatmul.mubr.bf16.vlgmr.msra.gmra.mrb[24].mxu1 %v24105_v10  ;;  %12079 = vmatmul.mubr.bf16.vlgmr.msra.gmra.mrb[28].mxu0 %v24105_v10  ;;  %v21628_v10 = vld [vmem:[#allocation9 + $0x26c] ss:$16 sps:$4 sm:$0xff]  }
 0x7a4   : > { %12004 = vmatpush1.bf16.msra.mxu1 %v21605_v43  ;;  %12035 = vmatprep.mubr.bf16.mxu1 %v24109_v24  ;;  %v21694_v43 = vld [vmem:[#allocation9 + $0x3cc] ss:$16 sps:$4 sm:$0xff]  }
 0x7a5   : > { %12090 = vmatpush1.bf16.msra.mxu0 %v21608_v17  ;;  %12121 = vmatprep.mubr.bf16.mxu0 %v24109_v24  ;;  %v21634_v24 = vld [vmem:[#allocation9 + $0x28c] ss:$16 sps:$4 sm:$0xff]   ;;  %v21689_v17 = vld [vmem:[#allocation9 + $0x3c0] ss:$16 sps:$4 sm:$0xff]  }
 0x7a6   : > { %12005 = vmatprep.subr.bf16.mxu1 %v21613_v4  ;;  %12091 = vmatprep.subr.bf16.mxu0 %v21616_v11  ;;  %v21692_v4 = vld [vmem:[#allocation9 + $0x3c8] ss:$16 sps:$4 sm:$0xff]   ;;  %v21697_v11 = vld [vmem:[#allocation9 + $0x3e4] ss:$16 sps:$4 sm:$0xff]  }
 0x7a8   : > { %12006 = vmatpush1.bf16.msra.mxu1 %v21611_v63  ;;  %v21700_v63 = vld [vmem:[#allocation9 + $0x3ec] ss:$16 sps:$4 sm:$0xff]  }
 0x7a9   : > { %12092 = vmatpush1.bf16.msra.mxu0 %v21614_v35  ;;  %12007 = vmatprep.subr.bf16.mxu1 %v21619_v21  ;;  %v21695_v35 = vld [vmem:[#allocation9 + $0x3e0] ss:$16 sps:$4 sm:$0xff]   ;;  %v21698_v21 = vld [vmem:[#allocation9 + $0x3e8] ss:$16 sps:$4 sm:$0xff]  }
 0x7aa   : > { %12093 = vmatprep.subr.bf16.mxu0 %v21622_v55  ;;  %v21703_v55 = vld [vmem:[#allocation12 + $0x4] ss:$16 sps:$4 sm:$0xff]  }
 0x7ac   : > { %12008 = vmatpush1.bf16.msra.mxu1 %v21617_v9  ;;  %v21706_v9 = vld [vmem:[#allocation12 + $0xc] ss:$16 sps:$4 sm:$0xff]  }
 0x7ad   : > { %12094 = vmatpush1.bf16.msra.mxu0 %v21620_v47  ;;  %12009 = vmatprep.subr.bf16.mxu1 %v21625_v62  ;;  %v21701_v47 = vld [vmem:[#allocation12] ss:$16 sps:$4 sm:$0xff]   ;;  %v21704_v62 = vld [vmem:[#allocation12 + $0x8] ss:$16 sps:$4 sm:$0xff]  }
 0x7ae   : > { %12095 = vmatprep.subr.bf16.mxu0 %v21628_v10  ;;  %v21709_v10 = vld [vmem:[#allocation12 + $0x24] ss:$16 sps:$4 sm:$0xff]  }
 0x7b0   : > { %12010 = vmatpush1.bf16.msra.mxu1 %v21623_v60  ;;  %v21712_v60 = vld [vmem:[#allocation12 + $0x2c] ss:$16 sps:$4 sm:$0xff]  }
 0x7b1   : > { %12096 = vmatpush1.bf16.msra.mxu0 %v21626_v61  ;;  %12011 = vmatprep.subr.bf16.mxu1 %v21631_v3  ;;  %v21707_v61 = vld [vmem:[#allocation12 + $0x20] ss:$16 sps:$4 sm:$0xff]   ;;  %v21710_v3 = vld [vmem:[#allocation12 + $0x28] ss:$16 sps:$4 sm:$0xff]  }
 0x7b2   : > { %12097 = vmatprep.subr.bf16.mxu0 %v21634_v24  ;;  %v21715_v24 = vld [vmem:[#allocation12 + $0x44] ss:$16 sps:$4 sm:$0xff]  }
 0x7b4   : > { %12012 = vmatpush1.bf16.msra.mxu1 %v21629_v28  ;;  %v21718_v28 = vld [vmem:[#allocation12 + $0x4c] ss:$16 sps:$4 sm:$0xff]  }
 0x7b5   : > { %12098 = vmatpush1.bf16.msra.mxu0 %v21632_v8  ;;  %12013 = vmatprep.subr.bf16.mxu1 %v21637_v56  ;;  %v21713_v8 = vld [vmem:[#allocation12 + $0x40] ss:$16 sps:$4 sm:$0xff]   ;;  %v21716_v56 = vld [vmem:[#allocation12 + $0x48] ss:$16 sps:$4 sm:$0xff]  }
 0x7b6   : > { %12099 = vmatprep.subr.bf16.mxu0 %v21640_v37  ;;  %v21721_v37 = vld [vmem:[#allocation12 + $0x64] ss:$16 sps:$4 sm:$0xff]  }
 0x7b8   : > { %12014 = vmatpush1.bf16.msra.mxu1 %v21635_v51  ;;  %v21724_v51 = vld [vmem:[#allocation12 + $0x6c] ss:$16 sps:$4 sm:$0xff]  }
 0x7b9   : > { %12100 = vmatpush1.bf16.msra.mxu0 %v21638_v14  ;;  %12015 = vmatprep.subr.bf16.mxu1 %v21643_v7  ;;  %v21719_v14 = vld [vmem:[#allocation12 + $0x60] ss:$16 sps:$4 sm:$0xff]   ;;  %v21727_v7 = vld [vmem:[#allocation12 + $0x84] ss:$16 sps:$4 sm:$0xff]  }
 0x7ba   : > { %12101 = vmatprep.subr.bf16.mxu0 %v21646_v52  ;;  %v21730_v52 = vld [vmem:[#allocation12 + $0x8c] ss:$16 sps:$4 sm:$0xff]  }
 0x7bc   : > { %12016 = vmatpush1.bf16.msra.mxu1 %v21641_v20  ;;  %v21725_v20 = vld [vmem:[#allocation12 + $0x80] ss:$16 sps:$4 sm:$0xff]  }
 0x7bd   : > { %12102 = vmatpush1.bf16.msra.mxu0 %v21644_v53  ;;  %12017 = vmatprep.subr.bf16.mxu1 %v21649_v40  ;;  %v21728_v53 = vld [vmem:[#allocation12 + $0x88] ss:$16 sps:$4 sm:$0xff]   ;;  %v21733_v40 = vld [vmem:[#allocation12 + $0xa4] ss:$16 sps:$4 sm:$0xff]  }
 0x7be   : > { %12103 = vmatprep.subr.bf16.mxu0 %v21652_v13  ;;  %v21736_v13 = vld [vmem:[#allocation12 + $0xac] ss:$16 sps:$4 sm:$0xff]  }
 0x7c0   : > { %12018 = vmatpush1.bf16.msra.mxu1 %v21647_v32  ;;  %v21731_v32 = vld [vmem:[#allocation12 + $0xa0] ss:$16 sps:$4 sm:$0xff]  }
 0x7c1   : > { %12104 = vmatpush1.bf16.msra.mxu0 %v21650_v54  ;;  %12019 = vmatprep.subr.bf16.mxu1 %v21655_v22  ;;  %v21734_v54 = vld [vmem:[#allocation12 + $0xa8] ss:$16 sps:$4 sm:$0xff]   ;;  %v21739_v22 = vld [vmem:[#allocation12 + $0xc4] ss:$16 sps:$4 sm:$0xff]  }
 0x7c2   : > { %12105 = vmatprep.subr.bf16.mxu0 %v21658_v36  ;;  %v21742_v36 = vld [vmem:[#allocation12 + $0xcc] ss:$16 sps:$4 sm:$0xff]  }
 0x7c4   : > { %12020 = vmatpush1.bf16.msra.mxu1 %v21653_v45  ;;  %v21737_v45 = vld [vmem:[#allocation12 + $0xc0] ss:$16 sps:$4 sm:$0xff]  }
 0x7c5   : > { %12106 = vmatpush1.bf16.msra.mxu0 %v21656_v26  ;;  %12021 = vmatprep.subr.bf16.mxu1 %v21661_v6  ;;  %v21740_v26 = vld [vmem:[#allocation12 + $0xc8] ss:$16 sps:$4 sm:$0xff]   ;;  %v21745_v6 = vld [vmem:[#allocation12 + $0xe4] ss:$16 sps:$4 sm:$0xff]  }
 0x7c6   : > { %12107 = vmatprep.subr.bf16.mxu0 %v21664_v27  ;;  %v21748_v27 = vld [vmem:[#allocation12 + $0xec] ss:$16 sps:$4 sm:$0xff]  }
 0x7c8   : > { %12022 = vmatpush1.bf16.msra.mxu1 %v21659_v41  ;;  %v21743_v41 = vld [vmem:[#allocation12 + $0xe0] ss:$16 sps:$4 sm:$0xff]  }
 0x7c9   : > { %12108 = vmatpush1.bf16.msra.mxu0 %v21662_v25  ;;  %12023 = vmatprep.subr.bf16.mxu1 %v21667_v38  ;;  %v21746_v25 = vld [vmem:[#allocation12 + $0xe8] ss:$16 sps:$4 sm:$0xff]   ;;  %v21751_v38 = vld [vmem:[#allocation12 + $0x104] ss:$16 sps:$4 sm:$0xff]  }
 0x7ca   : > { %12109 = vmatprep.subr.bf16.mxu0 %v21670_v18  ;;  %v21754_v18 = vld [vmem:[#allocation12 + $0x10c] ss:$16 sps:$4 sm:$0xff]  }
 0x7cc   : > { %12024 = vmatpush1.bf16.msra.mxu1 %v21665_v5  ;;  %v21749_v5 = vld [vmem:[#allocation12 + $0x100] ss:$16 sps:$4 sm:$0xff]  }
 0x7cd   : > { %12110 = vmatpush1.bf16.msra.mxu0 %v21668_v23  ;;  %12025 = vmatprep.subr.bf16.mxu1 %v21673_v29  ;;  %v21752_v23 = vld [vmem:[#allocation12 + $0x108] ss:$16 sps:$4 sm:$0xff]   ;;  %v21757_v29 = vld [vmem:[#allocation12 + $0x124] ss:$16 sps:$4 sm:$0xff]  }
 0x7ce   : > { %12111 = vmatprep.subr.bf16.mxu0 %v21676_v1  ;;  %v21760_v1 = vld [vmem:[#allocation12 + $0x12c] ss:$16 sps:$4 sm:$0xff]  }
 0x7d0   : > { %12026 = vmatpush1.bf16.msra.mxu1 %v21671_v44  ;;  %v21755_v44 = vld [vmem:[#allocation12 + $0x120] ss:$16 sps:$4 sm:$0xff]  }
 0x7d1   : > { %12112 = vmatpush1.bf16.msra.mxu0 %v21674_v30  ;;  %12027 = vmatprep.subr.bf16.mxu1 %v21679_v33  ;;  %v21758_v30 = vld [vmem:[#allocation12 + $0x128] ss:$16 sps:$4 sm:$0xff]   ;;  %v21763_v33 = vld [vmem:[#allocation12 + $0x144] ss:$16 sps:$4 sm:$0xff]  }
 0x7d2   : > { %12113 = vmatprep.subr.bf16.mxu0 %v21682_v19  ;;  %v21766_v19 = vld [vmem:[#allocation12 + $0x14c] ss:$16 sps:$4 sm:$0xff]  }
 0x7d4   : > { %12028 = vmatpush1.bf16.msra.mxu1 %v21677_v2  ;;  %v21761_v2 = vld [vmem:[#allocation12 + $0x140] ss:$16 sps:$4 sm:$0xff]  }
 0x7d5   : > { %12114 = vmatpush1.bf16.msra.mxu0 %v21680_v0  ;;  %12029 = vmatprep.subr.bf16.mxu1 %v21685_v59  ;;  %v21764_v0 = vld [vmem:[#allocation12 + $0x148] ss:$16 sps:$4 sm:$0xff]   ;;  %v21769_v59 = vld [vmem:[#allocation12 + $0x164] ss:$16 sps:$4 sm:$0xff]  }
 0x7d6   : > { %12115 = vmatprep.subr.bf16.mxu0 %v21688_v31  ;;  %v21772_v31 = vld [vmem:[#allocation12 + $0x16c] ss:$16 sps:$4 sm:$0xff]  }
 0x7d8   : > { %12030 = vmatpush1.bf16.msra.mxu1 %v21683_v46  ;;  %v21767_v46 = vld [vmem:[#allocation12 + $0x160] ss:$16 sps:$4 sm:$0xff]  }
 0x7d9   : > { %12116 = vmatpush1.bf16.msra.mxu0 %v21686_v58  ;;  %12031 = vmatprep.subr.bf16.mxu1 %v21691_v12  ;;  %v21770_v58 = vld [vmem:[#allocation12 + $0x168] ss:$16 sps:$4 sm:$0xff]   ;;  %v21775_v12 = vld [vmem:[#allocation12 + $0x184] ss:$16 sps:$4 sm:$0xff]  }
 0x7da   : > { %12117 = vmatprep.subr.bf16.mxu0 %v21694_v43  ;;  %v21778_v43 = vld [vmem:[#allocation12 + $0x18c] ss:$16 sps:$4 sm:$0xff]  }
 0x7dc   : > { %12032 = vmatpush1.bf16.msra.mxu1 %v21689_v17  ;;  %v21773_v17 = vld [vmem:[#allocation12 + $0x180] ss:$16 sps:$4 sm:$0xff]  }
 0x7dd   : > { %12118 = vmatpush1.bf16.msra.mxu0 %v21692_v4  ;;  %12033 = vmatprep.subr.bf16.mxu1 %v21697_v11  ;;  %v21776_v4 = vld [vmem:[#allocation12 + $0x188] ss:$16 sps:$4 sm:$0xff]   ;;  %v21781_v11 = vld [vmem:[#allocation12 + $0x1a4] ss:$16 sps:$4 sm:$0xff]  }
 0x7de   : > { %12119 = vmatprep.subr.bf16.mxu0 %v21700_v63  ;;  %v21784_v63 = vld [vmem:[#allocation12 + $0x1ac] ss:$16 sps:$4 sm:$0xff]  }
 0x7e0   : > { %12034 = vmatpush1.bf16.msra.mxu1 %v21695_v35  ;;  %v21779_v35 = vld [vmem:[#allocation12 + $0x1a0] ss:$16 sps:$4 sm:$0xff]  }
 0x7e1   : > { %12120 = vmatpush1.bf16.msra.mxu0 %v21698_v21  ;;  %12964 = vmatprep.subr.bf16.mxu1 %v21703_v55  ;;  %v21782_v21 = vld [vmem:[#allocation12 + $0x1a8] ss:$16 sps:$4 sm:$0xff]   ;;  %v21787_v55 = vld [vmem:[#allocation12 + $0x1c4] ss:$16 sps:$4 sm:$0xff]  }
 0x7e2   : > { %13050 = vmatprep.subr.bf16.mxu0 %v21706_v9  ;;  %v21790_v9 = vld [vmem:[#allocation12 + $0x1cc] ss:$16 sps:$4 sm:$0xff]  }
 0x7e3   : > { %12036 = vmatmul.mubr.bf16.vlgmr.msra.gmra.mrb[24].mxu1 %v24107_v57 }
 0x7e4   : > { %12122 = vmatmul.mubr.bf16.vlgmr.msra.gmra.mrb[28].mxu0 %v24107_v57  ;;  %12965 = vmatpush1.bf16.msra.mxu1 %v21701_v47  ;;  %v21722_v57 = vld [vmem:[#allocation12 + $0x68] ss:$16 sps:$4 sm:$0xff]   ;;  %v21785_v47 = vld [vmem:[#allocation12 + $0x1c0] ss:$16 sps:$4 sm:$0xff]  }
 0x7e5   : > { %13051 = vmatpush1.bf16.msra.mxu0 %v21704_v62  ;;  %12966 = vmatprep.subr.bf16.mxu1 %v21709_v10  ;;  %v21788_v62 = vld [vmem:[#allocation12 + $0x1c8] ss:$16 sps:$4 sm:$0xff]   ;;  %v21793_v10 = vld [vmem:[#allocation12 + $0x1e4] ss:$16 sps:$4 sm:$0xff]  }
 0x7e6   : > { %13052 = vmatprep.subr.bf16.mxu0 %v21712_v60  ;;  %v21796_v60 = vld [vmem:[#allocation12 + $0x1ec] ss:$16 sps:$4 sm:$0xff]  }
 0x7e8   : > { %12967 = vmatpush1.bf16.msra.mxu1 %v21707_v61  ;;  %v21791_v61 = vld [vmem:[#allocation12 + $0x1e0] ss:$16 sps:$4 sm:$0xff]  }
 0x7e9   : > { %13053 = vmatpush1.bf16.msra.mxu0 %v21710_v3  ;;  %12968 = vmatprep.subr.bf16.mxu1 %v21715_v24  ;;  %v21794_v3 = vld [vmem:[#allocation12 + $0x1e8] ss:$16 sps:$4 sm:$0xff]   ;;  %v21799_v24 = vld [vmem:[#allocation12 + $0x204] ss:$16 sps:$4 sm:$0xff]  }
 0x7ea   : > { %13054 = vmatprep.subr.bf16.mxu0 %v21718_v28  ;;  %v21802_v28 = vld [vmem:[#allocation12 + $0x20c] ss:$16 sps:$4 sm:$0xff]  }
 0x7ec   : > { %12969 = vmatpush1.bf16.msra.mxu1 %v21713_v8  ;;  %v12132_v8 = vld [vmem:[#allocation2 + $0xf] sm:$0xf] }
 0x7ed   : > { %13055 = vmatpush1.bf16.msra.mxu0 %v21716_v56  ;;  %12970 = vmatprep.subr.bf16.mxu1 %v21721_v37  ;;  %v12137_v56 = vrot.slane %v12132_v8, %v23944_v48  ;;  %v12145_v37 = vrot.slane %v12132_v8, %v23948_v39 }
 0x7ee   : > { %13056 = vmatprep.subr.bf16.mxu0 %v21724_v51  ;;  %v12141_v51 = vrot.slane %v12132_v8, %v23951_v15 }
 0x7f0   : > { %12971 = vmatpush1.bf16.msra.mxu1 %v21719_v14  ;;  %v12149_v14 = vrot.slane %v12132_v8, %v23954_v42  ;;  %v21838_v8 = vld [vmem:[#allocation12 + $0x2cc] ss:$16 sps:$4 sm:$0xff]  }
 0x7f1   : > { %13057 = vmatpush1.bf16.msra.mxu0 %v21722_v57  ;;  %12972 = vmatprep.subr.bf16.mxu1 %v21727_v7 }
 0x7f2   : > { %13058 = vmatprep.subr.bf16.mxu0 %v21730_v52 }
 0x7f4   : > { %12973 = vmatpush1.bf16.msra.mxu1 %v21725_v20 }
 0x7f5   : > { %13059 = vmatpush1.bf16.msra.mxu0 %v21728_v53  ;;  %12974 = vmatprep.subr.bf16.mxu1 %v21733_v40 }
 0x7f6   : > { %13060 = vmatprep.subr.bf16.mxu0 %v21736_v13 }
 0x7f8   : > { %12975 = vmatpush1.bf16.msra.mxu1 %v21731_v32 }
 0x7f9   : > { %13061 = vmatpush1.bf16.msra.mxu0 %v21734_v54  ;;  %12976 = vmatprep.subr.bf16.mxu1 %v21739_v22 }
 0x7fa   : > { %13062 = vmatprep.subr.bf16.mxu0 %v21742_v36 }
 0x7fc   : > { %12977 = vmatpush1.bf16.msra.mxu1 %v21737_v45 }
 0x7fd   : > { %13063 = vmatpush1.bf16.msra.mxu0 %v21740_v26  ;;  %12978 = vmatprep.subr.bf16.mxu1 %v21745_v6 }
 0x7fe   : > { %13064 = vmatprep.subr.bf16.mxu0 %v21748_v27 }
 0x800   : > { %12979 = vmatpush1.bf16.msra.mxu1 %v21743_v41 }
 0x801   : > { %13065 = vmatpush1.bf16.msra.mxu0 %v21746_v25  ;;  %12980 = vmatprep.subr.bf16.mxu1 %v21751_v38 }
 0x802   : > { %13066 = vmatprep.subr.bf16.mxu0 %v21754_v18 }
 0x804   : > { %12981 = vmatpush1.bf16.msra.mxu1 %v21749_v5 }
 0x805   : > { %13067 = vmatpush1.bf16.msra.mxu0 %v21752_v23  ;;  %12982 = vmatprep.subr.bf16.mxu1 %v21757_v29 }
 0x806   : > { %13068 = vmatprep.subr.bf16.mxu0 %v21760_v1 }
 0x808   : > { %12983 = vmatpush1.bf16.msra.mxu1 %v21755_v44 }
 0x809   : > { %13069 = vmatpush1.bf16.msra.mxu0 %v21758_v30  ;;  %12984 = vmatprep.subr.bf16.mxu1 %v21763_v33 }
 0x80a   : > { %13070 = vmatprep.subr.bf16.mxu0 %v21766_v19 }
 0x80c   : > { %12985 = vmatpush1.bf16.msra.mxu1 %v21761_v2  ;;  %v21797_v2 = vld [vmem:[#allocation12 + $0x200] ss:$16 sps:$4 sm:$0xff]  }
 0x80d   : > { %13071 = vmatpush1.bf16.msra.mxu0 %v21764_v0  ;;  %12986 = vmatprep.subr.bf16.mxu1 %v21769_v59  ;;  %v21800_v0 = vld [vmem:[#allocation12 + $0x208] ss:$16 sps:$4 sm:$0xff]  }
 0x80e   : > { %13072 = vmatprep.subr.bf16.mxu0 %v21772_v31  ;;  %v21805_v31 = vld [vmem:[#allocation12 + $0x224] ss:$16 sps:$4 sm:$0xff]  }
 0x810   : > { %12987 = vmatpush1.bf16.msra.mxu1 %v21767_v46  ;;  %v21808_v46 = vld [vmem:[#allocation12 + $0x22c] ss:$16 sps:$4 sm:$0xff]  }
 0x811   : > { %13073 = vmatpush1.bf16.msra.mxu0 %v21770_v58  ;;  %12988 = vmatprep.subr.bf16.mxu1 %v21775_v12  ;;  %v21803_v58 = vld [vmem:[#allocation12 + $0x220] ss:$16 sps:$4 sm:$0xff]   ;;  %v21806_v12 = vld [vmem:[#allocation12 + $0x228] ss:$16 sps:$4 sm:$0xff]  }
 0x812   : > { %13074 = vmatprep.subr.bf16.mxu0 %v21778_v43  ;;  %v21811_v43 = vld [vmem:[#allocation12 + $0x244] ss:$16 sps:$4 sm:$0xff]  }
 0x814   : > { %12989 = vmatpush1.bf16.msra.mxu1 %v21773_v17  ;;  %v21814_v17 = vld [vmem:[#allocation12 + $0x24c] ss:$16 sps:$4 sm:$0xff]  }
 0x815   : > { %13075 = vmatpush1.bf16.msra.mxu0 %v21776_v4  ;;  %12990 = vmatprep.subr.bf16.mxu1 %v21781_v11  ;;  %v21809_v4 = vld [vmem:[#allocation12 + $0x240] ss:$16 sps:$4 sm:$0xff]   ;;  %v21812_v11 = vld [vmem:[#allocation12 + $0x248] ss:$16 sps:$4 sm:$0xff]  }
 0x816   : > { %13076 = vmatprep.subr.bf16.mxu0 %v21784_v63  ;;  %v21817_v63 = vld [vmem:[#allocation12 + $0x264] ss:$16 sps:$4 sm:$0xff]  }
 0x818   : > { %12991 = vmatpush1.bf16.msra.mxu1 %v21779_v35  ;;  %v21820_v35 = vld [vmem:[#allocation12 + $0x26c] ss:$16 sps:$4 sm:$0xff]  }
 0x819   : > { %13077 = vmatpush1.bf16.msra.mxu0 %v21782_v21  ;;  %12992 = vmatprep.subr.bf16.mxu1 %v21787_v55  ;;  %v21815_v21 = vld [vmem:[#allocation12 + $0x260] ss:$16 sps:$4 sm:$0xff]   ;;  %v21818_v55 = vld [vmem:[#allocation12 + $0x268] ss:$16 sps:$4 sm:$0xff]  }
 0x81a   : > { %13078 = vmatprep.subr.bf16.mxu0 %v21790_v9  ;;  %v21823_v9 = vld [vmem:[#allocation12 + $0x284] ss:$16 sps:$4 sm:$0xff]  }
 0x81c   : > { %12993 = vmatpush1.bf16.msra.mxu1 %v21785_v47  ;;  %v21826_v47 = vld [vmem:[#allocation12 + $0x28c] ss:$16 sps:$4 sm:$0xff]  }
 0x81d   : > { %13079 = vmatpush1.bf16.msra.mxu0 %v21788_v62  ;;  %12994 = vmatprep.subr.bf16.mxu1 %v21793_v10  ;;  %v21821_v62 = vld [vmem:[#allocation12 + $0x280] ss:$16 sps:$4 sm:$0xff]   ;;  %v21824_v10 = vld [vmem:[#allocation12 + $0x288] ss:$16 sps:$4 sm:$0xff]  }
 0x81e   : > { %13080 = vmatprep.subr.bf16.mxu0 %v21796_v60  ;;  %v21829_v60 = vld [vmem:[#allocation12 + $0x2a4] ss:$16 sps:$4 sm:$0xff]  }
 0x820   : > { %12995 = vmatpush1.bf16.msra.mxu1 %v21791_v61  ;;  %v21832_v61 = vld [vmem:[#allocation12 + $0x2ac] ss:$16 sps:$4 sm:$0xff]  }
 0x821   : > { %13081 = vmatpush1.bf16.msra.mxu0 %v21794_v3  ;;  %13007 = vmatprep.subr.bf16.mxu1 %v21799_v24  ;;  %v21827_v3 = vld [vmem:[#allocation12 + $0x2a0] ss:$16 sps:$4 sm:$0xff]   ;;  %v21830_v24 = vld [vmem:[#allocation12 + $0x2a8] ss:$16 sps:$4 sm:$0xff]  }
 0x822   : > { %13093 = vmatprep.subr.bf16.mxu0 %v21802_v28  ;;  %v21835_v28 = vld [vmem:[#allocation12 + $0x2c4] ss:$16 sps:$4 sm:$0xff]  }
 0x8b6   : > { %v12037_v57 = vpop.f32.mrb[24].mxu1 }
 0x8b7   : > { %v12154_v7 = vadd.f32 %v12137_v56, %v12037_v57  ;;  %v12123_v52 = vpop.f32.mrb[28].mxu0  ;;  %v12039_v20 = vpop.f32.mrb[25].mxu1  ;;  %v21839_v57 = vld [vmem:[#allocation12 + $0x2e0] ss:$16 sps:$4 sm:$0xff]  }
 0x8b8   : > { %v12156_v53 = vadd.f32 %v12145_v37, %v12123_v52  ;;  %v12155_v40 = vadd.f32 %v12141_v51, %v12039_v20  ;;  %v12125_v13 = vpop.f32.mrb[29].mxu0  ;;  %v12041_v32 = vpop.f32.mrb[26].mxu1  ;;  %v21847_v52 = vld [vmem:[#allocation12 + $0x304] ss:$16 sps:$4 sm:$0xff]   ;;  %v21850_v20 = vld [vmem:[#allocation12 + $0x30c] ss:$16 sps:$4 sm:$0xff]  }
 0x8b9   : > { %v12157_v54 = vadd.f32 %v12149_v14, %v12125_v13  ;;  %v12158_v22 = vadd.f32 %v12137_v56, %v12041_v32  ;;  %v12127_v36 = vpop.f32.mrb[30].mxu0  ;;  %v12043_v45 = vpop.f32.mrb[27].mxu1  ;;  %v12162_v41 = vmax.f32 %v12154_v7, 0.0  ;;  %v21833_v56 = vld [vmem:[#allocation12 + $0x2c0] ss:$16 sps:$4 sm:$0xff]  }
 0x8ba   : > { %v12160_v26 = vadd.f32 %v12145_v37, %v12127_v36  ;;  %v12159_v6 = vadd.f32 %v12141_v51, %v12043_v45  ;;  %v12129_v27 = vpop.f32.mrb[31].mxu0  ;;  %v12164_v18 = vmax.f32 %v12156_v53, 0.0  ;;  %v12163_v5 = vmax.f32 %v12155_v40, 0.0  ;;  %v21836_v37 = vld [vmem:[#allocation12 + $0x2c8] ss:$16 sps:$4 sm:$0xff]  }
 0x8bb   : > { %v12166_v25 = vmax.f32 %v12158_v22, 0.0  ;;  %v12161_v38 = vadd.f32 %v12149_v14, %v12129_v27  ;;  %v12165_v1 = vmax.f32 %v12157_v54, 0.0  ;;  %v21841_v51 = vld [vmem:[#allocation12 + $0x2e4] ss:$16 sps:$4 sm:$0xff]   ;;  %v21844_v14 = vld [vmem:[#allocation12 + $0x2ec] ss:$16 sps:$4 sm:$0xff]  }
 0x8bc   : > { %v12168_v23 = vmax.f32 %v12160_v26, 0.0  ;;  %v12167_v29 = vmax.f32 %v12159_v6, 0.0  ;;  %v21842_v7 = vld [vmem:[#allocation12 + $0x2e8] ss:$16 sps:$4 sm:$0xff]   ;;  %v21845_v53 = vld [vmem:[#allocation12 + $0x300] ss:$16 sps:$4 sm:$0xff]  }
 0x8bd   : > { %v12170_v44 = vpack.c.bf16 %v12166_v25, %v12162_v41  ;;  %v12169_v30 = vmax.f32 %v12161_v38, 0.0  ;;  %v21848_v40 = vld [vmem:[#allocation12 + $0x308] ss:$16 sps:$4 sm:$0xff]   ;;  %v21853_v13 = vld [vmem:[#allocation12 + $0x324] ss:$16 sps:$4 sm:$0xff]  }
 0x8be   : > { %v24131_v33 = vpack.c.bf16 %v12168_v23, %v12164_v18  ;;  %v12171_v19 = vpack.c.bf16 %v12167_v29, %v12163_v5  ;;  %v21856_v32 = vld [vmem:[#allocation12 + $0x32c] ss:$16 sps:$4 sm:$0xff]   ;;  %v21851_v54 = vld [vmem:[#allocation12 + $0x320] ss:$16 sps:$4 sm:$0xff]   ;;  %v21854_v22 = vld [vmem:[#allocation12 + $0x328] ss:$16 sps:$4 sm:$0xff]  }
 0x8bf   : > { %v12173_v59 = vpack.c.bf16 %v12169_v30, %v12165_v1  ;;  %v21859_v36 = vld [vmem:[#allocation12 + $0x344] ss:$16 sps:$4 sm:$0xff]   ;;  %v21862_v45 = vld [vmem:[#allocation12 + $0x34c] ss:$16 sps:$4 sm:$0xff]   ;;  %v21857_v26 = vld [vmem:[#allocation12 + $0x340] ss:$16 sps:$4 sm:$0xff]  }
 0x8c0   : > { %12996 = vmatprep.mubr.bf16.mxu1 %v12171_v19  ;;  %13082 = vmatprep.mubr.bf16.mxu0 %v12171_v19  ;;  %v21860_v6 = vld [vmem:[#allocation12 + $0x348] ss:$16 sps:$4 sm:$0xff]   ;;  %v21865_v27 = vld [vmem:[#allocation12 + $0x364] ss:$16 sps:$4 sm:$0xff]   ;;  %v21868_v41 = vld [vmem:[#allocation12 + $0x36c] ss:$16 sps:$4 sm:$0xff]  }
 0x8c1   : > { %12997 = vmatmul.mubr.bf16.vlgmr.msra.gmra.mrb[28].mxu1 %v12170_v44  ;;  %13083 = vmatmul.mubr.bf16.vlgmr.msra.gmra.mrb[32].mxu0 %v12170_v44  ;;  %v21863_v25 = vld [vmem:[#allocation12 + $0x360] ss:$16 sps:$4 sm:$0xff]   ;;  %v21866_v38 = vld [vmem:[#allocation12 + $0x368] ss:$16 sps:$4 sm:$0xff]   ;;  %v21871_v18 = vld [vmem:[#allocation12 + $0x384] ss:$16 sps:$4 sm:$0xff]  }
 0x8c2   : > { %13008 = vmatpush1.bf16.msra.mxu1 %v21797_v2  ;;  %13094 = vmatpush1.bf16.msra.mxu0 %v21800_v0  ;;  %v21874_v5 = vld [vmem:[#allocation12 + $0x38c] ss:$16 sps:$4 sm:$0xff]   ;;  %v21869_v23 = vld [vmem:[#allocation12 + $0x380] ss:$16 sps:$4 sm:$0xff]   ;;  %v21872_v29 = vld [vmem:[#allocation12 + $0x388] ss:$16 sps:$4 sm:$0xff]  }
 0x8c3   : > { %13039 = vmatprep.mubr.bf16.mxu1 %v12173_v59  ;;  %13125 = vmatprep.mubr.bf16.mxu0 %v12173_v59  ;;  %v21877_v1 = vld [vmem:[#allocation12 + $0x3a4] ss:$16 sps:$4 sm:$0xff]   ;;  %v21880_v44 = vld [vmem:[#allocation12 + $0x3ac] ss:$16 sps:$4 sm:$0xff]   ;;  %v21875_v30 = vld [vmem:[#allocation12 + $0x3a0] ss:$16 sps:$4 sm:$0xff]  }
 0x8c4   : > { %13009 = vmatprep.subr.bf16.mxu1 %v21805_v31  ;;  %13095 = vmatprep.subr.bf16.mxu0 %v21808_v46  ;;  %v21878_v19 = vld [vmem:[#allocation12 + $0x3a8] ss:$16 sps:$4 sm:$0xff]   ;;  %v21883_v2 = vld [vmem:[#allocation12 + $0x3c4] ss:$16 sps:$4 sm:$0xff]   ;;  %v21886_v0 = vld [vmem:[#allocation12 + $0x3cc] ss:$16 sps:$4 sm:$0xff]  }
 0x8c5   : > { %v21881_v59 = vld [vmem:[#allocation12 + $0x3c0] ss:$16 sps:$4 sm:$0xff]   ;;  %v21884_v31 = vld [vmem:[#allocation12 + $0x3c8] ss:$16 sps:$4 sm:$0xff]   ;;  %v21889_v46 = vld [vmem:[#allocation12 + $0x3e4] ss:$16 sps:$4 sm:$0xff]  }
 0x8c6   : > { %13010 = vmatpush1.bf16.msra.mxu1 %v21803_v58  ;;  %13096 = vmatpush1.bf16.msra.mxu0 %v21806_v12  ;;  %v21892_v58 = vld [vmem:[#allocation12 + $0x3ec] ss:$16 sps:$4 sm:$0xff]   ;;  %v21887_v12 = vld [vmem:[#allocation12 + $0x3e0] ss:$16 sps:$4 sm:$0xff]  }
 0x8c7   : > { %13011 = vmatprep.subr.bf16.mxu1 %v21811_v43  ;;  %13097 = vmatprep.subr.bf16.mxu0 %v21814_v17  ;;  %v21890_v43 = vld [vmem:[#allocation12 + $0x3e8] ss:$16 sps:$4 sm:$0xff]   ;;  %v21895_v17 = vld [vmem:[#allocation13 + $0x4] ss:$16 sps:$4 sm:$0xff]  }
 0x8ca   : > { %13012 = vmatpush1.bf16.msra.mxu1 %v21809_v4  ;;  %13098 = vmatpush1.bf16.msra.mxu0 %v21812_v11  ;;  %v21898_v4 = vld [vmem:[#allocation13 + $0xc] ss:$16 sps:$4 sm:$0xff]   ;;  %v21893_v11 = vld [vmem:[#allocation13] ss:$16 sps:$4 sm:$0xff]  }
 0x8cb   : > { %13013 = vmatprep.subr.bf16.mxu1 %v21817_v63  ;;  %13099 = vmatprep.subr.bf16.mxu0 %v21820_v35  ;;  %v21896_v63 = vld [vmem:[#allocation13 + $0x8] ss:$16 sps:$4 sm:$0xff]   ;;  %v21901_v35 = vld [vmem:[#allocation13 + $0x24] ss:$16 sps:$4 sm:$0xff]  }
 0x8ce   : > { %13014 = vmatpush1.bf16.msra.mxu1 %v21815_v21  ;;  %13100 = vmatpush1.bf16.msra.mxu0 %v21818_v55  ;;  %v21904_v21 = vld [vmem:[#allocation13 + $0x2c] ss:$16 sps:$4 sm:$0xff]   ;;  %v21899_v55 = vld [vmem:[#allocation13 + $0x20] ss:$16 sps:$4 sm:$0xff]  }
 0x8cf   : > { %13015 = vmatprep.subr.bf16.mxu1 %v21823_v9  ;;  %13101 = vmatprep.subr.bf16.mxu0 %v21826_v47  ;;  %v21902_v9 = vld [vmem:[#allocation13 + $0x28] ss:$16 sps:$4 sm:$0xff]   ;;  %v21907_v47 = vld [vmem:[#allocation13 + $0x44] ss:$16 sps:$4 sm:$0xff]  }
 0x8d2   : > { %13016 = vmatpush1.bf16.msra.mxu1 %v21821_v62  ;;  %13102 = vmatpush1.bf16.msra.mxu0 %v21824_v10  ;;  %v21910_v62 = vld [vmem:[#allocation13 + $0x4c] ss:$16 sps:$4 sm:$0xff]   ;;  %v21905_v10 = vld [vmem:[#allocation13 + $0x40] ss:$16 sps:$4 sm:$0xff]  }
 0x8d3   : > { %13017 = vmatprep.subr.bf16.mxu1 %v21829_v60  ;;  %13103 = vmatprep.subr.bf16.mxu0 %v21832_v61  ;;  %v21908_v60 = vld [vmem:[#allocation13 + $0x48] ss:$16 sps:$4 sm:$0xff]   ;;  %v21913_v61 = vld [vmem:[#allocation13 + $0x64] ss:$16 sps:$4 sm:$0xff]  }
 0x8d6   : > { %13018 = vmatpush1.bf16.msra.mxu1 %v21827_v3  ;;  %13104 = vmatpush1.bf16.msra.mxu0 %v21830_v24  ;;  %v21916_v3 = vld [vmem:[#allocation13 + $0x6c] ss:$16 sps:$4 sm:$0xff]   ;;  %v21911_v24 = vld [vmem:[#allocation13 + $0x60] ss:$16 sps:$4 sm:$0xff]  }
 0x8d7   : > { %13019 = vmatprep.subr.bf16.mxu1 %v21835_v28  ;;  %13105 = vmatprep.subr.bf16.mxu0 %v21838_v8  ;;  %v21919_v28 = vld [vmem:[#allocation13 + $0x84] ss:$16 sps:$4 sm:$0xff]   ;;  %v21922_v8 = vld [vmem:[#allocation13 + $0x8c] ss:$16 sps:$4 sm:$0xff]  }
 0x8da   : > { %13020 = vmatpush1.bf16.msra.mxu1 %v21833_v56  ;;  %13106 = vmatpush1.bf16.msra.mxu0 %v21836_v37  ;;  %v21917_v56 = vld [vmem:[#allocation13 + $0x80] ss:$16 sps:$4 sm:$0xff]   ;;  %v21920_v37 = vld [vmem:[#allocation13 + $0x88] ss:$16 sps:$4 sm:$0xff]  }
 0x8db   : > { %13021 = vmatprep.subr.bf16.mxu1 %v21841_v51  ;;  %13107 = vmatprep.subr.bf16.mxu0 %v21844_v14  ;;  %v21925_v51 = vld [vmem:[#allocation13 + $0xa4] ss:$16 sps:$4 sm:$0xff]   ;;  %v21928_v14 = vld [vmem:[#allocation13 + $0xac] ss:$16 sps:$4 sm:$0xff]  }
 0x8de   : > { %13022 = vmatpush1.bf16.msra.mxu1 %v21839_v57  ;;  %13108 = vmatpush1.bf16.msra.mxu0 %v21842_v7  ;;  %v21923_v57 = vld [vmem:[#allocation13 + $0xa0] ss:$16 sps:$4 sm:$0xff]   ;;  %v21926_v7 = vld [vmem:[#allocation13 + $0xa8] ss:$16 sps:$4 sm:$0xff]  }
 0x8df   : > { %13023 = vmatprep.subr.bf16.mxu1 %v21847_v52  ;;  %13109 = vmatprep.subr.bf16.mxu0 %v21850_v20  ;;  %v21931_v52 = vld [vmem:[#allocation13 + $0xc4] ss:$16 sps:$4 sm:$0xff]   ;;  %v21934_v20 = vld [vmem:[#allocation13 + $0xcc] ss:$16 sps:$4 sm:$0xff]  }
 0x8e2   : > { %13024 = vmatpush1.bf16.msra.mxu1 %v21845_v53  ;;  %13110 = vmatpush1.bf16.msra.mxu0 %v21848_v40  ;;  %v21929_v53 = vld [vmem:[#allocation13 + $0xc0] ss:$16 sps:$4 sm:$0xff]   ;;  %v21932_v40 = vld [vmem:[#allocation13 + $0xc8] ss:$16 sps:$4 sm:$0xff]  }
 0x8e3   : > { %13025 = vmatprep.subr.bf16.mxu1 %v21853_v13  ;;  %13111 = vmatprep.subr.bf16.mxu0 %v21856_v32  ;;  %v21937_v13 = vld [vmem:[#allocation13 + $0xe4] ss:$16 sps:$4 sm:$0xff]   ;;  %v21940_v32 = vld [vmem:[#allocation13 + $0xec] ss:$16 sps:$4 sm:$0xff]  }
 0x8e6   : > { %13026 = vmatpush1.bf16.msra.mxu1 %v21851_v54  ;;  %13112 = vmatpush1.bf16.msra.mxu0 %v21854_v22  ;;  %v21935_v54 = vld [vmem:[#allocation13 + $0xe0] ss:$16 sps:$4 sm:$0xff]   ;;  %v21938_v22 = vld [vmem:[#allocation13 + $0xe8] ss:$16 sps:$4 sm:$0xff]  }
 0x8e7   : > { %13027 = vmatprep.subr.bf16.mxu1 %v21859_v36  ;;  %13113 = vmatprep.subr.bf16.mxu0 %v21862_v45  ;;  %v21943_v36 = vld [vmem:[#allocation13 + $0x104] ss:$16 sps:$4 sm:$0xff]   ;;  %v21946_v45 = vld [vmem:[#allocation13 + $0x10c] ss:$16 sps:$4 sm:$0xff]  }
 0x8ea   : > { %13028 = vmatpush1.bf16.msra.mxu1 %v21857_v26  ;;  %13114 = vmatpush1.bf16.msra.mxu0 %v21860_v6  ;;  %v21941_v26 = vld [vmem:[#allocation13 + $0x100] ss:$16 sps:$4 sm:$0xff]   ;;  %v21944_v6 = vld [vmem:[#allocation13 + $0x108] ss:$16 sps:$4 sm:$0xff]  }
 0x8eb   : > { %13029 = vmatprep.subr.bf16.mxu1 %v21865_v27  ;;  %13115 = vmatprep.subr.bf16.mxu0 %v21868_v41  ;;  %v21949_v27 = vld [vmem:[#allocation13 + $0x124] ss:$16 sps:$4 sm:$0xff]   ;;  %v21952_v41 = vld [vmem:[#allocation13 + $0x12c] ss:$16 sps:$4 sm:$0xff]  }
 0x8ee   : > { %13030 = vmatpush1.bf16.msra.mxu1 %v21863_v25  ;;  %13116 = vmatpush1.bf16.msra.mxu0 %v21866_v38  ;;  %v21947_v25 = vld [vmem:[#allocation13 + $0x120] ss:$16 sps:$4 sm:$0xff]   ;;  %v21950_v38 = vld [vmem:[#allocation13 + $0x128] ss:$16 sps:$4 sm:$0xff]  }
 0x8ef   : > { %13031 = vmatprep.subr.bf16.mxu1 %v21871_v18  ;;  %13117 = vmatprep.subr.bf16.mxu0 %v21874_v5  ;;  %v21955_v18 = vld [vmem:[#allocation13 + $0x144] ss:$16 sps:$4 sm:$0xff]   ;;  %v21958_v5 = vld [vmem:[#allocation13 + $0x14c] ss:$16 sps:$4 sm:$0xff]  }
 0x8f2   : > { %13032 = vmatpush1.bf16.msra.mxu1 %v21869_v23  ;;  %13118 = vmatpush1.bf16.msra.mxu0 %v21872_v29  ;;  %v21953_v23 = vld [vmem:[#allocation13 + $0x140] ss:$16 sps:$4 sm:$0xff]   ;;  %v21956_v29 = vld [vmem:[#allocation13 + $0x148] ss:$16 sps:$4 sm:$0xff]  }
 0x8f3   : > { %13033 = vmatprep.subr.bf16.mxu1 %v21877_v1  ;;  %13119 = vmatprep.subr.bf16.mxu0 %v21880_v44  ;;  %v21961_v1 = vld [vmem:[#allocation13 + $0x164] ss:$16 sps:$4 sm:$0xff]   ;;  %v21964_v44 = vld [vmem:[#allocation13 + $0x16c] ss:$16 sps:$4 sm:$0xff]  }
 0x8f6   : > { %13034 = vmatpush1.bf16.msra.mxu1 %v21875_v30  ;;  %13120 = vmatpush1.bf16.msra.mxu0 %v21878_v19  ;;  %v21959_v30 = vld [vmem:[#allocation13 + $0x160] ss:$16 sps:$4 sm:$0xff]   ;;  %v21962_v19 = vld [vmem:[#allocation13 + $0x168] ss:$16 sps:$4 sm:$0xff]  }
 0x8f7   : > { %13035 = vmatprep.subr.bf16.mxu1 %v21883_v2  ;;  %13121 = vmatprep.subr.bf16.mxu0 %v21886_v0  ;;  %v21967_v2 = vld [vmem:[#allocation13 + $0x184] ss:$16 sps:$4 sm:$0xff]   ;;  %v21970_v0 = vld [vmem:[#allocation13 + $0x18c] ss:$16 sps:$4 sm:$0xff]  }
 0x8fa   : > { %13036 = vmatpush1.bf16.msra.mxu1 %v21881_v59  ;;  %13122 = vmatpush1.bf16.msra.mxu0 %v21884_v31  ;;  %v21965_v59 = vld [vmem:[#allocation13 + $0x180] ss:$16 sps:$4 sm:$0xff]   ;;  %v21968_v31 = vld [vmem:[#allocation13 + $0x188] ss:$16 sps:$4 sm:$0xff]  }
 0x8fb   : > { %13037 = vmatprep.subr.bf16.mxu1 %v21889_v46  ;;  %13123 = vmatprep.subr.bf16.mxu0 %v21892_v58  ;;  %v21973_v46 = vld [vmem:[#allocation13 + $0x1a4] ss:$16 sps:$4 sm:$0xff]   ;;  %v21976_v58 = vld [vmem:[#allocation13 + $0x1ac] ss:$16 sps:$4 sm:$0xff]  }
 0x8fe   : > { %13038 = vmatpush1.bf16.msra.mxu1 %v21887_v12  ;;  %13124 = vmatpush1.bf16.msra.mxu0 %v21890_v43  ;;  %v21971_v12 = vld [vmem:[#allocation13 + $0x1a0] ss:$16 sps:$4 sm:$0xff]   ;;  %v21974_v43 = vld [vmem:[#allocation13 + $0x1a8] ss:$16 sps:$4 sm:$0xff]  }
 0x8ff   : > { %13938 = vmatprep.subr.bf16.mxu1 %v21895_v17  ;;  %14024 = vmatprep.subr.bf16.mxu0 %v21898_v4  ;;  %v21979_v17 = vld [vmem:[#allocation13 + $0x1c4] ss:$16 sps:$4 sm:$0xff]   ;;  %v21982_v4 = vld [vmem:[#allocation13 + $0x1cc] ss:$16 sps:$4 sm:$0xff]  }
 0x901   : > { %13040 = vmatmul.mubr.bf16.vlgmr.msra.gmra.mrb[28].mxu1 %v24131_v33  ;;  %13126 = vmatmul.mubr.bf16.vlgmr.msra.gmra.mrb[32].mxu0 %v24131_v33  ;;  %v21914_v33 = vld [vmem:[#allocation13 + $0x68] ss:$16 sps:$4 sm:$0xff]  }
 0x902   : > { %13939 = vmatpush1.bf16.msra.mxu1 %v21893_v11  ;;  %14025 = vmatpush1.bf16.msra.mxu0 %v21896_v63  ;;  %v21977_v11 = vld [vmem:[#allocation13 + $0x1c0] ss:$16 sps:$4 sm:$0xff]   ;;  %v21980_v63 = vld [vmem:[#allocation13 + $0x1c8] ss:$16 sps:$4 sm:$0xff]  }
 0x903   : > { %13940 = vmatprep.subr.bf16.mxu1 %v21901_v35  ;;  %14026 = vmatprep.subr.bf16.mxu0 %v21904_v21  ;;  %v21985_v35 = vld [vmem:[#allocation13 + $0x1e4] ss:$16 sps:$4 sm:$0xff]   ;;  %v21988_v21 = vld [vmem:[#allocation13 + $0x1ec] ss:$16 sps:$4 sm:$0xff]  }
 0x906   : > { %13941 = vmatpush1.bf16.msra.mxu1 %v21899_v55  ;;  %14027 = vmatpush1.bf16.msra.mxu0 %v21902_v9  ;;  %v21983_v55 = vld [vmem:[#allocation13 + $0x1e0] ss:$16 sps:$4 sm:$0xff]   ;;  %v21986_v9 = vld [vmem:[#allocation13 + $0x1e8] ss:$16 sps:$4 sm:$0xff]  }
 0x907   : > { %13942 = vmatprep.subr.bf16.mxu1 %v21907_v47  ;;  %14028 = vmatprep.subr.bf16.mxu0 %v21910_v62  ;;  %v21991_v47 = vld [vmem:[#allocation13 + $0x204] ss:$16 sps:$4 sm:$0xff]   ;;  %v21994_v62 = vld [vmem:[#allocation13 + $0x20c] ss:$16 sps:$4 sm:$0xff]  }
 0x90a   : > { %13943 = vmatpush1.bf16.msra.mxu1 %v21905_v10  ;;  %14029 = vmatpush1.bf16.msra.mxu0 %v21908_v60  ;;  %v12302_v10 = vld [vmem:[#allocation2 + $0x13] sm:$0xf] }
 0x90b   : > { %13944 = vmatprep.subr.bf16.mxu1 %v21913_v61  ;;  %14030 = vmatprep.subr.bf16.mxu0 %v21916_v3  ;;  %v12307_v60 = vrot.slane %v12302_v10, %v23944_v48  ;;  %v12315_v61 = vrot.slane %v12302_v10, %v23948_v39  ;;  %v12311_v3 = vrot.slane %v12302_v10, %v23951_v15 }
 0x90e   : > { %13945 = vmatpush1.bf16.msra.mxu1 %v21911_v24  ;;  %14031 = vmatpush1.bf16.msra.mxu0 %v21914_v33  ;;  %v12319_v24 = vrot.slane %v12302_v10, %v23954_v42  ;;  %v22030_v10 = vld [vmem:[#allocation13 + $0x2cc] ss:$16 sps:$4 sm:$0xff]  }
 0x90f   : > { %13946 = vmatprep.subr.bf16.mxu1 %v21919_v28  ;;  %14032 = vmatprep.subr.bf16.mxu0 %v21922_v8 }
 0x912   : > { %13947 = vmatpush1.bf16.msra.mxu1 %v21917_v56  ;;  %14033 = vmatpush1.bf16.msra.mxu0 %v21920_v37 }
 0x913   : > { %13948 = vmatprep.subr.bf16.mxu1 %v21925_v51  ;;  %14034 = vmatprep.subr.bf16.mxu0 %v21928_v14 }
 0x916   : > { %13949 = vmatpush1.bf16.msra.mxu1 %v21923_v57  ;;  %14035 = vmatpush1.bf16.msra.mxu0 %v21926_v7 }
 0x917   : > { %13950 = vmatprep.subr.bf16.mxu1 %v21931_v52  ;;  %14036 = vmatprep.subr.bf16.mxu0 %v21934_v20 }
 0x91a   : > { %13951 = vmatpush1.bf16.msra.mxu1 %v21929_v53  ;;  %14037 = vmatpush1.bf16.msra.mxu0 %v21932_v40 }
 0x91b   : > { %13952 = vmatprep.subr.bf16.mxu1 %v21937_v13  ;;  %14038 = vmatprep.subr.bf16.mxu0 %v21940_v32 }
 0x91e   : > { %13953 = vmatpush1.bf16.msra.mxu1 %v21935_v54  ;;  %14039 = vmatpush1.bf16.msra.mxu0 %v21938_v22 }
 0x91f   : > { %13954 = vmatprep.subr.bf16.mxu1 %v21943_v36  ;;  %14040 = vmatprep.subr.bf16.mxu0 %v21946_v45 }
 0x922   : > { %13955 = vmatpush1.bf16.msra.mxu1 %v21941_v26  ;;  %14041 = vmatpush1.bf16.msra.mxu0 %v21944_v6 }
 0x923   : > { %13956 = vmatprep.subr.bf16.mxu1 %v21949_v27  ;;  %14042 = vmatprep.subr.bf16.mxu0 %v21952_v41 }
 0x926   : > { %13957 = vmatpush1.bf16.msra.mxu1 %v21947_v25  ;;  %14043 = vmatpush1.bf16.msra.mxu0 %v21950_v38 }
 0x927   : > { %13958 = vmatprep.subr.bf16.mxu1 %v21955_v18  ;;  %14044 = vmatprep.subr.bf16.mxu0 %v21958_v5 }
 0x92a   : > { %13959 = vmatpush1.bf16.msra.mxu1 %v21953_v23  ;;  %14045 = vmatpush1.bf16.msra.mxu0 %v21956_v29  ;;  %v21989_v29 = vld [vmem:[#allocation13 + $0x200] ss:$16 sps:$4 sm:$0xff]  }
 0x92b   : > { %13960 = vmatprep.subr.bf16.mxu1 %v21961_v1  ;;  %14046 = vmatprep.subr.bf16.mxu0 %v21964_v44  ;;  %v21992_v1 = vld [vmem:[#allocation13 + $0x208] ss:$16 sps:$4 sm:$0xff]   ;;  %v21997_v44 = vld [vmem:[#allocation13 + $0x224] ss:$16 sps:$4 sm:$0xff]  }
 0x92e   : > { %13961 = vmatpush1.bf16.msra.mxu1 %v21959_v30  ;;  %14047 = vmatpush1.bf16.msra.mxu0 %v21962_v19  ;;  %v22000_v30 = vld [vmem:[#allocation13 + $0x22c] ss:$16 sps:$4 sm:$0xff]   ;;  %v21995_v19 = vld [vmem:[#allocation13 + $0x220] ss:$16 sps:$4 sm:$0xff]  }
 0x92f   : > { %13962 = vmatprep.subr.bf16.mxu1 %v21967_v2  ;;  %14048 = vmatprep.subr.bf16.mxu0 %v21970_v0  ;;  %v21998_v2 = vld [vmem:[#allocation13 + $0x228] ss:$16 sps:$4 sm:$0xff]   ;;  %v22003_v0 = vld [vmem:[#allocation13 + $0x244] ss:$16 sps:$4 sm:$0xff]  }
 0x932   : > { %13963 = vmatpush1.bf16.msra.mxu1 %v21965_v59  ;;  %14049 = vmatpush1.bf16.msra.mxu0 %v21968_v31  ;;  %v22006_v59 = vld [vmem:[#allocation13 + $0x24c] ss:$16 sps:$4 sm:$0xff]   ;;  %v22001_v31 = vld [vmem:[#allocation13 + $0x240] ss:$16 sps:$4 sm:$0xff]  }
 0x933   : > { %13964 = vmatprep.subr.bf16.mxu1 %v21973_v46  ;;  %14050 = vmatprep.subr.bf16.mxu0 %v21976_v58  ;;  %v22004_v46 = vld [vmem:[#allocation13 + $0x248] ss:$16 sps:$4 sm:$0xff]   ;;  %v22009_v58 = vld [vmem:[#allocation13 + $0x264] ss:$16 sps:$4 sm:$0xff]  }
 0x936   : > { %13965 = vmatpush1.bf16.msra.mxu1 %v21971_v12  ;;  %14051 = vmatpush1.bf16.msra.mxu0 %v21974_v43  ;;  %v22012_v12 = vld [vmem:[#allocation13 + $0x26c] ss:$16 sps:$4 sm:$0xff]   ;;  %v22007_v43 = vld [vmem:[#allocation13 + $0x260] ss:$16 sps:$4 sm:$0xff]  }
 0x937   : > { %13966 = vmatprep.subr.bf16.mxu1 %v21979_v17  ;;  %14052 = vmatprep.subr.bf16.mxu0 %v21982_v4  ;;  %v22010_v17 = vld [vmem:[#allocation13 + $0x268] ss:$16 sps:$4 sm:$0xff]   ;;  %v22015_v4 = vld [vmem:[#allocation13 + $0x284] ss:$16 sps:$4 sm:$0xff]  }
 0x93a   : > { %13967 = vmatpush1.bf16.msra.mxu1 %v21977_v11  ;;  %14053 = vmatpush1.bf16.msra.mxu0 %v21980_v63  ;;  %v22018_v11 = vld [vmem:[#allocation13 + $0x28c] ss:$16 sps:$4 sm:$0xff]   ;;  %v22013_v63 = vld [vmem:[#allocation13 + $0x280] ss:$16 sps:$4 sm:$0xff]  }
 0x93b   : > { %13968 = vmatprep.subr.bf16.mxu1 %v21985_v35  ;;  %14054 = vmatprep.subr.bf16.mxu0 %v21988_v21  ;;  %v22016_v35 = vld [vmem:[#allocation13 + $0x288] ss:$16 sps:$4 sm:$0xff]   ;;  %v22021_v21 = vld [vmem:[#allocation13 + $0x2a4] ss:$16 sps:$4 sm:$0xff]  }
 0x93e   : > { %13969 = vmatpush1.bf16.msra.mxu1 %v21983_v55  ;;  %14055 = vmatpush1.bf16.msra.mxu0 %v21986_v9  ;;  %v22024_v55 = vld [vmem:[#allocation13 + $0x2ac] ss:$16 sps:$4 sm:$0xff]   ;;  %v22019_v9 = vld [vmem:[#allocation13 + $0x2a0] ss:$16 sps:$4 sm:$0xff]  }
 0x93f   : > { %13981 = vmatprep.subr.bf16.mxu1 %v21991_v47  ;;  %14067 = vmatprep.subr.bf16.mxu0 %v21994_v62  ;;  %v22022_v47 = vld [vmem:[#allocation13 + $0x2a8] ss:$16 sps:$4 sm:$0xff]   ;;  %v22027_v62 = vld [vmem:[#allocation13 + $0x2c4] ss:$16 sps:$4 sm:$0xff]  }
 0x9d4   : > { %v13041_v33 = vpop.f32.mrb[28].mxu1  ;;  %v13127_v28 = vpop.f32.mrb[32].mxu0 }
 0x9d5   : > { %v20577_v8 = vadd.f32 %v13041_v33, %v12307_v60  ;;  %v20581_v56 = vadd.f32 %v13127_v28, %v12315_v61  ;;  %v13043_v37 = vpop.f32.mrb[29].mxu1  ;;  %v13129_v51 = vpop.f32.mrb[33].mxu0  ;;  %v22031_v33 = vld [vmem:[#allocation13 + $0x2e0] ss:$16 sps:$4 sm:$0xff]   ;;  %v22034_v28 = vld [vmem:[#allocation13 + $0x2e8] ss:$16 sps:$4 sm:$0xff]  }
 0x9d6   : > { %v20578_v14 = vadd.f32 %v13043_v37, %v12311_v3  ;;  %v20582_v57 = vadd.f32 %v13129_v51, %v12319_v24  ;;  %v13045_v7 = vpop.f32.mrb[30].mxu1  ;;  %v13131_v52 = vpop.f32.mrb[34].mxu0  ;;  %v22037_v37 = vld [vmem:[#allocation13 + $0x300] ss:$16 sps:$4 sm:$0xff]   ;;  %v22040_v51 = vld [vmem:[#allocation13 + $0x308] ss:$16 sps:$4 sm:$0xff]  }
 0x9d7   : > { %v20579_v20 = vadd.f32 %v13045_v7, %v12307_v60  ;;  %v20583_v53 = vadd.f32 %v13131_v52, %v12315_v61  ;;  %v13047_v40 = vpop.f32.mrb[31].mxu1  ;;  %v13133_v13 = vpop.f32.mrb[35].mxu0  ;;  %v13136_v22 = vmax.f32 %v20577_v8, 0.0  ;;  %v13138_v36 = vmax.f32 %v20581_v56, 0.0  ;;  %v22025_v60 = vld [vmem:[#allocation13 + $0x2c0] ss:$16 sps:$4 sm:$0xff]  }
 0x9d8   : > { %v20580_v32 = vadd.f32 %v13047_v40, %v12311_v3  ;;  %v20584_v54 = vadd.f32 %v13133_v13, %v12319_v24  ;;  %v13137_v6 = vmax.f32 %v20578_v14, 0.0  ;;  %v13139_v27 = vmax.f32 %v20582_v57, 0.0  ;;  %v22028_v61 = vld [vmem:[#allocation13 + $0x2c8] ss:$16 sps:$4 sm:$0xff]   ;;  %v22033_v3 = vld [vmem:[#allocation13 + $0x2e4] ss:$16 sps:$4 sm:$0xff]  }
 0x9d9   : > { %v13140_v45 = vmax.f32 %v20579_v20, 0.0  ;;  %v13142_v26 = vmax.f32 %v20583_v53, 0.0  ;;  %v22036_v24 = vld [vmem:[#allocation13 + $0x2ec] ss:$16 sps:$4 sm:$0xff]   ;;  %v22039_v8 = vld [vmem:[#allocation13 + $0x304] ss:$16 sps:$4 sm:$0xff]  }
 0x9da   : > { %v13141_v41 = vmax.f32 %v20580_v32, 0.0  ;;  %v13143_v25 = vmax.f32 %v20584_v54, 0.0  ;;  %v22042_v56 = vld [vmem:[#allocation13 + $0x30c] ss:$16 sps:$4 sm:$0xff]   ;;  %v22045_v14 = vld [vmem:[#allocation13 + $0x324] ss:$16 sps:$4 sm:$0xff]  }
 0x9db   : > { %v13144_v38 = vpack.c.bf16 %v13140_v45, %v13136_v22  ;;  %v24139_v18 = vpack.c.bf16 %v13142_v26, %v13138_v36  ;;  %v22048_v57 = vld [vmem:[#allocation13 + $0x32c] ss:$16 sps:$4 sm:$0xff]   ;;  %v22043_v7 = vld [vmem:[#allocation13 + $0x320] ss:$16 sps:$4 sm:$0xff]   ;;  %v22046_v52 = vld [vmem:[#allocation13 + $0x328] ss:$16 sps:$4 sm:$0xff]  }
 0x9dc   : > { %v13145_v5 = vpack.c.bf16 %v13141_v41, %v13137_v6  ;;  %v13147_v23 = vpack.c.bf16 %v13143_v25, %v13139_v27  ;;  %v22051_v20 = vld [vmem:[#allocation13 + $0x344] ss:$16 sps:$4 sm:$0xff]   ;;  %v22054_v53 = vld [vmem:[#allocation13 + $0x34c] ss:$16 sps:$4 sm:$0xff]   ;;  %v22049_v40 = vld [vmem:[#allocation13 + $0x340] ss:$16 sps:$4 sm:$0xff]  }
 0x9dd   : > { %v22052_v13 = vld [vmem:[#allocation13 + $0x348] ss:$16 sps:$4 sm:$0xff]   ;;  %v22057_v32 = vld [vmem:[#allocation13 + $0x364] ss:$16 sps:$4 sm:$0xff]   ;;  %v22060_v54 = vld [vmem:[#allocation13 + $0x36c] ss:$16 sps:$4 sm:$0xff]  }
 0x9de   : > { %13970 = vmatprep.mubr.bf16.mxu1 %v13145_v5  ;;  %14056 = vmatprep.mubr.bf16.mxu0 %v13145_v5  ;;  %v22055_v22 = vld [vmem:[#allocation13 + $0x360] ss:$16 sps:$4 sm:$0xff]   ;;  %v22058_v36 = vld [vmem:[#allocation13 + $0x368] ss:$16 sps:$4 sm:$0xff]   ;;  %v22063_v45 = vld [vmem:[#allocation13 + $0x384] ss:$16 sps:$4 sm:$0xff]  }
 0x9df   : > { %13971 = vmatmul.mubr.bf16.vlgmr.msra.gmra.mrb[32].mxu1 %v13144_v38  ;;  %14057 = vmatmul.mubr.bf16.vlgmr.msra.gmra.mrb[36].mxu0 %v13144_v38  ;;  %v22066_v26 = vld [vmem:[#allocation13 + $0x38c] ss:$16 sps:$4 sm:$0xff]   ;;  %v22061_v6 = vld [vmem:[#allocation13 + $0x380] ss:$16 sps:$4 sm:$0xff]   ;;  %v22064_v27 = vld [vmem:[#allocation13 + $0x388] ss:$16 sps:$4 sm:$0xff]  }
 0x9e0   : > { %13982 = vmatpush1.bf16.msra.mxu1 %v21989_v29  ;;  %14068 = vmatpush1.bf16.msra.mxu0 %v21992_v1  ;;  %v22069_v41 = vld [vmem:[#allocation13 + $0x3a4] ss:$16 sps:$4 sm:$0xff]   ;;  %v22072_v25 = vld [vmem:[#allocation13 + $0x3ac] ss:$16 sps:$4 sm:$0xff]   ;;  %v22067_v38 = vld [vmem:[#allocation13 + $0x3a0] ss:$16 sps:$4 sm:$0xff]  }
 0x9e1   : > { %14013 = vmatprep.mubr.bf16.mxu1 %v13147_v23  ;;  %14099 = vmatprep.mubr.bf16.mxu0 %v13147_v23  ;;  %v22070_v5 = vld [vmem:[#allocation13 + $0x3a8] ss:$16 sps:$4 sm:$0xff]   ;;  %v22075_v23 = vld [vmem:[#allocation13 + $0x3c4] ss:$16 sps:$4 sm:$0xff]   ;;  %v22078_v29 = vld [vmem:[#allocation13 + $0x3cc] ss:$16 sps:$4 sm:$0xff]  }
 0x9e2   : > { %13983 = vmatprep.subr.bf16.mxu1 %v21997_v44  ;;  %14069 = vmatprep.subr.bf16.mxu0 %v22000_v30  ;;  %v22073_v1 = vld [vmem:[#allocation13 + $0x3c0] ss:$16 sps:$4 sm:$0xff]   ;;  %v22076_v44 = vld [vmem:[#allocation13 + $0x3c8] ss:$16 sps:$4 sm:$0xff]   ;;  %v22081_v30 = vld [vmem:[#allocation13 + $0x3e4] ss:$16 sps:$4 sm:$0xff]  }
 0x9e4   : > { %13984 = vmatpush1.bf16.msra.mxu1 %v21995_v19  ;;  %14070 = vmatpush1.bf16.msra.mxu0 %v21998_v2  ;;  %v22084_v19 = vld [vmem:[#allocation13 + $0x3ec] ss:$16 sps:$4 sm:$0xff]   ;;  %v22079_v2 = vld [vmem:[#allocation13 + $0x3e0] ss:$16 sps:$4 sm:$0xff]  }
 0x9e5   : > { %13985 = vmatprep.subr.bf16.mxu1 %v22003_v0  ;;  %14071 = vmatprep.subr.bf16.mxu0 %v22006_v59  ;;  %v22082_v0 = vld [vmem:[#allocation13 + $0x3e8] ss:$16 sps:$4 sm:$0xff]   ;;  %v22087_v59 = vld [vmem:[#allocation15 + $0x4] ss:$16 sps:$4 sm:$0xff]  }
 0x9e8   : > { %13986 = vmatpush1.bf16.msra.mxu1 %v22001_v31  ;;  %14072 = vmatpush1.bf16.msra.mxu0 %v22004_v46  ;;  %v22090_v31 = vld [vmem:[#allocation15 + $0xc] ss:$16 sps:$4 sm:$0xff]   ;;  %v22085_v46 = vld [vmem:[#allocation15] ss:$16 sps:$4 sm:$0xff]  }
 0x9e9   : > { %13987 = vmatprep.subr.bf16.mxu1 %v22009_v58  ;;  %14073 = vmatprep.subr.bf16.mxu0 %v22012_v12  ;;  %v22088_v58 = vld [vmem:[#allocation15 + $0x8] ss:$16 sps:$4 sm:$0xff]   ;;  %v22093_v12 = vld [vmem:[#allocation15 + $0x24] ss:$16 sps:$4 sm:$0xff]  }
 0x9ec   : > { %13988 = vmatpush1.bf16.msra.mxu1 %v22007_v43  ;;  %14074 = vmatpush1.bf16.msra.mxu0 %v22010_v17  ;;  %v22096_v43 = vld [vmem:[#allocation15 + $0x2c] ss:$16 sps:$4 sm:$0xff]   ;;  %v22091_v17 = vld [vmem:[#allocation15 + $0x20] ss:$16 sps:$4 sm:$0xff]  }
 0x9ed   : > { %13989 = vmatprep.subr.bf16.mxu1 %v22015_v4  ;;  %14075 = vmatprep.subr.bf16.mxu0 %v22018_v11  ;;  %v22094_v4 = vld [vmem:[#allocation15 + $0x28] ss:$16 sps:$4 sm:$0xff]   ;;  %v22099_v11 = vld [vmem:[#allocation15 + $0x44] ss:$16 sps:$4 sm:$0xff]  }
 0x9f0   : > { %13990 = vmatpush1.bf16.msra.mxu1 %v22013_v63  ;;  %14076 = vmatpush1.bf16.msra.mxu0 %v22016_v35  ;;  %v22102_v63 = vld [vmem:[#allocation15 + $0x4c] ss:$16 sps:$4 sm:$0xff]   ;;  %v22097_v35 = vld [vmem:[#allocation15 + $0x40] ss:$16 sps:$4 sm:$0xff]  }
 0x9f1   : > { %13991 = vmatprep.subr.bf16.mxu1 %v22021_v21  ;;  %14077 = vmatprep.subr.bf16.mxu0 %v22024_v55  ;;  %v22100_v21 = vld [vmem:[#allocation15 + $0x48] ss:$16 sps:$4 sm:$0xff]   ;;  %v22105_v55 = vld [vmem:[#allocation15 + $0x64] ss:$16 sps:$4 sm:$0xff]  }
 0x9f4   : > { %13992 = vmatpush1.bf16.msra.mxu1 %v22019_v9  ;;  %14078 = vmatpush1.bf16.msra.mxu0 %v22022_v47  ;;  %v22108_v9 = vld [vmem:[#allocation15 + $0x6c] ss:$16 sps:$4 sm:$0xff]   ;;  %v22103_v47 = vld [vmem:[#allocation15 + $0x60] ss:$16 sps:$4 sm:$0xff]  }
 0x9f5   : > { %13993 = vmatprep.subr.bf16.mxu1 %v22027_v62  ;;  %14079 = vmatprep.subr.bf16.mxu0 %v22030_v10  ;;  %v22111_v62 = vld [vmem:[#allocation15 + $0x84] ss:$16 sps:$4 sm:$0xff]   ;;  %v22114_v10 = vld [vmem:[#allocation15 + $0x8c] ss:$16 sps:$4 sm:$0xff]  }
 0x9f8   : > { %13994 = vmatpush1.bf16.msra.mxu1 %v22025_v60  ;;  %14080 = vmatpush1.bf16.msra.mxu0 %v22028_v61  ;;  %v22109_v60 = vld [vmem:[#allocation15 + $0x80] ss:$16 sps:$4 sm:$0xff]   ;;  %v22112_v61 = vld [vmem:[#allocation15 + $0x88] ss:$16 sps:$4 sm:$0xff]  }
 0x9f9   : > { %13995 = vmatprep.subr.bf16.mxu1 %v22033_v3  ;;  %14081 = vmatprep.subr.bf16.mxu0 %v22036_v24  ;;  %v22117_v3 = vld [vmem:[#allocation15 + $0xa4] ss:$16 sps:$4 sm:$0xff]   ;;  %v22120_v24 = vld [vmem:[#allocation15 + $0xac] ss:$16 sps:$4 sm:$0xff]  }
 0x9fc   : > { %13996 = vmatpush1.bf16.msra.mxu1 %v22031_v33  ;;  %14082 = vmatpush1.bf16.msra.mxu0 %v22034_v28  ;;  %v22115_v33 = vld [vmem:[#allocation15 + $0xa0] ss:$16 sps:$4 sm:$0xff]   ;;  %v22118_v28 = vld [vmem:[#allocation15 + $0xa8] ss:$16 sps:$4 sm:$0xff]  }
 0x9fd   : > { %13997 = vmatprep.subr.bf16.mxu1 %v22039_v8  ;;  %14083 = vmatprep.subr.bf16.mxu0 %v22042_v56  ;;  %v22123_v8 = vld [vmem:[#allocation15 + $0xc4] ss:$16 sps:$4 sm:$0xff]   ;;  %v22126_v56 = vld [vmem:[#allocation15 + $0xcc] ss:$16 sps:$4 sm:$0xff]  }
 0xa00   : > { %13998 = vmatpush1.bf16.msra.mxu1 %v22037_v37  ;;  %14084 = vmatpush1.bf16.msra.mxu0 %v22040_v51  ;;  %v22121_v37 = vld [vmem:[#allocation15 + $0xc0] ss:$16 sps:$4 sm:$0xff]   ;;  %v22124_v51 = vld [vmem:[#allocation15 + $0xc8] ss:$16 sps:$4 sm:$0xff]  }
 0xa01   : > { %13999 = vmatprep.subr.bf16.mxu1 %v22045_v14  ;;  %14085 = vmatprep.subr.bf16.mxu0 %v22048_v57  ;;  %v22129_v14 = vld [vmem:[#allocation15 + $0xe4] ss:$16 sps:$4 sm:$0xff]   ;;  %v22132_v57 = vld [vmem:[#allocation15 + $0xec] ss:$16 sps:$4 sm:$0xff]  }
 0xa04   : > { %14000 = vmatpush1.bf16.msra.mxu1 %v22043_v7  ;;  %14086 = vmatpush1.bf16.msra.mxu0 %v22046_v52  ;;  %v22127_v7 = vld [vmem:[#allocation15 + $0xe0] ss:$16 sps:$4 sm:$0xff]   ;;  %v22130_v52 = vld [vmem:[#allocation15 + $0xe8] ss:$16 sps:$4 sm:$0xff]  }
 0xa05   : > { %14001 = vmatprep.subr.bf16.mxu1 %v22051_v20  ;;  %14087 = vmatprep.subr.bf16.mxu0 %v22054_v53  ;;  %v22135_v20 = vld [vmem:[#allocation15 + $0x104] ss:$16 sps:$4 sm:$0xff]   ;;  %v22138_v53 = vld [vmem:[#allocation15 + $0x10c] ss:$16 sps:$4 sm:$0xff]  }
 0xa08   : > { %14002 = vmatpush1.bf16.msra.mxu1 %v22049_v40  ;;  %14088 = vmatpush1.bf16.msra.mxu0 %v22052_v13  ;;  %v22133_v40 = vld [vmem:[#allocation15 + $0x100] ss:$16 sps:$4 sm:$0xff]   ;;  %v22136_v13 = vld [vmem:[#allocation15 + $0x108] ss:$16 sps:$4 sm:$0xff]  }
 0xa09   : > { %14003 = vmatprep.subr.bf16.mxu1 %v22057_v32  ;;  %14089 = vmatprep.subr.bf16.mxu0 %v22060_v54  ;;  %v22141_v32 = vld [vmem:[#allocation15 + $0x124] ss:$16 sps:$4 sm:$0xff]   ;;  %v22144_v54 = vld [vmem:[#allocation15 + $0x12c] ss:$16 sps:$4 sm:$0xff]  }
 0xa0c   : > { %14004 = vmatpush1.bf16.msra.mxu1 %v22055_v22  ;;  %14090 = vmatpush1.bf16.msra.mxu0 %v22058_v36  ;;  %v22139_v22 = vld [vmem:[#allocation15 + $0x120] ss:$16 sps:$4 sm:$0xff]   ;;  %v22142_v36 = vld [vmem:[#allocation15 + $0x128] ss:$16 sps:$4 sm:$0xff]  }
 0xa0d   : > { %14005 = vmatprep.subr.bf16.mxu1 %v22063_v45  ;;  %14091 = vmatprep.subr.bf16.mxu0 %v22066_v26  ;;  %v22147_v45 = vld [vmem:[#allocation15 + $0x144] ss:$16 sps:$4 sm:$0xff]   ;;  %v22150_v26 = vld [vmem:[#allocation15 + $0x14c] ss:$16 sps:$4 sm:$0xff]  }
 0xa10   : > { %14006 = vmatpush1.bf16.msra.mxu1 %v22061_v6  ;;  %14092 = vmatpush1.bf16.msra.mxu0 %v22064_v27  ;;  %v22145_v6 = vld [vmem:[#allocation15 + $0x140] ss:$16 sps:$4 sm:$0xff]   ;;  %v22148_v27 = vld [vmem:[#allocation15 + $0x148] ss:$16 sps:$4 sm:$0xff]  }
 0xa11   : > { %14007 = vmatprep.subr.bf16.mxu1 %v22069_v41  ;;  %14093 = vmatprep.subr.bf16.mxu0 %v22072_v25  ;;  %v22153_v41 = vld [vmem:[#allocation15 + $0x164] ss:$16 sps:$4 sm:$0xff]   ;;  %v22156_v25 = vld [vmem:[#allocation15 + $0x16c] ss:$16 sps:$4 sm:$0xff]  }
 0xa14   : > { %14008 = vmatpush1.bf16.msra.mxu1 %v22067_v38  ;;  %14094 = vmatpush1.bf16.msra.mxu0 %v22070_v5  ;;  %v22151_v38 = vld [vmem:[#allocation15 + $0x160] ss:$16 sps:$4 sm:$0xff]   ;;  %v22154_v5 = vld [vmem:[#allocation15 + $0x168] ss:$16 sps:$4 sm:$0xff]  }
 0xa15   : > { %14009 = vmatprep.subr.bf16.mxu1 %v22075_v23  ;;  %14095 = vmatprep.subr.bf16.mxu0 %v22078_v29  ;;  %v22159_v23 = vld [vmem:[#allocation15 + $0x184] ss:$16 sps:$4 sm:$0xff]   ;;  %v22162_v29 = vld [vmem:[#allocation15 + $0x18c] ss:$16 sps:$4 sm:$0xff]  }
 0xa18   : > { %14010 = vmatpush1.bf16.msra.mxu1 %v22073_v1  ;;  %14096 = vmatpush1.bf16.msra.mxu0 %v22076_v44  ;;  %v22157_v1 = vld [vmem:[#allocation15 + $0x180] ss:$16 sps:$4 sm:$0xff]   ;;  %v22160_v44 = vld [vmem:[#allocation15 + $0x188] ss:$16 sps:$4 sm:$0xff]  }
 0xa19   : > { %14011 = vmatprep.subr.bf16.mxu1 %v22081_v30  ;;  %14097 = vmatprep.subr.bf16.mxu0 %v22084_v19  ;;  %v22165_v30 = vld [vmem:[#allocation15 + $0x1a4] ss:$16 sps:$4 sm:$0xff]   ;;  %v22168_v19 = vld [vmem:[#allocation15 + $0x1ac] ss:$16 sps:$4 sm:$0xff]  }
 0xa1c   : > { %14012 = vmatpush1.bf16.msra.mxu1 %v22079_v2  ;;  %14098 = vmatpush1.bf16.msra.mxu0 %v22082_v0  ;;  %v22163_v2 = vld [vmem:[#allocation15 + $0x1a0] ss:$16 sps:$4 sm:$0xff]   ;;  %v22166_v0 = vld [vmem:[#allocation15 + $0x1a8] ss:$16 sps:$4 sm:$0xff]  }
 0xa1d   : > { %14915 = vmatprep.subr.bf16.mxu1 %v22087_v59  ;;  %14997 = vmatprep.subr.bf16.mxu0 %v22090_v31  ;;  %v22171_v59 = vld [vmem:[#allocation15 + $0x1c4] ss:$16 sps:$4 sm:$0xff]   ;;  %v22174_v31 = vld [vmem:[#allocation15 + $0x1cc] ss:$16 sps:$4 sm:$0xff]  }
 0xa1f   : > { %14014 = vmatmul.mubr.bf16.vlgmr.msra.gmra.mrb[32].mxu1 %v24139_v18  ;;  %14100 = vmatmul.mubr.bf16.vlgmr.msra.gmra.mrb[36].mxu0 %v24139_v18  ;;  %v22106_v18 = vld [vmem:[#allocation15 + $0x68] ss:$16 sps:$4 sm:$0xff]  }
 0xa20   : > { %14916 = vmatpush1.bf16.msra.mxu1 %v22085_v46  ;;  %14998 = vmatpush1.bf16.msra.mxu0 %v22088_v58  ;;  %v22169_v46 = vld [vmem:[#allocation15 + $0x1c0] ss:$16 sps:$4 sm:$0xff]   ;;  %v22172_v58 = vld [vmem:[#allocation15 + $0x1c8] ss:$16 sps:$4 sm:$0xff]  }
 0xa21   : > { %14917 = vmatprep.subr.bf16.mxu1 %v22093_v12  ;;  %14999 = vmatprep.subr.bf16.mxu0 %v22096_v43  ;;  %v22177_v12 = vld [vmem:[#allocation15 + $0x1e4] ss:$16 sps:$4 sm:$0xff]   ;;  %v22180_v43 = vld [vmem:[#allocation15 + $0x1ec] ss:$16 sps:$4 sm:$0xff]  }
 0xa24   : > { %14918 = vmatpush1.bf16.msra.mxu1 %v22091_v17  ;;  %15000 = vmatpush1.bf16.msra.mxu0 %v22094_v4  ;;  %v22175_v17 = vld [vmem:[#allocation15 + $0x1e0] ss:$16 sps:$4 sm:$0xff]   ;;  %v22178_v4 = vld [vmem:[#allocation15 + $0x1e8] ss:$16 sps:$4 sm:$0xff]  }
 0xa25   : > { %14919 = vmatprep.subr.bf16.mxu1 %v22099_v11  ;;  %15001 = vmatprep.subr.bf16.mxu0 %v22102_v63  ;;  %v22183_v11 = vld [vmem:[#allocation15 + $0x204] ss:$16 sps:$4 sm:$0xff]   ;;  %v22186_v63 = vld [vmem:[#allocation15 + $0x20c] ss:$16 sps:$4 sm:$0xff]  }
 0xa28   : > { %14920 = vmatpush1.bf16.msra.mxu1 %v22097_v35  ;;  %15002 = vmatpush1.bf16.msra.mxu0 %v22100_v21  ;;  %v13276_v35 = vld [vmem:[#allocation2 + $0x17] sm:$0xf] }
 0xa29   : > { %14921 = vmatprep.subr.bf16.mxu1 %v22105_v55  ;;  %15003 = vmatprep.subr.bf16.mxu0 %v22108_v9  ;;  %v13281_v21 = vrot.slane %v13276_v35, %v23944_v48  ;;  %v13289_v55 = vrot.slane %v13276_v35, %v23948_v39 }
 0xa2c   : > { %14922 = vmatpush1.bf16.msra.mxu1 %v22103_v47  ;;  %15004 = vmatpush1.bf16.msra.mxu0 %v22106_v18  ;;  %v13285_v18 = vrot.slane %v13276_v35, %v23951_v15 }
 0xa2d   : > { %14923 = vmatprep.subr.bf16.mxu1 %v22111_v62  ;;  %15005 = vmatprep.subr.bf16.mxu0 %v22114_v10  ;;  %v13293_v62 = vrot.slane %v13276_v35, %v23954_v42  ;;  %v22198_v35 = vld [vmem:[#allocation15 + $0x24c] ss:$16 sps:$4 sm:$0xff]  }
 0xa30   : > { %14924 = vmatpush1.bf16.msra.mxu1 %v22109_v60  ;;  %15006 = vmatpush1.bf16.msra.mxu0 %v22112_v61 }
 0xa31   : > { %14925 = vmatprep.subr.bf16.mxu1 %v22117_v3  ;;  %15007 = vmatprep.subr.bf16.mxu0 %v22120_v24 }
 0xa34   : > { %14926 = vmatpush1.bf16.msra.mxu1 %v22115_v33  ;;  %15008 = vmatpush1.bf16.msra.mxu0 %v22118_v28 }
 0xa35   : > { %14927 = vmatprep.subr.bf16.mxu1 %v22123_v8  ;;  %15009 = vmatprep.subr.bf16.mxu0 %v22126_v56 }
 0xa38   : > { %14928 = vmatpush1.bf16.msra.mxu1 %v22121_v37  ;;  %15010 = vmatpush1.bf16.msra.mxu0 %v22124_v51 }
 0xa39   : > { %14929 = vmatprep.subr.bf16.mxu1 %v22129_v14  ;;  %15011 = vmatprep.subr.bf16.mxu0 %v22132_v57 }
 0xa3c   : > { %14930 = vmatpush1.bf16.msra.mxu1 %v22127_v7  ;;  %15012 = vmatpush1.bf16.msra.mxu0 %v22130_v52 }
 0xa3d   : > { %14931 = vmatprep.subr.bf16.mxu1 %v22135_v20  ;;  %15013 = vmatprep.subr.bf16.mxu0 %v22138_v53 }
 0xa40   : > { %14932 = vmatpush1.bf16.msra.mxu1 %v22133_v40  ;;  %15014 = vmatpush1.bf16.msra.mxu0 %v22136_v13 }
 0xa41   : > { %14933 = vmatprep.subr.bf16.mxu1 %v22141_v32  ;;  %15015 = vmatprep.subr.bf16.mxu0 %v22144_v54 }
 0xa44   : > { %14934 = vmatpush1.bf16.msra.mxu1 %v22139_v22  ;;  %15016 = vmatpush1.bf16.msra.mxu0 %v22142_v36 }
 0xa45   : > { %14935 = vmatprep.subr.bf16.mxu1 %v22147_v45  ;;  %15017 = vmatprep.subr.bf16.mxu0 %v22150_v26 }
 0xa48   : > { %14936 = vmatpush1.bf16.msra.mxu1 %v22145_v6  ;;  %15018 = vmatpush1.bf16.msra.mxu0 %v22148_v27 }
 0xa49   : > { %14937 = vmatprep.subr.bf16.mxu1 %v22153_v41  ;;  %15019 = vmatprep.subr.bf16.mxu0 %v22156_v25 }
 0xa4c   : > { %14938 = vmatpush1.bf16.msra.mxu1 %v22151_v38  ;;  %15020 = vmatpush1.bf16.msra.mxu0 %v22154_v5 }
 0xa4d   : > { %14939 = vmatprep.subr.bf16.mxu1 %v22159_v23  ;;  %15021 = vmatprep.subr.bf16.mxu0 %v22162_v29 }
 0xa50   : > { %14940 = vmatpush1.bf16.msra.mxu1 %v22157_v1  ;;  %15022 = vmatpush1.bf16.msra.mxu0 %v22160_v44 }
 0xa51   : > { %14941 = vmatprep.subr.bf16.mxu1 %v22165_v30  ;;  %15023 = vmatprep.subr.bf16.mxu0 %v22168_v19 }
 0xa54   : > { %14942 = vmatpush1.bf16.msra.mxu1 %v22163_v2  ;;  %15024 = vmatpush1.bf16.msra.mxu0 %v22166_v0 }
 0xa55   : > { %14943 = vmatprep.subr.bf16.mxu1 %v22171_v59  ;;  %15025 = vmatprep.subr.bf16.mxu0 %v22174_v31  ;;  %v22181_v31 = vld [vmem:[#allocation15 + $0x200] ss:$16 sps:$4 sm:$0xff]  }
 0xa58   : > { %14944 = vmatpush1.bf16.msra.mxu1 %v22169_v46  ;;  %15026 = vmatpush1.bf16.msra.mxu0 %v22172_v58  ;;  %v22184_v46 = vld [vmem:[#allocation15 + $0x208] ss:$16 sps:$4 sm:$0xff]  }
 0xa59   : > { %14945 = vmatprep.subr.bf16.mxu1 %v22177_v12  ;;  %15027 = vmatprep.subr.bf16.mxu0 %v22180_v43  ;;  %v22189_v12 = vld [vmem:[#allocation15 + $0x224] ss:$16 sps:$4 sm:$0xff]   ;;  %v22192_v43 = vld [vmem:[#allocation15 + $0x22c] ss:$16 sps:$4 sm:$0xff]  }
 0xa5c   : > { %14946 = vmatpush1.bf16.msra.mxu1 %v22175_v17  ;;  %15028 = vmatpush1.bf16.msra.mxu0 %v22178_v4  ;;  %v22187_v4 = vld [vmem:[#allocation15 + $0x220] ss:$16 sps:$4 sm:$0xff]  }
 0xa5d   : > { %14956 = vmatprep.subr.bf16.mxu1 %v22183_v11  ;;  %15038 = vmatprep.subr.bf16.mxu0 %v22186_v63  ;;  %v22190_v11 = vld [vmem:[#allocation15 + $0x228] ss:$16 sps:$4 sm:$0xff]   ;;  %v22195_v63 = vld [vmem:[#allocation15 + $0x244] ss:$16 sps:$4 sm:$0xff]  }
 0xaf2   : > { %v14015_v9 = vpop.f32.mrb[32].mxu1  ;;  %v14101_v47 = vpop.f32.mrb[36].mxu0 }
 0xaf3   : > { %v14017_v10 = vpop.f32.mrb[33].mxu1  ;;  %v14103_v60 = vpop.f32.mrb[37].mxu0  ;;  %v20585_v24 = vadd.f32 %v14015_v9, %v13281_v21  ;;  %v20589_v33 = vadd.f32 %v14101_v47, %v13289_v55  ;;  %v22201_v9 = vld [vmem:[#allocation15 + $0x264] ss:$16 sps:$4 sm:$0xff]   ;;  %v22204_v47 = vld [vmem:[#allocation15 + $0x26c] ss:$16 sps:$4 sm:$0xff]  }
 0xaf4   : > { %v14019_v61 = vpop.f32.mrb[34].mxu1  ;;  %v14105_v3 = vpop.f32.mrb[38].mxu0  ;;  %v20586_v51 = vadd.f32 %v14017_v10, %v13285_v18  ;;  %v20590_v14 = vadd.f32 %v14103_v60, %v13293_v62  ;;  %v22207_v10 = vld [vmem:[#allocation15 + $0x284] ss:$16 sps:$4 sm:$0xff]   ;;  %v22210_v60 = vld [vmem:[#allocation15 + $0x28c] ss:$16 sps:$4 sm:$0xff]  }
 0xaf5   : > { %v20587_v28 = vadd.f32 %v14019_v61, %v13281_v21  ;;  %v20591_v8 = vadd.f32 %v14105_v3, %v13289_v55  ;;  %v14021_v56 = vpop.f32.mrb[35].mxu1  ;;  %v14107_v37 = vpop.f32.mrb[39].mxu0  ;;  %v22193_v21 = vld [vmem:[#allocation15 + $0x240] ss:$16 sps:$4 sm:$0xff]   ;;  %v22196_v55 = vld [vmem:[#allocation15 + $0x248] ss:$16 sps:$4 sm:$0xff]  }
 0xaf6   : > { %v20588_v57 = vadd.f32 %v14021_v56, %v13285_v18  ;;  %v20592_v7 = vadd.f32 %v14107_v37, %v13293_v62  ;;  %v22199_v18 = vld [vmem:[#allocation15 + $0x260] ss:$16 sps:$4 sm:$0xff]   ;;  %v22202_v62 = vld [vmem:[#allocation15 + $0x268] ss:$16 sps:$4 sm:$0xff]   ;;  %v22219_v56 = vld [vmem:[#allocation15 + $0x2c4] ss:$16 sps:$4 sm:$0xff]  }
 0xaf7   : > { %v14110_v52 = vadd.f32 %v20587_v28, %v20585_v24  ;;  %v24147_v20 = vadd.f32 %v20591_v8, %v20589_v33  ;;  %v22205_v61 = vld [vmem:[#allocation15 + $0x280] ss:$16 sps:$4 sm:$0xff]   ;;  %v22208_v3 = vld [vmem:[#allocation15 + $0x288] ss:$16 sps:$4 sm:$0xff]   ;;  %v22213_v24 = vld [vmem:[#allocation15 + $0x2a4] ss:$16 sps:$4 sm:$0xff]  }
 0xaf8   : > { %v14117_v53 = vadd.f32 %v20588_v57, %v20586_v51  ;;  %v14131_v40 = vadd.f32 %v20592_v7, %v20590_v14  ;;  %v22216_v33 = vld [vmem:[#allocation15 + $0x2ac] ss:$16 sps:$4 sm:$0xff]   ;;  %v22211_v28 = vld [vmem:[#allocation15 + $0x2a0] ss:$16 sps:$4 sm:$0xff]   ;;  %v22214_v8 = vld [vmem:[#allocation15 + $0x2a8] ss:$16 sps:$4 sm:$0xff]  }
 0xaf9   : > { %v14111_v13 = vrot.slane %v14110_v52, 4  ;;  %v22222_v37 = vld [vmem:[#allocation15 + $0x2cc] ss:$16 sps:$4 sm:$0xff]   ;;  %v22217_v51 = vld [vmem:[#allocation15 + $0x2c0] ss:$16 sps:$4 sm:$0xff]  }
 0xafa   : > { %v14118_v32 = vrot.slane %v14117_v53, 4  ;;  %v14132_v54 = vrot.slane %v14131_v40, 4  ;;  %v22220_v14 = vld [vmem:[#allocation15 + $0x2c8] ss:$16 sps:$4 sm:$0xff]   ;;  %v22225_v57 = vld [vmem:[#allocation15 + $0x2e4] ss:$16 sps:$4 sm:$0xff]  }
 0xafb   : > { %v14112_v22 = vadd.f32 %v14111_v13, %v14110_v52  ;;  %v22228_v7 = vld [vmem:[#allocation15 + $0x2ec] ss:$16 sps:$4 sm:$0xff]   ;;  %v22223_v52 = vld [vmem:[#allocation15 + $0x2e0] ss:$16 sps:$4 sm:$0xff]  }
 0xafc   : > { %v14119_v36 = vadd.f32 %v14118_v32, %v14117_v53  ;;  %v14133_v45 = vadd.f32 %v14132_v54, %v14131_v40  ;;  %v22226_v53 = vld [vmem:[#allocation15 + $0x2e8] ss:$16 sps:$4 sm:$0xff]   ;;  %v22231_v40 = vld [vmem:[#allocation15 + $0x304] ss:$16 sps:$4 sm:$0xff]   ;;  %v22234_v13 = vld [vmem:[#allocation15 + $0x30c] ss:$16 sps:$4 sm:$0xff]  }
 0xafd   : > { %v14113_v26 = vrot.slane %v14112_v22, 2  ;;  %v22229_v32 = vld [vmem:[#allocation15 + $0x300] ss:$16 sps:$4 sm:$0xff]   ;;  %v22232_v54 = vld [vmem:[#allocation15 + $0x308] ss:$16 sps:$4 sm:$0xff]  }
 0xafe   : > { %v14120_v6 = vrot.slane %v14119_v36, 2  ;;  %v14134_v27 = vrot.slane %v14133_v45, 2 }
 0xaff   : > { %v14114_v41 = vadd.f32 %v14113_v26, %v14112_v22  ;;  %v22237_v22 = vld [vmem:[#allocation15 + $0x324] ss:$16 sps:$4 sm:$0xff]   ;;  %v22238_v26 = vld [vmem:[#allocation15 + $0x328] ss:$16 sps:$4 sm:$0xff]  }
 0xb00   : > { %v14121_v25 = vadd.f32 %v14120_v6, %v14119_v36  ;;  %v14135_v38 = vadd.f32 %v14134_v27, %v14133_v45  ;;  %v22240_v36 = vld [vmem:[#allocation15 + $0x32c] ss:$16 sps:$4 sm:$0xff]   ;;  %v22235_v45 = vld [vmem:[#allocation15 + $0x320] ss:$16 sps:$4 sm:$0xff]   ;;  %v14125_v6 = vrot.slane %v24147_v20, 4 }
 0xb01   : > { %v14115_v5 = vrot.slane %v14114_v41, 1  ;;  %v22243_v27 = vld [vmem:[#allocation15 + $0x344] ss:$16 sps:$4 sm:$0xff]  }
 0xb02   : > { %v14122_v23 = vrot.slane %v14121_v25, 1  ;;  %v14136_v29 = vrot.slane %v14135_v38, 1 }
 0xb03   : > { %v14116_v1 = vadd.f32 %v14115_v5, %v14114_v41  ;;  %v22246_v41 = vld [vmem:[#allocation15 + $0x34c] ss:$16 sps:$4 sm:$0xff]   ;;  %v14126_v5 = vadd.f32 %v14125_v6, %v24147_v20  ;;  %v22261_v20 = vld [vmem:[#allocation15 + $0x3a4] ss:$16 sps:$4 sm:$0xff]  }
 0xb04   : > { %v14123_v44 = vadd.f32 %v14122_v23, %v14121_v25  ;;  %v14137_v30 = vadd.f32 %v14136_v29, %v14135_v38  ;;  %v22241_v25 = vld [vmem:[#allocation15 + $0x340] ss:$16 sps:$4 sm:$0xff]   ;;  %v22244_v38 = vld [vmem:[#allocation15 + $0x348] ss:$16 sps:$4 sm:$0xff]   ;;  %v22249_v23 = vld [vmem:[#allocation15 + $0x364] ss:$16 sps:$4 sm:$0xff]  }
 0xb05   : > { %v14139_v19 = vmul.f32 0.0625, %v14116_v1  ;;  %v22252_v29 = vld [vmem:[#allocation15 + $0x36c] ss:$16 sps:$4 sm:$0xff]   ;;  %v22247_v1 = vld [vmem:[#allocation15 + $0x360] ss:$16 sps:$4 sm:$0xff]  }
 0xb06   : > { %v14140_v2 = vmul.f32 0.0625, %v14123_v44  ;;  %v14142_v0 = vmul.f32 0.0625, %v14137_v30  ;;  %v22250_v44 = vld [vmem:[#allocation15 + $0x368] ss:$16 sps:$4 sm:$0xff]   ;;  %v14127_v30 = vrot.slane %v14126_v5, 2 }
 0xb07   : > { %v14143_v58 = vpack.c.bf16 %v14139_v19, %v14139_v19  ;;  %v22255_v19 = vld [vmem:[#allocation15 + $0x384] ss:$16 sps:$4 sm:$0xff]   ;;  %v22318_v6 = vld [vmem:[#allocation16 + $0xcc] ss:$16 sps:$4 sm:$0xff]  }
 0xb08   : > { %v14144_v59 = vpack.c.bf16 %v14140_v2, %v14140_v2  ;;  %v14146_v17 = vpack.c.bf16 %v14142_v0, %v14142_v0  ;;  %v22258_v2 = vld [vmem:[#allocation15 + $0x38c] ss:$16 sps:$4 sm:$0xff]   ;;  %v22253_v0 = vld [vmem:[#allocation15 + $0x380] ss:$16 sps:$4 sm:$0xff]  }
 0xb0a   : > { %14947 = vmatprep.mubr.bf16.mxu1 %v14144_v59  ;;  %15029 = vmatprep.mubr.bf16.mxu0 %v14144_v59  ;;  %v22256_v59 = vld [vmem:[#allocation15 + $0x388] ss:$16 sps:$4 sm:$0xff]  }
 0xb0b   : > { %14948 = vmatmul.mubr.bf16.vlgmr.msra.gmra.mrb[36].mxu1 %v14143_v58  ;;  %15030 = vmatmul.mubr.bf16.vlgmr.msra.gmra.mrb[40].mxu0 %v14143_v58  ;;  %v22259_v58 = vld [vmem:[#allocation15 + $0x3a0] ss:$16 sps:$4 sm:$0xff]  }
 0xb0c   : > { %14957 = vmatpush1.bf16.msra.mxu1 %v22181_v31  ;;  %15039 = vmatpush1.bf16.msra.mxu0 %v22184_v46  ;;  %v14128_v31 = vadd.f32 %v14127_v30, %v14126_v5  ;;  %v22264_v46 = vld [vmem:[#allocation15 + $0x3ac] ss:$16 sps:$4 sm:$0xff]   ;;  %v22319_v5 = vld [vmem:[#allocation16 + $0xe0] ss:$16 sps:$4 sm:$0xff]   ;;  %v22328_v30 = vld [vmem:[#allocation16 + $0x108] ss:$16 sps:$4 sm:$0xff]  }
 0xb0d   : > { %14988 = vmatprep.mubr.bf16.mxu1 %v14146_v17  ;;  %15070 = vmatprep.mubr.bf16.mxu0 %v14146_v17  ;;  %v22267_v17 = vld [vmem:[#allocation15 + $0x3c4] ss:$16 sps:$4 sm:$0xff]  }
 0xb0e   : > { %14958 = vmatprep.subr.bf16.mxu1 %v22189_v12  ;;  %15040 = vmatprep.subr.bf16.mxu0 %v22192_v43  ;;  %v22262_v12 = vld [vmem:[#allocation15 + $0x3a8] ss:$16 sps:$4 sm:$0xff]   ;;  %v14129_v43 = vrot.slane %v14128_v31, 1 }
 0xb10   : > { %14959 = vmatpush1.bf16.msra.mxu1 %v22187_v4  ;;  %15041 = vmatpush1.bf16.msra.mxu0 %v22190_v11  ;;  %v22270_v4 = vld [vmem:[#allocation15 + $0x3cc] ss:$16 sps:$4 sm:$0xff]   ;;  %v22265_v11 = vld [vmem:[#allocation15 + $0x3c0] ss:$16 sps:$4 sm:$0xff]  }
 0xb11   : > { %14960 = vmatprep.subr.bf16.mxu1 %v22195_v63  ;;  %15042 = vmatprep.subr.bf16.mxu0 %v22198_v35  ;;  %v22268_v63 = vld [vmem:[#allocation15 + $0x3c8] ss:$16 sps:$4 sm:$0xff]   ;;  %v22273_v35 = vld [vmem:[#allocation15 + $0x3e4] ss:$16 sps:$4 sm:$0xff]  }
 0xb14   : > { %14961 = vmatpush1.bf16.msra.mxu1 %v22193_v21  ;;  %15043 = vmatpush1.bf16.msra.mxu0 %v22196_v55  ;;  %v22276_v21 = vld [vmem:[#allocation15 + $0x3ec] ss:$16 sps:$4 sm:$0xff]   ;;  %v14130_v55 = vadd.f32 %v14129_v43, %v14128_v31  ;;  %v22339_v31 = vld [vmem:[#allocation16 + $0x144] ss:$16 sps:$4 sm:$0xff]  }
 0xb15   : > { %14962 = vmatprep.subr.bf16.mxu1 %v22201_v9  ;;  %15044 = vmatprep.subr.bf16.mxu0 %v22204_v47  ;;  %v22271_v9 = vld [vmem:[#allocation15 + $0x3e0] ss:$16 sps:$4 sm:$0xff]   ;;  %v22274_v47 = vld [vmem:[#allocation15 + $0x3e8] ss:$16 sps:$4 sm:$0xff]   ;;  %v22348_v43 = vld [vmem:[#allocation16 + $0x16c] ss:$16 sps:$4 sm:$0xff]  }
 0xb18   : > { %14963 = vmatpush1.bf16.msra.mxu1 %v22199_v18  ;;  %15045 = vmatpush1.bf16.msra.mxu0 %v22202_v62  ;;  %v14141_v18 = vmul.f32 0.0625, %v14130_v55  ;;  %v22279_v62 = vld [vmem:[#allocation16 + $0x4] ss:$16 sps:$4 sm:$0xff]  }
 0xb19   : > { %14964 = vmatprep.subr.bf16.mxu1 %v22207_v10  ;;  %15046 = vmatprep.subr.bf16.mxu0 %v22210_v60  ;;  %v22282_v10 = vld [vmem:[#allocation16 + $0xc] ss:$16 sps:$4 sm:$0xff]   ;;  %v22277_v60 = vld [vmem:[#allocation16] ss:$16 sps:$4 sm:$0xff]   ;;  %v22357_v55 = vld [vmem:[#allocation16 + $0x1a4] ss:$16 sps:$4 sm:$0xff]  }
 0xb1c   : > { %14965 = vmatpush1.bf16.msra.mxu1 %v22205_v61  ;;  %15047 = vmatpush1.bf16.msra.mxu0 %v22208_v3  ;;  %v14145_v61 = vpack.c.bf16 %v14141_v18, %v14141_v18  ;;  %v22280_v3 = vld [vmem:[#allocation16 + $0x8] ss:$16 sps:$4 sm:$0xff]  }
 0xb1d   : > { %14966 = vmatprep.subr.bf16.mxu1 %v22213_v24  ;;  %15048 = vmatprep.subr.bf16.mxu0 %v22216_v33  ;;  %v22285_v24 = vld [vmem:[#allocation16 + $0x24] ss:$16 sps:$4 sm:$0xff]   ;;  %v22288_v33 = vld [vmem:[#allocation16 + $0x2c] ss:$16 sps:$4 sm:$0xff]   ;;  %v22358_v18 = vld [vmem:[#allocation16 + $0x1a8] ss:$16 sps:$4 sm:$0xff]  }
 0xb20   : > { %14967 = vmatpush1.bf16.msra.mxu1 %v22211_v28  ;;  %15049 = vmatpush1.bf16.msra.mxu0 %v22214_v8  ;;  %v22283_v28 = vld [vmem:[#allocation16 + $0x20] ss:$16 sps:$4 sm:$0xff]   ;;  %v22286_v8 = vld [vmem:[#allocation16 + $0x28] ss:$16 sps:$4 sm:$0xff]  }
 0xb21   : > { %14968 = vmatprep.subr.bf16.mxu1 %v22219_v56  ;;  %15050 = vmatprep.subr.bf16.mxu0 %v22222_v37  ;;  %v22291_v56 = vld [vmem:[#allocation16 + $0x44] ss:$16 sps:$4 sm:$0xff]   ;;  %v22294_v37 = vld [vmem:[#allocation16 + $0x4c] ss:$16 sps:$4 sm:$0xff]  }
 0xb24   : > { %14969 = vmatpush1.bf16.msra.mxu1 %v22217_v51  ;;  %15051 = vmatpush1.bf16.msra.mxu0 %v22220_v14  ;;  %v22289_v51 = vld [vmem:[#allocation16 + $0x40] ss:$16 sps:$4 sm:$0xff]   ;;  %v22292_v14 = vld [vmem:[#allocation16 + $0x48] ss:$16 sps:$4 sm:$0xff]  }
 0xb25   : > { %14970 = vmatprep.subr.bf16.mxu1 %v22225_v57  ;;  %15052 = vmatprep.subr.bf16.mxu0 %v22228_v7  ;;  %v22297_v57 = vld [vmem:[#allocation16 + $0x64] ss:$16 sps:$4 sm:$0xff]   ;;  %v22300_v7 = vld [vmem:[#allocation16 + $0x6c] ss:$16 sps:$4 sm:$0xff]  }
 0xb28   : > { %14971 = vmatpush1.bf16.msra.mxu1 %v22223_v52  ;;  %15053 = vmatpush1.bf16.msra.mxu0 %v22226_v53  ;;  %v22295_v52 = vld [vmem:[#allocation16 + $0x60] ss:$16 sps:$4 sm:$0xff]   ;;  %v22298_v53 = vld [vmem:[#allocation16 + $0x68] ss:$16 sps:$4 sm:$0xff]  }
 0xb29   : > { %14972 = vmatprep.subr.bf16.mxu1 %v22231_v40  ;;  %15054 = vmatprep.subr.bf16.mxu0 %v22234_v13  ;;  %v22303_v40 = vld [vmem:[#allocation16 + $0x84] ss:$16 sps:$4 sm:$0xff]   ;;  %v22301_v13 = vld [vmem:[#allocation16 + $0x80] ss:$16 sps:$4 sm:$0xff]  }
 0xb2c   : > { %14973 = vmatpush1.bf16.msra.mxu1 %v22229_v32  ;;  %15055 = vmatpush1.bf16.msra.mxu0 %v22232_v54  ;;  %v22304_v32 = vld [vmem:[#allocation16 + $0x88] ss:$16 sps:$4 sm:$0xff]   ;;  %v22309_v54 = vld [vmem:[#allocation16 + $0xa4] ss:$16 sps:$4 sm:$0xff]  }
 0xb2d   : > { %14974 = vmatprep.subr.bf16.mxu1 %v22237_v22  ;;  %15056 = vmatprep.subr.bf16.mxu0 %v22240_v36  ;;  %v22312_v22 = vld [vmem:[#allocation16 + $0xac] ss:$16 sps:$4 sm:$0xff]   ;;  %v22307_v36 = vld [vmem:[#allocation16 + $0xa0] ss:$16 sps:$4 sm:$0xff]  }
 0xb30   : > { %14975 = vmatpush1.bf16.msra.mxu1 %v22235_v45  ;;  %15057 = vmatpush1.bf16.msra.mxu0 %v22238_v26  ;;  %v22310_v45 = vld [vmem:[#allocation16 + $0xa8] ss:$16 sps:$4 sm:$0xff]   ;;  %v22315_v26 = vld [vmem:[#allocation16 + $0xc4] ss:$16 sps:$4 sm:$0xff]  }
 0xb31   : > { %14976 = vmatprep.subr.bf16.mxu1 %v22243_v27  ;;  %15058 = vmatprep.subr.bf16.mxu0 %v22246_v41  ;;  %v22313_v27 = vld [vmem:[#allocation16 + $0xc0] ss:$16 sps:$4 sm:$0xff]   ;;  %v22316_v41 = vld [vmem:[#allocation16 + $0xc8] ss:$16 sps:$4 sm:$0xff]  }
 0xb34   : > { %14977 = vmatpush1.bf16.msra.mxu1 %v22241_v25  ;;  %15059 = vmatpush1.bf16.msra.mxu0 %v22244_v38  ;;  %v22321_v25 = vld [vmem:[#allocation16 + $0xe4] ss:$16 sps:$4 sm:$0xff]   ;;  %v22324_v38 = vld [vmem:[#allocation16 + $0xec] ss:$16 sps:$4 sm:$0xff]  }
 0xb35   : > { %14978 = vmatprep.subr.bf16.mxu1 %v22249_v23  ;;  %15060 = vmatprep.subr.bf16.mxu0 %v22252_v29  ;;  %v22322_v23 = vld [vmem:[#allocation16 + $0xe8] ss:$16 sps:$4 sm:$0xff]   ;;  %v22327_v29 = vld [vmem:[#allocation16 + $0x104] ss:$16 sps:$4 sm:$0xff]  }
 0xb38   : > { %14979 = vmatpush1.bf16.msra.mxu1 %v22247_v1  ;;  %15061 = vmatpush1.bf16.msra.mxu0 %v22250_v44  ;;  %v22330_v1 = vld [vmem:[#allocation16 + $0x10c] ss:$16 sps:$4 sm:$0xff]   ;;  %v22325_v44 = vld [vmem:[#allocation16 + $0x100] ss:$16 sps:$4 sm:$0xff]  }
 0xb39   : > { %14980 = vmatprep.subr.bf16.mxu1 %v22255_v19  ;;  %15062 = vmatprep.subr.bf16.mxu0 %v22258_v2  ;;  %v22333_v19 = vld [vmem:[#allocation16 + $0x124] ss:$16 sps:$4 sm:$0xff]   ;;  %v22336_v2 = vld [vmem:[#allocation16 + $0x12c] ss:$16 sps:$4 sm:$0xff]  }
 0xb3c   : > { %14981 = vmatpush1.bf16.msra.mxu1 %v22253_v0  ;;  %15063 = vmatpush1.bf16.msra.mxu0 %v22256_v59  ;;  %v22331_v0 = vld [vmem:[#allocation16 + $0x120] ss:$16 sps:$4 sm:$0xff]   ;;  %v22334_v59 = vld [vmem:[#allocation16 + $0x128] ss:$16 sps:$4 sm:$0xff]  }
 0xb3d   : > { %14982 = vmatprep.subr.bf16.mxu1 %v22261_v20  ;;  %15064 = vmatprep.subr.bf16.mxu0 %v22264_v46  ;;  %v22342_v20 = vld [vmem:[#allocation16 + $0x14c] ss:$16 sps:$4 sm:$0xff]   ;;  %v22337_v46 = vld [vmem:[#allocation16 + $0x140] ss:$16 sps:$4 sm:$0xff]  }
 0xb40   : > { %14983 = vmatpush1.bf16.msra.mxu1 %v22259_v58  ;;  %15065 = vmatpush1.bf16.msra.mxu0 %v22262_v12  ;;  %v22340_v58 = vld [vmem:[#allocation16 + $0x148] ss:$16 sps:$4 sm:$0xff]   ;;  %v22345_v12 = vld [vmem:[#allocation16 + $0x164] ss:$16 sps:$4 sm:$0xff]  }
 0xb41   : > { %14984 = vmatprep.subr.bf16.mxu1 %v22267_v17  ;;  %15066 = vmatprep.subr.bf16.mxu0 %v22270_v4  ;;  %v22343_v17 = vld [vmem:[#allocation16 + $0x160] ss:$16 sps:$4 sm:$0xff]   ;;  %v22346_v4 = vld [vmem:[#allocation16 + $0x168] ss:$16 sps:$4 sm:$0xff]  }
 0xb44   : > { %14985 = vmatpush1.bf16.msra.mxu1 %v22265_v11  ;;  %15067 = vmatpush1.bf16.msra.mxu0 %v22268_v63  ;;  %v22351_v11 = vld [vmem:[#allocation16 + $0x184] ss:$16 sps:$4 sm:$0xff]   ;;  %v22354_v63 = vld [vmem:[#allocation16 + $0x18c] ss:$16 sps:$4 sm:$0xff]  }
 0xb45   : > { %14986 = vmatprep.subr.bf16.mxu1 %v22273_v35  ;;  %15068 = vmatprep.subr.bf16.mxu0 %v22276_v21  ;;  %v22349_v35 = vld [vmem:[#allocation16 + $0x180] ss:$16 sps:$4 sm:$0xff]   ;;  %v22352_v21 = vld [vmem:[#allocation16 + $0x188] ss:$16 sps:$4 sm:$0xff]  }
 0xb48   : > { %14987 = vmatpush1.bf16.msra.mxu1 %v22271_v9  ;;  %15069 = vmatpush1.bf16.msra.mxu0 %v22274_v47  ;;  %v22360_v9 = vld [vmem:[#allocation16 + $0x1ac] ss:$16 sps:$4 sm:$0xff]   ;;  %v22355_v47 = vld [vmem:[#allocation16 + $0x1a0] ss:$16 sps:$4 sm:$0xff]  }
 0xb49   : > { %15863 = vmatprep.subr.bf16.mxu1 %v22279_v62  ;;  %15949 = vmatprep.subr.bf16.mxu0 %v22282_v10  ;;  %v22363_v62 = vld [vmem:[#allocation16 + $0x1c4] ss:$16 sps:$4 sm:$0xff]   ;;  %v22366_v10 = vld [vmem:[#allocation16 + $0x1cc] ss:$16 sps:$4 sm:$0xff]  }
 0xb4b   : > { %14989 = vmatmul.mubr.bf16.vlgmr.msra.gmra.mrb[36].mxu1 %v14145_v61  ;;  %15071 = vmatmul.mubr.bf16.vlgmr.msra.gmra.mrb[40].mxu0 %v14145_v61  ;;  %v22364_v61 = vld [vmem:[#allocation16 + $0x1c8] ss:$16 sps:$4 sm:$0xff]  }
 0xb4c   : > { %15864 = vmatpush1.bf16.msra.mxu1 %v22277_v60  ;;  %15895 = vmatprep.mubr.bf16.mxu1 %v24115_v49  ;;  %v22361_v60 = vld [vmem:[#allocation16 + $0x1c0] ss:$16 sps:$4 sm:$0xff]  }
 0xb4d   : > { %15950 = vmatpush1.bf16.msra.mxu0 %v22280_v3  ;;  %15981 = vmatprep.mubr.bf16.mxu0 %v24115_v49  ;;  %v22306_v49 = vld [vmem:[#allocation16 + $0x8c] ss:$16 sps:$4 sm:$0xff]   ;;  %v22369_v3 = vld [vmem:[#allocation16 + $0x1e4] ss:$16 sps:$4 sm:$0xff]  }
 0xb4e   : > { %15865 = vmatprep.subr.bf16.mxu1 %v22285_v24  ;;  %15951 = vmatprep.subr.bf16.mxu0 %v22288_v33  ;;  %v22372_v24 = vld [vmem:[#allocation16 + $0x1ec] ss:$16 sps:$4 sm:$0xff]   ;;  %v22367_v33 = vld [vmem:[#allocation16 + $0x1e0] ss:$16 sps:$4 sm:$0xff]  }
 0xb50   : > { %15866 = vmatpush1.bf16.msra.mxu1 %v22283_v28  ;;  %v22370_v28 = vld [vmem:[#allocation16 + $0x1e8] ss:$16 sps:$4 sm:$0xff]  }
 0xb51   : > { %15952 = vmatpush1.bf16.msra.mxu0 %v22286_v8  ;;  %15867 = vmatprep.subr.bf16.mxu1 %v22291_v56  ;;  %v22375_v8 = vld [vmem:[#allocation16 + $0x204] ss:$16 sps:$4 sm:$0xff]   ;;  %v22378_v56 = vld [vmem:[#allocation16 + $0x20c] ss:$16 sps:$4 sm:$0xff]  }
 0xb52   : > { %15953 = vmatprep.subr.bf16.mxu0 %v22294_v37  ;;  %v22373_v37 = vld [vmem:[#allocation16 + $0x200] ss:$16 sps:$4 sm:$0xff]  }
 0xb54   : > { %15868 = vmatpush1.bf16.msra.mxu1 %v22289_v51  ;;  %v22376_v51 = vld [vmem:[#allocation16 + $0x208] ss:$16 sps:$4 sm:$0xff]  }
 0xb55   : > { %15954 = vmatpush1.bf16.msra.mxu0 %v22292_v14  ;;  %15869 = vmatprep.subr.bf16.mxu1 %v22297_v57  ;;  %v22381_v14 = vld [vmem:[#allocation16 + $0x224] ss:$16 sps:$4 sm:$0xff]   ;;  %v22384_v57 = vld [vmem:[#allocation16 + $0x22c] ss:$16 sps:$4 sm:$0xff]  }
 0xb56   : > { %15955 = vmatprep.subr.bf16.mxu0 %v22300_v7  ;;  %v22379_v7 = vld [vmem:[#allocation16 + $0x220] ss:$16 sps:$4 sm:$0xff]  }
 0xb58   : > { %15870 = vmatpush1.bf16.msra.mxu1 %v22295_v52  ;;  %v22382_v52 = vld [vmem:[#allocation16 + $0x228] ss:$16 sps:$4 sm:$0xff]  }
 0xb59   : > { %15956 = vmatpush1.bf16.msra.mxu0 %v22298_v53  ;;  %15871 = vmatprep.subr.bf16.mxu1 %v22303_v40  ;;  %v22387_v53 = vld [vmem:[#allocation16 + $0x244] ss:$16 sps:$4 sm:$0xff]   ;;  %v22390_v40 = vld [vmem:[#allocation16 + $0x24c] ss:$16 sps:$4 sm:$0xff]  }
 0xb5a   : > { %15957 = vmatprep.subr.bf16.mxu0 %v22306_v49  ;;  %v22385_v49 = vld [vmem:[#allocation16 + $0x240] ss:$16 sps:$4 sm:$0xff]  }
 0xb5c   : > { %15872 = vmatpush1.bf16.msra.mxu1 %v22301_v13  ;;  %v22388_v13 = vld [vmem:[#allocation16 + $0x248] ss:$16 sps:$4 sm:$0xff]  }
 0xb5d   : > { %15958 = vmatpush1.bf16.msra.mxu0 %v22304_v32  ;;  %15873 = vmatprep.subr.bf16.mxu1 %v22309_v54  ;;  %v22393_v32 = vld [vmem:[#allocation16 + $0x264] ss:$16 sps:$4 sm:$0xff]   ;;  %v22391_v54 = vld [vmem:[#allocation16 + $0x260] ss:$16 sps:$4 sm:$0xff]  }
 0xb5e   : > { %15959 = vmatprep.subr.bf16.mxu0 %v22312_v22  ;;  %v22394_v22 = vld [vmem:[#allocation16 + $0x268] ss:$16 sps:$4 sm:$0xff]  }
 0xb60   : > { %15874 = vmatpush1.bf16.msra.mxu1 %v22307_v36  ;;  %v22399_v36 = vld [vmem:[#allocation16 + $0x284] ss:$16 sps:$4 sm:$0xff]  }
 0xb61   : > { %15960 = vmatpush1.bf16.msra.mxu0 %v22310_v45  ;;  %15875 = vmatprep.subr.bf16.mxu1 %v22315_v26  ;;  %v22402_v45 = vld [vmem:[#allocation16 + $0x28c] ss:$16 sps:$4 sm:$0xff]   ;;  %v22400_v26 = vld [vmem:[#allocation16 + $0x288] ss:$16 sps:$4 sm:$0xff]  }
 0xb62   : > { %15961 = vmatprep.subr.bf16.mxu0 %v22318_v6  ;;  %v22405_v6 = vld [vmem:[#allocation16 + $0x2a4] ss:$16 sps:$4 sm:$0xff]  }
 0xb64   : > { %15876 = vmatpush1.bf16.msra.mxu1 %v22313_v27  ;;  %v22408_v27 = vld [vmem:[#allocation16 + $0x2ac] ss:$16 sps:$4 sm:$0xff]  }
 0xb65   : > { %15962 = vmatpush1.bf16.msra.mxu0 %v22316_v41  ;;  %15877 = vmatprep.subr.bf16.mxu1 %v22321_v25  ;;  %v22403_v41 = vld [vmem:[#allocation16 + $0x2a0] ss:$16 sps:$4 sm:$0xff]   ;;  %v22406_v25 = vld [vmem:[#allocation16 + $0x2a8] ss:$16 sps:$4 sm:$0xff]  }
 0xb66   : > { %15963 = vmatprep.subr.bf16.mxu0 %v22324_v38  ;;  %v22411_v38 = vld [vmem:[#allocation16 + $0x2c4] ss:$16 sps:$4 sm:$0xff]  }
 0xb68   : > { %15878 = vmatpush1.bf16.msra.mxu1 %v22319_v5  ;;  %v22414_v5 = vld [vmem:[#allocation16 + $0x2cc] ss:$16 sps:$4 sm:$0xff]  }
 0xb69   : > { %15964 = vmatpush1.bf16.msra.mxu0 %v22322_v23  ;;  %15879 = vmatprep.subr.bf16.mxu1 %v22327_v29  ;;  %v22409_v23 = vld [vmem:[#allocation16 + $0x2c0] ss:$16 sps:$4 sm:$0xff]   ;;  %v22412_v29 = vld [vmem:[#allocation16 + $0x2c8] ss:$16 sps:$4 sm:$0xff]  }
 0xb6a   : > { %15965 = vmatprep.subr.bf16.mxu0 %v22330_v1  ;;  %v22417_v1 = vld [vmem:[#allocation16 + $0x2e4] ss:$16 sps:$4 sm:$0xff]  }
 0xb6c   : > { %15880 = vmatpush1.bf16.msra.mxu1 %v22325_v44  ;;  %v22420_v44 = vld [vmem:[#allocation16 + $0x2ec] ss:$16 sps:$4 sm:$0xff]  }
 0xb6d   : > { %15966 = vmatpush1.bf16.msra.mxu0 %v22328_v30  ;;  %15881 = vmatprep.subr.bf16.mxu1 %v22333_v19  ;;  %v22415_v30 = vld [vmem:[#allocation16 + $0x2e0] ss:$16 sps:$4 sm:$0xff]   ;;  %v22418_v19 = vld [vmem:[#allocation16 + $0x2e8] ss:$16 sps:$4 sm:$0xff]  }
 0xb6e   : > { %15967 = vmatprep.subr.bf16.mxu0 %v22336_v2  ;;  %v22423_v2 = vld [vmem:[#allocation16 + $0x304] ss:$16 sps:$4 sm:$0xff]  }
 0xb70   : > { %15882 = vmatpush1.bf16.msra.mxu1 %v22331_v0  ;;  %v22426_v0 = vld [vmem:[#allocation16 + $0x30c] ss:$16 sps:$4 sm:$0xff]  }
 0xb71   : > { %15968 = vmatpush1.bf16.msra.mxu0 %v22334_v59  ;;  %15883 = vmatprep.subr.bf16.mxu1 %v22339_v31  ;;  %v22421_v59 = vld [vmem:[#allocation16 + $0x300] ss:$16 sps:$4 sm:$0xff]   ;;  %v22424_v31 = vld [vmem:[#allocation16 + $0x308] ss:$16 sps:$4 sm:$0xff]  }
 0xb72   : > { %15969 = vmatprep.subr.bf16.mxu0 %v22342_v20  ;;  %v22429_v20 = vld [vmem:[#allocation16 + $0x324] ss:$16 sps:$4 sm:$0xff]  }
 0xb74   : > { %15884 = vmatpush1.bf16.msra.mxu1 %v22337_v46  ;;  %v22432_v46 = vld [vmem:[#allocation16 + $0x32c] ss:$16 sps:$4 sm:$0xff]  }
 0xb75   : > { %15970 = vmatpush1.bf16.msra.mxu0 %v22340_v58  ;;  %15885 = vmatprep.subr.bf16.mxu1 %v22345_v12  ;;  %v22427_v58 = vld [vmem:[#allocation16 + $0x320] ss:$16 sps:$4 sm:$0xff]   ;;  %v22430_v12 = vld [vmem:[#allocation16 + $0x328] ss:$16 sps:$4 sm:$0xff]  }
 0xb76   : > { %15971 = vmatprep.subr.bf16.mxu0 %v22348_v43  ;;  %v22435_v43 = vld [vmem:[#allocation16 + $0x344] ss:$16 sps:$4 sm:$0xff]  }
 0xb78   : > { %15886 = vmatpush1.bf16.msra.mxu1 %v22343_v17  ;;  %v22438_v17 = vld [vmem:[#allocation16 + $0x34c] ss:$16 sps:$4 sm:$0xff]  }
 0xb79   : > { %15972 = vmatpush1.bf16.msra.mxu0 %v22346_v4  ;;  %15887 = vmatprep.subr.bf16.mxu1 %v22351_v11  ;;  %v22433_v4 = vld [vmem:[#allocation16 + $0x340] ss:$16 sps:$4 sm:$0xff]   ;;  %v22436_v11 = vld [vmem:[#allocation16 + $0x348] ss:$16 sps:$4 sm:$0xff]  }
 0xb7a   : > { %15973 = vmatprep.subr.bf16.mxu0 %v22354_v63  ;;  %v22441_v63 = vld [vmem:[#allocation16 + $0x364] ss:$16 sps:$4 sm:$0xff]  }
 0xb7c   : > { %15888 = vmatpush1.bf16.msra.mxu1 %v22349_v35  ;;  %v22444_v35 = vld [vmem:[#allocation16 + $0x36c] ss:$16 sps:$4 sm:$0xff]  }
 0xb7d   : > { %15974 = vmatpush1.bf16.msra.mxu0 %v22352_v21  ;;  %15889 = vmatprep.subr.bf16.mxu1 %v22357_v55  ;;  %v22439_v21 = vld [vmem:[#allocation16 + $0x360] ss:$16 sps:$4 sm:$0xff]   ;;  %v22442_v55 = vld [vmem:[#allocation16 + $0x368] ss:$16 sps:$4 sm:$0xff]  }
 0xb7e   : > { %15975 = vmatprep.subr.bf16.mxu0 %v22360_v9  ;;  %v22447_v9 = vld [vmem:[#allocation16 + $0x384] ss:$16 sps:$4 sm:$0xff]  }
 0xb80   : > { %15890 = vmatpush1.bf16.msra.mxu1 %v22355_v47  ;;  %v22450_v47 = vld [vmem:[#allocation16 + $0x38c] ss:$16 sps:$4 sm:$0xff]  }
 0xb81   : > { %15976 = vmatpush1.bf16.msra.mxu0 %v22358_v18  ;;  %15891 = vmatprep.subr.bf16.mxu1 %v22363_v62  ;;  %v22445_v18 = vld [vmem:[#allocation16 + $0x380] ss:$16 sps:$4 sm:$0xff]   ;;  %v22448_v62 = vld [vmem:[#allocation16 + $0x388] ss:$16 sps:$4 sm:$0xff]  }
 0xb82   : > { %15977 = vmatprep.subr.bf16.mxu0 %v22366_v10  ;;  %v22453_v10 = vld [vmem:[#allocation16 + $0x3a4] ss:$16 sps:$4 sm:$0xff]  }
 0xb84   : > { %15892 = vmatpush1.bf16.msra.mxu1 %v22361_v60  ;;  %v22456_v60 = vld [vmem:[#allocation16 + $0x3ac] ss:$16 sps:$4 sm:$0xff]  }
 0xb85   : > { %15978 = vmatpush1.bf16.msra.mxu0 %v22364_v61  ;;  %15893 = vmatprep.subr.bf16.mxu1 %v22369_v3  ;;  %v22451_v61 = vld [vmem:[#allocation16 + $0x3a0] ss:$16 sps:$4 sm:$0xff]   ;;  %v22454_v3 = vld [vmem:[#allocation16 + $0x3a8] ss:$16 sps:$4 sm:$0xff]  }
 0xb86   : > { %15979 = vmatprep.subr.bf16.mxu0 %v22372_v24  ;;  %v22459_v24 = vld [vmem:[#allocation16 + $0x3c4] ss:$16 sps:$4 sm:$0xff]  }
 0xb88   : > { %15894 = vmatpush1.bf16.msra.mxu1 %v22367_v33  ;;  %v22462_v33 = vld [vmem:[#allocation16 + $0x3cc] ss:$16 sps:$4 sm:$0xff]  }
 0xb89   : > { %15980 = vmatpush1.bf16.msra.mxu0 %v22370_v28  ;;  %15906 = vmatprep.subr.bf16.mxu1 %v22375_v8  ;;  %v22457_v28 = vld [vmem:[#allocation16 + $0x3c0] ss:$16 sps:$4 sm:$0xff]   ;;  %v22460_v8 = vld [vmem:[#allocation16 + $0x3c8] ss:$16 sps:$4 sm:$0xff]  }
 0xb8a   : > { %15992 = vmatprep.subr.bf16.mxu0 %v22378_v56  ;;  %v22465_v56 = vld [vmem:[#allocation16 + $0x3e4] ss:$16 sps:$4 sm:$0xff]  }
 0xb8b   : > { %15896 = vmatmul.mubr.bf16.vlgmr.msra.gmra.mrb[40].mxu1 %v24111_v34 }
 0xb8c   : > { %15982 = vmatmul.mubr.bf16.vlgmr.msra.gmra.mrb[44].mxu0 %v24111_v34  ;;  %15907 = vmatpush1.bf16.msra.mxu1 %v22373_v37  ;;  %v22396_v34 = vld [vmem:[#allocation16 + $0x26c] ss:$16 sps:$4 sm:$0xff]  }
 0xb8d   : > { %15938 = vmatprep.mubr.bf16.mxu1 %v24117_v50  ;;  %15993 = vmatpush1.bf16.msra.mxu0 %v22376_v51  ;;  %v22468_v37 = vld [vmem:[#allocation16 + $0x3ec] ss:$16 sps:$4 sm:$0xff]   ;;  %v22463_v51 = vld [vmem:[#allocation16 + $0x3e0] ss:$16 sps:$4 sm:$0xff]  }
 0xb8e   : > { %16024 = vmatprep.mubr.bf16.mxu0 %v24117_v50  ;;  %15908 = vmatprep.subr.bf16.mxu1 %v22381_v14  ;;  %v22397_v50 = vld [vmem:[#allocation16 + $0x280] ss:$16 sps:$4 sm:$0xff]   ;;  %v22466_v14 = vld [vmem:[#allocation16 + $0x3e8] ss:$16 sps:$4 sm:$0xff]  }
 0xb8f   : > { %15994 = vmatprep.subr.bf16.mxu0 %v22384_v57  ;;  %v22471_v57 = vld [vmem:[#allocation18 + $0x4] ss:$16 sps:$4 sm:$0xff]  }
 0xb90   : > { %15909 = vmatpush1.bf16.msra.mxu1 %v22379_v7  ;;  %v22474_v7 = vld [vmem:[#allocation18 + $0xc] ss:$16 sps:$4 sm:$0xff]  }
 0xb91   : > { %15995 = vmatpush1.bf16.msra.mxu0 %v22382_v52  ;;  %15910 = vmatprep.subr.bf16.mxu1 %v22387_v53  ;;  %v22469_v52 = vld [vmem:[#allocation18] ss:$16 sps:$4 sm:$0xff]   ;;  %v22472_v53 = vld [vmem:[#allocation18 + $0x8] ss:$16 sps:$4 sm:$0xff]  }
 0xb92   : > { %15996 = vmatprep.subr.bf16.mxu0 %v22390_v40  ;;  %v22477_v40 = vld [vmem:[#allocation18 + $0x24] ss:$16 sps:$4 sm:$0xff]  }
 0xb94   : > { %15911 = vmatpush1.bf16.msra.mxu1 %v22385_v49  ;;  %v22480_v49 = vld [vmem:[#allocation18 + $0x2c] ss:$16 sps:$4 sm:$0xff]  }
 0xb95   : > { %15997 = vmatpush1.bf16.msra.mxu0 %v22388_v13  ;;  %15912 = vmatprep.subr.bf16.mxu1 %v22393_v32  ;;  %v22475_v13 = vld [vmem:[#allocation18 + $0x20] ss:$16 sps:$4 sm:$0xff]   ;;  %v22478_v32 = vld [vmem:[#allocation18 + $0x28] ss:$16 sps:$4 sm:$0xff]  }
 0xb96   : > { %15998 = vmatprep.subr.bf16.mxu0 %v22396_v34  ;;  %v22483_v34 = vld [vmem:[#allocation18 + $0x44] ss:$16 sps:$4 sm:$0xff]  }
 0xb98   : > { %15913 = vmatpush1.bf16.msra.mxu1 %v22391_v54  ;;  %v22486_v54 = vld [vmem:[#allocation18 + $0x4c] ss:$16 sps:$4 sm:$0xff]  }
 0xb99   : > { %15999 = vmatpush1.bf16.msra.mxu0 %v22394_v22  ;;  %15914 = vmatprep.subr.bf16.mxu1 %v22399_v36  ;;  %v22481_v22 = vld [vmem:[#allocation18 + $0x40] ss:$16 sps:$4 sm:$0xff]   ;;  %v22484_v36 = vld [vmem:[#allocation18 + $0x48] ss:$16 sps:$4 sm:$0xff]  }
 0xb9a   : > { %16000 = vmatprep.subr.bf16.mxu0 %v22402_v45  ;;  %v22489_v45 = vld [vmem:[#allocation18 + $0x64] ss:$16 sps:$4 sm:$0xff]  }
 0xb9c   : > { %15915 = vmatpush1.bf16.msra.mxu1 %v22397_v50  ;;  %v22492_v50 = vld [vmem:[#allocation18 + $0x6c] ss:$16 sps:$4 sm:$0xff]  }
 0xb9d   : > { %16001 = vmatpush1.bf16.msra.mxu0 %v22400_v26  ;;  %15916 = vmatprep.subr.bf16.mxu1 %v22405_v6  ;;  %v22487_v26 = vld [vmem:[#allocation18 + $0x60] ss:$16 sps:$4 sm:$0xff]   ;;  %v22495_v6 = vld [vmem:[#allocation18 + $0x84] ss:$16 sps:$4 sm:$0xff]  }
 0xb9e   : > { %16002 = vmatprep.subr.bf16.mxu0 %v22408_v27  ;;  %v22498_v27 = vld [vmem:[#allocation18 + $0x8c] ss:$16 sps:$4 sm:$0xff]  }
 0xba0   : > { %15917 = vmatpush1.bf16.msra.mxu1 %v22403_v41  ;;  %v22493_v41 = vld [vmem:[#allocation18 + $0x80] ss:$16 sps:$4 sm:$0xff]  }
 0xba1   : > { %16003 = vmatpush1.bf16.msra.mxu0 %v22406_v25  ;;  %15918 = vmatprep.subr.bf16.mxu1 %v22411_v38  ;;  %v22496_v25 = vld [vmem:[#allocation18 + $0x88] ss:$16 sps:$4 sm:$0xff]   ;;  %v22501_v38 = vld [vmem:[#allocation18 + $0xa4] ss:$16 sps:$4 sm:$0xff]  }
 0xba2   : > { %16004 = vmatprep.subr.bf16.mxu0 %v22414_v5  ;;  %v22504_v5 = vld [vmem:[#allocation18 + $0xac] ss:$16 sps:$4 sm:$0xff]  }
 0xba4   : > { %15919 = vmatpush1.bf16.msra.mxu1 %v22409_v23  ;;  %v22499_v23 = vld [vmem:[#allocation18 + $0xa0] ss:$16 sps:$4 sm:$0xff]  }
 0xba5   : > { %16005 = vmatpush1.bf16.msra.mxu0 %v22412_v29  ;;  %15920 = vmatprep.subr.bf16.mxu1 %v22417_v1  ;;  %v22502_v29 = vld [vmem:[#allocation18 + $0xa8] ss:$16 sps:$4 sm:$0xff]   ;;  %v22507_v1 = vld [vmem:[#allocation18 + $0xc4] ss:$16 sps:$4 sm:$0xff]  }
 0xba6   : > { %16006 = vmatprep.subr.bf16.mxu0 %v22420_v44  ;;  %v22510_v44 = vld [vmem:[#allocation18 + $0xcc] ss:$16 sps:$4 sm:$0xff]  }
 0xba8   : > { %15921 = vmatpush1.bf16.msra.mxu1 %v22415_v30  ;;  %v22505_v30 = vld [vmem:[#allocation18 + $0xc0] ss:$16 sps:$4 sm:$0xff]  }
 0xba9   : > { %16007 = vmatpush1.bf16.msra.mxu0 %v22418_v19  ;;  %15922 = vmatprep.subr.bf16.mxu1 %v22423_v2  ;;  %v22508_v19 = vld [vmem:[#allocation18 + $0xc8] ss:$16 sps:$4 sm:$0xff]   ;;  %v22513_v2 = vld [vmem:[#allocation18 + $0xe4] ss:$16 sps:$4 sm:$0xff]  }
 0xbaa   : > { %16008 = vmatprep.subr.bf16.mxu0 %v22426_v0  ;;  %v22516_v0 = vld [vmem:[#allocation18 + $0xec] ss:$16 sps:$4 sm:$0xff]  }
 0xbac   : > { %15923 = vmatpush1.bf16.msra.mxu1 %v22421_v59  ;;  %v22511_v59 = vld [vmem:[#allocation18 + $0xe0] ss:$16 sps:$4 sm:$0xff]  }
 0xbad   : > { %16009 = vmatpush1.bf16.msra.mxu0 %v22424_v31  ;;  %15924 = vmatprep.subr.bf16.mxu1 %v22429_v20  ;;  %v22514_v31 = vld [vmem:[#allocation18 + $0xe8] ss:$16 sps:$4 sm:$0xff]   ;;  %v22519_v20 = vld [vmem:[#allocation18 + $0x104] ss:$16 sps:$4 sm:$0xff]  }
 0xbae   : > { %16010 = vmatprep.subr.bf16.mxu0 %v22432_v46  ;;  %v22522_v46 = vld [vmem:[#allocation18 + $0x10c] ss:$16 sps:$4 sm:$0xff]  }
 0xbb0   : > { %15925 = vmatpush1.bf16.msra.mxu1 %v22427_v58  ;;  %v22517_v58 = vld [vmem:[#allocation18 + $0x100] ss:$16 sps:$4 sm:$0xff]  }
 0xbb1   : > { %16011 = vmatpush1.bf16.msra.mxu0 %v22430_v12  ;;  %15926 = vmatprep.subr.bf16.mxu1 %v22435_v43  ;;  %v22520_v12 = vld [vmem:[#allocation18 + $0x108] ss:$16 sps:$4 sm:$0xff]   ;;  %v22525_v43 = vld [vmem:[#allocation18 + $0x124] ss:$16 sps:$4 sm:$0xff]  }
 0xbb2   : > { %16012 = vmatprep.subr.bf16.mxu0 %v22438_v17  ;;  %v22528_v17 = vld [vmem:[#allocation18 + $0x12c] ss:$16 sps:$4 sm:$0xff]  }
 0xbb4   : > { %15927 = vmatpush1.bf16.msra.mxu1 %v22433_v4  ;;  %v22523_v4 = vld [vmem:[#allocation18 + $0x120] ss:$16 sps:$4 sm:$0xff]  }
 0xbb5   : > { %16013 = vmatpush1.bf16.msra.mxu0 %v22436_v11  ;;  %15928 = vmatprep.subr.bf16.mxu1 %v22441_v63  ;;  %v22526_v11 = vld [vmem:[#allocation18 + $0x128] ss:$16 sps:$4 sm:$0xff]   ;;  %v22531_v63 = vld [vmem:[#allocation18 + $0x144] ss:$16 sps:$4 sm:$0xff]  }
 0xbb6   : > { %16014 = vmatprep.subr.bf16.mxu0 %v22444_v35  ;;  %v22534_v35 = vld [vmem:[#allocation18 + $0x14c] ss:$16 sps:$4 sm:$0xff]  }
 0xbb8   : > { %15929 = vmatpush1.bf16.msra.mxu1 %v22439_v21  ;;  %v22529_v21 = vld [vmem:[#allocation18 + $0x140] ss:$16 sps:$4 sm:$0xff]  }
 0xbb9   : > { %16015 = vmatpush1.bf16.msra.mxu0 %v22442_v55  ;;  %15930 = vmatprep.subr.bf16.mxu1 %v22447_v9  ;;  %v22532_v55 = vld [vmem:[#allocation18 + $0x148] ss:$16 sps:$4 sm:$0xff]   ;;  %v22537_v9 = vld [vmem:[#allocation18 + $0x164] ss:$16 sps:$4 sm:$0xff]  }
 0xbba   : > { %16016 = vmatprep.subr.bf16.mxu0 %v22450_v47  ;;  %v22540_v47 = vld [vmem:[#allocation18 + $0x16c] ss:$16 sps:$4 sm:$0xff]  }
 0xbbc   : > { %15931 = vmatpush1.bf16.msra.mxu1 %v22445_v18  ;;  %v22535_v18 = vld [vmem:[#allocation18 + $0x160] ss:$16 sps:$4 sm:$0xff]  }
 0xbbd   : > { %16017 = vmatpush1.bf16.msra.mxu0 %v22448_v62  ;;  %15932 = vmatprep.subr.bf16.mxu1 %v22453_v10  ;;  %v22538_v62 = vld [vmem:[#allocation18 + $0x168] ss:$16 sps:$4 sm:$0xff]   ;;  %v22543_v10 = vld [vmem:[#allocation18 + $0x184] ss:$16 sps:$4 sm:$0xff]  }
 0xbbe   : > { %16018 = vmatprep.subr.bf16.mxu0 %v22456_v60  ;;  %v22546_v60 = vld [vmem:[#allocation18 + $0x18c] ss:$16 sps:$4 sm:$0xff]  }
 0xbc0   : > { %15933 = vmatpush1.bf16.msra.mxu1 %v22451_v61  ;;  %v22541_v61 = vld [vmem:[#allocation18 + $0x180] ss:$16 sps:$4 sm:$0xff]  }
 0xbc1   : > { %16019 = vmatpush1.bf16.msra.mxu0 %v22454_v3  ;;  %15934 = vmatprep.subr.bf16.mxu1 %v22459_v24  ;;  %v22544_v3 = vld [vmem:[#allocation18 + $0x188] ss:$16 sps:$4 sm:$0xff]  }
 0xbc2   : > { %16020 = vmatprep.subr.bf16.mxu0 %v22462_v33 }
 0xbc4   : > { %15935 = vmatpush1.bf16.msra.mxu1 %v22457_v28  ;;  %v22549_v28 = vld [vmem:[#allocation18 + $0x1a4] ss:$16 sps:$4 sm:$0xff]  }
 0xbc5   : > { %16021 = vmatpush1.bf16.msra.mxu0 %v22460_v8  ;;  %15936 = vmatprep.subr.bf16.mxu1 %v22465_v56  ;;  %v22552_v8 = vld [vmem:[#allocation18 + $0x1ac] ss:$16 sps:$4 sm:$0xff]  }
 0xbc6   : > { %16022 = vmatprep.subr.bf16.mxu0 %v22468_v37 }
 0xbc8   : > { %15937 = vmatpush1.bf16.msra.mxu1 %v22463_v51  ;;  %v22547_v51 = vld [vmem:[#allocation18 + $0x1a0] ss:$16 sps:$4 sm:$0xff]  }
 0xbc9   : > { %16023 = vmatpush1.bf16.msra.mxu0 %v22466_v14  ;;  %16867 = vmatprep.subr.bf16.mxu1 %v22471_v57 }
 0xbca   : > { %16953 = vmatprep.subr.bf16.mxu0 %v22474_v7  ;;  %v22550_v7 = vld [vmem:[#allocation18 + $0x1a8] ss:$16 sps:$4 sm:$0xff]  }
 0xbcb   : > { %15939 = vmatmul.mubr.bf16.vlgmr.msra.gmra.mrb[40].mxu1 %v24113_v16 }
 0xbcc   : > { %16025 = vmatmul.mubr.bf16.vlgmr.msra.gmra.mrb[44].mxu0 %v24113_v16  ;;  %16868 = vmatpush1.bf16.msra.mxu1 %v22469_v52  ;;  %v22490_v16 = vld [vmem:[#allocation18 + $0x68] ss:$16 sps:$4 sm:$0xff]  }
 0xbcd   : > { %16954 = vmatpush1.bf16.msra.mxu0 %v22472_v53  ;;  %16869 = vmatprep.subr.bf16.mxu1 %v22477_v40  ;;  %v22555_v40 = vld [vmem:[#allocation18 + $0x1c4] ss:$16 sps:$4 sm:$0xff]  }
 0xbce   : > { %16955 = vmatprep.subr.bf16.mxu0 %v22480_v49  ;;  %v22558_v49 = vld [vmem:[#allocation18 + $0x1cc] ss:$16 sps:$4 sm:$0xff]  }
 0xbd0   : > { %16870 = vmatpush1.bf16.msra.mxu1 %v22475_v13  ;;  %v22553_v13 = vld [vmem:[#allocation18 + $0x1c0] ss:$16 sps:$4 sm:$0xff]  }
 0xbd1   : > { %16956 = vmatpush1.bf16.msra.mxu0 %v22478_v32  ;;  %16871 = vmatprep.subr.bf16.mxu1 %v22483_v34  ;;  %v22556_v32 = vld [vmem:[#allocation18 + $0x1c8] ss:$16 sps:$4 sm:$0xff]   ;;  %v22561_v34 = vld [vmem:[#allocation18 + $0x1e4] ss:$16 sps:$4 sm:$0xff]  }
 0xbd2   : > { %16957 = vmatprep.subr.bf16.mxu0 %v22486_v54  ;;  %v22564_v54 = vld [vmem:[#allocation18 + $0x1ec] ss:$16 sps:$4 sm:$0xff]  }
 0xbd4   : > { %16872 = vmatpush1.bf16.msra.mxu1 %v22481_v22  ;;  %v22559_v22 = vld [vmem:[#allocation18 + $0x1e0] ss:$16 sps:$4 sm:$0xff]  }
 0xbd5   : > { %16958 = vmatpush1.bf16.msra.mxu0 %v22484_v36  ;;  %16873 = vmatprep.subr.bf16.mxu1 %v22489_v45  ;;  %v22562_v36 = vld [vmem:[#allocation18 + $0x1e8] ss:$16 sps:$4 sm:$0xff]   ;;  %v22567_v45 = vld [vmem:[#allocation18 + $0x204] ss:$16 sps:$4 sm:$0xff]  }
 0xbd6   : > { %16959 = vmatprep.subr.bf16.mxu0 %v22492_v50  ;;  %v22570_v50 = vld [vmem:[#allocation18 + $0x20c] ss:$16 sps:$4 sm:$0xff]  }
 0xbd8   : > { %16874 = vmatpush1.bf16.msra.mxu1 %v22487_v26  ;;  %v16035_v26 = vld [vmem:[#allocation2 + $0x1b] sm:$0xf] }
 0xbd9   : > { %16960 = vmatpush1.bf16.msra.mxu0 %v22490_v16  ;;  %16875 = vmatprep.subr.bf16.mxu1 %v22495_v6  ;;  %v16040_v6 = vrot.slane %v16035_v26, %v23944_v48 }
 0xbda   : > { %16961 = vmatprep.subr.bf16.mxu0 %v22498_v27 }
 0xbdc   : > { %16876 = vmatpush1.bf16.msra.mxu1 %v22493_v41 }
 0xbdd   : > { %16962 = vmatpush1.bf16.msra.mxu0 %v22496_v25  ;;  %16877 = vmatprep.subr.bf16.mxu1 %v22501_v38  ;;  %v16048_v38 = vrot.slane %v16035_v26, %v23948_v39 }
 0xbde   : > { %16963 = vmatprep.subr.bf16.mxu0 %v22504_v5  ;;  %v16044_v5 = vrot.slane %v16035_v26, %v23951_v15 }
 0xbe0   : > { %16878 = vmatpush1.bf16.msra.mxu1 %v22499_v23 }
 0xbe1   : > { %16964 = vmatpush1.bf16.msra.mxu0 %v22502_v29  ;;  %16879 = vmatprep.subr.bf16.mxu1 %v22507_v1 }
 0xbe2   : > { %16965 = vmatprep.subr.bf16.mxu0 %v22510_v44 }
 0xbe4   : > { %16880 = vmatpush1.bf16.msra.mxu1 %v22505_v30  ;;  %v16052_v30 = vrot.slane %v16035_v26, %v23954_v42  ;;  %v22594_v26 = vld [vmem:[#allocation18 + $0x28c] ss:$16 sps:$4 sm:$0xff]  }
 0xbe5   : > { %16966 = vmatpush1.bf16.msra.mxu0 %v22508_v19  ;;  %16881 = vmatprep.subr.bf16.mxu1 %v22513_v2 }
 0xbe6   : > { %16967 = vmatprep.subr.bf16.mxu0 %v22516_v0 }
 0xbe8   : > { %16882 = vmatpush1.bf16.msra.mxu1 %v22511_v59 }
 0xbe9   : > { %16968 = vmatpush1.bf16.msra.mxu0 %v22514_v31  ;;  %16883 = vmatprep.subr.bf16.mxu1 %v22519_v20 }
 0xbea   : > { %16969 = vmatprep.subr.bf16.mxu0 %v22522_v46 }
 0xbec   : > { %16884 = vmatpush1.bf16.msra.mxu1 %v22517_v58 }
 0xbed   : > { %16970 = vmatpush1.bf16.msra.mxu0 %v22520_v12  ;;  %16885 = vmatprep.subr.bf16.mxu1 %v22525_v43 }
 0xbee   : > { %16971 = vmatprep.subr.bf16.mxu0 %v22528_v17 }
 0xbf0   : > { %16886 = vmatpush1.bf16.msra.mxu1 %v22523_v4 }
 0xbf1   : > { %16972 = vmatpush1.bf16.msra.mxu0 %v22526_v11  ;;  %16887 = vmatprep.subr.bf16.mxu1 %v22531_v63 }
 0xbf2   : > { %16973 = vmatprep.subr.bf16.mxu0 %v22534_v35 }
 0xbf4   : > { %16888 = vmatpush1.bf16.msra.mxu1 %v22529_v21 }
 0xbf5   : > { %16974 = vmatpush1.bf16.msra.mxu0 %v22532_v55  ;;  %16889 = vmatprep.subr.bf16.mxu1 %v22537_v9 }
 0xbf6   : > { %16975 = vmatprep.subr.bf16.mxu0 %v22540_v47 }
 0xbf8   : > { %16890 = vmatpush1.bf16.msra.mxu1 %v22535_v18 }
 0xbf9   : > { %16976 = vmatpush1.bf16.msra.mxu0 %v22538_v62  ;;  %16891 = vmatprep.subr.bf16.mxu1 %v22543_v10 }
 0xbfa   : > { %16977 = vmatprep.subr.bf16.mxu0 %v22546_v60 }
 0xbfc   : > { %16892 = vmatpush1.bf16.msra.mxu1 %v22541_v61 }
 0xbfd   : > { %16978 = vmatpush1.bf16.msra.mxu0 %v22544_v3  ;;  %16893 = vmatprep.subr.bf16.mxu1 %v22549_v28 }
 0xbfe   : > { %16979 = vmatprep.subr.bf16.mxu0 %v22552_v8 }
 0xc00   : > { %16894 = vmatpush1.bf16.msra.mxu1 %v22547_v51  ;;  %v22565_v51 = vld [vmem:[#allocation18 + $0x200] ss:$16 sps:$4 sm:$0xff]  }
 0xc01   : > { %16980 = vmatpush1.bf16.msra.mxu0 %v22550_v7  ;;  %16895 = vmatprep.subr.bf16.mxu1 %v22555_v40  ;;  %v22573_v7 = vld [vmem:[#allocation18 + $0x224] ss:$16 sps:$4 sm:$0xff]   ;;  %v22574_v40 = vld [vmem:[#allocation18 + $0x228] ss:$16 sps:$4 sm:$0xff]  }
 0xc02   : > { %16981 = vmatprep.subr.bf16.mxu0 %v22558_v49  ;;  %v22579_v49 = vld [vmem:[#allocation18 + $0x244] ss:$16 sps:$4 sm:$0xff]  }
 0xc04   : > { %16896 = vmatpush1.bf16.msra.mxu1 %v22553_v13  ;;  %v22582_v13 = vld [vmem:[#allocation18 + $0x24c] ss:$16 sps:$4 sm:$0xff]  }
 0xc05   : > { %16982 = vmatpush1.bf16.msra.mxu0 %v22556_v32  ;;  %16897 = vmatprep.subr.bf16.mxu1 %v22561_v34  ;;  %v22577_v32 = vld [vmem:[#allocation18 + $0x240] ss:$16 sps:$4 sm:$0xff]   ;;  %v22580_v34 = vld [vmem:[#allocation18 + $0x248] ss:$16 sps:$4 sm:$0xff]  }
 0xc06   : > { %16983 = vmatprep.subr.bf16.mxu0 %v22564_v54  ;;  %v22585_v54 = vld [vmem:[#allocation18 + $0x264] ss:$16 sps:$4 sm:$0xff]  }
 0xc08   : > { %16898 = vmatpush1.bf16.msra.mxu1 %v22559_v22  ;;  %v22588_v22 = vld [vmem:[#allocation18 + $0x26c] ss:$16 sps:$4 sm:$0xff]  }
 0xc09   : > { %16984 = vmatpush1.bf16.msra.mxu0 %v22562_v36  ;;  %16910 = vmatprep.subr.bf16.mxu1 %v22567_v45  ;;  %v22583_v36 = vld [vmem:[#allocation18 + $0x260] ss:$16 sps:$4 sm:$0xff]   ;;  %v22586_v45 = vld [vmem:[#allocation18 + $0x268] ss:$16 sps:$4 sm:$0xff]  }
 0xc0a   : > { %16996 = vmatprep.subr.bf16.mxu0 %v22570_v50  ;;  %v22591_v50 = vld [vmem:[#allocation18 + $0x284] ss:$16 sps:$4 sm:$0xff]  }
 0xc1e   : > { %v14990_v24 = vpop.f32.mrb[36].mxu1  ;;  %v15072_v33 = vpop.f32.mrb[40].mxu0 }
 0xc1f   : > { %v14992_v56 = vpop.f32.mrb[37].mxu1  ;;  %v15074_v37 = vpop.f32.mrb[41].mxu0  ;;  %v15210_v16 = vrot.slane %v14990_v24, %v23944_v48  ;;  %v15218_v27 = vrot.slane %v15072_v33, %v23944_v48 }
 0xc20   : > { %v14994_v14 = vpop.f32.mrb[38].mxu1  ;;  %v15076_v57 = vpop.f32.mrb[42].mxu0  ;;  %v15214_v41 = vrot.slane %v14992_v56, %v23944_v48  ;;  %v15222_v23 = vrot.slane %v15074_v37, %v23944_v48 }
 0xc21   : > { %v14995_v52 = vpop.f32.mrb[39].mxu1  ;;  %v15077_v53 = vpop.f32.mrb[43].mxu0  ;;  %v22568_v14 = vld [vmem:[#allocation18 + $0x208] ss:$16 sps:$4 sm:$0xff]  }
 0xc22   : > { %v22576_v52 = vld [vmem:[#allocation18 + $0x22c] ss:$16 sps:$4 sm:$0xff]   ;;  %v22571_v53 = vld [vmem:[#allocation18 + $0x220] ss:$16 sps:$4 sm:$0xff]  }
 0xc9e   : > { %v15940_v25 = vpop.f32.mrb[40].mxu1 }
 0xc9f   : > { %v20593_v29 = vadd.f32 %v15940_v25, %v15210_v16  ;;  %v16026_v1 = vpop.f32.mrb[44].mxu0  ;;  %v15942_v44 = vpop.f32.mrb[41].mxu1  ;;  %v22595_v25 = vld [vmem:[#allocation18 + $0x2a0] ss:$16 sps:$4 sm:$0xff]  }
 0xca0   : > { %v20597_v19 = vadd.f32 %v16026_v1, %v15218_v27  ;;  %v20594_v2 = vadd.f32 %v15942_v44, %v15214_v41  ;;  %v16028_v0 = vpop.f32.mrb[45].mxu0  ;;  %v15944_v59 = vpop.f32.mrb[42].mxu1  ;;  %v22604_v1 = vld [vmem:[#allocation18 + $0x2c8] ss:$16 sps:$4 sm:$0xff]   ;;  %v22609_v44 = vld [vmem:[#allocation18 + $0x2e4] ss:$16 sps:$4 sm:$0xff]  }
 0xca1   : > { %v16057_v31 = vadd.f32 %v20593_v29, %v16040_v6  ;;  %v20598_v20 = vadd.f32 %v16028_v0, %v15222_v23  ;;  %v20595_v46 = vadd.f32 %v15944_v59, %v15210_v16  ;;  %v16030_v58 = vpop.f32.mrb[46].mxu0  ;;  %v15946_v12 = vpop.f32.mrb[43].mxu1  ;;  %v22589_v16 = vld [vmem:[#allocation18 + $0x280] ss:$16 sps:$4 sm:$0xff]   ;;  %v22615_v0 = vld [vmem:[#allocation18 + $0x304] ss:$16 sps:$4 sm:$0xff]  }
 0xca2   : > { %v16059_v43 = vadd.f32 %v20597_v19, %v16048_v38  ;;  %v16058_v17 = vadd.f32 %v20594_v2, %v16044_v5  ;;  %v20599_v4 = vadd.f32 %v16030_v58, %v15218_v27  ;;  %v20596_v11 = vadd.f32 %v15946_v12, %v15214_v41  ;;  %v16032_v63 = vpop.f32.mrb[47].mxu0  ;;  %v22597_v27 = vld [vmem:[#allocation18 + $0x2a4] ss:$16 sps:$4 sm:$0xff]   ;;  %v22600_v41 = vld [vmem:[#allocation18 + $0x2ac] ss:$16 sps:$4 sm:$0xff]  }
 0xca3   : > { %v16060_v35 = vadd.f32 %v20598_v20, %v16052_v30  ;;  %v16061_v21 = vadd.f32 %v20595_v46, %v16040_v6  ;;  %v20600_v55 = vadd.f32 %v16032_v63, %v15222_v23  ;;  %v16065_v18 = vmax.f32 %v16057_v31, 0.0  ;;  %v22592_v6 = vld [vmem:[#allocation18 + $0x288] ss:$16 sps:$4 sm:$0xff]   ;;  %v22606_v23 = vld [vmem:[#allocation18 + $0x2cc] ss:$16 sps:$4 sm:$0xff]  }
 0xca4   : > { %v16063_v9 = vadd.f32 %v20599_v4, %v16048_v38  ;;  %v16062_v47 = vadd.f32 %v20596_v11, %v16044_v5  ;;  %v16067_v60 = vmax.f32 %v16059_v43, 0.0  ;;  %v16066_v61 = vmax.f32 %v16058_v17, 0.0  ;;  %v22598_v38 = vld [vmem:[#allocation18 + $0x2a8] ss:$16 sps:$4 sm:$0xff]   ;;  %v22603_v5 = vld [vmem:[#allocation18 + $0x2c4] ss:$16 sps:$4 sm:$0xff]  }
 0xca5   : > { %v16069_v62 = vmax.f32 %v16061_v21, 0.0  ;;  %v16064_v10 = vadd.f32 %v20600_v55, %v16052_v30  ;;  %v16068_v33 = vmax.f32 %v16060_v35, 0.0  ;;  %v22601_v29 = vld [vmem:[#allocation18 + $0x2c0] ss:$16 sps:$4 sm:$0xff]   ;;  %v22612_v30 = vld [vmem:[#allocation18 + $0x2ec] ss:$16 sps:$4 sm:$0xff]  }
 0xca6   : > { %v16071_v3 = vmax.f32 %v16063_v9, 0.0  ;;  %v16070_v24 = vmax.f32 %v16062_v47, 0.0  ;;  %v22607_v19 = vld [vmem:[#allocation18 + $0x2e0] ss:$16 sps:$4 sm:$0xff]   ;;  %v22610_v2 = vld [vmem:[#allocation18 + $0x2e8] ss:$16 sps:$4 sm:$0xff]  }
 0xca7   : > { %v16073_v28 = vpack.c.bf16 %v16069_v62, %v16065_v18  ;;  %v16072_v8 = vmax.f32 %v16064_v10, 0.0  ;;  %v22618_v59 = vld [vmem:[#allocation18 + $0x30c] ss:$16 sps:$4 sm:$0xff]   ;;  %v22613_v31 = vld [vmem:[#allocation18 + $0x300] ss:$16 sps:$4 sm:$0xff]  }
 0xca8   : > { %v24167_v56 = vpack.c.bf16 %v16071_v3, %v16067_v60  ;;  %v16074_v37 = vpack.c.bf16 %v16070_v24, %v16066_v61  ;;  %v22616_v20 = vld [vmem:[#allocation18 + $0x308] ss:$16 sps:$4 sm:$0xff]   ;;  %v22621_v46 = vld [vmem:[#allocation18 + $0x324] ss:$16 sps:$4 sm:$0xff]   ;;  %v22624_v58 = vld [vmem:[#allocation18 + $0x32c] ss:$16 sps:$4 sm:$0xff]  }
 0xca9   : > { %v16076_v57 = vpack.c.bf16 %v16072_v8, %v16068_v33  ;;  %v22619_v12 = vld [vmem:[#allocation18 + $0x320] ss:$16 sps:$4 sm:$0xff]   ;;  %v22622_v43 = vld [vmem:[#allocation18 + $0x328] ss:$16 sps:$4 sm:$0xff]   ;;  %v22627_v17 = vld [vmem:[#allocation18 + $0x344] ss:$16 sps:$4 sm:$0xff]  }
 0xcaa   : > { %16899 = vmatprep.mubr.bf16.mxu1 %v16074_v37  ;;  %16985 = vmatprep.mubr.bf16.mxu0 %v16074_v37  ;;  %v22630_v4 = vld [vmem:[#allocation18 + $0x34c] ss:$16 sps:$4 sm:$0xff]   ;;  %v22625_v11 = vld [vmem:[#allocation18 + $0x340] ss:$16 sps:$4 sm:$0xff]   ;;  %v22628_v63 = vld [vmem:[#allocation18 + $0x348] ss:$16 sps:$4 sm:$0xff]  }
 0xcab   : > { %16900 = vmatmul.mubr.bf16.vlgmr.msra.gmra.mrb[44].mxu1 %v16073_v28  ;;  %16986 = vmatmul.mubr.bf16.vlgmr.msra.gmra.mrb[48].mxu0 %v16073_v28  ;;  %v22633_v35 = vld [vmem:[#allocation18 + $0x364] ss:$16 sps:$4 sm:$0xff]   ;;  %v22636_v21 = vld [vmem:[#allocation18 + $0x36c] ss:$16 sps:$4 sm:$0xff]   ;;  %v22631_v55 = vld [vmem:[#allocation18 + $0x360] ss:$16 sps:$4 sm:$0xff]  }
 0xcac   : > { %16911 = vmatpush1.bf16.msra.mxu1 %v22565_v51  ;;  %16997 = vmatpush1.bf16.msra.mxu0 %v22568_v14  ;;  %v22634_v9 = vld [vmem:[#allocation18 + $0x368] ss:$16 sps:$4 sm:$0xff]   ;;  %v22639_v47 = vld [vmem:[#allocation18 + $0x384] ss:$16 sps:$4 sm:$0xff]   ;;  %v22642_v18 = vld [vmem:[#allocation18 + $0x38c] ss:$16 sps:$4 sm:$0xff]  }
 0xcad   : > { %16942 = vmatprep.mubr.bf16.mxu1 %v16076_v57  ;;  %17028 = vmatprep.mubr.bf16.mxu0 %v16076_v57  ;;  %v22637_v62 = vld [vmem:[#allocation18 + $0x380] ss:$16 sps:$4 sm:$0xff]   ;;  %v22640_v10 = vld [vmem:[#allocation18 + $0x388] ss:$16 sps:$4 sm:$0xff]   ;;  %v22645_v60 = vld [vmem:[#allocation18 + $0x3a4] ss:$16 sps:$4 sm:$0xff]  }
 0xcae   : > { %16912 = vmatprep.subr.bf16.mxu1 %v22573_v7  ;;  %16998 = vmatprep.subr.bf16.mxu0 %v22576_v52  ;;  %v22648_v61 = vld [vmem:[#allocation18 + $0x3ac] ss:$16 sps:$4 sm:$0xff]   ;;  %v22643_v3 = vld [vmem:[#allocation18 + $0x3a0] ss:$16 sps:$4 sm:$0xff]   ;;  %v22646_v24 = vld [vmem:[#allocation18 + $0x3a8] ss:$16 sps:$4 sm:$0xff]  }
 0xcaf   : > { %v22651_v33 = vld [vmem:[#allocation18 + $0x3c4] ss:$16 sps:$4 sm:$0xff]   ;;  %v22654_v28 = vld [vmem:[#allocation18 + $0x3cc] ss:$16 sps:$4 sm:$0xff]   ;;  %v22649_v8 = vld [vmem:[#allocation18 + $0x3c0] ss:$16 sps:$4 sm:$0xff]  }
 0xcb0   : > { %16913 = vmatpush1.bf16.msra.mxu1 %v22571_v53  ;;  %16999 = vmatpush1.bf16.msra.mxu0 %v22574_v40  ;;  %v22652_v37 = vld [vmem:[#allocation18 + $0x3c8] ss:$16 sps:$4 sm:$0xff]   ;;  %v22657_v51 = vld [vmem:[#allocation18 + $0x3e4] ss:$16 sps:$4 sm:$0xff]   ;;  %v22660_v14 = vld [vmem:[#allocation18 + $0x3ec] ss:$16 sps:$4 sm:$0xff]  }
 0xcb1   : > { %16914 = vmatprep.subr.bf16.mxu1 %v22579_v49  ;;  %17000 = vmatprep.subr.bf16.mxu0 %v22582_v13  ;;  %v22655_v57 = vld [vmem:[#allocation18 + $0x3e0] ss:$16 sps:$4 sm:$0xff]   ;;  %v22658_v7 = vld [vmem:[#allocation18 + $0x3e8] ss:$16 sps:$4 sm:$0xff]   ;;  %v22663_v52 = vld [vmem:[#allocation19 + $0x4] ss:$8 sps:$4 sm:$0xff]  }
 0xcb2   : > { %v22661_v53 = vld [vmem:[#allocation19] ss:$8 sps:$4 sm:$0xff]   ;;  %v22666_v40 = vld [vmem:[#allocation19 + $0x14] ss:$8 sps:$4 sm:$0xff]   ;;  %v22664_v49 = vld [vmem:[#allocation19 + $0x10] ss:$8 sps:$4 sm:$0xff]  }
 0xcb3   : > { %v22669_v13 = vld [vmem:[#allocation19 + $0x24] ss:$8 sps:$4 sm:$0xff]  }
 0xcb4   : > { %16915 = vmatpush1.bf16.msra.mxu1 %v22577_v32  ;;  %17001 = vmatpush1.bf16.msra.mxu0 %v22580_v34  ;;  %v22667_v32 = vld [vmem:[#allocation19 + $0x20] ss:$8 sps:$4 sm:$0xff]   ;;  %v22672_v34 = vld [vmem:[#allocation19 + $0x34] ss:$8 sps:$4 sm:$0xff]  }
 0xcb5   : > { %16916 = vmatprep.subr.bf16.mxu1 %v22585_v54  ;;  %17002 = vmatprep.subr.bf16.mxu0 %v22588_v22  ;;  %v22670_v54 = vld [vmem:[#allocation19 + $0x30] ss:$8 sps:$4 sm:$0xff]   ;;  %v22675_v22 = vld [vmem:[#allocation19 + $0x44] ss:$8 sps:$4 sm:$0xff]  }
 0xcb8   : > { %16917 = vmatpush1.bf16.msra.mxu1 %v22583_v36  ;;  %17003 = vmatpush1.bf16.msra.mxu0 %v22586_v45  ;;  %v22673_v36 = vld [vmem:[#allocation19 + $0x40] ss:$8 sps:$4 sm:$0xff]   ;;  %v22678_v45 = vld [vmem:[#allocation19 + $0x54] ss:$8 sps:$4 sm:$0xff]  }
 0xcb9   : > { %16918 = vmatprep.subr.bf16.mxu1 %v22591_v50  ;;  %17004 = vmatprep.subr.bf16.mxu0 %v22594_v26  ;;  %v22676_v50 = vld [vmem:[#allocation19 + $0x50] ss:$8 sps:$4 sm:$0xff]   ;;  %v22679_v26 = vld [vmem:[#allocation19 + $0x60] ss:$8 sps:$4 sm:$0xff]  }
 0xcbc   : > { %16919 = vmatpush1.bf16.msra.mxu1 %v22589_v16  ;;  %17005 = vmatpush1.bf16.msra.mxu0 %v22592_v6  ;;  %v22684_v16 = vld [vmem:[#allocation19 + $0x74] ss:$8 sps:$4 sm:$0xff]   ;;  %v22682_v6 = vld [vmem:[#allocation19 + $0x70] ss:$8 sps:$4 sm:$0xff]  }
 0xcbd   : > { %16920 = vmatprep.subr.bf16.mxu1 %v22597_v27  ;;  %17006 = vmatprep.subr.bf16.mxu0 %v22600_v41  ;;  %v22687_v27 = vld [vmem:[#allocation19 + $0x84] ss:$8 sps:$4 sm:$0xff]   ;;  %v22685_v41 = vld [vmem:[#allocation19 + $0x80] ss:$8 sps:$4 sm:$0xff]  }
 0xcc0   : > { %16921 = vmatpush1.bf16.msra.mxu1 %v22595_v25  ;;  %17007 = vmatpush1.bf16.msra.mxu0 %v22598_v38  ;;  %v22690_v25 = vld [vmem:[#allocation19 + $0x94] ss:$8 sps:$4 sm:$0xff]   ;;  %v22688_v38 = vld [vmem:[#allocation19 + $0x90] ss:$8 sps:$4 sm:$0xff]  }
 0xcc1   : > { %16922 = vmatprep.subr.bf16.mxu1 %v22603_v5  ;;  %17008 = vmatprep.subr.bf16.mxu0 %v22606_v23  ;;  %v22693_v5 = vld [vmem:[#allocation19 + $0xa4] ss:$8 sps:$4 sm:$0xff]   ;;  %v22691_v23 = vld [vmem:[#allocation19 + $0xa0] ss:$8 sps:$4 sm:$0xff]  }
 0xcc4   : > { %16923 = vmatpush1.bf16.msra.mxu1 %v22601_v29  ;;  %17009 = vmatpush1.bf16.msra.mxu0 %v22604_v1  ;;  %v22696_v29 = vld [vmem:[#allocation19 + $0xb4] ss:$8 sps:$4 sm:$0xff]   ;;  %v22694_v1 = vld [vmem:[#allocation19 + $0xb0] ss:$8 sps:$4 sm:$0xff]  }
 0xcc5   : > { %16924 = vmatprep.subr.bf16.mxu1 %v22609_v44  ;;  %17010 = vmatprep.subr.bf16.mxu0 %v22612_v30  ;;  %v22699_v44 = vld [vmem:[#allocation19 + $0xc4] ss:$8 sps:$4 sm:$0xff]   ;;  %v22697_v30 = vld [vmem:[#allocation19 + $0xc0] ss:$8 sps:$4 sm:$0xff]  }
 0xcc8   : > { %16925 = vmatpush1.bf16.msra.mxu1 %v22607_v19  ;;  %17011 = vmatpush1.bf16.msra.mxu0 %v22610_v2  ;;  %v22702_v19 = vld [vmem:[#allocation19 + $0xd4] ss:$8 sps:$4 sm:$0xff]   ;;  %v22700_v2 = vld [vmem:[#allocation19 + $0xd0] ss:$8 sps:$4 sm:$0xff]  }
 0xcc9   : > { %16926 = vmatprep.subr.bf16.mxu1 %v22615_v0  ;;  %17012 = vmatprep.subr.bf16.mxu0 %v22618_v59  ;;  %v22705_v0 = vld [vmem:[#allocation19 + $0xe4] ss:$8 sps:$4 sm:$0xff]   ;;  %v22703_v59 = vld [vmem:[#allocation19 + $0xe0] ss:$8 sps:$4 sm:$0xff]  }
 0xccc   : > { %16927 = vmatpush1.bf16.msra.mxu1 %v22613_v31  ;;  %17013 = vmatpush1.bf16.msra.mxu0 %v22616_v20  ;;  %v22708_v31 = vld [vmem:[#allocation19 + $0xf4] ss:$8 sps:$4 sm:$0xff]   ;;  %v22706_v20 = vld [vmem:[#allocation19 + $0xf0] ss:$8 sps:$4 sm:$0xff]  }
 0xccd   : > { %16928 = vmatprep.subr.bf16.mxu1 %v22621_v46  ;;  %17014 = vmatprep.subr.bf16.mxu0 %v22624_v58  ;;  %v22711_v46 = vld [vmem:[#allocation19 + $0x104] ss:$8 sps:$4 sm:$0xff]   ;;  %v22757_v58 = vld [vmem:[#allocation21] ss:$8 sps:$4 sm:$0xff]  }
 0xcd0   : > { %16929 = vmatpush1.bf16.msra.mxu1 %v22619_v12  ;;  %17015 = vmatpush1.bf16.msra.mxu0 %v22622_v43  ;;  %v22759_v12 = vld [vmem:[#allocation21 + $0x4] ss:$8 sps:$4 sm:$0xff]   ;;  %v22762_v43 = vld [vmem:[#allocation21 + $0x14] ss:$8 sps:$4 sm:$0xff]  }
 0xcd1   : > { %16930 = vmatprep.subr.bf16.mxu1 %v22627_v17  ;;  %17016 = vmatprep.subr.bf16.mxu0 %v22630_v4  ;;  %v22760_v17 = vld [vmem:[#allocation21 + $0x10] ss:$8 sps:$4 sm:$0xff]   ;;  %v22765_v4 = vld [vmem:[#allocation21 + $0x24] ss:$8 sps:$4 sm:$0xff]  }
 0xcd4   : > { %16931 = vmatpush1.bf16.msra.mxu1 %v22625_v11  ;;  %17017 = vmatpush1.bf16.msra.mxu0 %v22628_v63  ;;  %v22763_v11 = vld [vmem:[#allocation21 + $0x20] ss:$8 sps:$4 sm:$0xff]   ;;  %v22768_v63 = vld [vmem:[#allocation21 + $0x34] ss:$8 sps:$4 sm:$0xff]  }
 0xcd5   : > { %16932 = vmatprep.subr.bf16.mxu1 %v22633_v35  ;;  %17018 = vmatprep.subr.bf16.mxu0 %v22636_v21  ;;  %v22766_v35 = vld [vmem:[#allocation21 + $0x30] ss:$8 sps:$4 sm:$0xff]   ;;  %v22771_v21 = vld [vmem:[#allocation21 + $0x44] ss:$8 sps:$4 sm:$0xff]  }
 0xcd8   : > { %16933 = vmatpush1.bf16.msra.mxu1 %v22631_v55  ;;  %17019 = vmatpush1.bf16.msra.mxu0 %v22634_v9  ;;  %v22769_v55 = vld [vmem:[#allocation21 + $0x40] ss:$8 sps:$4 sm:$0xff]   ;;  %v22774_v9 = vld [vmem:[#allocation21 + $0x54] ss:$8 sps:$4 sm:$0xff]  }
 0xcd9   : > { %16934 = vmatprep.subr.bf16.mxu1 %v22639_v47  ;;  %17020 = vmatprep.subr.bf16.mxu0 %v22642_v18  ;;  %v22772_v47 = vld [vmem:[#allocation21 + $0x50] ss:$8 sps:$4 sm:$0xff]   ;;  %v22777_v18 = vld [vmem:[#allocation21 + $0x64] ss:$8 sps:$4 sm:$0xff]  }
 0xcdc   : > { %16935 = vmatpush1.bf16.msra.mxu1 %v22637_v62  ;;  %17021 = vmatpush1.bf16.msra.mxu0 %v22640_v10  ;;  %v22775_v62 = vld [vmem:[#allocation21 + $0x60] ss:$8 sps:$4 sm:$0xff]   ;;  %v22780_v10 = vld [vmem:[#allocation21 + $0x74] ss:$8 sps:$4 sm:$0xff]  }
 0xcdd   : > { %16936 = vmatprep.subr.bf16.mxu1 %v22645_v60  ;;  %17022 = vmatprep.subr.bf16.mxu0 %v22648_v61  ;;  %v22778_v60 = vld [vmem:[#allocation21 + $0x70] ss:$8 sps:$4 sm:$0xff]   ;;  %v22783_v61 = vld [vmem:[#allocation21 + $0x84] ss:$8 sps:$4 sm:$0xff]  }
 0xce0   : > { %16937 = vmatpush1.bf16.msra.mxu1 %v22643_v3  ;;  %17023 = vmatpush1.bf16.msra.mxu0 %v22646_v24  ;;  %v22781_v3 = vld [vmem:[#allocation21 + $0x80] ss:$8 sps:$4 sm:$0xff]   ;;  %v22786_v24 = vld [vmem:[#allocation21 + $0x94] ss:$8 sps:$4 sm:$0xff]  }
 0xce1   : > { %16938 = vmatprep.subr.bf16.mxu1 %v22651_v33  ;;  %17024 = vmatprep.subr.bf16.mxu0 %v22654_v28  ;;  %v22784_v33 = vld [vmem:[#allocation21 + $0x90] ss:$8 sps:$4 sm:$0xff]   ;;  %v22789_v28 = vld [vmem:[#allocation21 + $0xa4] ss:$8 sps:$4 sm:$0xff]  }
 0xce4   : > { %16939 = vmatpush1.bf16.msra.mxu1 %v22649_v8  ;;  %17025 = vmatpush1.bf16.msra.mxu0 %v22652_v37  ;;  %v22787_v8 = vld [vmem:[#allocation21 + $0xa0] ss:$8 sps:$4 sm:$0xff]   ;;  %v22792_v37 = vld [vmem:[#allocation21 + $0xb4] ss:$8 sps:$4 sm:$0xff]  }
 0xce5   : > { %16940 = vmatprep.subr.bf16.mxu1 %v22657_v51  ;;  %17026 = vmatprep.subr.bf16.mxu0 %v22660_v14  ;;  %v22790_v51 = vld [vmem:[#allocation21 + $0xb0] ss:$8 sps:$4 sm:$0xff]   ;;  %v22795_v14 = vld [vmem:[#allocation21 + $0xc4] ss:$8 sps:$4 sm:$0xff]  }
 0xce8   : > { %16941 = vmatpush1.bf16.msra.mxu1 %v22655_v57  ;;  %17027 = vmatpush1.bf16.msra.mxu0 %v22658_v7  ;;  %v16205_v57 = vld [vmem:[#allocation2 + $0x1f] sm:$0xf]  ;;  %v22793_v7 = vld [vmem:[#allocation21 + $0xc0] ss:$8 sps:$4 sm:$0xff]  }
 0xce9   : > { %17447 = vmatprep.subr.bf16.mxu1 %v22663_v52  ;;  %17743 = vmatprep.subr.bf16.mxu0 %v22759_v12  ;;  %v22798_v52 = vld [vmem:[#allocation21 + $0xd4] ss:$8 sps:$4 sm:$0xff]   ;;  %v22712_v12 = vld [vmem:[#allocation19 + $0x110] ss:$8 sps:$4 sm:$0xff]  }
 0xceb   : > { %16943 = vmatmul.mubr.bf16.vlgmr.msra.gmra.mrb[44].mxu1 %v24167_v56  ;;  %17029 = vmatmul.mubr.bf16.vlgmr.msra.gmra.mrb[48].mxu0 %v24167_v56  ;;  %v22681_v56 = vld [vmem:[#allocation19 + $0x64] ss:$8 sps:$4 sm:$0xff]  }
 0xcec   : > { %17448 = vmatpush1.bf16.msra.mxu1 %v22661_v53  ;;  %17744 = vmatpush1.bf16.msra.mxu0 %v22757_v58  ;;  %v16210_v53 = vrot.slane %v16205_v57, %v23944_v48  ;;  %v22714_v58 = vld [vmem:[#allocation19 + $0x114] ss:$8 sps:$4 sm:$0xff]  }
 0xced   : > { %17449 = vmatprep.subr.bf16.mxu1 %v22666_v40  ;;  %17745 = vmatprep.subr.bf16.mxu0 %v22762_v43  ;;  %v16218_v40 = vrot.slane %v16205_v57, %v23948_v39  ;;  %v22717_v43 = vld [vmem:[#allocation19 + $0x124] ss:$8 sps:$4 sm:$0xff]  }
 0xcf0   : > { %17450 = vmatpush1.bf16.msra.mxu1 %v22664_v49  ;;  %17746 = vmatpush1.bf16.msra.mxu0 %v22760_v17  ;;  %v16214_v49 = vrot.slane %v16205_v57, %v23951_v15  ;;  %v22715_v17 = vld [vmem:[#allocation19 + $0x120] ss:$8 sps:$4 sm:$0xff]  }
 0xcf1   : > { %17451 = vmatprep.subr.bf16.mxu1 %v22669_v13  ;;  %17747 = vmatprep.subr.bf16.mxu0 %v22765_v4  ;;  %v16222_v13 = vrot.slane %v16205_v57, %v23954_v42  ;;  %v22720_v4 = vld [vmem:[#allocation19 + $0x134] ss:$8 sps:$4 sm:$0xff]   ;;  %v22748_v57 = vld [vmem:[#allocation19 + $0x1d0] ss:$8 sps:$4 sm:$0xff]  }
 0xcf4   : > { %17452 = vmatpush1.bf16.msra.mxu1 %v22667_v32  ;;  %17748 = vmatpush1.bf16.msra.mxu0 %v22763_v11  ;;  %v22796_v32 = vld [vmem:[#allocation21 + $0xd0] ss:$8 sps:$4 sm:$0xff]  }
 0xcf5   : > { %17453 = vmatprep.subr.bf16.mxu1 %v22672_v34  ;;  %17749 = vmatprep.subr.bf16.mxu0 %v22768_v63  ;;  %v22718_v11 = vld [vmem:[#allocation19 + $0x130] ss:$8 sps:$4 sm:$0xff]   ;;  %v22723_v63 = vld [vmem:[#allocation19 + $0x144] ss:$8 sps:$4 sm:$0xff]  }
 0xcf8   : > { %17454 = vmatpush1.bf16.msra.mxu1 %v22670_v54  ;;  %17750 = vmatpush1.bf16.msra.mxu0 %v22766_v35  ;;  %v22721_v35 = vld [vmem:[#allocation19 + $0x140] ss:$8 sps:$4 sm:$0xff]  }
 0xcf9   : > { %17455 = vmatprep.subr.bf16.mxu1 %v22675_v22  ;;  %17751 = vmatprep.subr.bf16.mxu0 %v22771_v21  ;;  %v22726_v21 = vld [vmem:[#allocation19 + $0x154] ss:$8 sps:$4 sm:$0xff]  }
 0xcfc   : > { %17456 = vmatpush1.bf16.msra.mxu1 %v22673_v36  ;;  %17752 = vmatpush1.bf16.msra.mxu0 %v22769_v55  ;;  %v22724_v55 = vld [vmem:[#allocation19 + $0x150] ss:$8 sps:$4 sm:$0xff]  }
 0xcfd   : > { %17457 = vmatprep.subr.bf16.mxu1 %v22678_v45  ;;  %17753 = vmatprep.subr.bf16.mxu0 %v22774_v9  ;;  %v22729_v9 = vld [vmem:[#allocation19 + $0x164] ss:$8 sps:$4 sm:$0xff]  }
 0xd00   : > { %17458 = vmatpush1.bf16.msra.mxu1 %v22676_v50  ;;  %17754 = vmatpush1.bf16.msra.mxu0 %v22772_v47  ;;  %v22727_v47 = vld [vmem:[#allocation19 + $0x160] ss:$8 sps:$4 sm:$0xff]  }
 0xd01   : > { %17459 = vmatprep.subr.bf16.mxu1 %v22681_v56  ;;  %17755 = vmatprep.subr.bf16.mxu0 %v22777_v18  ;;  %v22732_v18 = vld [vmem:[#allocation19 + $0x174] ss:$8 sps:$4 sm:$0xff]  }
 0xd04   : > { %17460 = vmatpush1.bf16.msra.mxu1 %v22679_v26  ;;  %17756 = vmatpush1.bf16.msra.mxu0 %v22775_v62  ;;  %v22730_v62 = vld [vmem:[#allocation19 + $0x170] ss:$8 sps:$4 sm:$0xff]  }
 0xd05   : > { %17461 = vmatprep.subr.bf16.mxu1 %v22684_v16  ;;  %17757 = vmatprep.subr.bf16.mxu0 %v22780_v10  ;;  %v22735_v10 = vld [vmem:[#allocation19 + $0x184] ss:$8 sps:$4 sm:$0xff]  }
 0xd08   : > { %17462 = vmatpush1.bf16.msra.mxu1 %v22682_v6  ;;  %17758 = vmatpush1.bf16.msra.mxu0 %v22778_v60  ;;  %v22733_v60 = vld [vmem:[#allocation19 + $0x180] ss:$8 sps:$4 sm:$0xff]  }
 0xd09   : > { %17463 = vmatprep.subr.bf16.mxu1 %v22687_v27  ;;  %17759 = vmatprep.subr.bf16.mxu0 %v22783_v61  ;;  %v22738_v61 = vld [vmem:[#allocation19 + $0x194] ss:$8 sps:$4 sm:$0xff]  }
 0xd0c   : > { %17464 = vmatpush1.bf16.msra.mxu1 %v22685_v41  ;;  %17760 = vmatpush1.bf16.msra.mxu0 %v22781_v3  ;;  %v22736_v3 = vld [vmem:[#allocation19 + $0x190] ss:$8 sps:$4 sm:$0xff]  }
 0xd0d   : > { %17465 = vmatprep.subr.bf16.mxu1 %v22690_v25  ;;  %17761 = vmatprep.subr.bf16.mxu0 %v22786_v24  ;;  %v22741_v24 = vld [vmem:[#allocation19 + $0x1a4] ss:$8 sps:$4 sm:$0xff]  }
 0xd10   : > { %17466 = vmatpush1.bf16.msra.mxu1 %v22688_v38  ;;  %17762 = vmatpush1.bf16.msra.mxu0 %v22784_v33  ;;  %v22739_v33 = vld [vmem:[#allocation19 + $0x1a0] ss:$8 sps:$4 sm:$0xff]  }
 0xd11   : > { %17467 = vmatprep.subr.bf16.mxu1 %v22693_v5  ;;  %17763 = vmatprep.subr.bf16.mxu0 %v22789_v28  ;;  %v22744_v28 = vld [vmem:[#allocation19 + $0x1b4] ss:$8 sps:$4 sm:$0xff]  }
 0xd14   : > { %17468 = vmatpush1.bf16.msra.mxu1 %v22691_v23  ;;  %17764 = vmatpush1.bf16.msra.mxu0 %v22787_v8  ;;  %v22742_v8 = vld [vmem:[#allocation19 + $0x1b0] ss:$8 sps:$4 sm:$0xff]  }
 0xd15   : > { %17469 = vmatprep.subr.bf16.mxu1 %v22696_v29  ;;  %17765 = vmatprep.subr.bf16.mxu0 %v22792_v37  ;;  %v22747_v37 = vld [vmem:[#allocation19 + $0x1c4] ss:$8 sps:$4 sm:$0xff]  }
 0xd18   : > { %17470 = vmatpush1.bf16.msra.mxu1 %v22694_v1  ;;  %17766 = vmatpush1.bf16.msra.mxu0 %v22790_v51  ;;  %v22745_v51 = vld [vmem:[#allocation19 + $0x1c0] ss:$8 sps:$4 sm:$0xff]  }
 0xd19   : > { %17471 = vmatprep.subr.bf16.mxu1 %v22699_v44  ;;  %17767 = vmatprep.subr.bf16.mxu0 %v22795_v14  ;;  %v22750_v14 = vld [vmem:[#allocation19 + $0x1d4] ss:$8 sps:$4 sm:$0xff]  }
 0xd1c   : > { %17472 = vmatpush1.bf16.msra.mxu1 %v22697_v30  ;;  %17768 = vmatpush1.bf16.msra.mxu0 %v22793_v7  ;;  %v22753_v7 = vld [vmem:[#allocation19 + $0x1e4] ss:$8 sps:$4 sm:$0xff]  }
 0xd1d   : > { %17473 = vmatprep.subr.bf16.mxu1 %v22702_v19  ;;  %17769 = vmatprep.subr.bf16.mxu0 %v22798_v52  ;;  %v22751_v52 = vld [vmem:[#allocation19 + $0x1e0] ss:$8 sps:$4 sm:$0xff]  }
 0xd20   : > { %17474 = vmatpush1.bf16.msra.mxu1 %v22700_v2  ;;  %17770 = vmatpush1.bf16.msra.mxu0 %v22796_v32  ;;  %v22804_v32 = vld [vmem:[#allocation21 + $0xf4] ss:$8 sps:$4 sm:$0xff]  }
 0xd21   : > { %17475 = vmatprep.subr.bf16.mxu1 %v22705_v0 }
 0xd24   : > { %17476 = vmatpush1.bf16.msra.mxu1 %v22703_v59 }
 0xd25   : > { %17477 = vmatprep.subr.bf16.mxu1 %v22708_v31 }
 0xd28   : > { %17478 = vmatpush1.bf16.msra.mxu1 %v22706_v20 }
 0xd29   : > { %17490 = vmatprep.subr.bf16.mxu1 %v22711_v46  ;;  %v22709_v46 = vld [vmem:[#allocation19 + $0x100] ss:$8 sps:$4 sm:$0xff]  }
 0xdbe   : > { %v16944_v34 = vpop.f32.mrb[44].mxu1  ;;  %v17030_v54 = vpop.f32.mrb[48].mxu0 }
 0xdbf   : > { %v20601_v22 = vadd.f32 %v16944_v34, %v16210_v53  ;;  %v20605_v36 = vadd.f32 %v17030_v54, %v16218_v40  ;;  %v16946_v45 = vpop.f32.mrb[45].mxu1  ;;  %v17032_v50 = vpop.f32.mrb[49].mxu0  ;;  %v22802_v34 = vld [vmem:[#allocation21 + $0xf0] ss:$8 sps:$4 sm:$0xff]  }
 0xdc0   : > { %v20602_v56 = vadd.f32 %v16946_v45, %v16214_v49  ;;  %v20606_v26 = vadd.f32 %v17032_v50, %v16222_v13  ;;  %v16948_v16 = vpop.f32.mrb[46].mxu1  ;;  %v17034_v6 = vpop.f32.mrb[50].mxu0  ;;  %v22805_v54 = vld [vmem:[%s24307_s23 + $0x40] sm:$0xff]  }
 0xdc1   : > { %v20603_v27 = vadd.f32 %v16948_v16, %v16210_v53  ;;  %v20607_v39 = vadd.f32 %v17034_v6, %v16218_v40  ;;  %v16950_v41 = vpop.f32.mrb[47].mxu1  ;;  %v17036_v25 = vpop.f32.mrb[51].mxu0  ;;  %v17039_v5 = vmax.f32 %v20601_v22, 0.0  ;;  %v17041_v23 = vmax.f32 %v20605_v36, 0.0  ;;  %v22756_v53 = vld [vmem:[#allocation19 + $0x1f4] ss:$8 sps:$4 sm:$0xff]  }
 0xdc2   : > { %v20604_v38 = vadd.f32 %v16950_v41, %v16214_v49  ;;  %v20608_v42 = vadd.f32 %v17036_v25, %v16222_v13  ;;  %v17040_v44 = vmax.f32 %v20602_v56, 0.0  ;;  %v17042_v30 = vmax.f32 %v20606_v26, 0.0  ;;  %v22754_v40 = vld [vmem:[#allocation19 + $0x1f0] ss:$8 sps:$4 sm:$0xff]   ;;  %v22801_v49 = vld [vmem:[#allocation21 + $0xe4] ss:$8 sps:$4 sm:$0xff]  }
 0xdc3   : > { %v17043_v29 = vmax.f32 %v20603_v27, 0.0  ;;  %v17045_v1 = vmax.f32 %v20607_v39, 0.0  ;;  %v22799_v13 = vld [vmem:[#allocation21 + $0xe0] ss:$8 sps:$4 sm:$0xff]   ;;  %17771 = vmatprep.subr.bf16.mxu0 %v22801_v49  ;;  %v17115_v22 = vld [vmem:[#allocation2 + $0x23] sm:$0x3] }
 0xdc4   : > { %v17044_v19 = vmax.f32 %v20604_v38, 0.0  ;;  %v17046_v2 = vmax.f32 %v20608_v42, 0.0  ;;  %17772 = vmatpush1.bf16.msra.mxu0 %v22799_v13  ;;  %v17120_v36 = vrot.slane %v17115_v22, %v23944_v48  ;;  %v17124_v45 = vrot.slane %v17115_v22, %v23951_v15 }
 0xdc5   : > { %v17047_v0 = vpack.c.bf16 %v17043_v29, %v17039_v5  ;;  %v24175_v59 = vpack.c.bf16 %v17045_v1, %v17041_v23  ;;  %17773 = vmatprep.subr.bf16.mxu0 %v22804_v32  ;;  %v22806_v1 = vld [vmem:[%s24307_s23] sm:$0xff]  }
 0xdc6   : > { %v17048_v31 = vpack.c.bf16 %v17044_v19, %v17040_v44  ;;  %v17050_v20 = vpack.c.bf16 %v17046_v2, %v17042_v30  ;;  %v22807_v44 = vld [vmem:[%s24307_s23 + $0x48] sm:$0xff]   ;;  %v22809_v19 = vld [vmem:[%s24307_s23 + $0x50] sm:$0xff]  }
 0xdc7   : > { %v22808_v30 = vld [vmem:[%s24307_s23 + $0x8] sm:$0xff]   ;;  %v22810_v2 = vld [vmem:[%s24307_s23 + $0x10] sm:$0xff]  }
 0xdc8   : > { %17479 = vmatprep.mubr.bf16.mxu1 %v17048_v31  ;;  %17774 = vmatpush1.bf16.msra.mxu0 %v22802_v34  ;;  %v22813_v31 = vld [vmem:[%s24307_s23 + $0x60] sm:$0xff]  }
 0xdc9   : > { %17480 = vmatmul.mubr.bf16.vlgmr.msra.gmra.mrb[48].mxu1 %v17047_v0  ;;  %20495 = vmatprep.subr.bf16.mxu0 %v22805_v54  ;;  %v22811_v0 = vld [vmem:[%s24307_s23 + $0x58] sm:$0xff]  }
 0xdca   : > { %17491 = vmatpush1.bf16.msra.mxu1 %v22709_v46  ;;  %17522 = vmatprep.mubr.bf16.mxu1 %v17050_v20  ;;  %v22814_v20 = vld [vmem:[%s24307_s23 + $0x20] sm:$0xff]   ;;  %v22815_v46 = vld [vmem:[%s24307_s23 + $0x68] sm:$0xff]  }
 0xdcb   : > { %17492 = vmatprep.subr.bf16.mxu1 %v22714_v58  ;;  %v22816_v58 = vld [vmem:[%s24307_s23 + $0x28] sm:$0xff]  }
 0xdce   : > { %17493 = vmatpush1.bf16.msra.mxu1 %v22712_v12  ;;  %v22817_v12 = vld [vmem:[%s24307_s23 + $0x70] sm:$0xff]  }
 0xdcf   : > { %17494 = vmatprep.subr.bf16.mxu1 %v22717_v43  ;;  %v22818_v43 = vld [vmem:[%s24307_s23 + $0x30] sm:$0xff]  }
 0xdd2   : > { %17495 = vmatpush1.bf16.msra.mxu1 %v22715_v17  ;;  %v22819_v17 = vld [vmem:[%s24307_s23 + $0x78] sm:$0xff]  }
 0xdd3   : > { %17496 = vmatprep.subr.bf16.mxu1 %v22720_v4  ;;  %v22820_v4 = vld [vmem:[%s24307_s23 + $0x38] sm:$0xff]  }
 0xdd6   : > { %17497 = vmatpush1.bf16.msra.mxu1 %v22718_v11  ;;  %v17571_v11 = vld [vmem:[#allocation2 + $0x25] sm:$0x3] }
 0xdd7   : > { %17498 = vmatprep.subr.bf16.mxu1 %v22723_v63  ;;  %v17576_v63 = vrot.slane %v17571_v11, %v23944_v48 }
 0xdda   : > { %17499 = vmatpush1.bf16.msra.mxu1 %v22721_v35  ;;  %v17580_v35 = vrot.slane %v17571_v11, %v23951_v15  ;;  %v20467_v15 = vld [vmem:[#allocation2 + $0x27] ss:$0 sm:$0xff] }
 0xddb   : > { %17500 = vmatprep.subr.bf16.mxu1 %v22726_v21 }
 0xdde   : > { %17501 = vmatpush1.bf16.msra.mxu1 %v22724_v55 }
 0xddf   : > { %17502 = vmatprep.subr.bf16.mxu1 %v22729_v9 }
 0xde2   : > { %17503 = vmatpush1.bf16.msra.mxu1 %v22727_v47 }
 0xde3   : > { %17504 = vmatprep.subr.bf16.mxu1 %v22732_v18 }
 0xde6   : > { %17505 = vmatpush1.bf16.msra.mxu1 %v22730_v62 }
 0xde7   : > { %17506 = vmatprep.subr.bf16.mxu1 %v22735_v10 }
 0xdea   : > { %17507 = vmatpush1.bf16.msra.mxu1 %v22733_v60 }
 0xdeb   : > { %17508 = vmatprep.subr.bf16.mxu1 %v22738_v61 }
 0xdee   : > { %17509 = vmatpush1.bf16.msra.mxu1 %v22736_v3 }
 0xdef   : > { %17510 = vmatprep.subr.bf16.mxu1 %v22741_v24 }
 0xdf2   : > { %17511 = vmatpush1.bf16.msra.mxu1 %v22739_v33 }
 0xdf3   : > { %17512 = vmatprep.subr.bf16.mxu1 %v22744_v28 }
 0xdf6   : > { %17513 = vmatpush1.bf16.msra.mxu1 %v22742_v8 }
 0xdf7   : > { %17514 = vmatprep.subr.bf16.mxu1 %v22747_v37 }
 0xdfa   : > { %17515 = vmatpush1.bf16.msra.mxu1 %v22745_v51 }
 0xdfb   : > { %17516 = vmatprep.subr.bf16.mxu1 %v22750_v14 }
 0xdfe   : > { %17517 = vmatpush1.bf16.msra.mxu1 %v22748_v57  ;;  %v17990_v57 = vld [vmem:[%s770_s20] sm:$0xff] }
 0xdff   : > { %17518 = vmatprep.subr.bf16.mxu1 %v22753_v7 }
 0xe02   : > { %17519 = vmatpush1.bf16.msra.mxu1 %v22751_v52 }
 0xe03   : > { %17520 = vmatprep.subr.bf16.mxu1 %v22756_v53 }
 0xe06   : > { %17521 = vmatpush1.bf16.msra.mxu1 %v22754_v40  ;;  %v17991_v40 = vld [vmem:[%s770_s20 + $0x8] sm:$0xff] }
 0xe09   : > { %17523 = vmatmul.mubr.bf16.vlgmr.msra.gmra.mrb[48].mxu1 %v24175_v59  ;;  %v22812_v59 = vld [vmem:[%s24307_s23 + $0x18] sm:$0xff]  }
 0xedc   : > { %v17524_v50 = vpop.f32.mrb[48].mxu1 }
 0xedd   : > { %v20609_v56 = vadd.f32 %v17524_v50, %v17120_v36  ;;  %v17526_v26 = vpop.f32.mrb[49].mxu1 }
 0xede   : > { %v20610_v16 = vadd.f32 %v17526_v26, %v17124_v45  ;;  %v17528_v6 = vpop.f32.mrb[50].mxu1 }
 0xedf   : > { %v20611_v27 = vadd.f32 %v17528_v6, %v17120_v36  ;;  %v17530_v39 = vpop.f32.mrb[51].mxu1  ;;  %v17533_v25 = vmax.f32 %v20609_v56, 0.0 }
 0xee0   : > { %v20612_v41 = vadd.f32 %v17530_v39, %v17124_v45  ;;  %v17534_v42 = vmax.f32 %v20610_v16, 0.0 }
 0xee1   : > { %v17535_v38 = vmax.f32 %v20611_v27, 0.0 }
 0xee2   : > { %v17536_v5 = vmax.f32 %v20612_v41, 0.0 }
 0xee3   : > { %v17537_v23 = vpack.c.bf16 %v17535_v38, %v17533_v25 }
 0xee4   : > { %v17538_v29 = vpack.c.bf16 %v17536_v5, %v17534_v42 }
 0xee6   : > { %17775 = vmatprep.mubr.bf16.mxu0 %v17538_v29 }
 0xee7   : > { %17776 = vmatmul.mubr.bf16.vlgmr.msra.gmra.mrb[52].mxu0 %v17537_v23 }
 0xee8   : > { %20496 = vmatpush3.bf16.msra.mxu0 %v22806_v1 }
 0xee9   : > { %20497 = vmatprep.subr.bf16.mxu0 %v22807_v44 }
 0xeec   : > { %20498 = vmatpush3.bf16.msra.mxu0 %v22808_v30 }
 0xeed   : > { %20499 = vmatprep.subr.bf16.mxu0 %v22809_v19 }
 0xef0   : > { %20500 = vmatpush3.bf16.msra.mxu0 %v22810_v2 }
 0xef1   : > { %20501 = vmatprep.subr.bf16.mxu0 %v22811_v0 }
 0xef4   : > { %20502 = vmatpush3.bf16.msra.mxu0 %v22812_v59 }
 0xef5   : > { %20503 = vmatprep.subr.bf16.mxu0 %v22813_v31 }
 0xef8   : > { %20504 = vmatpush3.bf16.msra.mxu0 %v22814_v20 }
 0xef9   : > { %20505 = vmatprep.subr.bf16.mxu0 %v22815_v46 }
 0xefc   : > { %20506 = vmatpush3.bf16.msra.mxu0 %v22816_v58 }
 0xefd   : > { %20507 = vmatprep.subr.bf16.mxu0 %v22817_v12 }
 0xf00   : > { %20508 = vmatpush3.bf16.msra.mxu0 %v22818_v43 }
 0xf01   : > { %20509 = vmatprep.subr.bf16.mxu0 %v22819_v17 }
 0xf04   : > { %20510 = vmatpush3.bf16.msra.mxu0 %v22820_v4 }
 0xfba   : > { %v17777_v21 = vpop.f32.mrb[52].mxu0 }
 0xfbb   : > { %v17778_v55 = vadd.f32 %v17777_v21, %v17576_v63  ;;  %v17779_v9 = vpop.f32.mrb[53].mxu0 }
 0xfbc   : > { %v17780_v47 = vadd.f32 %v17779_v9, %v17580_v35  ;;  %v17781_v18 = vpop.f32.mrb[54].mxu0 }
 0xfbd   : > { %v17782_v62 = vadd.f32 %v17781_v18, %v17576_v63  ;;  %v17783_v10 = vpop.f32.mrb[55].mxu0  ;;  %v17786_v61 = vmax.f32 %v17778_v55, 0.0 }
 0xfbe   : > { %v17784_v60 = vadd.f32 %v17783_v10, %v17580_v35  ;;  %v17787_v24 = vmax.f32 %v17780_v47, 0.0 }
 0xfbf   : > { %v17788_v3 = vmax.f32 %v17782_v62, 0.0 }
 0xfc0   : > { %v17789_v33 = vmax.f32 %v17784_v60, 0.0 }
 0xfc1   : > { %v17790_v28 = vpack.c.bf16 %v17788_v3, %v17786_v61 }
 0xfc2   : > { %v17791_v8 = vpack.c.bf16 %v17789_v33, %v17787_v24 }
 0xfc4   : > { %17959 = vmatprep.mubr.bf16.mxu0 %v17791_v8 }
 0xfc5   : > { %17960 = vmatmul.mubr.bf16.vlgmr.msra.gmra.mrb[56].mxu0 %v17790_v28 }
0x1098   : > { %v20511_v48 = vpop.f32.mrb[56].mxu0 }
0x1099   : > { %v20512_v37 = vpop.f32.mrb[57].mxu0 }
0x109a   : > { %v20513_v51 = vadd.f32 %v20512_v37, %v20511_v48  ;;  %v20514_v14 = vpop.f32.mrb[58].mxu0 }
0x109b   : > { %v20515_v7 = vpop.f32.mrb[59].mxu0 }
0x109c   : > { %v17962_v52 = vadd.f32 %v20513_v51, %v20467_v15  ;;  %v20516_v53 = vadd.f32 %v20515_v7, %v20514_v14 }
0x109e   : > { %v17970_v49 = vand.u32 2147483647, %v17962_v52  ;;  %v17965_v13 = vadd.f32 %v20516_v53, %v20467_v15  ;;  %17998 = vrot.lane.b32.xlu1 %v17962_v52, %s23254_s2  ;;  %v17992_v32 = vmul.f32 %v17990_v57, %v17962_v52  ;;  %v17968_v39 = vmax.f32 %v17962_v52, 0.0 }
0x10a0   : > { %v17972_v34 = vsub.f32 0.0, %v17970_v49  ;;  %v17971_v54 = vand.u32 2147483647, %v17965_v13  ;;  %v17993_v22 = vmul.f32 %v17991_v40, %v17965_v13  ;;  %v17969_v42 = vmax.f32 %v17965_v13, 0.0 }
0x10a2   : > { %v17974_v36 = vmul.f32 1.442695, %v17972_v34  ;;  %v17973_v45 = vsub.f32 0.0, %v17971_v54  ;;  %18000 = vrot.lane.b32.xlu1 %v17965_v13, %s23254_s2 }
0x10a4   : > { %22821 = vpow2.f32 %v17974_v36  ;;  %v17976_v50 = vmul.f32 1.442695, %v17973_v45 }
0x10a6   : > { %22823 = vpow2.f32 %v17976_v50 }
0x10ae   : > { %v22822_v56 = vpop.eup %22821 }
0x10af   : > { %v17978_v26 = vadd.f32 1.0, %v22822_v56 }
0x10b0   : > { %v22824_v16 = vpop.eup %22823 }
0x10b1   : > { %22825 = vlog2.f32 %v17978_v26  ;;  %v17979_v6 = vadd.f32 1.0, %v22824_v16 }
0x10b3   : > { %22827 = vlog2.f32 %v17979_v6 }
0x10bb   : > { %v22826_v27 = vpop.eup %22825 }
0x10bc   : > { %v17981_v41 = vmul.f32 0.6931472, %v22826_v27 }
0x10bd   : > { %v22828_v25 = vpop.eup %22827 }
0x10be   : > { %v17984_v38 = vadd.f32 %v17981_v41, %v17968_v39  ;;  %v17983_v5 = vmul.f32 0.6931472, %v22828_v25 }
0x10c0   : > { %v17986_v23 = vmul.f32 0.09, %v17984_v38  ;;  %v17985_v29 = vadd.f32 %v17983_v5, %v17969_v42  ;;  %v17994_v1 = vsub.f32 %v17992_v32, %v17984_v38 }
0x10c2   : > { %v17988_v44 = vadd.f32 0.01, %v17986_v23  ;;  %v17987_v30 = vmul.f32 0.09, %v17985_v29  ;;  %v17995_v19 = vsub.f32 %v17993_v22, %v17985_v29 }
0x10c4   : > { %18006 = vrot.lane.b32.xlu0 %v17988_v44, %s23254_s2  ;;  %v17989_v2 = vadd.f32 0.01, %v17987_v30 }
0x10c6   : > { %18008 = vrot.lane.b32.xlu1 %v17989_v2, %s23254_s2 }
0x1110   : > { %v17999_v0 = vpop.permute.xlu1 %17998 }
0x1111   : > { %v18013_v31 = vsel %vm18012_vm2, %v17994_v1, %v17999_v0 }
0x1114   : > { %v18001_v59 = vpop.permute.xlu1 %18000 }
0x1115   : > { %v18014_v58 = vsel %vm18012_vm2, %v17995_v19, %v18001_v59 }
0x1136   : > { %v18007_v20 = vpop.permute.xlu0 %18006 }
0x1137   : > { %v18016_v46 = vsel %vm18015_vm3, %v18013_v31, %v18007_v20 }
0x1138   : > { %18019 = vst.msk [vmem:[%s775_s4] sm:$0xff] %vm18018_vm4, %v18016_v46  ;;  %v18009_v12 = vpop.permute.xlu1 %18008 }
0x1139   : > { %v18017_v43 = vsel %vm18015_vm3, %v18014_v58, %v18009_v12 }
0x113a   : > { %18020 = vst.msk [vmem:[%s775_s4 + $0x8] sm:$0xff] %vm18018_vm4, %v18017_v43 }
0x113b PF: > { %s24310_s22 = sld [smem:[#allocation29_spill]] }
0x1141   : > { %s34_s24 = sadd.s32 1, %s24310_s22  }
0x1142   : > { %p31_p3 = scmp.ge.s32.totalorder %s34_s24, 4  }
0x1144   :  { %33 = sbr.rel (!%p31_p3) target bundleno = 14 (0xe), region = 177 }
0x114b   :  { %18042 = vsyncpa [#allocation3], 1 }
0x114c   :  { %18044 = vsyncpa [#allocation3 + $0x1], 1 }
0x114d   :  { %18045 = vsyncpa [#allocation5], 1 }
0x114e   :  { %18046 = vsyncpa [#allocation8], 1 }
0x114f   :  { %18047 = vsyncpa [#allocation11], 1 }
0x1150   :  { %18048 = vsyncpa [#allocation14], 1 }
0x1151   :  { %18049 = vsyncpa [#allocation17], 1 }
0x1152   :  { %18050 = vsyncpa [#allocation20], 1 }

</bundles_post_ra>
